<compile_context>
chip_gen: v6e
topology: v6e:2x2x1
jax: 0.10.0
libtpu: 0.0.40
codegen_flags: <defaults>
</compile_context>

<pallas_src>
import jax
import jax.numpy as jnp
from jax.experimental import pallas as pl
from jax.experimental.pallas import tpu as pltpu

HIDDEN = 512
OUT_PAD = 128      # zero-padded lane width of the final Linear(512, 1) layer (unmasked MXU pass)
TILE_B_MIN = 256   # MXU M-dim width on v6e/v7x
TILE_B_MAX = 1024


def _round_up(x, m):
    return -(-x // m) * m


def _pick_tile_b(batch):
    """Batch tile: multiple of 256, ~ceil(B/2) so >=2 tiles can feed both v7x TCs, capped at 1024."""
    tile = _round_up(max(-(-batch // 2), 1), TILE_B_MIN)
    return int(min(max(tile, TILE_B_MIN), TILE_B_MAX))


def _discriminator_kernel(z_ref, w1_ref, b1_ref, w2_ref, b2_ref, w3_ref, b3_ref, o_ref):
    # Layer 1: Linear(z_dim, 512) + LeakyReLU(0.2).  bf16 MXU matmul, f32 accumulate.
    h = jnp.dot(z_ref[...], w1_ref[...], preferred_element_type=jnp.float32)
    h = h + b1_ref[...]
    h = jnp.where(h > 0, h, 0.2 * h)

    # Layer 2: Linear(512, 512) + LeakyReLU(0.2)
    h = jnp.dot(h.astype(jnp.bfloat16), w2_ref[...], preferred_element_type=jnp.float32)
    h = h + b2_ref[...]
    h = jnp.where(h > 0, h, 0.2 * h)

    # Layer 3: Linear(512, 1), zero-padded to OUT_PAD lanes so the MXU pass / adds are unmasked.
    o = jnp.dot(h.astype(jnp.bfloat16), w3_ref[...], preferred_element_type=jnp.float32)
    o = o + b3_ref[...]                       # column 0 holds the real logit

    # Lane-major epilogue: transpose on the XLU (idle in this kernel) and store only the real
    # logit row -> TILE_B f32 of writeback per tile instead of TILE_B * 128.
    ot = o.T                                  # [OUT_PAD, TILE_B]
    o_ref[0] = ot[0:1, :]                     # (1, TILE_B) lane-dense, unmasked store


@jax.jit
def discriminator_forward(z, params):
    """z: [B, z_dim] float -> preds: [B, 1] float32 (raw logits, no sigmoid)."""
    w1, b1, w2, b2, w3p, b3p = params
    B, z_dim = z.shape

    tile_b = _pick_tile_b(B)
    n_tiles = pl.cdiv(B, tile_b)
    b_pad = n_tiles * tile_b

    zb = z.astype(jnp.bfloat16)               # matmul input is bf16 anyway; halves streamed DMA
    if b_pad != B:
        zb = jnp.pad(zb, ((0, b_pad - B), (0, 0)))

    batch_spec = pl.BlockSpec((tile_b, z_dim), lambda i: (i, 0))       # streamed per batch tile
    const_spec = lambda shape: pl.BlockSpec(shape, lambda i: (0, 0))   # VMEM-resident weights
    out_spec = pl.BlockSpec((1, 1, tile_b), lambda i: (i, 0, 0))       # lane-major logits

    out = pl.pallas_call(
        _discriminator_kernel,
        out_shape=jax.ShapeDtypeStruct((n_tiles, 1, tile_b), jnp.float32),
        grid=(n_tiles,),
        in_specs=[
            batch_spec,
            const_spec(w1.shape),
            const_spec(b1.shape),
            const_spec(w2.shape),
            const_spec(b2.shape),
            const_spec(w3p.shape),
            const_spec(b3p.shape),
        ],
        out_specs=out_spec,
        compiler_params=pltpu.CompilerParams(dimension_semantics=("parallel",)),
    )(zb, w1, b1, w2, b2, w3p, b3p)

    # (n_tiles, 1, tile_b) row-major flatten restores batch order; drop padded tail rows.
    return out.reshape(b_pad, 1)[:B]


def init_discriminator_params(key, z_dim):
    """Deterministic synthetic init mirroring nn.Linear shapes.

    PyTorch nn.Linear(in, out) has weight [out, in], bias [out]; here weights are stored
    transposed as [in, out] in bf16 (f32 accumulation in-kernel) and biases as [1, out] f32.
    The final [512, 1] layer is zero-padded to [512, OUT_PAD].
    """
    k1, k2, k3, k4, k5, k6 = jax.random.split(key, 6)

    def lin(kw, kb, fan_in, fan_out):
        bound = 1.0 / jnp.sqrt(fan_in)
        w = jax.random.uniform(kw, (fan_in, fan_out), jnp.float32, -bound, bound)
        b = jax.random.uniform(kb, (1, fan_out), jnp.float32, -bound, bound)
        return w, b

    w1, b1 = lin(k1, k2, z_dim, HIDDEN)
    w2, b2 = lin(k3, k4, HIDDEN, HIDDEN)
    w3, b3 = lin(k5, k6, HIDDEN, 1)

    w3p = jnp.zeros((HIDDEN, OUT_PAD), jnp.float32).at[:, :1].set(w3)
    b3p = jnp.zeros((1, OUT_PAD), jnp.float32).at[:, :1].set(b3)

    return (w1.astype(jnp.bfloat16), b1,
            w2.astype(jnp.bfloat16), b2,
            w3p.astype(jnp.bfloat16), b3p)


def _reference_forward(z, params):
    """Pure-JAX reference using the same bf16-input / f32-accumulate numerics."""
    w1, b1, w2, b2, w3p, b3p = params
    f32 = jnp.float32
    hp = jax.lax.Precision.HIGHEST
    h = jnp.dot(z.astype(jnp.bfloat16).astype(f32), w1.astype(f32), precision=hp) + b1
    h = jnp.where(h > 0, h, 0.2 * h)
    h = jnp.dot(h.astype(jnp.bfloat16).astype(f32), w2.astype(f32), precision=hp) + b2
    h = jnp.where(h > 0, h, 0.2 * h)
    o = jnp.dot(h.astype(jnp.bfloat16).astype(f32), w3p.astype(f32), precision=hp) + b3p
    return o[:, :1]


if __name__ == "__main__":
    key = jax.random.PRNGKey(0)
    k_params, k_z = jax.random.split(key)

    # z_dim=8 matches AdversarialAE's default; B=600 spans two 512-row batch tiles (padded tail).
    B, z_dim = 600, 8
    params = init_discriminator_params(k_params, z_dim)
    z = jax.random.normal(k_z, (B, z_dim), dtype=jnp.float32)

    preds = discriminator_forward(z, params)
    preds = jax.block_until_ready(preds)

    ref = _reference_forward(z, params)
    assert preds.shape == (B, 1)
    assert jnp.allclose(preds, ref, atol=2e-3, rtol=2e-3), float(jnp.max(jnp.abs(preds - ref)))

    print("KERNEL_OK")
</pallas_src>

<mosaic_0001>
module attributes {stable_mosaic.version = 11 : i64} {
  func.func @_discriminator_kernel(%arg0: i32, %arg1: memref<512x8xbf16, #tpu.memory_space<vmem>>, %arg2: memref<8x512xbf16, #tpu.memory_space<vmem>>, %arg3: memref<1x512xf32, #tpu.memory_space<vmem>>, %arg4: memref<512x512xbf16, #tpu.memory_space<vmem>>, %arg5: memref<1x512xf32, #tpu.memory_space<vmem>>, %arg6: memref<512x128xbf16, #tpu.memory_space<vmem>>, %arg7: memref<1x128xf32, #tpu.memory_space<vmem>>, %arg8: memref<1x1x512xf32, #tpu.memory_space<vmem>>) attributes {dimension_semantics = [#tpu.dimension_semantics<parallel>], iteration_bounds = array<i64: 2>, scalar_prefetch = 0 : i64, scratch_operands = 0 : i64, tpu.core_type = #tpu.core_type<tc>, window_params = [{transform_indices = @transform_0, window_bounds = array<i64: 512, 8>}, {pipeline_mode = #tpu.pipeline_mode<synchronous>, transform_indices = @transform_1, window_bounds = array<i64: 8, 512>}, {pipeline_mode = #tpu.pipeline_mode<synchronous>, transform_indices = @transform_2, window_bounds = array<i64: 1, 512>}, {pipeline_mode = #tpu.pipeline_mode<synchronous>, transform_indices = @transform_3, window_bounds = array<i64: 512, 512>}, {pipeline_mode = #tpu.pipeline_mode<synchronous>, transform_indices = @transform_4, window_bounds = array<i64: 1, 512>}, {pipeline_mode = #tpu.pipeline_mode<synchronous>, transform_indices = @transform_5, window_bounds = array<i64: 512, 128>}, {pipeline_mode = #tpu.pipeline_mode<synchronous>, transform_indices = @transform_6, window_bounds = array<i64: 1, 128>}, {transform_indices = @transform_7, window_bounds = array<i64: 1, 1, 512>}]} {
    %c0 = arith.constant 0 : index
    %c0_0 = arith.constant 0 : index
    %0 = vector.load %arg1[%c0, %c0_0] : memref<512x8xbf16, #tpu.memory_space<vmem>>, vector<512x8xbf16>
    %c0_1 = arith.constant 0 : index
    %c0_2 = arith.constant 0 : index
    %1 = vector.load %arg2[%c0_1, %c0_2] : memref<8x512xbf16, #tpu.memory_space<vmem>>, vector<8x512xbf16>
    %cst = arith.constant dense<0.000000e+00> : vector<512x512xf32>
    %2 = tpu.matmul %0, %1, %cst {dimension_numbers = #tpu.dot_dimension_numbers<[1], [0], [0], [1], [0, 0, 1, 1], [], []>} : vector<512x8xbf16>, vector<8x512xbf16>, vector<512x512xf32> -> vector<512x512xf32>
    %c0_3 = arith.constant 0 : index
    %c0_4 = arith.constant 0 : index
    %3 = vector.load %arg3[%c0_3, %c0_4] : memref<1x512xf32, #tpu.memory_space<vmem>>, vector<1x512xf32>
    %4 = vector.broadcast %3 : vector<1x512xf32> to vector<512x512xf32>
    %5 = arith.addf %2, %4 : vector<512x512xf32>
    %cst_5 = arith.constant 0.000000e+00 : f32
    %6 = vector.broadcast %cst_5 : f32 to vector<512x512xf32>
    %7 = arith.cmpf ogt, %5, %6 : vector<512x512xf32>
    %cst_6 = arith.constant 2.000000e-01 : f32
    %8 = vector.broadcast %cst_6 : f32 to vector<512x512xf32>
    %9 = arith.mulf %8, %5 : vector<512x512xf32>
    %10 = arith.select %7, %5, %9 : vector<512x512xi1>, vector<512x512xf32>
    %11 = arith.truncf %10 : vector<512x512xf32> to vector<512x512xbf16>
    %c0_7 = arith.constant 0 : index
    %c0_8 = arith.constant 0 : index
    %12 = vector.load %arg4[%c0_7, %c0_8] : memref<512x512xbf16, #tpu.memory_space<vmem>>, vector<512x512xbf16>
    %cst_9 = arith.constant dense<0.000000e+00> : vector<512x512xf32>
    %13 = tpu.matmul %11, %12, %cst_9 {dimension_numbers = #tpu.dot_dimension_numbers<[1], [0], [0], [1], [0, 0, 1, 1], [], []>} : vector<512x512xbf16>, vector<512x512xbf16>, vector<512x512xf32> -> vector<512x512xf32>
    %c0_10 = arith.constant 0 : index
    %c0_11 = arith.constant 0 : index
    %14 = vector.load %arg5[%c0_10, %c0_11] : memref<1x512xf32, #tpu.memory_space<vmem>>, vector<1x512xf32>
    %15 = vector.broadcast %14 : vector<1x512xf32> to vector<512x512xf32>
    %16 = arith.addf %13, %15 : vector<512x512xf32>
    %cst_12 = arith.constant 0.000000e+00 : f32
    %17 = vector.broadcast %cst_12 : f32 to vector<512x512xf32>
    %18 = arith.cmpf ogt, %16, %17 : vector<512x512xf32>
    %cst_13 = arith.constant 2.000000e-01 : f32
    %19 = vector.broadcast %cst_13 : f32 to vector<512x512xf32>
    %20 = arith.mulf %19, %16 : vector<512x512xf32>
    %21 = arith.select %18, %16, %20 : vector<512x512xi1>, vector<512x512xf32>
    %22 = arith.truncf %21 : vector<512x512xf32> to vector<512x512xbf16>
    %c0_14 = arith.constant 0 : index
    %c0_15 = arith.constant 0 : index
    %23 = vector.load %arg6[%c0_14, %c0_15] : memref<512x128xbf16, #tpu.memory_space<vmem>>, vector<512x128xbf16>
    %cst_16 = arith.constant dense<0.000000e+00> : vector<512x128xf32>
    %24 = tpu.matmul %22, %23, %cst_16 {dimension_numbers = #tpu.dot_dimension_numbers<[1], [0], [0], [1], [0, 0, 1, 1], [], []>} : vector<512x512xbf16>, vector<512x128xbf16>, vector<512x128xf32> -> vector<512x128xf32>
    %c0_17 = arith.constant 0 : index
    %c0_18 = arith.constant 0 : index
    %25 = vector.load %arg7[%c0_17, %c0_18] : memref<1x128xf32, #tpu.memory_space<vmem>>, vector<1x128xf32>
    %26 = vector.broadcast %25 : vector<1x128xf32> to vector<512x128xf32>
    %27 = arith.addf %24, %26 : vector<512x128xf32>
    %28 = tpu.transpose %27, [1, 0] : vector<512x128xf32> -> vector<128x512xf32>
    %29 = vector.extract_strided_slice %28 {offsets = [0, 0], sizes = [1, 512], strides = [1, 1]} : vector<128x512xf32> to vector<1x512xf32>
    %c0_19 = arith.constant 0 : index
    %c0_20 = arith.constant 0 : index
    %c0_21 = arith.constant 0 : index
    %30 = vector.load %arg8[%c0_19, %c0_20, %c0_21] : memref<1x1x512xf32, #tpu.memory_space<vmem>>, vector<1x1x512xf32>
    %31 = vector.shape_cast %30 : vector<1x1x512xf32> to vector<1x512xf32>
    %32 = vector.shape_cast %29 : vector<1x512xf32> to vector<1x1x512xf32>
    tpu.vector_store %arg8[%c0_19, %c0_20, %c0_21], %32 {strides = array<i32>} : memref<1x1x512xf32, #tpu.memory_space<vmem>>, vector<1x1x512xf32>,
    return
  }
  func.func @transform_0(%arg0: i32) -> (i32, i32) {
    %c0_i32 = arith.constant 0 : i32
    %c0_i32_0 = arith.constant 0 : i32
    return %arg0, %c0_i32 : i32, i32
  }
  func.func @transform_1(%arg0: i32) -> (i32, i32) {
    %c0_i32 = arith.constant 0 : i32
    %c0_i32_0 = arith.constant 0 : i32
    %c0_i32_1 = arith.constant 0 : i32
    return %c0_i32, %c0_i32_0 : i32, i32
  }
  func.func @transform_2(%arg0: i32) -> (i32, i32) {
    %c0_i32 = arith.constant 0 : i32
    %c0_i32_0 = arith.constant 0 : i32
    %c0_i32_1 = arith.constant 0 : i32
    return %c0_i32, %c0_i32_0 : i32, i32
  }
  func.func @transform_3(%arg0: i32) -> (i32, i32) {
    %c0_i32 = arith.constant 0 : i32
    %c0_i32_0 = arith.constant 0 : i32
    %c0_i32_1 = arith.constant 0 : i32
    return %c0_i32, %c0_i32_0 : i32, i32
  }
  func.func @transform_4(%arg0: i32) -> (i32, i32) {
    %c0_i32 = arith.constant 0 : i32
    %c0_i32_0 = arith.constant 0 : i32
    %c0_i32_1 = arith.constant 0 : i32
    return %c0_i32, %c0_i32_0 : i32, i32
  }
  func.func @transform_5(%arg0: i32) -> (i32, i32) {
    %c0_i32 = arith.constant 0 : i32
    %c0_i32_0 = arith.constant 0 : i32
    %c0_i32_1 = arith.constant 0 : i32
    return %c0_i32, %c0_i32_0 : i32, i32
  }
  func.func @transform_6(%arg0: i32) -> (i32, i32) {
    %c0_i32 = arith.constant 0 : i32
    %c0_i32_0 = arith.constant 0 : i32
    %c0_i32_1 = arith.constant 0 : i32
    return %c0_i32, %c0_i32_0 : i32, i32
  }
  func.func @transform_7(%arg0: i32) -> (i32, i32, i32) {
    %c0_i32 = arith.constant 0 : i32
    %c0_i32_0 = arith.constant 0 : i32
    %c0_i32_1 = arith.constant 0 : i32
    return %arg0, %c0_i32, %c0_i32_0 : i32, i32, i32
  }
}

</mosaic_0001>

<bundles_post_ra>
// kernel: discriminator_forward.1
= control target key start
LH: loop header
LB: loop body
LE: loop exit
PB: predicated region body
PF: predicated region fallthrough
CT: control target
= control target key end

     0   :  { %12 = vsyncpa [#allocation3], 0  ;;  %s7074_s24 = smov 0   ;;  %s12838_s0 = inlined_call_operand.vmem [shape: bf16[1024,8], index: 0, kind: input, shape index: {}]   ;;  %s12839_s1 = inlined_call_operand.vmem [shape: bf16[8,512], index: 1, kind: input, shape index: {}]   ;;  %s12840_s2 = inlined_call_operand.vmem [shape: f32[1,512], index: 2, kind: input, shape index: {}]   ;;  %s12841_s3 = inlined_call_operand.vmem [shape: bf16[512,512], index: 3, kind: input, shape index: {}]   ;;  %s12842_s4 = inlined_call_operand.vmem [shape: f32[1,512], index: 4, kind: input, shape index: {}]   ;;  %s12843_s5 = inlined_call_operand.hbm [shape: bf16[512,128], index: 5, kind: input, shape index: {}]   ;;  %s12844_s6 = inlined_call_operand.vmem [shape: f32[1,128], index: 6, kind: input, shape index: {}]   ;;  %s12845_s7 = inlined_call_operand.vmem [shape: f32[2,1,512], index: 7, kind: output, shape index: {}]  }
   0x1 LB: > { %s7080_s25 = sadd.s32 4294967295, %s7027_s24   ;;  %p6433_p0 = scmp.ge.s32.totalorder %s7027_s24, 1  ;;  %s7027_s24 = sphi %s7074_s24, %s18_s24  }
   0x2   : > { %p201_p1 = scmp.lt.s32.totalorder %s7027_s24, 3  ;;  %s7029_s26 = smov [#allocation2]  }
   0x3   : > { %s225_s27 = sshll.u32 %s7029_s26, 4  ;;  %p6714_p3 = scmp.eq.s32.totalorder %s7080_s25, 0  ;;  %s226_s27 = int_to_ptr.vmem [resolvable:$true] %s225_s27 }
   0x4   : > { %p7084_p2 = pnand %p6433_p0, %p201_p1  ;;  %s7002_s29 = scalar_lea.vmem %s226_s27, 4096 }
   0x5   : > { %p7003_p7 = scmp.ne.s32.totalorder %s226_s27, %s7002_s29  ;;  %p7010_p10 = scmp.lt.s32.totalorder %s226_s27, %s226_s27 }
   0x6   : > { %p6710_p4 = pneg %p7084_p2  ;;  %p7011_p11 = scmp.lt.s32.totalorder %s7002_s29, %s7002_s29 }
   0x8   : > { %p6711_p5 = pnand %p6714_p3, %p6710_p4  ;;  %p7012_p12 = por %p7011_p11, %p7010_p10 }
   0xa   : > { %p6993_p6 = pneg %p6711_p5 }
   0xc   : > { %p7005_p8 = pnand %p7003_p7, %p6993_p6 }
   0xe   : > { %p7006_p9 = pneg %p7005_p8 }
  0x10   : > { %p7013_p13 = pnand %p7012_p12, %p7006_p9 }
  0x12   : > { %7016 = shalt.err (!%p7013_p13)
}
  0x13   : > { %s7030_s30 = smov 64   ;;  %s7031_s8 = smov 4  }
  0x14   : > { %6713 = dma.hbm_to_vmem [thread:$0]  (!%p6711_p5), %s12843_s5, 4096, %s226_s27, [#allocation3], %s7030_s30, %s7030_s30, %s7031_s8  }
  0x15   : > { %253 = sbr.rel (%p7084_p2) target bundleno = 1383 (0x567), region = 48 }
  0x1a   : > { %7022 = dma.done.wait (%p6714_p3), [#allocation3], 4096  }
  0x1b   : > { %7024 = vsyncadd (%p6714_p3), [#allocation3], 4294963200  ;;  %s6438_s11 = sshll.u32 %s7080_s25, 6  ;;  %v12851_v0 = vmov 0   ;;  %v359_v1 = vld [vmem:[%s12839_s1] sm:$0xff]  ;;  %vm650_vm0 = vcmask 1043456  }
  0x1c   : > { %695 = vmatprep.mubr.bf16.mxu0 %v12851_v0  ;;  %1048 = vmatprep.mubr.bf16.mxu1 %v12851_v0  ;;  %p285_p0 = scmp.lt.s32.totalorder %s6438_s11, 127  ;;  %v360_v2 = vld [vmem:[%s12839_s1 + $0x8] sm:$0xff]  ;;  %v6474_v3 = vcombine.high %v359_v1, %v359_v1  ;;  %v6473_v5 = vcombine.low %v359_v1, %v359_v1  ;;  %vm553_vm1 = vcmask 64512   ;;  %v6734_v8 = vld [vmem:[%s12841_s3 + $0xe0] ss:$16 sps:$4 sm:$0xff]   ;;  %p290_p1 = scmp.lt.s32.totalorder %s7080_s25, 1 }
  0x1d   : > { %v6476_v4 = vcombine.high %v360_v2, %v360_v2  ;;  %v6475_v6 = vcombine.low %v360_v2, %v360_v2  ;;  %v6736_v9 = vld [vmem:[%s12841_s3 + $0xe4] ss:$16 sps:$4 sm:$0xff]   ;;  %v6737_v12 = vld [vmem:[%s12841_s3 + $0x2e0] ss:$16 sps:$4 sm:$0xff]  }
  0x1e   : > { %s14174_s11 = smov (!%p285_p0, %s6438_s11), 127  ;;  %6477 = vmatprep.subr.msk.bf16.mxu0 %vm650_vm0, %v6474_v3  ;;  %v652_v10 = vsel %vm650_vm0, %v6473_v5, 0  ;;  %v6739_v13 = vld [vmem:[%s12841_s3 + $0x2e4] ss:$16 sps:$4 sm:$0xff]   ;;  %v6742_v14 = vld [vmem:[%s12841_s3 + $0xc0] ss:$16 sps:$4 sm:$0xff]  }
  0x1f   : > { %s6439_s12 = sshll.u32 %s14174_s11, 2  ;;  %6510 = vmatprep.subr.msk.bf16.mxu1 %vm650_vm0, %v6476_v4  ;;  %v658_v11 = vsel %vm650_vm0, %v6475_v6, 0  ;;  %678 = vmatpush1.bf16.msra.mxu0 %v652_v10  ;;  %v6744_v15 = vld [vmem:[%s12841_s3 + $0xc4] ss:$16 sps:$4 sm:$0xff]   ;;  %v6745_v16 = vld [vmem:[%s12841_s3 + $0x2c0] ss:$16 sps:$4 sm:$0xff]  }
  0x20   : > { %s7108_s15 = scalar_lea.vmem %s12838_s0, %s6439_s12  ;;  %1031 = vmatpush1.bf16.msra.mxu1 %v658_v11  ;;  %3055 = vmatprep.subr.bf16.mxu0 %v6736_v9  ;;  %v6747_v17 = vld [vmem:[%s12841_s3 + $0x2c4] ss:$16 sps:$4 sm:$0xff]   ;;  %v6750_v20 = vld [vmem:[%s12841_s3 + $0xa0] ss:$16 sps:$4 sm:$0xff]   ;;  %s14176_s25 = smov (!%p290_p1, %s7080_s25), 1 }
  0x21   : > { %v6733_v7 = vld [vmem:[%s7108_s15] sm:$0xff]   ;;  %3408 = vmatprep.subr.bf16.mxu1 %v6739_v13  ;;  %v6740_v18 = vld [vmem:[%s7108_s15 + $0x8] sm:$0xff]   ;;  %v6741_v27 = vld [vmem:[%s7108_s15 + $0x10] sm:$0xff]   ;;  %s6440_s19 = sshll.u32 %s14176_s25, 2 }
  0x22   : > { %6478 = vmatmul.mubr.msk.bf16.vlgmr.msra.gmra.mxu0 %vm553_vm1, %v6733_v7  ;;  %v6752_v19 = vld [vmem:[%s12841_s3 + $0xa4] ss:$16 sps:$4 sm:$0xff]   ;;  %v6753_v22 = vld [vmem:[%s12841_s3 + $0x2a0] ss:$16 sps:$4 sm:$0xff]   ;;  %v6748_v32 = vld [vmem:[%s7108_s15 + $0x18] sm:$0xff]   ;;  %s293_s22 = scalar_lea.vmem %s12845_s7, %s6440_s19 }
  0x23   : > { %6511 = vmatmul.mubr.msk.bf16.vlgmr.msra.gmra.mxu1 %vm553_vm1, %v6733_v7  ;;  %3056 = vmatpush1.bf16.msra.mxu0 %v6734_v8  ;;  %v6755_v21 = vld [vmem:[%s12841_s3 + $0x2a4] ss:$16 sps:$4 sm:$0xff]   ;;  %v6758_v23 = vld [vmem:[%s12841_s3 + $0x80] ss:$16 sps:$4 sm:$0xff]   ;;  %v6756_v50 = vld [vmem:[%s7108_s15 + $0x28] sm:$0xff]  }
  0x24   : > { %3409 = vmatpush1.bf16.msra.mxu1 %v6737_v12  ;;  %705 = vmatprep.mubr.bf16.mxu0 %v12851_v0  ;;  %v6760_v24 = vld [vmem:[%s12841_s3 + $0x84] ss:$16 sps:$4 sm:$0xff]   ;;  %v6761_v25 = vld [vmem:[%s12841_s3 + $0x280] ss:$16 sps:$4 sm:$0xff]   ;;  %v6764_v1 = vld [vmem:[%s7108_s15 + $0x38] sm:$0xff]  }
  0x25   : > { %1058 = vmatprep.mubr.bf16.mxu1 %v12851_v0  ;;  %3057 = vmatprep.subr.bf16.mxu0 %v6744_v15  ;;  %v6763_v26 = vld [vmem:[%s12841_s3 + $0x284] ss:$16 sps:$4 sm:$0xff]   ;;  %v6766_v28 = vld [vmem:[%s12841_s3 + $0x60] ss:$16 sps:$4 sm:$0xff]   ;;  %v6772_v3 = vld [vmem:[%s7108_s15 + $0x48] sm:$0xff]  }
  0x26   : > { %3410 = vmatprep.subr.bf16.mxu1 %v6747_v17  ;;  %v6768_v29 = vld [vmem:[%s12841_s3 + $0x64] ss:$16 sps:$4 sm:$0xff]   ;;  %v6769_v30 = vld [vmem:[%s12841_s3 + $0x260] ss:$16 sps:$4 sm:$0xff]   ;;  %v6780_v9 = vld [vmem:[%s7108_s15 + $0x58] sm:$0xff]  }
  0x27   : > { %3058 = vmatpush1.bf16.msra.mxu0 %v6742_v14  ;;  %v6771_v31 = vld [vmem:[%s12841_s3 + $0x264] ss:$16 sps:$4 sm:$0xff]   ;;  %v6774_v33 = vld [vmem:[%s12841_s3 + $0x40] ss:$16 sps:$4 sm:$0xff]   ;;  %v6788_v15 = vld [vmem:[%s7108_s15 + $0x68] sm:$0xff]  }
  0x28   : > { %3411 = vmatpush1.bf16.msra.mxu1 %v6745_v16  ;;  %3059 = vmatprep.subr.bf16.mxu0 %v6752_v19  ;;  %v6776_v34 = vld [vmem:[%s12841_s3 + $0x44] ss:$16 sps:$4 sm:$0xff]   ;;  %v6777_v35 = vld [vmem:[%s12841_s3 + $0x240] ss:$16 sps:$4 sm:$0xff]  }
  0x29   : > { %3412 = vmatprep.subr.bf16.mxu1 %v6755_v21  ;;  %v6779_v36 = vld [vmem:[%s12841_s3 + $0x244] ss:$16 sps:$4 sm:$0xff]   ;;  %v6782_v37 = vld [vmem:[%s12841_s3 + $0x20] ss:$16 sps:$4 sm:$0xff]   ;;  %v6796_v21 = vld [vmem:[%s7108_s15 + $0x78] sm:$0xff]  }
  0x2a   : > { %6479 = vmatmul.mubr.msk.bf16.gmra.mxu0 %vm553_vm1, %v6740_v18  ;;  %v6784_v38 = vld [vmem:[%s12841_s3 + $0x24] ss:$16 sps:$4 sm:$0xff]   ;;  %v6785_v39 = vld [vmem:[%s12841_s3 + $0x220] ss:$16 sps:$4 sm:$0xff]  }
  0x2b   : > { %6512 = vmatmul.mubr.msk.bf16.gmra.mxu1 %vm553_vm1, %v6740_v18  ;;  %715 = vmatprep.mubr.bf16.mxu0 %v12851_v0  ;;  %v6787_v40 = vld [vmem:[%s12841_s3 + $0x224] ss:$16 sps:$4 sm:$0xff]   ;;  %v6790_v42 = vld [vmem:[%s12841_s3] ss:$16 sps:$4 sm:$0xff]  }
  0x2c   : > { %1068 = vmatprep.mubr.bf16.mxu1 %v12851_v0  ;;  %3060 = vmatpush1.bf16.msra.mxu0 %v6750_v20  ;;  %v6749_v41 = vld [vmem:[%s7108_s15 + $0x20] sm:$0xff]   ;;  %v6757_v59 = vld [vmem:[%s7108_s15 + $0x30] sm:$0xff]  }
  0x2d   : > { %3413 = vmatpush1.bf16.msra.mxu1 %v6753_v22  ;;  %3061 = vmatprep.subr.bf16.mxu0 %v6760_v24  ;;  %v6792_v43 = vld [vmem:[%s12841_s3 + $0x4] ss:$16 sps:$4 sm:$0xff]   ;;  %v6793_v45 = vld [vmem:[%s12841_s3 + $0x200] ss:$16 sps:$4 sm:$0xff]  }
  0x2e   : > { %3414 = vmatprep.subr.bf16.mxu1 %v6763_v26  ;;  %v6795_v44 = vld [vmem:[%s12841_s3 + $0x204] ss:$16 sps:$4 sm:$0xff]   ;;  %v6798_v46 = vld [vmem:[%s12841_s3 + $0x1e0] ss:$16 sps:$4 sm:$0xff]  }
  0x2f   : > { %v6800_v47 = vld [vmem:[%s12841_s3 + $0x1e4] ss:$16 sps:$4 sm:$0xff]   ;;  %v6801_v48 = vld [vmem:[%s12841_s3 + $0x3e0] ss:$16 sps:$4 sm:$0xff]  }
  0x30   : > { %3062 = vmatpush1.bf16.msra.mxu0 %v6758_v23  ;;  %v6803_v49 = vld [vmem:[%s12841_s3 + $0x3e4] ss:$16 sps:$4 sm:$0xff]   ;;  %v6806_v51 = vld [vmem:[%s12841_s3 + $0x1c0] ss:$16 sps:$4 sm:$0xff]  }
  0x31   : > { %3415 = vmatpush1.bf16.msra.mxu1 %v6761_v25  ;;  %3063 = vmatprep.subr.bf16.mxu0 %v6768_v29  ;;  %v6808_v52 = vld [vmem:[%s12841_s3 + $0x1c4] ss:$16 sps:$4 sm:$0xff]   ;;  %v6809_v53 = vld [vmem:[%s12841_s3 + $0x3c0] ss:$16 sps:$4 sm:$0xff]   ;;  %v6866_v29 = vld [vmem:[%s12841_s3 + $0x2ec] ss:$16 sps:$4 sm:$0xff]  }
  0x32   : > { %6480 = vmatmul.mubr.msk.bf16.gmra.mxu0 %vm553_vm1, %v6741_v27  ;;  %3416 = vmatprep.subr.bf16.mxu1 %v6771_v31  ;;  %v6811_v54 = vld [vmem:[%s12841_s3 + $0x3c4] ss:$16 sps:$4 sm:$0xff]   ;;  %v6814_v55 = vld [vmem:[%s12841_s3 + $0x1a0] ss:$16 sps:$4 sm:$0xff]   ;;  %v6812_v31 = vld [vmem:[%s7108_s15 + $0x98] sm:$0xff]  }
  0x33   : > { %6513 = vmatmul.mubr.msk.bf16.gmra.mxu1 %vm553_vm1, %v6741_v27  ;;  %725 = vmatprep.mubr.bf16.mxu0 %v12851_v0  ;;  %v6816_v56 = vld [vmem:[%s12841_s3 + $0x1a4] ss:$16 sps:$4 sm:$0xff]   ;;  %v6817_v57 = vld [vmem:[%s12841_s3 + $0x3a0] ss:$16 sps:$4 sm:$0xff]   ;;  %v6804_v27 = vld [vmem:[%s7108_s15 + $0x88] sm:$0xff]  }
  0x34   : > { %1078 = vmatprep.mubr.bf16.mxu1 %v12851_v0  ;;  %3064 = vmatpush1.bf16.msra.mxu0 %v6766_v28  ;;  %v6819_v58 = vld [vmem:[%s12841_s3 + $0x3a4] ss:$16 sps:$4 sm:$0xff]   ;;  %v6822_v60 = vld [vmem:[%s12841_s3 + $0x180] ss:$16 sps:$4 sm:$0xff]   ;;  %v6863_v28 = vld [vmem:[%s12841_s3 + $0xec] ss:$16 sps:$4 sm:$0xff]  }
  0x35   : > { %3417 = vmatpush1.bf16.msra.mxu1 %v6769_v30  ;;  %3065 = vmatprep.subr.bf16.mxu0 %v6776_v34  ;;  %v6824_v61 = vld [vmem:[%s12841_s3 + $0x184] ss:$16 sps:$4 sm:$0xff]   ;;  %v6825_v62 = vld [vmem:[%s12841_s3 + $0x380] ss:$16 sps:$4 sm:$0xff]  }
  0x36   : > { %3418 = vmatprep.subr.bf16.mxu1 %v6779_v36  ;;  %v6827_v63 = vld [vmem:[%s12841_s3 + $0x384] ss:$16 sps:$4 sm:$0xff]   ;;  %v6830_v4 = vld [vmem:[%s12841_s3 + $0x160] ss:$16 sps:$4 sm:$0xff]  }
  0x37   : > { %v6765_v2 = vld [vmem:[%s7108_s15 + $0x40] sm:$0xff]   ;;  %v6773_v8 = vld [vmem:[%s7108_s15 + $0x50] sm:$0xff]  }
  0x38   : > { %3066 = vmatpush1.bf16.msra.mxu0 %v6774_v33  ;;  %v6832_v5 = vld [vmem:[%s12841_s3 + $0x164] ss:$16 sps:$4 sm:$0xff]   ;;  %v6833_v6 = vld [vmem:[%s12841_s3 + $0x360] ss:$16 sps:$4 sm:$0xff]   ;;  %v6820_v33 = vld [vmem:[%s7108_s15 + $0xa8] sm:$0xff]  }
  0x39   : > { %3419 = vmatpush1.bf16.msra.mxu1 %v6777_v35  ;;  %3067 = vmatprep.subr.bf16.mxu0 %v6784_v38  ;;  %v6835_v7 = vld [vmem:[%s12841_s3 + $0x364] ss:$16 sps:$4 sm:$0xff]   ;;  %v6838_v10 = vld [vmem:[%s12841_s3 + $0x140] ss:$16 sps:$4 sm:$0xff]   ;;  %v6828_v35 = vld [vmem:[%s7108_s15 + $0xb8] sm:$0xff]  }
  0x3a   : > { %6481 = vmatmul.mubr.msk.bf16.gmra.mxu0 %vm553_vm1, %v6748_v32  ;;  %3420 = vmatprep.subr.bf16.mxu1 %v6787_v40  ;;  %v6840_v11 = vld [vmem:[%s12841_s3 + $0x144] ss:$16 sps:$4 sm:$0xff]   ;;  %v6841_v12 = vld [vmem:[%s12841_s3 + $0x340] ss:$16 sps:$4 sm:$0xff]  }
  0x3b   : > { %6514 = vmatmul.mubr.msk.bf16.gmra.mxu1 %vm553_vm1, %v6748_v32  ;;  %735 = vmatprep.mubr.bf16.mxu0 %v12851_v0  ;;  %v6843_v13 = vld [vmem:[%s12841_s3 + $0x344] ss:$16 sps:$4 sm:$0xff]   ;;  %v6846_v16 = vld [vmem:[%s12841_s3 + $0x120] ss:$16 sps:$4 sm:$0xff]  }
  0x3c   : > { %1088 = vmatprep.mubr.bf16.mxu1 %v12851_v0  ;;  %3068 = vmatpush1.bf16.msra.mxu0 %v6782_v37  ;;  %v6781_v14 = vld [vmem:[%s7108_s15 + $0x60] sm:$0xff]   ;;  %v6789_v20 = vld [vmem:[%s7108_s15 + $0x70] sm:$0xff]  }
  0x3d   : > { %3421 = vmatpush1.bf16.msra.mxu1 %v6785_v39  ;;  %3069 = vmatprep.subr.bf16.mxu0 %v6792_v43  ;;  %v6848_v17 = vld [vmem:[%s12841_s3 + $0x124] ss:$16 sps:$4 sm:$0xff]   ;;  %v6849_v18 = vld [vmem:[%s12841_s3 + $0x320] ss:$16 sps:$4 sm:$0xff]   ;;  %v6836_v43 = vld [vmem:[%s7108_s15 + $0xc8] sm:$0xff]  }
  0x3e   : > { %3422 = vmatprep.subr.bf16.mxu1 %v6795_v44  ;;  %v6851_v19 = vld [vmem:[%s12841_s3 + $0x324] ss:$16 sps:$4 sm:$0xff]   ;;  %v6854_v23 = vld [vmem:[%s12841_s3 + $0x100] ss:$16 sps:$4 sm:$0xff]  }
  0x3f   : > { %v6856_v22 = vld [vmem:[%s12841_s3 + $0x104] ss:$16 sps:$4 sm:$0xff]   ;;  %v6857_v24 = vld [vmem:[%s12841_s3 + $0x300] ss:$16 sps:$4 sm:$0xff]  }
  0x40   : > { %3070 = vmatpush1.bf16.msra.mxu0 %v6790_v42  ;;  %v6859_v25 = vld [vmem:[%s12841_s3 + $0x304] ss:$16 sps:$4 sm:$0xff]  }
  0x41   : > { %3423 = vmatpush1.bf16.msra.mxu1 %v6793_v45  ;;  %3071 = vmatprep.subr.bf16.mxu0 %v6800_v47  ;;  %v6797_v26 = vld [vmem:[%s7108_s15 + $0x80] sm:$0xff]   ;;  %v6805_v30 = vld [vmem:[%s7108_s15 + $0x90] sm:$0xff]  }
  0x42   : > { %6482 = vmatmul.mubr.msk.bf16.gmra.mxu0 %vm553_vm1, %v6749_v41  ;;  %3424 = vmatprep.subr.bf16.mxu1 %v6803_v49  ;;  %v6813_v32 = vld [vmem:[%s7108_s15 + $0xa0] sm:$0xff]   ;;  %v6821_v34 = vld [vmem:[%s7108_s15 + $0xb0] sm:$0xff]  }
  0x43   : > { %6515 = vmatmul.mubr.msk.bf16.gmra.mxu1 %vm553_vm1, %v6749_v41  ;;  %745 = vmatprep.mubr.bf16.mxu0 %v12851_v0  ;;  %v6829_v36 = vld [vmem:[%s7108_s15 + $0xc0] sm:$0xff]  }
  0x44   : > { %1098 = vmatprep.mubr.bf16.mxu1 %v12851_v0  ;;  %3072 = vmatpush2.bf16.msra.mxu0 %v6798_v46 }
  0x45   : > { %3425 = vmatpush2.bf16.msra.mxu1 %v6801_v48  ;;  %3073 = vmatprep.subr.bf16.mxu0 %v6808_v52  ;;  %v6837_v52 = vld [vmem:[%s7108_s15 + $0xd0] sm:$0xff]  }
  0x46   : > { %3426 = vmatprep.subr.bf16.mxu1 %v6811_v54 }
  0x48   : > { %3074 = vmatpush2.bf16.msra.mxu0 %v6806_v51 }
  0x49   : > { %3427 = vmatpush2.bf16.msra.mxu1 %v6809_v53  ;;  %3075 = vmatprep.subr.bf16.mxu0 %v6816_v56 }
  0x4a   : > { %6483 = vmatmul.mubr.msk.bf16.gmra.mxu0 %vm553_vm1, %v6756_v50  ;;  %3428 = vmatprep.subr.bf16.mxu1 %v6819_v58 }
  0x4b   : > { %6516 = vmatmul.mubr.msk.bf16.gmra.mxu1 %vm553_vm1, %v6756_v50  ;;  %755 = vmatprep.mubr.bf16.mxu0 %v12851_v0 }
  0x4c   : > { %1108 = vmatprep.mubr.bf16.mxu1 %v12851_v0  ;;  %3076 = vmatpush2.bf16.msra.mxu0 %v6814_v55 }
  0x4d   : > { %3429 = vmatpush2.bf16.msra.mxu1 %v6817_v57  ;;  %3077 = vmatprep.subr.bf16.mxu0 %v6824_v61 }
  0x4e   : > { %3430 = vmatprep.subr.bf16.mxu1 %v6827_v63 }
  0x50   : > { %3078 = vmatpush2.bf16.msra.mxu0 %v6822_v60 }
  0x51   : > { %3431 = vmatpush2.bf16.msra.mxu1 %v6825_v62  ;;  %3079 = vmatprep.subr.bf16.mxu0 %v6832_v5  ;;  %v6844_v62 = vld [vmem:[%s7108_s15 + $0xd8] sm:$0xff]  }
  0x52   : > { %6484 = vmatmul.mubr.msk.bf16.gmra.mxu0 %vm553_vm1, %v6757_v59  ;;  %3432 = vmatprep.subr.bf16.mxu1 %v6835_v7 }
  0x53   : > { %6517 = vmatmul.mubr.msk.bf16.gmra.mxu1 %vm553_vm1, %v6757_v59  ;;  %765 = vmatprep.mubr.bf16.mxu0 %v12851_v0  ;;  %v12846_v59 = vlaneseq }
  0x54   : > { %1118 = vmatprep.mubr.bf16.mxu1 %v12851_v0  ;;  %3080 = vmatpush2.bf16.msra.mxu0 %v6830_v4 }
  0x55   : > { %3433 = vmatpush2.bf16.msra.mxu1 %v6833_v6  ;;  %3081 = vmatprep.subr.bf16.mxu0 %v6840_v11  ;;  %v361_v11 = vld [vmem:[%s12840_s2] sm:$0xf] }
  0x56   : > { %3434 = vmatprep.subr.bf16.mxu1 %v6843_v13 }
  0x58   : > { %3082 = vmatpush2.bf16.msra.mxu0 %v6838_v10  ;;  %v6845_v10 = vld [vmem:[%s7108_s15 + $0xe0] sm:$0xff]  }
  0x59   : > { %3435 = vmatpush2.bf16.msra.mxu1 %v6841_v12  ;;  %3083 = vmatprep.subr.bf16.mxu0 %v6848_v17 }
  0x5a   : > { %6485 = vmatmul.mubr.msk.bf16.gmra.mxu0 %vm553_vm1, %v6764_v1  ;;  %3436 = vmatprep.subr.bf16.mxu1 %v6851_v19 }
  0x5b   : > { %6518 = vmatmul.mubr.msk.bf16.gmra.mxu1 %vm553_vm1, %v6764_v1  ;;  %775 = vmatprep.mubr.bf16.mxu0 %v12851_v0 }
  0x5c   : > { %1128 = vmatprep.mubr.bf16.mxu1 %v12851_v0  ;;  %3084 = vmatpush2.bf16.msra.mxu0 %v6846_v16 }
  0x5d   : > { %3437 = vmatpush2.bf16.msra.mxu1 %v6849_v18  ;;  %3085 = vmatprep.subr.bf16.mxu0 %v6856_v22 }
  0x5e   : > { %3438 = vmatprep.subr.bf16.mxu1 %v6859_v25 }
  0x60   : > { %3086 = vmatpush2.bf16.msra.mxu0 %v6854_v23 }
  0x61   : > { %3439 = vmatpush2.bf16.msra.mxu1 %v6857_v24  ;;  %3761 = vmatprep.subr.bf16.mxu0 %v6863_v28 }
  0x62   : > { %6486 = vmatmul.mubr.msk.bf16.gmra.mxu0 %vm553_vm1, %v6765_v2  ;;  %4114 = vmatprep.subr.bf16.mxu1 %v6866_v29 }
  0x63   : > { %6519 = vmatmul.mubr.msk.bf16.gmra.mxu1 %vm553_vm1, %v6765_v2  ;;  %785 = vmatprep.mubr.bf16.mxu0 %v12851_v0  ;;  %v7499_v2 = vshrl.u32 %v12846_v59, 7 }
  0x64   : > { %1138 = vmatprep.mubr.bf16.mxu1 %v12851_v0 }
  0x65   : > { %13122 = vst [vmem:[#allocation5_spill] sm:$0xff] %v7499_v2  ;;  %v12850_v7 = vsub.s32 0, %v7499_v2  ;;  %v12847_v12 = vsub.s32 2, %v7499_v2  ;;  %v12849_v13 = vsub.s32 1, %v7499_v2 }
  0x67   : > { %v7530_v16 = vrot.slane %v361_v11, %v12850_v7  ;;  %v7540_v19 = vrot.slane %v361_v11, %v12847_v12 }
  0x6a   : > { %6487 = vmatmul.mubr.msk.bf16.gmra.mxu0 %vm553_vm1, %v6772_v3 }
  0x6b   : > { %6520 = vmatmul.mubr.msk.bf16.gmra.mxu1 %vm553_vm1, %v6772_v3  ;;  %795 = vmatprep.mubr.bf16.mxu0 %v12851_v0 }
  0x6c   : > { %1148 = vmatprep.mubr.bf16.mxu1 %v12851_v0 }
  0x72   : > { %6488 = vmatmul.mubr.msk.bf16.gmra.mxu0 %vm553_vm1, %v6773_v8 }
  0x73   : > { %6521 = vmatmul.mubr.msk.bf16.gmra.mxu1 %vm553_vm1, %v6773_v8  ;;  %805 = vmatprep.mubr.bf16.mxu0 %v12851_v0 }
  0x74   : > { %1158 = vmatprep.mubr.bf16.mxu1 %v12851_v0 }
  0x7a   : > { %6489 = vmatmul.mubr.msk.bf16.gmra.mxu0 %vm553_vm1, %v6780_v9 }
  0x7b   : > { %6522 = vmatmul.mubr.msk.bf16.gmra.mxu1 %vm553_vm1, %v6780_v9  ;;  %815 = vmatprep.mubr.bf16.mxu0 %v12851_v0 }
  0x7c   : > { %1168 = vmatprep.mubr.bf16.mxu1 %v12851_v0 }
  0x82   : > { %6490 = vmatmul.mubr.msk.bf16.gmra.mxu0 %vm553_vm1, %v6781_v14 }
  0x83   : > { %6523 = vmatmul.mubr.msk.bf16.gmra.mxu1 %vm553_vm1, %v6781_v14  ;;  %825 = vmatprep.mubr.bf16.mxu0 %v12851_v0 }
  0x84   : > { %1178 = vmatprep.mubr.bf16.mxu1 %v12851_v0 }
  0x8a   : > { %6491 = vmatmul.mubr.msk.bf16.gmra.mxu0 %vm553_vm1, %v6788_v15 }
  0x8b   : > { %6524 = vmatmul.mubr.msk.bf16.gmra.mxu1 %vm553_vm1, %v6788_v15  ;;  %835 = vmatprep.mubr.bf16.mxu0 %v12851_v0 }
  0x8c   : > { %1188 = vmatprep.mubr.bf16.mxu1 %v12851_v0 }
  0x92   : > { %6492 = vmatmul.mubr.msk.bf16.gmra.mxu0 %vm553_vm1, %v6789_v20 }
  0x93   : > { %6525 = vmatmul.mubr.msk.bf16.gmra.mxu1 %vm553_vm1, %v6789_v20  ;;  %845 = vmatprep.mubr.bf16.mxu0 %v12851_v0  ;;  %v12848_v20 = vsub.s32 3, %v7499_v2 }
  0x94   : > { %1198 = vmatprep.mubr.bf16.mxu1 %v12851_v0 }
  0x95   : > { %v7564_v29 = vrot.slane %v361_v11, %v12848_v20  ;;  %v6853_v20 = vld [vmem:[%s7108_s15 + $0xf0] sm:$0xff]  }
  0x9a   : > { %6493 = vmatmul.mubr.msk.bf16.gmra.mxu0 %vm553_vm1, %v6796_v21 }
  0x9b   : > { %6526 = vmatmul.mubr.msk.bf16.gmra.mxu1 %vm553_vm1, %v6796_v21  ;;  %855 = vmatprep.mubr.bf16.mxu0 %v12851_v0  ;;  %v7547_v21 = vrot.slane %v361_v11, %v12849_v13 }
  0x9c   : > { %1208 = vmatprep.mubr.bf16.mxu1 %v12851_v0 }
  0xa2   : > { %6494 = vmatmul.mubr.msk.bf16.gmra.mxu0 %vm553_vm1, %v6797_v26 }
  0xa3   : > { %6527 = vmatmul.mubr.msk.bf16.gmra.mxu1 %vm553_vm1, %v6797_v26  ;;  %865 = vmatprep.mubr.bf16.mxu0 %v12851_v0 }
  0xa4   : > { %1218 = vmatprep.mubr.bf16.mxu1 %v12851_v0 }
  0xaa   : > { %6495 = vmatmul.mubr.msk.bf16.gmra.mxu0 %vm553_vm1, %v6804_v27 }
  0xab   : > { %6528 = vmatmul.mubr.msk.bf16.gmra.mxu1 %vm553_vm1, %v6804_v27  ;;  %875 = vmatprep.mubr.bf16.mxu0 %v12851_v0  ;;  %v6852_v27 = vld [vmem:[%s7108_s15 + $0xe8] sm:$0xff]  }
  0xac   : > { %1228 = vmatprep.mubr.bf16.mxu1 %v12851_v0 }
  0xb2   : > { %6496 = vmatmul.mubr.msk.bf16.gmra.mxu0 %vm553_vm1, %v6805_v30 }
  0xb3   : > { %6529 = vmatmul.mubr.msk.bf16.gmra.mxu1 %vm553_vm1, %v6805_v30  ;;  %885 = vmatprep.mubr.bf16.mxu0 %v12851_v0 }
  0xb4   : > { %1238 = vmatprep.mubr.bf16.mxu1 %v12851_v0 }
  0xba   : > { %6497 = vmatmul.mubr.msk.bf16.gmra.mxu0 %vm553_vm1, %v6812_v31 }
  0xbb   : > { %6530 = vmatmul.mubr.msk.bf16.gmra.mxu1 %vm553_vm1, %v6812_v31  ;;  %895 = vmatprep.mubr.bf16.mxu0 %v12851_v0 }
  0xbc   : > { %1248 = vmatprep.mubr.bf16.mxu1 %v12851_v0 }
  0xc2   : > { %6498 = vmatmul.mubr.msk.bf16.gmra.mxu0 %vm553_vm1, %v6813_v32 }
  0xc3   : > { %6531 = vmatmul.mubr.msk.bf16.gmra.mxu1 %vm553_vm1, %v6813_v32  ;;  %905 = vmatprep.mubr.bf16.mxu0 %v12851_v0 }
  0xc4   : > { %1258 = vmatprep.mubr.bf16.mxu1 %v12851_v0 }
  0xca   : > { %6499 = vmatmul.mubr.msk.bf16.gmra.mxu0 %vm553_vm1, %v6820_v33 }
  0xcb   : > { %6532 = vmatmul.mubr.msk.bf16.gmra.mxu1 %vm553_vm1, %v6820_v33  ;;  %915 = vmatprep.mubr.bf16.mxu0 %v12851_v0 }
  0xcc   : > { %1268 = vmatprep.mubr.bf16.mxu1 %v12851_v0 }
  0xd2   : > { %6500 = vmatmul.mubr.msk.bf16.gmra.mxu0 %vm553_vm1, %v6821_v34 }
  0xd3   : > { %6533 = vmatmul.mubr.msk.bf16.gmra.mxu1 %vm553_vm1, %v6821_v34  ;;  %925 = vmatprep.mubr.bf16.mxu0 %v12851_v0 }
  0xd4   : > { %1278 = vmatprep.mubr.bf16.mxu1 %v12851_v0 }
  0xda   : > { %6501 = vmatmul.mubr.msk.bf16.gmra.mxu0 %vm553_vm1, %v6828_v35 }
  0xdb   : > { %6534 = vmatmul.mubr.msk.bf16.gmra.mxu1 %vm553_vm1, %v6828_v35  ;;  %935 = vmatprep.mubr.bf16.mxu0 %v12851_v0 }
  0xdc   : > { %1288 = vmatprep.mubr.bf16.mxu1 %v12851_v0 }
  0xe2   : > { %v7435_v37 = vpop.f32.mrf.mxu0  ;;  %6502 = vmatmul.mubr.msk.bf16.gmra.mxu0 %vm553_vm1, %v6829_v36 }
  0xe3   : > { %v7438_v38 = vpop.f32.mrf.mxu1  ;;  %6535 = vmatmul.mubr.msk.bf16.gmra.mxu1 %vm553_vm1, %v6829_v36  ;;  %945 = vmatprep.mubr.bf16.mxu0 %v12851_v0  ;;  %v698_v24 = vadd.f32 %v7435_v37, %v7530_v16 }
  0xe4   : > { %1298 = vmatprep.mubr.bf16.mxu1 %v12851_v0  ;;  %v7443_v39 = vpop.f32.mrf.mxu0  ;;  %v1051_v28 = vadd.f32 %v7438_v38, %v7540_v19 }
  0xe5   : > { %v7445_v40 = vpop.f32.mrf.mxu1  ;;  %v700_v30 = vadd.f32 %v7443_v39, %v7547_v21  ;;  %vm1369_vm2 = vcmp.gt.f32.partialorder %v698_v24, 0.0  ;;  %v1625_v37 = vmul.f32 0.2, %v698_v24 }
  0xe6   : > { %v7447_v41 = vpop.f32.mrf.mxu0  ;;  %vm1371_vm3 = vcmp.gt.f32.partialorder %v1051_v28, 0.0  ;;  %v1627_v38 = vmul.f32 0.2, %v1051_v28  ;;  %v7584_v39 = vadd.f32 %v7445_v40, %v7564_v29 }
  0xe7   : > { %v7449_v42 = vpop.f32.mrf.mxu1  ;;  %v702_v31 = vadd.f32 %v7447_v41, %v7530_v16  ;;  %vm1370_vm4 = vcmp.gt.f32.partialorder %v700_v30, 0.0  ;;  %v1626_v41 = vmul.f32 0.2, %v700_v30  ;;  %v1881_v13 = vsel %vm1369_vm2, %v698_v24, %v1625_v37 }
  0xe8   : > { %v7452_v44 = vpop.f32.mrf.mxu0  ;;  %v1055_v34 = vadd.f32 %v7449_v42, %v7540_v19  ;;  %v1883_v7 = vsel %vm1371_vm3, %v1051_v28, %v1627_v38  ;;  %vm1372_vm7 = vcmp.gt.f32.partialorder %v7584_v39, 0.0 }
  0xe9   : > { %v7454_v45 = vpop.f32.mrf.mxu1  ;;  %v1629_v42 = vmul.f32 0.2, %v702_v31  ;;  %vm1373_vm5 = vcmp.gt.f32.partialorder %v702_v31, 0.0  ;;  %v1882_v2 = vsel %vm1370_vm4, %v700_v30, %v1626_v41 }
  0xea   : > { %v7456_v46 = vpop.f32.mrf.mxu0  ;;  %6503 = vmatmul.mubr.msk.bf16.gmra.mxu0 %vm553_vm1, %v6836_v43  ;;  %vm1375_vm6 = vcmp.gt.f32.partialorder %v1055_v34, 0.0 }
  0xeb   : > { %v7459_v47 = vpop.f32.mrf.mxu1  ;;  %6536 = vmatmul.mubr.msk.bf16.gmra.mxu1 %vm553_vm1, %v6836_v43  ;;  %955 = vmatprep.mubr.bf16.mxu0 %v12851_v0  ;;  %v704_v43 = vadd.f32 %v7452_v44, %v7547_v21  ;;  %v708_v40 = vadd.f32 %v7456_v46, %v7530_v16 }
  0xec   : > { %v7463_v48 = vpop.f32.mrf.mxu0  ;;  %1308 = vmatprep.mubr.bf16.mxu1 %v12851_v0  ;;  %v1061_v11 = vadd.f32 %v7459_v47, %v7540_v19  ;;  %v1628_v47 = vmul.f32 0.2, %v7584_v39 }
  0xed   : > { %v7465_v49 = vpop.f32.mrf.mxu1  ;;  %vm1374_vm8 = vcmp.gt.f32.partialorder %v704_v43, 0.0  ;;  %v1630_v24 = vmul.f32 0.2, %v704_v43  ;;  %v1633_v37 = vmul.f32 0.2, %v708_v40  ;;  %vm1377_vm9 = vcmp.gt.f32.partialorder %v708_v40, 0.0 }
  0xee   : > { %v7468_v50 = vpop.f32.mrf.mxu0  ;;  %v1635_v28 = vmul.f32 0.2, %v1061_v11  ;;  %vm1379_vm10 = vcmp.gt.f32.partialorder %v1061_v11, 0.0 }
  0xef   : > { %v7470_v51 = vpop.f32.mrf.mxu1  ;;  %v712_v59 = vadd.f32 %v7468_v50, %v7530_v16 }
  0xf0   : > { %v7473_v53 = vpop.f32.mrf.mxu0  ;;  %v1065_v46 = vadd.f32 %v7470_v51, %v7540_v19 }
  0xf1   : > { %v7475_v54 = vpop.f32.mrf.mxu1  ;;  %vm1381_vm12 = vcmp.gt.f32.partialorder %v712_v59, 0.0 }
  0xf2   : > { %v7477_v55 = vpop.f32.mrf.mxu0  ;;  %6504 = vmatmul.mubr.msk.bf16.gmra.mxu0 %vm553_vm1, %v6837_v52  ;;  %v1639_v30 = vmul.f32 0.2, %v1065_v46  ;;  %vm1383_vm13 = vcmp.gt.f32.partialorder %v1065_v46, 0.0 }
  0xf3   : > { %v7480_v56 = vpop.f32.mrf.mxu1  ;;  %6537 = vmatmul.mubr.msk.bf16.gmra.mxu1 %vm553_vm1, %v6837_v52  ;;  %965 = vmatprep.mubr.bf16.mxu0 %v12851_v0 }
  0xf4   : > { %1318 = vmatprep.mubr.bf16.mxu1 %v12851_v0  ;;  %v7485_v57 = vpop.f32.mrf.mxu0 }
  0xf5   : > { %v7487_v58 = vpop.f32.mrf.mxu1 }
  0xf6   : > { %v7489_v60 = vpop.f32.mrf.mxu0 }
  0xf7   : > { %v7491_v61 = vpop.f32.mrf.mxu1 }
  0xf8   : > { %v7494_v63 = vpop.f32.mrf.mxu0 }
  0xf9   : > { %v7496_v1 = vpop.f32.mrf.mxu1 }
  0xfa   : > { %v7501_v3 = vpop.f32.mrf.mxu0  ;;  %6505 = vmatmul.mubr.msk.bf16.gmra.mxu0 %vm553_vm1, %v6844_v62 }
  0xfb   : > { %v7504_v4 = vpop.f32.mrf.mxu1  ;;  %6538 = vmatmul.mubr.msk.bf16.gmra.mxu1 %vm553_vm1, %v6844_v62  ;;  %975 = vmatprep.mubr.bf16.mxu0 %v12851_v0 }
  0xfc   : > { %1328 = vmatprep.mubr.bf16.mxu1 %v12851_v0  ;;  %v7509_v5 = vpop.f32.mrf.mxu0 }
  0xfd   : > { %v7511_v6 = vpop.f32.mrf.mxu1 }
  0xfe   : > { %v7514_v8 = vpop.f32.mrf.mxu0 }
  0xff   : > { %v7516_v9 = vpop.f32.mrf.mxu1 }
 0x100   : > { %v7524_v14 = vpop.f32.mrf.mxu0 }
 0x101   : > { %v7526_v15 = vpop.f32.mrf.mxu1 }
 0x102   : > { %v7532_v17 = vpop.f32.mrf.mxu0  ;;  %6506 = vmatmul.mubr.msk.bf16.gmra.mxu0 %vm553_vm1, %v6845_v10 }
 0x103   : > { %v7535_v18 = vpop.f32.mrf.mxu1  ;;  %6539 = vmatmul.mubr.msk.bf16.gmra.mxu1 %vm553_vm1, %v6845_v10  ;;  %985 = vmatprep.mubr.bf16.mxu0 %v12851_v0  ;;  %v1631_v10 = vmul.f32 0.2, %v1055_v34 }
 0x104   : > { %1338 = vmatprep.mubr.bf16.mxu1 %v12851_v0  ;;  %v7549_v22 = vpop.f32.mrf.mxu0 }
 0x105   : > { %v7551_v23 = vpop.f32.mrf.mxu1 }
 0x106   : > { %v7555_v25 = vpop.f32.mrf.mxu0 }
 0x107   : > { %v7557_v26 = vpop.f32.mrf.mxu1 }
 0x108   : > { %v7570_v32 = vpop.f32.mrf.mxu0 }
 0x109   : > { %v7572_v33 = vpop.f32.mrf.mxu1 }
 0x10a   : > { %v7576_v35 = vpop.f32.mrf.mxu0  ;;  %6507 = vmatmul.mubr.msk.bf16.gmra.mxu0 %vm553_vm1, %v6852_v27 }
 0x10b   : > { %v7579_v36 = vpop.f32.mrf.mxu1  ;;  %6540 = vmatmul.mubr.msk.bf16.gmra.mxu1 %vm553_vm1, %v6852_v27  ;;  %995 = vmatprep.mubr.bf16.mxu0 %v12851_v0  ;;  %v1057_v27 = vadd.f32 %v7454_v45, %v7564_v29  ;;  %v1885_v45 = vsel %vm1373_vm5, %v702_v31, %v1629_v42 }
 0x10c   : > { %1348 = vmatprep.mubr.bf16.mxu1 %v12851_v0  ;;  %v7590_v52 = vpop.f32.mrf.mxu0  ;;  %v7625_v42 = vpack.c.bf16 %v1885_v45, %v1881_v13  ;;  %v1889_v45 = vsel %vm1377_vm9, %v708_v40, %v1633_v37  ;;  %v6860_v40 = vld [vmem:[%s7108_s15 + $0xf8] sm:$0xff]   ;;  %v1895_v37 = vsel %vm1383_vm13, %v1065_v46, %v1639_v30 }
 0x10d   : > { %13123 = vst [vmem:[#allocation6_spill] sm:$0xff] %v7590_v52  ;;  %v7592_v62 = vpop.f32.mrf.mxu1  ;;  %v1632_v38 = vmul.f32 0.2, %v1057_v27  ;;  %v1637_v52 = vmul.f32 0.2, %v712_v59  ;;  %vm1376_vm11 = vcmp.gt.f32.partialorder %v1057_v27, 0.0 }
 0x10e   : > { %13124 = vst [vmem:[#allocation7_spill] sm:$0xff] %v7592_v62  ;;  %v7602_v44 = vpop.f32.mrf.mxu0  ;;  %v1887_v62 = vsel %vm1375_vm6, %v1055_v34, %v1631_v10  ;;  %13127 = vst [vmem:[#allocation10_spill] sm:$0xff] %v7625_v42  ;;  %v13128_v34 = vmov 0   ;;  %v7633_v10 = vadd.f32 %v7463_v48, %v7547_v21 }
 0x10f   : > { %v7604_v12 = vpop.f32.mrf.mxu1  ;;  %v7629_v41 = vpack.c.bf16 %v1887_v62, %v1883_v7  ;;  %v722_v7 = vadd.f32 %v7489_v60, %v7530_v16  ;;  %v1886_v62 = vsel %vm1374_vm8, %v704_v43, %v1630_v24  ;;  %v1893_v48 = vsel %vm1381_vm12, %v712_v59, %v1637_v52 }
 0x110   : > { %v7613_v0 = vpop.f32.mrf.mxu0  ;;  %v718_v60 = vadd.f32 %v7477_v55, %v7530_v16  ;;  %v1071_v59 = vadd.f32 %v7480_v56, %v7540_v19  ;;  %vm1378_vm14 = vcmp.gt.f32.partialorder %v7633_v10, 0.0  ;;  %v1884_v55 = vsel %vm1372_vm7, %v7584_v39, %v1628_v47 }
 0x111   : > { %13125 = vst [vmem:[#allocation8_spill] sm:$0xff] %v7613_v0  ;;  %v7615_v50 = vpop.f32.mrf.mxu1  ;;  %13129 = vst [vmem:[#allocation11_spill] sm:$0xff] %v7629_v41  ;;  %v714_v0 = vadd.f32 %v7473_v53, %v7547_v21  ;;  %v1075_v53 = vadd.f32 %v7491_v61, %v7540_v19  ;;  %v7678_v46 = vpack.c.bf16 %v1893_v48, %v1889_v45  ;;  %v1645_v56 = vmul.f32 0.2, %v722_v7 }
 0x112   : > { %13126 = vst [vmem:[#allocation9_spill] sm:$0xff] %v7615_v50  ;;  %v7619_v51 = vpop.f32.mrf.mxu0  ;;  %6508 = vmatmul.mubr.msk.bf16.gmra.mxu0 %vm553_vm1, %v6853_v20  ;;  %v7637_v50 = vadd.f32 %v7465_v49, %v7564_v29  ;;  %v7652_v49 = vadd.f32 %v7475_v54, %v7564_v29  ;;  %v1634_v54 = vmul.f32 0.2, %v7633_v10  ;;  %v7680_v24 = vpack.c.bf16 %v1886_v62, %v1882_v2 }
 0x113   : > { %v7622_v31 = vpop.f32.mrf.mxu1  ;;  %6541 = vmatmul.mubr.msk.bf16.gmra.mxu1 %vm553_vm1, %v6853_v20  ;;  %1005 = vmatprep.mubr.bf16.mxu0 %v13128_v34  ;;  %13133 = vst [vmem:[#allocation15_spill] sm:$0xff] %v7678_v46  ;;  %vm1382_vm15 = vcmp.gt.f32.partialorder %v714_v0, 0.0  ;;  %vm1389_vm0 = vcmp.gt.f32.partialorder %v722_v7, 0.0  ;;  %v1641_v2 = vmul.f32 0.2, %v718_v60  ;;  %v7696_v47 = vadd.f32 %v7485_v57, %v7547_v21 }
 0x114   : > { %1358 = vmatprep.mubr.bf16.mxu1 %v13128_v34  ;;  %v7639_v13 = vpop.f32.mrf.mxu0  ;;  %v1891_v34 = vsel %vm1379_vm10, %v1061_v11, %v1635_v28  ;;  %v1888_v11 = vsel %vm1376_vm11, %v1057_v27, %v1632_v38  ;;  %v7669_v43 = vmul.f32 0.2, %v7637_v50  ;;  %13134 = vst [vmem:[#allocation16_spill] sm:$0xff] %v7680_v24  ;;  %v1638_v38 = vmul.f32 0.2, %v714_v0 }
 0x115   : > { %13130 = vst [vmem:[#allocation12_spill] sm:$0xff] %v7639_v13  ;;  %v7641_v20 = vpop.f32.mrf.mxu1  ;;  %v7682_v61 = vpack.c.bf16 %v1888_v11, %v1884_v55  ;;  %v7684_v28 = vpack.c.bf16 %v1895_v37, %v1891_v34  ;;  %vm1380_vm2 = vcmp.gt.f32.partialorder %v7637_v50, 0.0  ;;  %vm1384_vm3 = vcmp.gt.f32.partialorder %v7652_v49, 0.0 }
 0x116   : > { %13131 = vst [vmem:[#allocation13_spill] sm:$0xff] %v7641_v20  ;;  %v7654_v13 = vpop.f32.mrf.mxu0  ;;  %v1643_v39 = vmul.f32 0.2, %v1071_v59  ;;  %v1647_v34 = vmul.f32 0.2, %v1075_v53  ;;  %vm1385_vm4 = vcmp.gt.f32.partialorder %v718_v60, 0.0  ;;  %v7702_v45 = vadd.f32 %v7487_v58, %v7564_v29 }
 0x117   : > { %v7656_v20 = vpop.f32.mrf.mxu1  ;;  %13135 = vst [vmem:[#allocation17_spill] sm:$0xff] %v7682_v61  ;;  %13136 = vst [vmem:[#allocation18_spill] sm:$0xff] %v7684_v28  ;;  %vm1387_vm5 = vcmp.gt.f32.partialorder %v1071_v59, 0.0  ;;  %v7711_v57 = vadd.f32 %v7494_v63, %v7547_v21  ;;  %v7715_v11 = vadd.f32 %v7496_v1, %v7564_v29  ;;  %v728_v37 = vadd.f32 %v7501_v3, %v7530_v16 }
 0x118   : > { %v7671_v52 = vpop.f32.mrf.mxu0  ;;  %v1640_v58 = vmul.f32 0.2, %v7652_v49  ;;  %v732_v55 = vadd.f32 %v7514_v8, %v7530_v16  ;;  %v1894_v63 = vsel %vm1382_vm15, %v714_v0, %v1638_v38  ;;  %v1897_v1 = vsel %vm1385_vm4, %v718_v60, %v1641_v2  ;;  %v6861_v8 = vld [vmem:[%s12841_s3 + $0xe8] ss:$16 sps:$4 sm:$0xff]   ;;  %v6869_v2 = vld [vmem:[%s12841_s3 + $0xcc] ss:$16 sps:$4 sm:$0xff]  }
 0x119   : > { %v7673_v27 = vpop.f32.mrf.mxu1  ;;  %v7732_v3 = vmul.f32 0.2, %v7696_v47  ;;  %v1081_v60 = vadd.f32 %v7504_v4, %v7540_v19  ;;  %vm1390_vm6 = vcmp.gt.f32.partialorder %v7711_v57, 0.0  ;;  %v7763_v4 = vmul.f32 0.2, %v7711_v57 }
 0x11a   : > { %13132 = vst [vmem:[#allocation14_spill] sm:$0xff] %v7673_v27  ;;  %v7686_v30 = vpop.f32.mrf.mxu0  ;;  %6509 = vmatmul.mubr.msk.bf16.gmra.mxu0 %vm553_vm1, %v6860_v40  ;;  %vm1393_vm7 = vcmp.gt.f32.partialorder %v728_v37, 0.0  ;;  %vm1386_vm8 = vcmp.gt.f32.partialorder %v7696_v47, 0.0  ;;  %vm1397_vm9 = vcmp.gt.f32.partialorder %v732_v55, 0.0  ;;  %vm1388_vm11 = vcmp.gt.f32.partialorder %v7702_v45, 0.0 }
 0x11b   : > { %v7689_v27 = vpop.f32.mrf.mxu1  ;;  %6542 = vmatmul.mubr.msk.bf16.gmra.mxu1 %vm553_vm1, %v6860_v40  ;;  %3087 = vmatprep.mubr.bf16.mxu0 %v7680_v24  ;;  %vm1391_vm1 = vcmp.gt.f32.partialorder %v1075_v53, 0.0  ;;  %v1901_v40 = vsel %vm1389_vm0, %v722_v7, %v1645_v56  ;;  %v1899_v24 = vsel %vm1387_vm5, %v1071_v59, %v1643_v39  ;;  %v6872_v39 = vld [vmem:[%s12841_s3 + $0x2cc] ss:$16 sps:$4 sm:$0xff]   ;;  %vm1392_vm12 = vcmp.gt.f32.partialorder %v7715_v11, 0.0 }
 0x11c   : > { %3440 = vmatprep.mubr.bf16.mxu1 %v7682_v61  ;;  %v7704_v62 = vpop.f32.mrf.mxu0  ;;  %v1085_v61 = vadd.f32 %v7516_v9, %v7540_v19  ;;  %v6864_v9 = vld [vmem:[%s12841_s3 + $0x2e8] ss:$16 sps:$4 sm:$0xff]   ;;  %v7744_v0 = vpack.c.bf16 %v1901_v40, %v1897_v1  ;;  %v1649_v40 = vmul.f32 0.2, %v728_v37  ;;  %vm1395_vm13 = vcmp.gt.f32.partialorder %v1081_v60, 0.0 }
 0x11d   : > { %13137 = vst [vmem:[#allocation19_spill] sm:$0xff] %v7704_v62  ;;  %v7706_v48 = vpop.f32.mrf.mxu1  ;;  %v7742_v62 = vmul.f32 0.2, %v7702_v45 }
 0x11e   : > { %13138 = vst [vmem:[#allocation20_spill] sm:$0xff] %v7706_v48  ;;  %v7724_v7 = vpop.f32.mrf.mxu0  ;;  %v1903_v48 = vsel %vm1391_vm1, %v1075_v53, %v1647_v34  ;;  %13140 = vst [vmem:[#allocation22_spill] sm:$0xff] %v7744_v0  ;;  %v1890_v53 = vsel %vm1378_vm14, %v7633_v10, %v1634_v54  ;;  %v7766_v34 = vmul.f32 0.2, %v7715_v11  ;;  %v1653_v54 = vmul.f32 0.2, %v732_v55 }
 0x11f   : > { %v7726_v56 = vpop.f32.mrf.mxu1  ;;  %v7768_v1 = vpack.c.bf16 %v1894_v63, %v1890_v53  ;;  %v7770_v10 = vpack.c.bf16 %v1903_v48, %v1899_v24  ;;  %vm1399_vm10 = vcmp.gt.f32.partialorder %v1085_v61, 0.0  ;;  %v738_v63 = vadd.f32 %v7532_v17, %v7530_v16 }
 0x120   : > { %13139 = vst [vmem:[#allocation21_spill] sm:$0xff] %v7726_v56  ;;  %v7748_v59 = vpop.f32.mrf.mxu0  ;;  %v1091_v24 = vadd.f32 %v7535_v18, %v7540_v19  ;;  %v1651_v48 = vmul.f32 0.2, %v1081_v60  ;;  %v7788_v53 = vadd.f32 %v7509_v5, %v7547_v21  ;;  %v742_v17 = vadd.f32 %v7555_v25, %v7530_v16 }
 0x121   : > { %13141 = vst [vmem:[#allocation23_spill] sm:$0xff] %v7748_v59  ;;  %v7750_v38 = vpop.f32.mrf.mxu1  ;;  %13143 = vst [vmem:[#allocation25_spill] sm:$0xff] %v7768_v1  ;;  %v1905_v5 = vsel %vm1393_vm7, %v728_v37, %v1649_v40  ;;  %v7810_v25 = vadd.f32 %v7526_v15, %v7564_v29  ;;  %v1896_v15 = vsel %vm1384_vm3, %v7652_v49, %v1640_v58  ;;  %vm1401_vm14 = vcmp.gt.f32.partialorder %v738_v63, 0.0 }
 0x122   : > { %13142 = vst [vmem:[#allocation24_spill] sm:$0xff] %v7750_v38  ;;  %13144 = vst [vmem:[#allocation26_spill] sm:$0xff] %v7770_v10  ;;  %v1655_v38 = vmul.f32 0.2, %v1085_v61  ;;  %v7772_v59 = vpop.f32.mrf.mxu0  ;;  %3088 = vmatmul.mubr.bf16.vlgmr.msra.gmra.mxu0 %v7625_v42  ;;  %v6867_v42 = vld [vmem:[%s12841_s3 + $0xc8] ss:$16 sps:$4 sm:$0xff]   ;;  %v1907_v49 = vsel %vm1395_vm13, %v1081_v60, %v1651_v48  ;;  %v7857_v60 = vadd.f32 %v7551_v23, %v7564_v29 }
 0x123   : > { %v7774_v56 = vpop.f32.mrf.mxu1  ;;  %3441 = vmatmul.mubr.bf16.vlgmr.msra.gmra.mxu1 %v7629_v41  ;;  %3097 = vmatprep.mubr.bf16.mxu0 %v7768_v1  ;;  %v7792_v41 = vadd.f32 %v7511_v6, %v7564_v29  ;;  %v7806_v6 = vadd.f32 %v7524_v14, %v7547_v21  ;;  %v1892_v14 = vsel %vm1380_vm2, %v7637_v50, %v7669_v43  ;;  %v1659_v40 = vmul.f32 0.2, %v1091_v24  ;;  %v6875_v50 = vld [vmem:[%s12841_s3 + $0xac] ss:$16 sps:$4 sm:$0xff]  }
 0x124   : > { %3762 = vmatpush1.bf16.msra.mxu0 %v6861_v8  ;;  %v7796_v18 = vpop.f32.mrf.mxu0  ;;  %4115 = vmatpush1.bf16.msra.mxu1 %v6864_v9  ;;  %v6870_v8 = vld [vmem:[%s12841_s3 + $0x2c8] ss:$16 sps:$4 sm:$0xff]   ;;  %v1909_v9 = vsel %vm1397_vm9, %v732_v55, %v1653_v54  ;;  %v1657_v55 = vmul.f32 0.2, %v738_v63  ;;  %vm1403_vm15 = vcmp.gt.f32.partialorder %v1091_v24, 0.0  ;;  %vm1405_vm0 = vcmp.gt.f32.partialorder %v742_v17, 0.0 }
 0x125   : > { %13145 = vst [vmem:[#allocation27_spill] sm:$0xff] %v7796_v18  ;;  %v7798_v1 = vpop.f32.mrf.mxu1  ;;  %3763 = vmatprep.subr.bf16.mxu0 %v6869_v2  ;;  %4116 = vmatprep.subr.bf16.mxu1 %v6872_v39  ;;  %v6873_v39 = vld [vmem:[%s12841_s3 + $0xa8] ss:$16 sps:$4 sm:$0xff]   ;;  %v1661_v43 = vmul.f32 0.2, %v742_v17  ;;  %vm1394_vm2 = vcmp.gt.f32.partialorder %v7788_v53, 0.0 }
 0x126   : > { %13146 = vst [vmem:[#allocation28_spill] sm:$0xff] %v7798_v1  ;;  %v1911_v1 = vsel %vm1399_vm10, %v1085_v61, %v1655_v38  ;;  %v7824_v37 = vpop.f32.mrf.mxu0  ;;  %v7833_v61 = vadd.f32 %v7557_v26, %v7540_v19  ;;  %v7835_v38 = vpack.c.bf16 %v1896_v15, %v1892_v14  ;;  %v6878_v26 = vld [vmem:[%s12841_s3 + $0x2ac] ss:$16 sps:$4 sm:$0xff]   ;;  %v7849_v14 = vmul.f32 0.2, %v7788_v53 }
 0x127   : > { %v7826_v2 = vpop.f32.mrf.mxu1  ;;  %v7853_v15 = vadd.f32 %v7549_v22, %v7547_v21  ;;  %v7864_v48 = vmul.f32 0.2, %v7792_v41  ;;  %v7871_v22 = vmul.f32 0.2, %v7806_v6  ;;  %vm1396_vm3 = vcmp.gt.f32.partialorder %v7792_v41, 0.0 }
 0x128   : > { %13147 = vst [vmem:[#allocation29_spill] sm:$0xff] %v7835_v38  ;;  %v7841_v58 = vpop.f32.mrf.mxu0  ;;  %3764 = vmatpush1.bf16.msra.mxu0 %v6867_v42  ;;  %3450 = vmatprep.mubr.bf16.mxu1 %v7835_v38  ;;  %v6881_v42 = vld [vmem:[%s12841_s3 + $0x8c] ss:$16 sps:$4 sm:$0xff]   ;;  %v7896_v38 = vadd.f32 %v7576_v35, %v7530_v16  ;;  %vm1398_vm4 = vcmp.gt.f32.partialorder %v7806_v6, 0.0  ;;  %vm1400_vm5 = vcmp.gt.f32.partialorder %v7810_v25, 0.0  ;;  %vm1407_vm1 = vcmp.gt.f32.partialorder %v7833_v61, 0.0 }
 0x129   : > { %13148 = vst [vmem:[#allocation30_spill] sm:$0xff] %v7841_v58  ;;  %v7843_v54 = vpop.f32.mrf.mxu1  ;;  %4117 = vmatpush1.bf16.msra.mxu1 %v6870_v8  ;;  %v7868_v58 = vpack.c.bf16 %v1911_v1, %v1907_v49  ;;  %v6876_v8 = vld [vmem:[%s12841_s3 + $0x2a8] ss:$16 sps:$4 sm:$0xff]   ;;  %v1913_v1 = vsel %vm1401_vm14, %v738_v63, %v1657_v55  ;;  %v1663_v49 = vmul.f32 0.2, %v7833_v61  ;;  %3765 = vmatprep.subr.bf16.mxu0 %v6875_v50  ;;  %vm1402_vm10 = vcmp.gt.f32.partialorder %v7853_v15, 0.0 }
 0x12a   : > { %13149 = vst [vmem:[#allocation31_spill] sm:$0xff] %v7843_v54  ;;  %v7866_v54 = vpack.c.bf16 %v1909_v9, %v1905_v5  ;;  %v7873_v23 = vpop.f32.mrf.mxu0  ;;  %3098 = vmatmul.mubr.bf16.gmra.mxu0 %v7678_v46  ;;  %v7883_v5 = vmul.f32 0.2, %v7810_v25  ;;  %v7887_v9 = vsel %vm1403_vm15, %v1091_v24, %v1659_v40  ;;  %v6884_v46 = vld [vmem:[%s12841_s3 + $0x28c] ss:$16 sps:$4 sm:$0xff]   ;;  %v1902_v63 = vsel %vm1390_vm6, %v7711_v57, %v7763_v4 }
 0x12b   : > { %13151 = vst [vmem:[#allocation33_spill] sm:$0xff] %v7868_v58  ;;  %v7875_v18 = vpop.f32.mrf.mxu1  ;;  %3451 = vmatmul.mubr.bf16.gmra.mxu1 %v7684_v28  ;;  %v1917_v28 = vsel %vm1405_vm0, %v742_v17, %v1661_v43  ;;  %v6879_v17 = vld [vmem:[%s12841_s3 + $0x88] ss:$16 sps:$4 sm:$0xff]   ;;  %v7918_v35 = vmul.f32 0.2, %v7853_v15  ;;  %v7926_v57 = vadd.f32 %v7570_v32, %v7547_v21  ;;  %4118 = vmatprep.subr.bf16.mxu1 %v6878_v26  ;;  %vm1409_vm6 = vcmp.gt.f32.partialorder %v7896_v38, 0.0 }
 0x12c   : > { %13150 = vst [vmem:[#allocation32_spill] sm:$0xff] %v7866_v54  ;;  %13152 = vst [vmem:[#allocation34_spill] sm:$0xff] %v7875_v18  ;;  %v7900_v18 = vadd.f32 %v7579_v36, %v7540_v19  ;;  %v7906_v24 = vpop.f32.mrf.mxu0  ;;  %3766 = vmatpush1.bf16.msra.mxu0 %v6873_v39  ;;  %v7921_v36 = vmul.f32 0.2, %v7857_v60  ;;  %v7930_v4 = vadd.f32 %v7572_v33, %v7564_v29 }
 0x12d   : > { %v7908_v55 = vpop.f32.mrf.mxu1  ;;  %3767 = vmatprep.subr.bf16.mxu0 %v6881_v42  ;;  %v752_v39 = vadd.f32 %v7602_v44, %v7530_v16  ;;  %v1105_v40 = vadd.f32 %v7604_v12, %v7540_v19  ;;  %v1898_v50 = vsel %vm1386_vm8, %v7696_v47, %v7732_v3  ;;  %4119 = vmatpush1.bf16.msra.mxu1 %v6876_v8  ;;  %v6882_v47 = vld [vmem:[%s12841_s3 + $0x288] ss:$16 sps:$4 sm:$0xff]  }
 0x12e   : > { %v7940_v43 = vpop.f32.mrf.mxu0  ;;  %v7944_v26 = vpack.c.bf16 %v1917_v28, %v1913_v1  ;;  %v7946_v33 = vpack.c.bf16 %v1902_v63, %v1898_v50  ;;  %v1900_v44 = vsel %vm1388_vm11, %v7702_v45, %v7742_v62  ;;  %v1904_v12 = vsel %vm1392_vm12, %v7715_v11, %v7766_v34  ;;  %4120 = vmatprep.subr.bf16.mxu1 %v6884_v46  ;;  %v6887_v28 = vld [vmem:[%s12841_s3 + $0x6c] ss:$16 sps:$4 sm:$0xff]   ;;  %v6885_v46 = vld [vmem:[%s12841_s3 + $0x68] ss:$16 sps:$4 sm:$0xff]   ;;  %v13159_v1 = vld [vmem:[#allocation7_spill] sm:$0xff] }
 0x12f   : > { %v7942_v32 = vpop.f32.mrf.mxu1  ;;  %v1919_v3 = vsel %vm1407_vm1, %v7833_v61, %v1663_v49  ;;  %v1665_v45 = vmul.f32 0.2, %v7896_v38  ;;  %v1667_v62 = vmul.f32 0.2, %v7900_v18  ;;  %v7967_v42 = vpack.c.bf16 %v1904_v12, %v1900_v44  ;;  %v13158_v61 = vld [vmem:[#allocation6_spill] sm:$0xff] }
 0x130   : > { %13153 = vst [vmem:[#allocation35_spill] sm:$0xff] %v7944_v26  ;;  %13154 = vst [vmem:[#allocation36_spill] sm:$0xff] %v7946_v33  ;;  %v7969_v11 = vpop.f32.mrf.mxu0  ;;  %3768 = vmatpush1.bf16.msra.mxu0 %v6879_v17  ;;  %vm1411_vm7 = vcmp.gt.f32.partialorder %v7900_v18, 0.0  ;;  %v7980_v8 = vadd.f32 %v13158_v61, %v7547_v21  ;;  %v7984_v49 = vadd.f32 %v13159_v1, %v7564_v29  ;;  %3107 = vmatprep.mubr.bf16.mxu0 %v7946_v33  ;;  %v6890_v63 = vld [vmem:[%s12841_s3 + $0x26c] ss:$16 sps:$4 sm:$0xff]  }
 0x131   : > { %13155 = vst [vmem:[#allocation37_spill] sm:$0xff] %v7967_v42  ;;  %13156 = vst [vmem:[#allocation38_spill] sm:$0xff] %v7969_v11  ;;  %v7971_v34 = vpop.f32.mrf.mxu1  ;;  %v6893_v17 = vld [vmem:[%s12841_s3 + $0x4c] ss:$16 sps:$4 sm:$0xff]   ;;  %v7994_v50 = vmul.f32 0.2, %v7926_v57  ;;  %v762_v61 = vadd.f32 %v7654_v13, %v7530_v16  ;;  %3460 = vmatprep.mubr.bf16.mxu1 %v7967_v42  ;;  %v8010_v11 = vadd.f32 %v7622_v31, %v7540_v19  ;;  %3769 = vmatprep.subr.bf16.mxu0 %v6887_v28 }
 0x132   : > { %13157 = vst [vmem:[#allocation39_spill] sm:$0xff] %v7971_v34  ;;  %v1669_v44 = vmul.f32 0.2, %v752_v39  ;;  %v1671_v12 = vmul.f32 0.2, %v1105_v40  ;;  %v7999_v1 = vpop.f32.mrf.mxu0  ;;  %3108 = vmatmul.mubr.bf16.gmra.mxu0 %v7744_v0  ;;  %vm1413_vm8 = vcmp.gt.f32.partialorder %v752_v39, 0.0  ;;  %v8006_v34 = vadd.f32 %v7619_v51, %v7530_v16  ;;  %4121 = vmatpush1.bf16.msra.mxu1 %v6882_v47 }
 0x133   : > { %13160 = vst [vmem:[#allocation6_spill] sm:$0xff] %v7999_v1  ;;  %v8001_v33 = vpop.f32.mrf.mxu1  ;;  %vm1415_vm9 = vcmp.gt.f32.partialorder %v1105_v40, 0.0  ;;  %3461 = vmatmul.mubr.bf16.gmra.mxu1 %v7770_v10  ;;  %v8014_v13 = vpack.c.bf16 %v1919_v3, %v7887_v9  ;;  %v8017_v42 = vmul.f32 0.2, %v7930_v4  ;;  %v1921_v0 = vsel %vm1409_vm6, %v7896_v38, %v1665_v45  ;;  %v6888_v9 = vld [vmem:[%s12841_s3 + $0x268] ss:$16 sps:$4 sm:$0xff]   ;;  %4122 = vmatprep.subr.bf16.mxu1 %v6890_v63 }
 0x134   : > { %13161 = vst [vmem:[#allocation7_spill] sm:$0xff] %v8001_v33  ;;  %v1923_v51 = vsel %vm1411_vm7, %v7900_v18, %v1667_v62  ;;  %v8025_v33 = vpop.f32.mrf.mxu0  ;;  %3770 = vmatpush1.bf16.msra.mxu0 %v6885_v46  ;;  %vm1406_vm11 = vcmp.gt.f32.partialorder %v7926_v57, 0.0  ;;  %v8035_v38 = vmul.f32 0.2, %v7980_v8  ;;  %v8038_v28 = vmul.f32 0.2, %v7984_v49 }
 0x135   : > { %13162 = vst [vmem:[#allocation40_spill] sm:$0xff] %v8014_v13  ;;  %13163 = vst [vmem:[#allocation41_spill] sm:$0xff] %v8025_v33  ;;  %v8027_v31 = vpop.f32.mrf.mxu1  ;;  %v13165_v18 = vld [vmem:[#allocation8_spill] sm:$0xff]  ;;  %v13166_v47 = vld [vmem:[#allocation9_spill] sm:$0xff]  ;;  %v1925_v46 = vsel %vm1413_vm8, %v752_v39, %v1669_v44  ;;  %v1927_v10 = vsel %vm1415_vm9, %v1105_v40, %v1671_v12  ;;  %v8055_v33 = vadd.f32 %v7656_v20, %v7540_v19  ;;  %3771 = vmatprep.subr.bf16.mxu0 %v6893_v17 }
 0x136   : > { %13164 = vst [vmem:[#allocation42_spill] sm:$0xff] %v8027_v31  ;;  %v8042_v3 = vadd.f32 %v13165_v18, %v7547_v21  ;;  %v8046_v45 = vadd.f32 %v13166_v47, %v7564_v29  ;;  %v6891_v62 = vld [vmem:[%s12841_s3 + $0x48] ss:$16 sps:$4 sm:$0xff]   ;;  %v1677_v31 = vmul.f32 0.2, %v762_v61  ;;  %v8057_v18 = vpop.f32.mrf.mxu0  ;;  %vm1404_vm12 = vcmp.gt.f32.partialorder %v7857_v60, 0.0  ;;  %4123 = vmatpush1.bf16.msra.mxu1 %v6888_v9 }
 0x137   : > { %13167 = vst [vmem:[#allocation8_spill] sm:$0xff] %v8057_v18  ;;  %v8059_v1 = vpop.f32.mrf.mxu1  ;;  %v6896_v63 = vld [vmem:[%s12841_s3 + $0x24c] ss:$16 sps:$4 sm:$0xff]   ;;  %vm1408_vm13 = vcmp.gt.f32.partialorder %v7930_v4, 0.0  ;;  %vm1417_vm14 = vcmp.gt.f32.partialorder %v8006_v34, 0.0  ;;  %vm1419_vm15 = vcmp.gt.f32.partialorder %v8010_v11, 0.0  ;;  %v1906_v40 = vsel %vm1394_vm2, %v7788_v53, %v7849_v14 }
 0x138   : > { %13168 = vst [vmem:[#allocation9_spill] sm:$0xff] %v8059_v1  ;;  %v6899_v39 = vld [vmem:[%s12841_s3 + $0x2c] ss:$16 sps:$4 sm:$0xff]   ;;  %v1673_v20 = vmul.f32 0.2, %v8006_v34  ;;  %vm1421_vm0 = vcmp.gt.f32.partialorder %v762_v61, 0.0  ;;  %v1910_v17 = vsel %vm1398_vm4, %v7806_v6, %v7871_v22  ;;  %v1908_v44 = vsel %vm1396_vm3, %v7792_v41, %v7864_v48  ;;  %v8088_v47 = vpop.f32.mrf.mxu0  ;;  %3772 = vmatpush1.bf16.msra.mxu0 %v6891_v62  ;;  %4124 = vmatprep.subr.bf16.mxu1 %v6896_v63 }
 0x139   : > { %v1912_v12 = vsel %vm1400_vm5, %v7810_v25, %v7883_v5  ;;  %v8090_v1 = vpop.f32.mrf.mxu1  ;;  %v1675_v53 = vmul.f32 0.2, %v8010_v11  ;;  %v13170_v14 = vld [vmem:[#allocation12_spill] sm:$0xff]  ;;  %v8097_v22 = vpack.c.bf16 %v1910_v17, %v1906_v40  ;;  %v8107_v48 = vpack.c.bf16 %v1925_v46, %v1921_v0  ;;  %v13174_v5 = vld [vmem:[#allocation13_spill] sm:$0xff]  ;;  %3773 = vmatprep.subr.bf16.mxu0 %v6899_v39 }
 0x13a   : > { %13169 = vst [vmem:[#allocation43_spill] sm:$0xff] %v8090_v1  ;;  %v8095_v6 = vadd.f32 %v13170_v14, %v7547_v21  ;;  %v8099_v18 = vpack.c.bf16 %v1912_v12, %v1908_v44  ;;  %v6894_v41 = vld [vmem:[%s12841_s3 + $0x248] ss:$16 sps:$4 sm:$0xff]   ;;  %v8111_v9 = vadd.f32 %v13174_v5, %v7564_v29  ;;  %v1933_v40 = vsel %vm1421_vm0, %v762_v61, %v1677_v31  ;;  %v8115_v44 = vpop.f32.mrf.mxu0  ;;  %v6902_v12 = vld [vmem:[%s12841_s3 + $0x22c] ss:$16 sps:$4 sm:$0xff]  }
 0x13b   : > { %13171 = vst [vmem:[#allocation12_spill] sm:$0xff] %v8097_v22  ;;  %v6897_v25 = vld [vmem:[%s12841_s3 + $0x28] ss:$16 sps:$4 sm:$0xff]   ;;  %13173 = vst [vmem:[#allocation45_spill] sm:$0xff] %v8107_v48  ;;  %v1679_v17 = vmul.f32 0.2, %v8055_v33  ;;  %v8117_v62 = vpop.f32.mrf.mxu1  ;;  %v8128_v61 = vadd.f32 %v7686_v30, %v7530_v16  ;;  %v8132_v31 = vadd.f32 %v7689_v27, %v7540_v19  ;;  %v772_v46 = vadd.f32 %v7724_v7, %v7530_v16 }
 0x13c   : > { %13172 = vst [vmem:[#allocation44_spill] sm:$0xff] %v8099_v18  ;;  %v6905_v0 = vld [vmem:[%s12841_s3 + $0xc] ss:$16 sps:$4 sm:$0xff]   ;;  %vm1423_vm2 = vcmp.gt.f32.partialorder %v8055_v33, 0.0  ;;  %3117 = vmatprep.mubr.bf16.mxu0 %v8097_v22  ;;  %3470 = vmatprep.mubr.bf16.mxu1 %v8099_v18  ;;  %v8138_v63 = vpack.c.bf16 %v1927_v10, %v1923_v51  ;;  %vm1414_vm3 = vcmp.gt.f32.partialorder %v8042_v3, 0.0  ;;  %v1929_v27 = vsel %vm1417_vm14, %v8006_v34, %v1673_v20  ;;  %v8152_v7 = vpop.f32.mrf.mxu0  ;;  %v13178_v34 = vld [vmem:[#allocation21_spill] sm:$0xff] }
 0x13d   : > { %v8142_v39 = vmul.f32 0.2, %v8042_v3  ;;  %v8145_v30 = vmul.f32 0.2, %v8046_v45  ;;  %3118 = vmatmul.mubr.bf16.gmra.mxu0 %v7866_v54  ;;  %3471 = vmatmul.mubr.bf16.gmra.mxu1 %v7868_v58  ;;  %13176 = vst [vmem:[#allocation46_spill] sm:$0xff] %v8152_v7  ;;  %v8154_v10 = vpop.f32.mrf.mxu1  ;;  %v1931_v51 = vsel %vm1419_vm15, %v8010_v11, %v1675_v53  ;;  %v8164_v5 = vadd.f32 %v7671_v52, %v7547_v21  ;;  %v13184_v7 = vld [vmem:[#allocation19_spill] sm:$0xff] }
 0x13e   : > { %13175 = vst [vmem:[#allocation13_spill] sm:$0xff] %v8138_v63  ;;  %13177 = vst [vmem:[#allocation47_spill] sm:$0xff] %v8154_v10  ;;  %v8160_v14 = vmul.f32 0.2, %v8095_v6  ;;  %v8168_v20 = vadd.f32 %v13178_v34, %v7540_v19  ;;  %4125 = vmatpush1.bf16.msra.mxu1 %v6894_v41  ;;  %3774 = vmatpush1.bf16.msra.mxu0 %v6897_v25  ;;  %v6900_v58 = vld [vmem:[%s12841_s3 + $0x228] ss:$16 sps:$4 sm:$0xff]   ;;  %v8180_v52 = vpack.c.bf16 %v1933_v40, %v1929_v27  ;;  %v8189_v54 = vpop.f32.mrf.mxu0 }
 0x13f   : > { %v6903_v11 = vld [vmem:[%s12841_s3 + $0x8] ss:$16 sps:$4 sm:$0xff]   ;;  %vm1410_vm4 = vcmp.gt.f32.partialorder %v7980_v8, 0.0  ;;  %v8178_v53 = vmul.f32 0.2, %v8111_v9  ;;  %v1935_v41 = vsel %vm1423_vm2, %v8055_v33, %v1679_v17  ;;  %v8191_v18 = vpop.f32.mrf.mxu1  ;;  %4126 = vmatprep.subr.bf16.mxu1 %v6902_v12  ;;  %3775 = vmatprep.subr.bf16.mxu0 %v6905_v0  ;;  %vm1425_vm5 = vcmp.gt.f32.partialorder %v8128_v61, 0.0 }
 0x140   : > { %13179 = vst [vmem:[#allocation21_spill] sm:$0xff] %v8180_v52  ;;  %v13180_v25 = vld [vmem:[#allocation14_spill] sm:$0xff]  ;;  %v1681_v40 = vmul.f32 0.2, %v8128_v61  ;;  %vm1427_vm1 = vcmp.gt.f32.partialorder %v8132_v31, 0.0  ;;  %vm1412_vm6 = vcmp.gt.f32.partialorder %v7984_v49, 0.0  ;;  %v1914_v12 = vsel %vm1402_vm10, %v7853_v15, %v7918_v35  ;;  %v8210_v27 = vpop.f32.mrf.mxu0 }
 0x141   : > { %v8187_v34 = vadd.f32 %v13180_v25, %v7564_v29  ;;  %13181 = vst [vmem:[#allocation14_spill] sm:$0xff] %v8191_v18  ;;  %v6908_v22 = vld [vmem:[%s12841_s3 + $0x20c] ss:$16 sps:$4 sm:$0xff]   ;;  %v1685_v33 = vmul.f32 0.2, %v772_v46  ;;  %vm1416_vm7 = vcmp.gt.f32.partialorder %v8046_v45, 0.0  ;;  %v1918_v0 = vsel %vm1406_vm11, %v7926_v57, %v7994_v50  ;;  %v8212_v25 = vpop.f32.mrf.mxu1 }
 0x142   : > { %v1683_v17 = vmul.f32 0.2, %v8132_v31  ;;  %vm1429_vm8 = vcmp.gt.f32.partialorder %v772_v46, 0.0  ;;  %13182 = vst [vmem:[#allocation48_spill] sm:$0xff] %v8210_v27  ;;  %13183 = vst [vmem:[#allocation49_spill] sm:$0xff] %v8212_v25  ;;  %v8219_v18 = vadd.f32 %v13184_v7, %v7547_v21  ;;  %v13185_v1 = vld [vmem:[#allocation20_spill] sm:$0xff]  ;;  %v8226_v35 = vpack.c.bf16 %v1918_v0, %v1914_v12  ;;  %4127 = vmatpush1.bf16.msra.mxu1 %v6900_v58 }
 0x143   : > { %v6911_v10 = vld [vmem:[%s12841_s3 + $0x1ec] ss:$16 sps:$4 sm:$0xff]   ;;  %v8223_v15 = vadd.f32 %v13185_v1, %v7564_v29  ;;  %vm1431_vm9 = vcmp.gt.f32.partialorder %v8168_v20, 0.0  ;;  %3776 = vmatpush1.bf16.msra.mxu0 %v6903_v11  ;;  %v6906_v57 = vld [vmem:[%s12841_s3 + $0x208] ss:$16 sps:$4 sm:$0xff]   ;;  %v13187_v25 = vld [vmem:[#allocation23_spill] sm:$0xff]  ;;  %v1916_v1 = vsel %vm1404_vm12, %v7857_v60, %v7921_v36  ;;  %v1920_v58 = vsel %vm1408_vm13, %v7930_v4, %v8017_v42  ;;  %v8244_v11 = vpop.f32.mrf.mxu0  ;;  %v8246_v12 = vpop.f32.mrf.mxu1  ;;  %4128 = vmatprep.subr.bf16.mxu1 %v6908_v22 }
 0x144   : > { %13186 = vst [vmem:[#allocation19_spill] sm:$0xff] %v8226_v35  ;;  %v1687_v50 = vmul.f32 0.2, %v8168_v20  ;;  %v8234_v7 = vadd.f32 %v13187_v25, %v7547_v21  ;;  %v1941_v0 = vsel %vm1429_vm8, %v772_v46, %v1685_v33  ;;  %v8251_v25 = vadd.f32 %v7772_v59, %v7530_v16  ;;  %3127 = vmatprep.mubr.bf16.mxu0 %v8226_v35  ;;  %v6909_v36 = vld [vmem:[%s12841_s3 + $0x1e8] ss:$16 sps:$4 sm:$0xff]  }
 0x145   : > { %v782_v27 = vadd.f32 %v7824_v37, %v7530_v16  ;;  %v8256_v60 = vpack.c.bf16 %v1920_v58, %v1916_v1  ;;  %v8261_v4 = vpack.c.bf16 %v1935_v41, %v1931_v51  ;;  %v8264_v42 = vmul.f32 0.2, %v8164_v5  ;;  %3128 = vmatmul.mubr.bf16.gmra.mxu0 %v7944_v26  ;;  %v8273_v22 = vpop.f32.mrf.mxu0  ;;  %v8275_v46 = vpop.f32.mrf.mxu1  ;;  %3777 = vmatprep.subr.bf16.mxu0 %v6911_v10  ;;  %v6914_v51 = vld [vmem:[%s12841_s3 + $0x3ec] ss:$16 sps:$4 sm:$0xff]   ;;  %v6912_v10 = vld [vmem:[%s12841_s3 + $0x3e8] ss:$16 sps:$4 sm:$0xff]  }
 0x146   : > { %v8268_v59 = vadd.f32 %v7774_v56, %v7540_v19  ;;  %v1135_v37 = vadd.f32 %v7826_v2, %v7540_v19  ;;  %13190 = vst [vmem:[#allocation50_spill] sm:$0xff] %v8273_v22  ;;  %13191 = vst [vmem:[#allocation51_spill] sm:$0xff] %v8275_v46  ;;  %vm1422_vm10 = vcmp.gt.f32.partialorder %v8164_v5, 0.0  ;;  %v8282_v41 = vmul.f32 0.2, %v8187_v34  ;;  %4129 = vmatpush1.bf16.msra.mxu1 %v6906_v57  ;;  %v13198_v35 = vld [vmem:[#allocation28_spill] sm:$0xff] }
 0x147   : > { %13188 = vst [vmem:[#allocation20_spill] sm:$0xff] %v8256_v60  ;;  %13189 = vst [vmem:[#allocation23_spill] sm:$0xff] %v8261_v4  ;;  %v1937_v56 = vsel %vm1425_vm5, %v8128_v61, %v1681_v40  ;;  %v1939_v2 = vsel %vm1427_vm1, %v8132_v31, %v1683_v17  ;;  %v8291_v33 = vmul.f32 0.2, %v8219_v18  ;;  %3480 = vmatprep.mubr.bf16.mxu1 %v8256_v60  ;;  %v8298_v1 = vmul.f32 0.2, %v8223_v15  ;;  %v8310_v17 = vpop.f32.mrf.mxu0  ;;  %v8312_v57 = vpop.f32.mrf.mxu1 }
 0x148   : > { %v8300_v58 = vpack.c.bf16 %v1941_v0, %v1937_v56  ;;  %v1943_v61 = vsel %vm1431_vm9, %v8168_v20, %v1687_v50  ;;  %v13193_v31 = vld [vmem:[#allocation24_spill] sm:$0xff]  ;;  %3481 = vmatmul.mubr.bf16.gmra.mxu1 %v8014_v13  ;;  %vm1418_vm11 = vcmp.gt.f32.partialorder %v8095_v6, 0.0  ;;  %v8316_v26 = vmul.f32 0.2, %v8234_v7  ;;  %3778 = vmatpush2.bf16.msra.mxu0 %v6909_v36 }
 0x149   : > { %v8307_v40 = vadd.f32 %v13193_v31, %v7564_v29  ;;  %13194 = vst [vmem:[#allocation24_spill] sm:$0xff] %v8312_v57  ;;  %vm1433_vm12 = vcmp.gt.f32.partialorder %v8251_v25, 0.0  ;;  %v1693_v0 = vmul.f32 0.2, %v782_v27  ;;  %v1926_v20 = vsel %vm1414_vm3, %v8042_v3, %v8142_v39  ;;  %v8325_v31 = vpop.f32.mrf.mxu0  ;;  %v8327_v13 = vpop.f32.mrf.mxu1  ;;  %4130 = vmatprep.subr.bf16.mxu1 %v6914_v51  ;;  %v13197_v3 = vld [vmem:[#allocation27_spill] sm:$0xff] }
 0x14a   : > { %13192 = vst [vmem:[#allocation52_spill] sm:$0xff] %v8300_v58  ;;  %v1689_v50 = vmul.f32 0.2, %v8251_v25  ;;  %vm1435_vm13 = vcmp.gt.f32.partialorder %v8268_v59, 0.0  ;;  %vm1437_vm14 = vcmp.gt.f32.partialorder %v782_v27, 0.0  ;;  %13195 = vst [vmem:[#allocation53_spill] sm:$0xff] %v8325_v31  ;;  %v8334_v39 = vadd.f32 %v13197_v3, %v7547_v21  ;;  %4131 = vmatpush2.bf16.msra.mxu1 %v6912_v10 }
 0x14b   : > { %v1695_v56 = vmul.f32 0.2, %v1135_v37  ;;  %13196 = vst [vmem:[#allocation54_spill] sm:$0xff] %v8327_v13  ;;  %vm1420_vm15 = vcmp.gt.f32.partialorder %v8111_v9, 0.0  ;;  %vm1424_vm0 = vcmp.gt.f32.partialorder %v8187_v34, 0.0  ;;  %vm1439_vm2 = vcmp.gt.f32.partialorder %v1135_v37, 0.0  ;;  %v8352_v22 = vpop.f32.mrf.mxu0  ;;  %v8354_v57 = vpop.f32.mrf.mxu1 }
 0x14c   : > { %v1691_v60 = vmul.f32 0.2, %v8268_v59  ;;  %v1922_v36 = vsel %vm1410_vm4, %v7980_v8, %v8035_v38  ;;  %v8342_v51 = vadd.f32 %v13198_v35, %v7564_v29  ;;  %v13199_v13 = vld [vmem:[#allocation30_spill] sm:$0xff]  ;;  %v788_v46 = vadd.f32 %v7873_v23, %v7530_v16  ;;  %v13201_v35 = vld [vmem:[#allocation31_spill] sm:$0xff] }
 0x14d   : > { %v8346_v31 = vadd.f32 %v13199_v13, %v7547_v21  ;;  %v8350_v3 = vpack.c.bf16 %v1926_v20, %v1922_v36  ;;  %v6915_v8 = vld [vmem:[%s12841_s3 + $0x1c8] ss:$16 sps:$4 sm:$0xff]   ;;  %v1949_v38 = vsel %vm1437_vm14, %v782_v27, %v1693_v0  ;;  %v8362_v10 = vadd.f32 %v13201_v35, %v7564_v29  ;;  %v6917_v20 = vld [vmem:[%s12841_s3 + $0x1cc] ss:$16 sps:$4 sm:$0xff]  }
 0x14e   : > { %v1924_v23 = vsel %vm1412_vm6, %v7984_v49, %v8038_v28  ;;  %v1928_v13 = vsel %vm1416_vm7, %v8046_v45, %v8145_v30  ;;  %v1951_v36 = vsel %vm1439_vm2, %v1135_v37, %v1695_v56  ;;  %v792_v27 = vadd.f32 %v7940_v43, %v7530_v16  ;;  %v8382_v49 = vpop.f32.mrf.mxu0  ;;  %v8384_v28 = vpop.f32.mrf.mxu1  ;;  %v6920_v45 = vld [vmem:[%s12841_s3 + $0x3cc] ss:$16 sps:$4 sm:$0xff]   ;;  %3779 = vmatprep.subr.bf16.mxu0 %v6917_v20 }
 0x14f   : > { %13200 = vst [vmem:[#allocation27_spill] sm:$0xff] %v8350_v3  ;;  %v1145_v0 = vadd.f32 %v7942_v32, %v7540_v19  ;;  %3137 = vmatprep.mubr.bf16.mxu0 %v8350_v3  ;;  %v8380_v35 = vpack.c.bf16 %v1928_v13, %v1924_v23  ;;  %13203 = vst [vmem:[#allocation30_spill] sm:$0xff] %v8382_v49  ;;  %v8389_v30 = vpack.c.bf16 %v1943_v61, %v1939_v2  ;;  %v13206_v32 = vld [vmem:[#allocation34_spill] sm:$0xff] }
 0x150   : > { %13204 = vst [vmem:[#allocation31_spill] sm:$0xff] %v8384_v28  ;;  %v8392_v37 = vmul.f32 0.2, %v8307_v40  ;;  %v1945_v43 = vsel %vm1433_vm12, %v8251_v25, %v1689_v50  ;;  %v1141_v56 = vadd.f32 %v13206_v32, %v7540_v19  ;;  %3138 = vmatmul.mubr.bf16.gmra.mxu0 %v8107_v48  ;;  %v6918_v23 = vld [vmem:[%s12841_s3 + $0x3c8] ss:$16 sps:$4 sm:$0xff]   ;;  %vm1430_vm3 = vcmp.gt.f32.partialorder %v8234_v7, 0.0  ;;  %v8414_v13 = vpop.f32.mrf.mxu0  ;;  %v8416_v20 = vpop.f32.mrf.mxu1  ;;  %4132 = vmatprep.subr.bf16.mxu1 %v6920_v45 }
 0x151   : > { %13202 = vst [vmem:[#allocation28_spill] sm:$0xff] %v8380_v35  ;;  %13205 = vst [vmem:[#allocation55_spill] sm:$0xff] %v8389_v30  ;;  %v1947_v2 = vsel %vm1435_vm13, %v8268_v59, %v1691_v60  ;;  %v8408_v61 = vmul.f32 0.2, %v8334_v39  ;;  %v8411_v25 = vmul.f32 0.2, %v8342_v51  ;;  %3490 = vmatprep.mubr.bf16.mxu1 %v8380_v35  ;;  %3780 = vmatpush2.bf16.msra.mxu0 %v6915_v8 }
 0x152   : > { %v1697_v50 = vmul.f32 0.2, %v788_v46  ;;  %v8418_v32 = vpack.c.bf16 %v1949_v38, %v1945_v43  ;;  %v8420_v48 = vpack.c.bf16 %v1951_v36, %v1947_v2  ;;  %v8423_v60 = vmul.f32 0.2, %v8346_v31  ;;  %3491 = vmatmul.mubr.bf16.gmra.mxu1 %v8138_v63  ;;  %v8434_v38 = vpop.f32.mrf.mxu0  ;;  %v8436_v36 = vpop.f32.mrf.mxu1 }
 0x153   : > { %vm1441_vm4 = vcmp.gt.f32.partialorder %v788_v46, 0.0  ;;  %vm1426_vm5 = vcmp.gt.f32.partialorder %v8219_v18, 0.0  ;;  %v8428_v59 = vmul.f32 0.2, %v8362_v10  ;;  %v1701_v35 = vmul.f32 0.2, %v792_v27  ;;  %4133 = vmatpush2.bf16.msra.mxu1 %v6918_v23 }
 0x154   : > { %13207 = vst [vmem:[#allocation34_spill] sm:$0xff] %v8418_v32  ;;  %13208 = vst [vmem:[#allocation56_spill] sm:$0xff] %v8420_v48  ;;  %v1703_v3 = vmul.f32 0.2, %v1145_v0  ;;  %v1934_v8 = vsel %vm1422_vm10, %v8164_v5, %v8264_v42  ;;  %vm1443_vm1 = vcmp.gt.f32.partialorder %v1141_v56, 0.0  ;;  %vm1445_vm6 = vcmp.gt.f32.partialorder %v792_v27, 0.0  ;;  %v8453_v45 = vpop.f32.mrf.mxu0  ;;  %v8455_v23 = vpop.f32.mrf.mxu1 }
 0x155   : > { %13209 = vst [vmem:[#allocation57_spill] sm:$0xff] %v8434_v38  ;;  %13210 = vst [vmem:[#allocation58_spill] sm:$0xff] %v8436_v36  ;;  %v1699_v43 = vmul.f32 0.2, %v1141_v56  ;;  %vm1447_vm7 = vcmp.gt.f32.partialorder %v1145_v0, 0.0  ;;  %vm1428_vm8 = vcmp.gt.f32.partialorder %v8223_v15, 0.0  ;;  %v1953_v2 = vsel %vm1441_vm4, %v788_v46, %v1697_v50 }
 0x156   : > { %vm1432_vm9 = vcmp.gt.f32.partialorder %v8307_v40, 0.0  ;;  %v8443_v63 = vadd.f32 %v7906_v24, %v7547_v21  ;;  %v8447_v5 = vadd.f32 %v7908_v55, %v7564_v29  ;;  %v1930_v42 = vsel %vm1418_vm11, %v8095_v6, %v8160_v14  ;;  %13211 = vst [vmem:[#allocation59_spill] sm:$0xff] %v8455_v23  ;;  %v13212_v36 = vld [vmem:[#allocation38_spill] sm:$0xff]  ;;  %v13213_v24 = vld [vmem:[#allocation39_spill] sm:$0xff]  ;;  %v8481_v23 = vpop.f32.mrf.mxu1 }
 0x157   : > { %v8459_v46 = vadd.f32 %v13212_v36, %v7547_v21  ;;  %v8463_v50 = vadd.f32 %v13213_v24, %v7564_v29  ;;  %v13214_v55 = vld [vmem:[#allocation6_spill] sm:$0xff]  ;;  %v8469_v28 = vpack.c.bf16 %v1934_v8, %v1930_v42  ;;  %v1957_v49 = vsel %vm1445_vm6, %v792_v27, %v1701_v35  ;;  %v8479_v24 = vpop.f32.mrf.mxu0  ;;  %v13218_v8 = vld [vmem:[#allocation7_spill] sm:$0xff] }
 0x158   : > { %v8467_v38 = vadd.f32 %v13214_v55, %v7530_v16  ;;  %v1959_v6 = vsel %vm1447_vm7, %v1145_v0, %v1703_v3  ;;  %v1932_v14 = vsel %vm1420_vm15, %v8111_v9, %v8178_v53  ;;  %v1936_v36 = vsel %vm1424_vm0, %v8187_v34, %v8282_v41  ;;  %13216 = vst [vmem:[#allocation39_spill] sm:$0xff] %v8479_v24  ;;  %v13219_v3 = vld [vmem:[#allocation8_spill] sm:$0xff]  ;;  %v13221_v41 = vld [vmem:[#allocation41_spill] sm:$0xff]  ;;  %v13233_v24 = vld [vmem:[#allocation43_spill] sm:$0xff] }
 0x159   : > { %13215 = vst [vmem:[#allocation38_spill] sm:$0xff] %v8469_v28  ;;  %13217 = vst [vmem:[#allocation6_spill] sm:$0xff] %v8481_v23  ;;  %v1955_v55 = vsel %vm1443_vm1, %v1141_v56, %v1699_v43  ;;  %v8486_v27 = vadd.f32 %v13218_v8, %v7540_v19  ;;  %v802_v0 = vadd.f32 %v13219_v3, %v7530_v16  ;;  %3147 = vmatprep.mubr.bf16.mxu0 %v8469_v28  ;;  %v13222_v56 = vld [vmem:[#allocation9_spill] sm:$0xff]  ;;  %v8506_v42 = vpop.f32.mrf.mxu0  ;;  %v8508_v8 = vpop.f32.mrf.mxu1 }
 0x15a   : > { %v8491_v9 = vpack.c.bf16 %v1936_v36, %v1932_v14  ;;  %v8494_v53 = vmul.f32 0.2, %v8443_v63  ;;  %v8497_v34 = vmul.f32 0.2, %v8447_v5  ;;  %v8501_v35 = vadd.f32 %v13221_v41, %v7547_v21  ;;  %3148 = vmatmul.mubr.bf16.gmra.mxu0 %v8180_v52  ;;  %13223 = vst [vmem:[#allocation8_spill] sm:$0xff] %v8508_v8  ;;  %v13226_v52 = vld [vmem:[#allocation42_spill] sm:$0xff] }
 0x15b   : > { %v1155_v43 = vadd.f32 %v13222_v56, %v7540_v19  ;;  %vm1438_vm10 = vcmp.gt.f32.partialorder %v8346_v31, 0.0  ;;  %v8511_v14 = vpack.c.bf16 %v1957_v49, %v1953_v2  ;;  %v8513_v36 = vpack.c.bf16 %v1959_v6, %v1955_v55  ;;  %v8533_v2 = vpop.f32.mrf.mxu0  ;;  %v8535_v6 = vpop.f32.mrf.mxu1 }
 0x15c   : > { %13220 = vst [vmem:[#allocation7_spill] sm:$0xff] %v8491_v9  ;;  %v8516_v3 = vmul.f32 0.2, %v8459_v46  ;;  %v8519_v41 = vmul.f32 0.2, %v8463_v50  ;;  %3500 = vmatprep.mubr.bf16.mxu1 %v8491_v9  ;;  %vm1449_vm11 = vcmp.gt.f32.partialorder %v8467_v38, 0.0  ;;  %v8526_v28 = vadd.f32 %v13226_v52, %v7564_v29 }
 0x15d   : > { %13224 = vst [vmem:[#allocation41_spill] sm:$0xff] %v8511_v14  ;;  %13225 = vst [vmem:[#allocation9_spill] sm:$0xff] %v8513_v36  ;;  %v1705_v56 = vmul.f32 0.2, %v8467_v38  ;;  %v8530_v49 = vadd.f32 %v8088_v47, %v7547_v21  ;;  %3501 = vmatmul.mubr.bf16.gmra.mxu1 %v8261_v4  ;;  %vm1434_vm12 = vcmp.gt.f32.partialorder %v8334_v39, 0.0  ;;  %vm1451_vm13 = vcmp.gt.f32.partialorder %v8486_v27, 0.0  ;;  %v8551_v23 = vpop.f32.mrf.mxu1 }
 0x15e   : > { %13227 = vst [vmem:[#allocation42_spill] sm:$0xff] %v8533_v2  ;;  %13228 = vst [vmem:[#allocation60_spill] sm:$0xff] %v8535_v6  ;;  %v1707_v55 = vmul.f32 0.2, %v8486_v27  ;;  %v1709_v9 = vmul.f32 0.2, %v802_v0  ;;  %v1942_v52 = vsel %vm1430_vm3, %v8234_v7, %v8316_v26  ;;  %v808_v6 = vadd.f32 %v8115_v44, %v7530_v16  ;;  %v8549_v2 = vpop.f32.mrf.mxu0 }
 0x15f   : > { %v8545_v47 = vmul.f32 0.2, %v8501_v35  ;;  %vm1453_vm14 = vcmp.gt.f32.partialorder %v802_v0, 0.0  ;;  %v1711_v4 = vmul.f32 0.2, %v1155_v43  ;;  %13230 = vst [vmem:[#allocation62_spill] sm:$0xff] %v8549_v2  ;;  %v1161_v26 = vadd.f32 %v8117_v62, %v7540_v19 }
 0x160   : > { %13231 = vst [vmem:[#allocation63_spill] sm:$0xff] %v8551_v23  ;;  %vm1436_vm15 = vcmp.gt.f32.partialorder %v8342_v51, 0.0  ;;  %vm1440_vm0 = vcmp.gt.f32.partialorder %v8362_v10, 0.0  ;;  %vm1455_vm2 = vcmp.gt.f32.partialorder %v1155_v43, 0.0  ;;  %v812_v7 = vadd.f32 %v8189_v54, %v7530_v16  ;;  %v8575_v62 = vpop.f32.mrf.mxu0  ;;  %v8577_v54 = vpop.f32.mrf.mxu1 }
 0x161   : > { %13229 = vst [vmem:[#allocation61_spill] sm:$0xff] %v8545_v47  ;;  %v1938_v44 = vsel %vm1426_vm5, %v8219_v18, %v8291_v33  ;;  %v8564_v2 = vmul.f32 0.2, %v8526_v28  ;;  %v8567_v23 = vmul.f32 0.2, %v8530_v49  ;;  %v8571_v47 = vadd.f32 %v13233_v24, %v7564_v29  ;;  %13235 = vst [vmem:[#allocation65_spill] sm:$0xff] %v8575_v62 }
 0x162   : > { %v8573_v8 = vpack.c.bf16 %v1942_v52, %v1938_v44  ;;  %13236 = vst [vmem:[#allocation66_spill] sm:$0xff] %v8577_v54  ;;  %v6921_v18 = vld [vmem:[%s12841_s3 + $0x1a8] ss:$16 sps:$4 sm:$0xff]   ;;  %v1965_v33 = vsel %vm1453_vm14, %v802_v0, %v1709_v9  ;;  %v1940_v24 = vsel %vm1428_vm8, %v8223_v15, %v8298_v1  ;;  %v1944_v52 = vsel %vm1432_vm9, %v8307_v40, %v8392_v37  ;;  %v6923_v44 = vld [vmem:[%s12841_s3 + $0x1ac] ss:$16 sps:$4 sm:$0xff]   ;;  %v8602_v15 = vpop.f32.mrf.mxu1 }
 0x163   : > { %13232 = vst [vmem:[#allocation64_spill] sm:$0xff] %v8564_v2  ;;  %v13237_v2 = vld [vmem:[#allocation14_spill] sm:$0xff]  ;;  %v1967_v54 = vsel %vm1455_vm2, %v1155_v43, %v1711_v4  ;;  %vm1457_vm3 = vcmp.gt.f32.partialorder %v808_v6, 0.0  ;;  %v1713_v0 = vmul.f32 0.2, %v808_v6  ;;  %v8598_v9 = vpack.c.bf16 %v1944_v52, %v1940_v24  ;;  %3781 = vmatprep.subr.bf16.mxu0 %v6923_v44 }
 0x164   : > { %13234 = vst [vmem:[#allocation43_spill] sm:$0xff] %v8573_v8  ;;  %v1165_v36 = vadd.f32 %v13237_v2, %v7540_v19  ;;  %3157 = vmatprep.mubr.bf16.mxu0 %v8573_v8  ;;  %v8600_v2 = vpop.f32.mrf.mxu0  ;;  %v6926_v1 = vld [vmem:[%s12841_s3 + $0x3ac] ss:$16 sps:$4 sm:$0xff]   ;;  %v1961_v40 = vsel %vm1449_vm11, %v8467_v38, %v1705_v56  ;;  %v1963_v4 = vsel %vm1451_vm13, %v8486_v27, %v1707_v55  ;;  %v1715_v37 = vmul.f32 0.2, %v1161_v26  ;;  %v13240_v38 = vld [vmem:[#allocation47_spill] sm:$0xff]  ;;  %v8629_v55 = vpop.f32.mrf.mxu1 }
 0x165   : > { %13238 = vst [vmem:[#allocation14_spill] sm:$0xff] %v8598_v9  ;;  %v1717_v43 = vmul.f32 0.2, %v812_v7  ;;  %3158 = vmatmul.mubr.bf16.gmra.mxu0 %v8300_v58  ;;  %v6924_v24 = vld [vmem:[%s12841_s3 + $0x3a8] ss:$16 sps:$4 sm:$0xff]   ;;  %vm1446_vm4 = vcmp.gt.f32.partialorder %v8459_v46, 0.0  ;;  %v8624_v56 = vadd.f32 %v13240_v38, %v7564_v29  ;;  %3510 = vmatprep.mubr.bf16.mxu1 %v8598_v9  ;;  %v8631_v44 = vpack.c.bf16 %v1965_v33, %v1961_v40 }
 0x166   : > { %vm1459_vm5 = vcmp.gt.f32.partialorder %v1161_v26, 0.0  ;;  %v13239_v52 = vld [vmem:[#allocation46_spill] sm:$0xff]  ;;  %vm1461_vm1 = vcmp.gt.f32.partialorder %v812_v7, 0.0  ;;  %v8627_v27 = vpop.f32.mrf.mxu0  ;;  %3782 = vmatpush2.bf16.msra.mxu0 %v6921_v18  ;;  %v8633_v58 = vpack.c.bf16 %v1967_v54, %v1963_v4  ;;  %v8636_v62 = vmul.f32 0.2, %v8571_v47  ;;  %3511 = vmatmul.mubr.bf16.gmra.mxu1 %v8389_v30  ;;  %v8649_v33 = vpop.f32.mrf.mxu1 }
 0x167   : > { %v8620_v8 = vadd.f32 %v13239_v52, %v7547_v21  ;;  %13241 = vst [vmem:[#allocation46_spill] sm:$0xff] %v8631_v44  ;;  %v1719_v52 = vmul.f32 0.2, %v1165_v36  ;;  %vm1442_vm6 = vcmp.gt.f32.partialorder %v8443_v63, 0.0  ;;  %v1969_v38 = vsel %vm1457_vm3, %v808_v6, %v1713_v0  ;;  %13243 = vst [vmem:[#allocation67_spill] sm:$0xff] %v8649_v33  ;;  %4134 = vmatprep.subr.bf16.mxu1 %v6926_v1 }
 0x168   : > { %13242 = vst [vmem:[#allocation47_spill] sm:$0xff] %v8633_v58  ;;  %vm1463_vm7 = vcmp.gt.f32.partialorder %v1165_v36, 0.0  ;;  %v818_v9 = vadd.f32 %v8244_v11, %v7530_v16  ;;  %v1950_v54 = vsel %vm1438_vm10, %v8346_v31, %v8423_v60  ;;  %v8647_v18 = vpop.f32.mrf.mxu0  ;;  %v1971_v40 = vsel %vm1459_vm5, %v1161_v26, %v1715_v37  ;;  %4135 = vmatpush2.bf16.msra.mxu1 %v6924_v24  ;;  %v13244_v26 = vld [vmem:[#allocation48_spill] sm:$0xff]  ;;  %v8675_v0 = vpop.f32.mrf.mxu1  ;;  %v13245_v37 = vld [vmem:[#allocation49_spill] sm:$0xff] }
 0x169   : > { %v1973_v4 = vsel %vm1461_vm1, %v812_v7, %v1717_v43  ;;  %v1171_v6 = vadd.f32 %v8246_v12, %v7540_v19  ;;  %v822_v11 = vadd.f32 %v8310_v17, %v7530_v16  ;;  %vm1444_vm8 = vcmp.gt.f32.partialorder %v8447_v5, 0.0  ;;  %v13246_v24 = vld [vmem:[#allocation24_spill] sm:$0xff] }
 0x16a   : > { %vm1448_vm9 = vcmp.gt.f32.partialorder %v8463_v50, 0.0  ;;  %v8660_v31 = vmul.f32 0.2, %v8620_v8  ;;  %v8663_v60 = vmul.f32 0.2, %v8624_v56  ;;  %v8667_v7 = vadd.f32 %v13244_v26, %v7547_v21  ;;  %v8673_v17 = vpop.f32.mrf.mxu0 }
 0x16b   : > { %v1946_v12 = vsel %vm1434_vm12, %v8334_v39, %v8408_v61  ;;  %v1975_v1 = vsel %vm1463_vm7, %v1165_v36, %v1719_v52  ;;  %v8680_v43 = vadd.f32 %v13245_v37, %v7564_v29  ;;  %v1175_v30 = vadd.f32 %v13246_v24, %v7540_v19  ;;  %v8698_v52 = vpop.f32.mrf.mxu1 }
 0x16c   : > { %v8684_v26 = vpack.c.bf16 %v1950_v54, %v1946_v12  ;;  %v8686_v33 = vpack.c.bf16 %v1973_v4, %v1969_v38  ;;  %vm1465_vm10 = vcmp.gt.f32.partialorder %v818_v9, 0.0  ;;  %v1948_v39 = vsel %vm1436_vm15, %v8342_v51, %v8411_v25  ;;  %v8696_v36 = vpop.f32.mrf.mxu0  ;;  %v13250_v4 = vld [vmem:[#allocation50_spill] sm:$0xff]  ;;  %v13251_v25 = vld [vmem:[#allocation51_spill] sm:$0xff] }
 0x16d   : > { %v1952_v61 = vsel %vm1440_vm0, %v8362_v10, %v8428_v59  ;;  %v1721_v37 = vmul.f32 0.2, %v818_v9  ;;  %v1723_v54 = vmul.f32 0.2, %v1171_v6  ;;  %v1725_v12 = vmul.f32 0.2, %v822_v11  ;;  %v8714_v59 = vpop.f32.mrf.mxu1 }
 0x16e   : > { %13247 = vst [vmem:[#allocation48_spill] sm:$0xff] %v8684_v26  ;;  %13248 = vst [vmem:[#allocation49_spill] sm:$0xff] %v8686_v33  ;;  %3167 = vmatprep.mubr.bf16.mxu0 %v8684_v26  ;;  %v8701_v38 = vpack.c.bf16 %v1952_v61, %v1948_v39  ;;  %vm1467_vm11 = vcmp.gt.f32.partialorder %v1171_v6, 0.0  ;;  %v8705_v51 = vadd.f32 %v13250_v4, %v7547_v21  ;;  %vm1469_vm12 = vcmp.gt.f32.partialorder %v822_v11, 0.0  ;;  %v8712_v10 = vpop.f32.mrf.mxu0 }
 0x16f   : > { %v8709_v24 = vadd.f32 %v13251_v25, %v7564_v29  ;;  %3168 = vmatmul.mubr.bf16.gmra.mxu0 %v8418_v32  ;;  %13252 = vst [vmem:[#allocation50_spill] sm:$0xff] %v8712_v10  ;;  %13253 = vst [vmem:[#allocation51_spill] sm:$0xff] %v8714_v59  ;;  %vm1454_vm13 = vcmp.gt.f32.partialorder %v8530_v49, 0.0  ;;  %v8717_v39 = vpack.c.bf16 %v1975_v1, %v1971_v40  ;;  %v8720_v61 = vmul.f32 0.2, %v8667_v7  ;;  %v8737_v59 = vpop.f32.mrf.mxu1 }
 0x170   : > { %13249 = vst [vmem:[#allocation24_spill] sm:$0xff] %v8701_v38  ;;  %v1727_v4 = vmul.f32 0.2, %v1175_v30  ;;  %v8724_v26 = vadd.f32 %v8352_v22, %v7530_v16  ;;  %3520 = vmatprep.mubr.bf16.mxu1 %v8701_v38  ;;  %v8728_v25 = vmul.f32 0.2, %v8680_v43  ;;  %vm1471_vm14 = vcmp.gt.f32.partialorder %v1175_v30, 0.0  ;;  %v8735_v1 = vpop.f32.mrf.mxu0 }
 0x171   : > { %13254 = vst [vmem:[#allocation68_spill] sm:$0xff] %v8717_v39  ;;  %v1181_v32 = vadd.f32 %v8354_v57, %v7540_v19  ;;  %v832_v40 = vadd.f32 %v8414_v13, %v7530_v16  ;;  %3521 = vmatmul.mubr.bf16.gmra.mxu1 %v8420_v48  ;;  %13255 = vst [vmem:[#allocation69_spill] sm:$0xff] %v8735_v1  ;;  %vm1450_vm15 = vcmp.gt.f32.partialorder %v8501_v35, 0.0  ;;  %v8748_v13 = vmul.f32 0.2, %v8705_v51 }
 0x172   : > { %13256 = vst [vmem:[#allocation70_spill] sm:$0xff] %v8737_v59  ;;  %v1977_v22 = vsel %vm1465_vm10, %v818_v9, %v1721_v37  ;;  %v1979_v38 = vsel %vm1467_vm11, %v1171_v6, %v1723_v54  ;;  %v1981_v10 = vsel %vm1469_vm12, %v822_v11, %v1725_v12  ;;  %v1958_v57 = vsel %vm1446_vm4, %v8459_v46, %v8516_v3  ;;  %v13259_v59 = vld [vmem:[#allocation53_spill] sm:$0xff]  ;;  %v13260_v9 = vld [vmem:[#allocation54_spill] sm:$0xff]  ;;  %v8761_v11 = vpop.f32.mrf.mxu0  ;;  %v8763_v37 = vpop.f32.mrf.mxu1 }
 0x173   : > { %13257 = vst [vmem:[#allocation71_spill] sm:$0xff] %v8748_v13  ;;  %v8751_v48 = vmul.f32 0.2, %v8709_v24  ;;  %v8755_v1 = vadd.f32 %v13259_v59, %v7547_v21  ;;  %v8759_v6 = vadd.f32 %v13260_v9, %v7564_v29  ;;  %13261 = vst [vmem:[#allocation53_spill] sm:$0xff] %v8761_v11  ;;  %vm1452_vm0 = vcmp.gt.f32.partialorder %v8526_v28, 0.0 }
 0x174   : > { %13262 = vst [vmem:[#allocation54_spill] sm:$0xff] %v8763_v37  ;;  %vm1456_vm2 = vcmp.gt.f32.partialorder %v8571_v47, 0.0  ;;  %v1983_v46 = vsel %vm1471_vm14, %v1175_v30, %v1727_v4  ;;  %v1729_v3 = vmul.f32 0.2, %v8724_v26  ;;  %v1185_v54 = vadd.f32 %v8416_v20, %v7540_v19  ;;  %v8781_v13 = vpop.f32.mrf.mxu1  ;;  %v6927_v30 = vld [vmem:[%s12841_s3 + $0x188] ss:$16 sps:$4 sm:$0xff]  }
 0x175   : > { %13258 = vst [vmem:[#allocation72_spill] sm:$0xff] %v8751_v48  ;;  %v1954_v12 = vsel %vm1442_vm6, %v8443_v63, %v8494_v53  ;;  %v8775_v59 = vpack.c.bf16 %v1981_v10, %v1977_v22  ;;  %v1731_v9 = vmul.f32 0.2, %v1181_v32  ;;  %v1733_v37 = vmul.f32 0.2, %v832_v40  ;;  %v8779_v48 = vpop.f32.mrf.mxu0  ;;  %v13265_v20 = vld [vmem:[#allocation30_spill] sm:$0xff] }
 0x176   : > { %v8777_v11 = vpack.c.bf16 %v1958_v57, %v1954_v12  ;;  %v8788_v4 = vadd.f32 %v13265_v20, %v7547_v21  ;;  %vm1477_vm3 = vcmp.gt.f32.partialorder %v832_v40, 0.0  ;;  %v1956_v63 = vsel %vm1444_vm8, %v8447_v5, %v8497_v34  ;;  %v6929_v10 = vld [vmem:[%s12841_s3 + $0x18c] ss:$16 sps:$4 sm:$0xff]   ;;  %v13266_v22 = vld [vmem:[#allocation31_spill] sm:$0xff]  ;;  %v8811_v34 = vpop.f32.mrf.mxu1 }
 0x177   : > { %13263 = vst [vmem:[#allocation73_spill] sm:$0xff] %v8775_v59  ;;  %v1960_v53 = vsel %vm1448_vm9, %v8463_v50, %v8519_v41  ;;  %vm1473_vm4 = vcmp.gt.f32.partialorder %v8724_v26, 0.0  ;;  %vm1475_vm5 = vcmp.gt.f32.partialorder %v1181_v32, 0.0  ;;  %v8804_v57 = vadd.f32 %v13266_v22, %v7564_v29  ;;  %v8809_v5 = vpop.f32.mrf.mxu0  ;;  %13269 = vst [vmem:[#allocation75_spill] sm:$0xff] %v8811_v34  ;;  %v6932_v50 = vld [vmem:[%s12841_s3 + $0x38c] ss:$16 sps:$4 sm:$0xff]   ;;  %3783 = vmatprep.subr.bf16.mxu0 %v6929_v10 }
 0x178   : > { %13264 = vst [vmem:[#allocation74_spill] sm:$0xff] %v8777_v11  ;;  %3177 = vmatprep.mubr.bf16.mxu0 %v8777_v11  ;;  %v8807_v12 = vpack.c.bf16 %v1960_v53, %v1956_v63  ;;  %13268 = vst [vmem:[#allocation31_spill] sm:$0xff] %v8809_v5  ;;  %v8816_v41 = vpack.c.bf16 %v1983_v46, %v1979_v38  ;;  %v8819_v20 = vmul.f32 0.2, %v8755_v1  ;;  %v1735_v59 = vmul.f32 0.2, %v1185_v54  ;;  %v8837_v10 = vpop.f32.mrf.mxu1 }
 0x179   : > { %v842_v22 = vadd.f32 %v8506_v42, %v7530_v16  ;;  %3178 = vmatmul.mubr.bf16.gmra.mxu0 %v8511_v14  ;;  %v6930_v63 = vld [vmem:[%s12841_s3 + $0x388] ss:$16 sps:$4 sm:$0xff]   ;;  %vm1462_vm1 = vcmp.gt.f32.partialorder %v8667_v7, 0.0  ;;  %v8829_v53 = vmul.f32 0.2, %v8759_v6  ;;  %v1989_v38 = vsel %vm1477_vm3, %v832_v40, %v1733_v37  ;;  %v8835_v42 = vpop.f32.mrf.mxu0  ;;  %13272 = vst [vmem:[#allocation78_spill] sm:$0xff] %v8837_v10  ;;  %4136 = vmatprep.subr.bf16.mxu1 %v6932_v50 }
 0x17a   : > { %13267 = vst [vmem:[#allocation30_spill] sm:$0xff] %v8807_v12  ;;  %13270 = vst [vmem:[#allocation76_spill] sm:$0xff] %v8816_v41  ;;  %vm1479_vm6 = vcmp.gt.f32.partialorder %v1185_v54, 0.0  ;;  %v838_v46 = vadd.f32 %v8453_v45, %v7530_v16  ;;  %3530 = vmatprep.mubr.bf16.mxu1 %v8807_v12  ;;  %3784 = vmatpush2.bf16.msra.mxu0 %v6927_v30  ;;  %v1985_v14 = vsel %vm1473_vm4, %v8724_v26, %v1729_v3  ;;  %v13274_v40 = vld [vmem:[#allocation59_spill] sm:$0xff]  ;;  %v13275_v45 = vld [vmem:[#allocation9_spill] sm:$0xff] }
 0x17b   : > { %13271 = vst [vmem:[#allocation77_spill] sm:$0xff] %v8835_v42  ;;  %v1987_v11 = vsel %vm1475_vm5, %v1181_v32, %v1731_v9  ;;  %v8844_v34 = vmul.f32 0.2, %v8788_v4  ;;  %v1191_v37 = vadd.f32 %v13274_v40, %v7540_v19  ;;  %3531 = vmatmul.mubr.bf16.gmra.mxu1 %v13275_v45  ;;  %vm1458_vm7 = vcmp.gt.f32.partialorder %v8620_v8, 0.0  ;;  %v13277_v30 = vld [vmem:[#allocation57_spill] sm:$0xff]  ;;  %v13278_v26 = vld [vmem:[#allocation8_spill] sm:$0xff]  ;;  %v8863_v9 = vpop.f32.mrf.mxu0  ;;  %v8865_v40 = vpop.f32.mrf.mxu1 }
 0x17c   : > { %v8851_v12 = vmul.f32 0.2, %v8804_v57  ;;  %v8855_v10 = vadd.f32 %v13277_v30, %v7547_v21  ;;  %v1195_v32 = vadd.f32 %v13278_v26, %v7540_v19  ;;  %v1966_v3 = vsel %vm1454_vm13, %v8530_v49, %v8567_v23  ;;  %13279 = vst [vmem:[#allocation57_spill] sm:$0xff] %v8863_v9  ;;  %13280 = vst [vmem:[#allocation8_spill] sm:$0xff] %v8865_v40  ;;  %v13282_v30 = vld [vmem:[#allocation58_spill] sm:$0xff]  ;;  %v13283_v49 = vld [vmem:[#allocation61_spill] sm:$0xff] }
 0x17d   : > { %13273 = vst [vmem:[#allocation79_spill] sm:$0xff] %v8844_v34  ;;  %v8867_v45 = vpack.c.bf16 %v1989_v38, %v1985_v14  ;;  %v8872_v34 = vadd.f32 %v13282_v30, %v7564_v29  ;;  %v1741_v5 = vmul.f32 0.2, %v842_v22  ;;  %4137 = vmatpush2.bf16.msra.mxu1 %v6930_v63  ;;  %vm1460_vm8 = vcmp.gt.f32.partialorder %v8624_v56, 0.0  ;;  %v8880_v50 = vpop.f32.mrf.mxu0  ;;  %v13286_v63 = vld [vmem:[#allocation39_spill] sm:$0xff]  ;;  %v13288_v30 = vld [vmem:[#allocation6_spill] sm:$0xff] }
 0x17e   : > { %13276 = vst [vmem:[#allocation59_spill] sm:$0xff] %v8851_v12  ;;  %v1991_v12 = vsel %vm1479_vm6, %v1185_v54, %v1735_v59  ;;  %vm1464_vm9 = vcmp.gt.f32.partialorder %v8680_v43, 0.0  ;;  %vm1481_vm10 = vcmp.gt.f32.partialorder %v838_v46, 0.0  ;;  %v1737_v23 = vmul.f32 0.2, %v838_v46  ;;  %13284 = vst [vmem:[#allocation58_spill] sm:$0xff] %v8880_v50  ;;  %v8882_v54 = vpop.f32.mrf.mxu1 }
 0x17f   : > { %13281 = vst [vmem:[#allocation80_spill] sm:$0xff] %v8867_v45  ;;  %vm1485_vm11 = vcmp.gt.f32.partialorder %v842_v22, 0.0  ;;  %v1962_v14 = vsel %vm1450_vm15, %v8501_v35, %v13283_v49  ;;  %13285 = vst [vmem:[#allocation61_spill] sm:$0xff] %v8882_v54  ;;  %vm1483_vm12 = vcmp.gt.f32.partialorder %v1191_v37, 0.0  ;;  %v1739_v59 = vmul.f32 0.2, %v1191_v37  ;;  %v8902_v54 = vpop.f32.mrf.mxu0 }
 0x180   : > { %v8886_v38 = vadd.f32 %v13286_v63, %v7547_v21  ;;  %v8888_v26 = vpack.c.bf16 %v1966_v3, %v1962_v14  ;;  %v8892_v40 = vadd.f32 %v13288_v30, %v7564_v29  ;;  %v1743_v9 = vmul.f32 0.2, %v1195_v32  ;;  %v13289_v45 = vld [vmem:[#allocation64_spill] sm:$0xff]  ;;  %13290 = vst [vmem:[#allocation6_spill] sm:$0xff] %v8902_v54  ;;  %v8904_v63 = vpop.f32.mrf.mxu1  ;;  %v13292_v14 = vld [vmem:[#allocation42_spill] sm:$0xff] }
 0x181   : > { %v1964_v35 = vsel %vm1452_vm0, %v8526_v28, %v13289_v45  ;;  %v1968_v49 = vsel %vm1456_vm2, %v8571_v47, %v8636_v62  ;;  %13291 = vst [vmem:[#allocation64_spill] sm:$0xff] %v8904_v63  ;;  %v1997_v3 = vsel %vm1485_vm11, %v842_v22, %v1741_v5  ;;  %vm1487_vm13 = vcmp.gt.f32.partialorder %v1195_v32, 0.0  ;;  %v13295_v45 = vld [vmem:[#allocation60_spill] sm:$0xff]  ;;  %v13296_v47 = vld [vmem:[#allocation62_spill] sm:$0xff]  ;;  %v13297_v5 = vld [vmem:[#allocation63_spill] sm:$0xff] }
 0x182   : > { %13287 = vst [vmem:[#allocation39_spill] sm:$0xff] %v8888_v26  ;;  %v8908_v30 = vadd.f32 %v13292_v14, %v7547_v21  ;;  %3187 = vmatprep.mubr.bf16.mxu0 %v8888_v26  ;;  %v8911_v50 = vpack.c.bf16 %v1968_v49, %v1964_v35  ;;  %v8913_v28 = vpack.c.bf16 %v1991_v12, %v1987_v11  ;;  %v8928_v14 = vpop.f32.mrf.mxu0  ;;  %v8930_v35 = vpop.f32.mrf.mxu1  ;;  %vm1470_vm14 = vcmp.gt.f32.partialorder %v8755_v1, 0.0 }
 0x183   : > { %v8917_v42 = vadd.f32 %v13295_v45, %v7564_v29  ;;  %v8921_v62 = vadd.f32 %v13296_v47, %v7530_v16  ;;  %v8925_v22 = vadd.f32 %v13297_v5, %v7540_v19  ;;  %3188 = vmatmul.mubr.bf16.gmra.mxu0 %v8631_v44  ;;  %v8934_v11 = vmul.f32 0.2, %v8855_v10 }
 0x184   : > { %13293 = vst [vmem:[#allocation42_spill] sm:$0xff] %v8911_v50  ;;  %13294 = vst [vmem:[#allocation81_spill] sm:$0xff] %v8913_v28  ;;  %v8937_v12 = vmul.f32 0.2, %v8872_v34  ;;  %v1993_v49 = vsel %vm1481_vm10, %v838_v46, %v1737_v23  ;;  %v1995_v45 = vsel %vm1483_vm12, %v1191_v37, %v1739_v59  ;;  %3540 = vmatprep.mubr.bf16.mxu1 %v8911_v50  ;;  %v8943_v47 = vmul.f32 0.2, %v8886_v38  ;;  %v8952_v63 = vpop.f32.mrf.mxu0  ;;  %v8954_v54 = vpop.f32.mrf.mxu1 }
 0x185   : > { %v8946_v5 = vmul.f32 0.2, %v8892_v40  ;;  %v8948_v44 = vpack.c.bf16 %v1997_v3, %v1993_v49  ;;  %v1999_v26 = vsel %vm1487_vm13, %v1195_v32, %v1743_v9  ;;  %3541 = vmatmul.mubr.bf16.gmra.mxu1 %v8633_v58  ;;  %13300 = vst [vmem:[#allocation63_spill] sm:$0xff] %v8952_v63  ;;  %13301 = vst [vmem:[#allocation82_spill] sm:$0xff] %v8954_v54  ;;  %vm1466_vm15 = vcmp.gt.f32.partialorder %v8705_v51, 0.0  ;;  %v13304_v49 = vld [vmem:[#allocation66_spill] sm:$0xff] }
 0x186   : > { %v8958_v46 = vmul.f32 0.2, %v8908_v30  ;;  %v852_v37 = vadd.f32 %v8600_v2, %v7530_v16  ;;  %v1205_v23 = vadd.f32 %v8602_v15, %v7540_v19  ;;  %v1974_v32 = vsel %vm1462_vm1, %v8667_v7, %v8720_v61  ;;  %v8974_v3 = vpop.f32.mrf.mxu0  ;;  %v8976_v2 = vpop.f32.mrf.mxu1  ;;  %v13303_v7 = vld [vmem:[#allocation65_spill] sm:$0xff] }
 0x187   : > { %13298 = vst [vmem:[#allocation60_spill] sm:$0xff] %v8946_v5  ;;  %13299 = vst [vmem:[#allocation62_spill] sm:$0xff] %v8948_v44  ;;  %v8969_v9 = vmul.f32 0.2, %v8917_v42  ;;  %vm1489_vm0 = vcmp.gt.f32.partialorder %v8921_v62, 0.0  ;;  %vm1491_vm2 = vcmp.gt.f32.partialorder %v8925_v22, 0.0  ;;  %v8983_v61 = vadd.f32 %v13303_v7, %v7547_v21 }
 0x188   : > { %v1745_v59 = vmul.f32 0.2, %v8921_v62  ;;  %vm1468_vm3 = vcmp.gt.f32.partialorder %v8709_v24, 0.0  ;;  %vm1472_vm4 = vcmp.gt.f32.partialorder %v8759_v6, 0.0  ;;  %v1747_v15 = vmul.f32 0.2, %v8925_v22 }
 0x189   : > { %13302 = vst [vmem:[#allocation83_spill] sm:$0xff] %v8969_v9  ;;  %v8987_v58 = vadd.f32 %v13304_v49, %v7564_v29  ;;  %v1970_v50 = vsel %vm1458_vm7, %v8620_v8, %v8660_v31  ;;  %v8995_v54 = vadd.f32 %v8627_v27, %v7547_v21  ;;  %v8999_v44 = vadd.f32 %v8629_v55, %v7564_v29  ;;  %v9007_v49 = vpop.f32.mrf.mxu0  ;;  %v9009_v9 = vpop.f32.mrf.mxu1 }
 0x18a   : > { %v9003_v7 = vadd.f32 %v8647_v18, %v7530_v16  ;;  %v9005_v63 = vpack.c.bf16 %v1974_v32, %v1970_v50  ;;  %13306 = vst [vmem:[#allocation66_spill] sm:$0xff] %v9007_v49  ;;  %13307 = vst [vmem:[#allocation84_spill] sm:$0xff] %v9009_v9  ;;  %v1749_v5 = vmul.f32 0.2, %v852_v37  ;;  %v1751_v8 = vmul.f32 0.2, %v1205_v23 }
 0x18b   : > { %v1972_v27 = vsel %vm1460_vm8, %v8624_v56, %v8663_v60  ;;  %v1976_v55 = vsel %vm1464_vm9, %v8680_v43, %v8728_v25  ;;  %vm1493_vm5 = vcmp.gt.f32.partialorder %v852_v37, 0.0  ;;  %vm1495_vm1 = vcmp.gt.f32.partialorder %v1205_v23, 0.0  ;;  %v13308_v18 = vld [vmem:[#allocation67_spill] sm:$0xff]  ;;  %v9026_v32 = vpop.f32.mrf.mxu0  ;;  %v9028_v9 = vpop.f32.mrf.mxu1  ;;  %v13324_v49 = vld [vmem:[#allocation69_spill] sm:$0xff] }
 0x18c   : > { %13305 = vst [vmem:[#allocation65_spill] sm:$0xff] %v9005_v63  ;;  %v9021_v31 = vadd.f32 %v13308_v18, %v7540_v19  ;;  %3197 = vmatprep.mubr.bf16.mxu0 %v9005_v63  ;;  %v9024_v50 = vpack.c.bf16 %v1976_v55, %v1972_v27  ;;  %13310 = vst [vmem:[#allocation85_spill] sm:$0xff] %v9028_v9  ;;  %v9031_v56 = vmul.f32 0.2, %v8983_v61  ;;  %v9034_v60 = vmul.f32 0.2, %v8987_v58 }
 0x18d   : > { %v862_v43 = vadd.f32 %v8696_v36, %v7530_v16  ;;  %v1215_v25 = vadd.f32 %v8698_v52, %v7540_v19  ;;  %3198 = vmatmul.mubr.bf16.gmra.mxu0 %v8686_v33  ;;  %vm1478_vm6 = vcmp.gt.f32.partialorder %v8855_v10, 0.0  ;;  %v9042_v27 = vpack.c.bf16 %v1999_v26, %v1995_v45  ;;  %v9052_v36 = vpop.f32.mrf.mxu0  ;;  %v9054_v63 = vpop.f32.mrf.mxu1 }
 0x18e   : > { %13309 = vst [vmem:[#allocation67_spill] sm:$0xff] %v9024_v50  ;;  %13311 = vst [vmem:[#allocation86_spill] sm:$0xff] %v9031_v56  ;;  %v9045_v55 = vmul.f32 0.2, %v8995_v54  ;;  %v9048_v18 = vmul.f32 0.2, %v8999_v44  ;;  %3550 = vmatprep.mubr.bf16.mxu1 %v9024_v50  ;;  %v2001_v52 = vsel %vm1489_vm0, %v8921_v62, %v1745_v59  ;;  %v2003_v26 = vsel %vm1491_vm2, %v8925_v22, %v1747_v15 }
 0x18f   : > { %13312 = vst [vmem:[#allocation87_spill] sm:$0xff] %v9034_v60  ;;  %13313 = vst [vmem:[#allocation88_spill] sm:$0xff] %v9042_v27  ;;  %vm1497_vm7 = vcmp.gt.f32.partialorder %v9003_v7, 0.0  ;;  %v2005_v45 = vsel %vm1493_vm5, %v852_v37, %v1749_v5  ;;  %v2007_v33 = vsel %vm1495_vm1, %v1205_v23, %v1751_v8  ;;  %3551 = vmatmul.mubr.bf16.gmra.mxu1 %v8717_v39  ;;  %v6933_v50 = vld [vmem:[%s12841_s3 + $0x168] ss:$16 sps:$4 sm:$0xff]   ;;  %vm1474_vm8 = vcmp.gt.f32.partialorder %v8788_v4, 0.0  ;;  %v9085_v59 = vpop.f32.mrf.mxu0  ;;  %v9087_v15 = vpop.f32.mrf.mxu1 }
 0x190   : > { %13314 = vst [vmem:[#allocation89_spill] sm:$0xff] %v9048_v18  ;;  %13315 = vst [vmem:[#allocation90_spill] sm:$0xff] %v9052_v36  ;;  %v6936_v62 = vld [vmem:[%s12841_s3 + $0x368] ss:$16 sps:$4 sm:$0xff]   ;;  %v1753_v22 = vmul.f32 0.2, %v9003_v7  ;;  %v9079_v37 = vadd.f32 %v8673_v17, %v7547_v21  ;;  %v1982_v23 = vsel %vm1470_vm14, %v8755_v1, %v8819_v20  ;;  %v9094_v39 = vadd.f32 %v8675_v0, %v7564_v29 }
 0x191   : > { %13316 = vst [vmem:[#allocation91_spill] sm:$0xff] %v9054_v63  ;;  %v6935_v63 = vld [vmem:[%s12841_s3 + $0x16c] ss:$16 sps:$4 sm:$0xff]   ;;  %v1755_v5 = vmul.f32 0.2, %v9021_v31  ;;  %13317 = vst [vmem:[#allocation92_spill] sm:$0xff] %v9085_v59  ;;  %v9116_v59 = vadd.f32 %v13324_v49, %v7530_v16 }
 0x192   : > { %13318 = vst [vmem:[#allocation93_spill] sm:$0xff] %v9087_v15  ;;  %v6938_v8 = vld [vmem:[%s12841_s3 + $0x36c] ss:$16 sps:$4 sm:$0xff]   ;;  %vm1501_vm9 = vcmp.gt.f32.partialorder %v862_v43, 0.0  ;;  %v1757_v17 = vmul.f32 0.2, %v862_v43  ;;  %3785 = vmatprep.subr.bf16.mxu0 %v6935_v63  ;;  %v9110_v15 = vpop.f32.mrf.mxu0  ;;  %v9112_v63 = vpop.f32.mrf.mxu1 }
 0x193   : > { %v1759_v36 = vmul.f32 0.2, %v1215_v25  ;;  %vm1476_vm10 = vcmp.gt.f32.partialorder %v8804_v57, 0.0  ;;  %vm1480_vm11 = vcmp.gt.f32.partialorder %v8872_v34, 0.0  ;;  %vm1503_vm12 = vcmp.gt.f32.partialorder %v1215_v25, 0.0  ;;  %v13319_v1 = vld [vmem:[#allocation50_spill] sm:$0xff]  ;;  %3786 = vmatpush2.bf16.msra.mxu0 %v6933_v50  ;;  %4138 = vmatprep.subr.bf16.mxu1 %v6938_v8 }
 0x194   : > { %v9100_v20 = vadd.f32 %v13319_v1, %v7547_v21  ;;  %v13320_v18 = vld [vmem:[#allocation51_spill] sm:$0xff]  ;;  %13322 = vst [vmem:[#allocation50_spill] sm:$0xff] %v9110_v15  ;;  %v872_v1 = vadd.f32 %v8779_v48, %v7530_v16  ;;  %4139 = vmatpush2.bf16.msra.mxu1 %v6936_v62  ;;  %vm1499_vm13 = vcmp.gt.f32.partialorder %v9021_v31, 0.0  ;;  %v13326_v50 = vld [vmem:[#allocation72_spill] sm:$0xff]  ;;  %v1984_v48 = vsel %vm1472_vm4, %v8759_v6, %v8829_v53  ;;  %v13331_v8 = vld [vmem:[#allocation70_spill] sm:$0xff] }
 0x195   : > { %v9104_v60 = vadd.f32 %v13320_v18, %v7564_v29  ;;  %v13321_v56 = vld [vmem:[#allocation71_spill] sm:$0xff]  ;;  %13323 = vst [vmem:[#allocation51_spill] sm:$0xff] %v9112_v63  ;;  %v1225_v18 = vadd.f32 %v8781_v13, %v7540_v19  ;;  %v1980_v49 = vsel %vm1468_vm3, %v8709_v24, %v13326_v50  ;;  %v9136_v13 = vpop.f32.mrf.mxu0  ;;  %v9141_v62 = vmul.f32 0.2, %v9079_v37  ;;  %v13332_v50 = vld [vmem:[#allocation73_spill] sm:$0xff] }
 0x196   : > { %v1978_v0 = vsel %vm1466_vm15, %v8705_v51, %v13321_v56  ;;  %v2009_v51 = vsel %vm1497_vm7, %v9003_v7, %v1753_v22  ;;  %v9138_v56 = vpop.f32.mrf.mxu1  ;;  %v2013_v7 = vsel %vm1501_vm9, %v862_v43, %v1757_v17  ;;  %v2015_v22 = vsel %vm1503_vm12, %v1215_v25, %v1759_v36 }
 0x197   : > { %v9122_v9 = vpack.c.bf16 %v1982_v23, %v1978_v0  ;;  %13327 = vst [vmem:[#allocation69_spill] sm:$0xff] %v9141_v62  ;;  %v9146_v23 = vpack.c.bf16 %v1984_v48, %v1980_v49  ;;  %v9149_v24 = vmul.f32 0.2, %v9094_v39  ;;  %v9152_v6 = vmul.f32 0.2, %v9100_v20  ;;  %v9160_v43 = vpop.f32.mrf.mxu0 }
 0x198   : > { %v9155_v53 = vmul.f32 0.2, %v9104_v60  ;;  %v1221_v0 = vadd.f32 %v13331_v8, %v7540_v19  ;;  %13333 = vst [vmem:[#allocation70_spill] sm:$0xff] %v9160_v43  ;;  %v9162_v25 = vpop.f32.mrf.mxu1  ;;  %vm1486_vm14 = vcmp.gt.f32.partialorder %v8908_v30, 0.0  ;;  %v2011_v36 = vsel %vm1499_vm13, %v9021_v31, %v1755_v5  ;;  %v6939_v31 = vld [vmem:[%s12841_s3 + $0x148] ss:$16 sps:$4 sm:$0xff]  }
 0x199   : > { %13325 = vst [vmem:[#allocation71_spill] sm:$0xff] %v9122_v9  ;;  %3207 = vmatprep.mubr.bf16.mxu0 %v9122_v9  ;;  %13328 = vst [vmem:[#allocation72_spill] sm:$0xff] %v9146_v23  ;;  %vm1505_vm15 = vcmp.gt.f32.partialorder %v9116_v59, 0.0  ;;  %v1765_v17 = vmul.f32 0.2, %v872_v1  ;;  %3560 = vmatprep.mubr.bf16.mxu1 %v9146_v23  ;;  %v9170_v48 = vpack.c.bf16 %v2005_v45, %v2001_v52  ;;  %vm1482_vm0 = vcmp.gt.f32.partialorder %v8886_v38, 0.0 }
 0x19a   : > { %13329 = vst [vmem:[#allocation94_spill] sm:$0xff] %v9149_v24  ;;  %13330 = vst [vmem:[#allocation95_spill] sm:$0xff] %v9155_v53  ;;  %3208 = vmatmul.mubr.bf16.gmra.mxu0 %v13332_v50  ;;  %v1767_v49 = vmul.f32 0.2, %v1225_v18  ;;  %v9172_v8 = vpack.c.bf16 %v2007_v33, %v2003_v26  ;;  %v9174_v50 = vpack.c.bf16 %v2013_v7, %v2009_v51  ;;  %3561 = vmatmul.mubr.bf16.gmra.mxu1 %v8816_v41  ;;  %v9181_v53 = vpop.f32.mrf.mxu1  ;;  %v6941_v52 = vld [vmem:[%s12841_s3 + $0x14c] ss:$16 sps:$4 sm:$0xff]  }
 0x19b   : > { %13334 = vst [vmem:[#allocation96_spill] sm:$0xff] %v9162_v25  ;;  %13335 = vst [vmem:[#allocation97_spill] sm:$0xff] %v9170_v48  ;;  %v9176_v9 = vpack.c.bf16 %v2015_v22, %v2011_v36  ;;  %v9179_v25 = vpop.f32.mrf.mxu0  ;;  %v6942_v33 = vld [vmem:[%s12841_s3 + $0x348] ss:$16 sps:$4 sm:$0xff]   ;;  %vm1509_vm2 = vcmp.gt.f32.partialorder %v872_v1, 0.0  ;;  %vm1511_vm3 = vcmp.gt.f32.partialorder %v1225_v18, 0.0  ;;  %v1990_v5 = vsel %vm1478_vm6, %v8855_v10, %v8934_v11  ;;  %3787 = vmatprep.subr.bf16.mxu0 %v6941_v52 }
 0x19c   : > { %13336 = vst [vmem:[#allocation98_spill] sm:$0xff] %v9172_v8  ;;  %13337 = vst [vmem:[#allocation99_spill] sm:$0xff] %v9174_v50  ;;  %v13339_v26 = vld [vmem:[#allocation77_spill] sm:$0xff]  ;;  %v6944_v51 = vld [vmem:[%s12841_s3 + $0x34c] ss:$16 sps:$4 sm:$0xff]   ;;  %v9213_v50 = vpop.f32.mrf.mxu1  ;;  %vm1484_vm4 = vcmp.gt.f32.partialorder %v8892_v40, 0.0  ;;  %3788 = vmatpush2.bf16.msra.mxu0 %v6939_v31  ;;  %v2021_v52 = vsel %vm1509_vm2, %v872_v1, %v1765_v17 }
 0x19d   : > { %13338 = vst [vmem:[#allocation100_spill] sm:$0xff] %v9176_v9  ;;  %v878_v45 = vadd.f32 %v13339_v26, %v7530_v16  ;;  %v1761_v7 = vmul.f32 0.2, %v9116_v59  ;;  %v1763_v22 = vmul.f32 0.2, %v1221_v0  ;;  %v13340_v36 = vld [vmem:[#allocation53_spill] sm:$0xff]  ;;  %v9211_v26 = vpop.f32.mrf.mxu0  ;;  %4140 = vmatprep.subr.bf16.mxu1 %v6944_v51 }
 0x19e   : > { %v9205_v41 = vadd.f32 %v13340_v36, %v7547_v21  ;;  %v13341_v23 = vld [vmem:[#allocation54_spill] sm:$0xff]  ;;  %13342 = vst [vmem:[#allocation77_spill] sm:$0xff] %v9211_v26  ;;  %13343 = vst [vmem:[#allocation53_spill] sm:$0xff] %v9213_v50  ;;  %vm1488_vm5 = vcmp.gt.f32.partialorder %v8917_v42, 0.0  ;;  %vm1507_vm1 = vcmp.gt.f32.partialorder %v1221_v0, 0.0  ;;  %v13344_v10 = vld [vmem:[#allocation31_spill] sm:$0xff]  ;;  %v2023_v50 = vsel %vm1511_vm3, %v1225_v18, %v1767_v49  ;;  %4141 = vmatpush2.bf16.msra.mxu1 %v6942_v33 }
 0x19f   : > { %v9209_v9 = vadd.f32 %v13341_v23, %v7564_v29  ;;  %v9219_v11 = vadd.f32 %v13344_v10, %v7547_v21  ;;  %v13345_v36 = vld [vmem:[#allocation78_spill] sm:$0xff]  ;;  %v13346_v43 = vld [vmem:[#allocation79_spill] sm:$0xff]  ;;  %v9235_v63 = vpop.f32.mrf.mxu0  ;;  %v1769_v15 = vmul.f32 0.2, %v878_v45  ;;  %v1992_v18 = vsel %vm1480_vm11, %v8872_v34, %v8937_v12 }
 0x1a0   : > { %v1231_v24 = vadd.f32 %v13345_v36, %v7540_v19  ;;  %v1986_v23 = vsel %vm1474_vm8, %v8788_v4, %v13346_v43  ;;  %v13347_v26 = vld [vmem:[#allocation75_spill] sm:$0xff]  ;;  %v9237_v36 = vpop.f32.mrf.mxu1  ;;  %v13349_v4 = vld [vmem:[#allocation58_spill] sm:$0xff]  ;;  %v2017_v17 = vsel %vm1505_vm15, %v9116_v59, %v1761_v7  ;;  %v2019_v49 = vsel %vm1507_vm1, %v1221_v0, %v1763_v22  ;;  %v13352_v59 = vld [vmem:[#allocation61_spill] sm:$0xff] }
 0x1a1   : > { %v9231_v62 = vadd.f32 %v13347_v26, %v7564_v29  ;;  %v9233_v10 = vpack.c.bf16 %v1990_v5, %v1986_v23  ;;  %v882_v43 = vadd.f32 %v13349_v4, %v7530_v16  ;;  %v13350_v31 = vld [vmem:[#allocation59_spill] sm:$0xff]  ;;  %vm1513_vm6 = vcmp.gt.f32.partialorder %v878_v45, 0.0  ;;  %v9256_v5 = vpop.f32.mrf.mxu0  ;;  %v13353_v0 = vld [vmem:[#allocation80_spill] sm:$0xff]  ;;  %v13356_v23 = vld [vmem:[#allocation57_spill] sm:$0xff] }
 0x1a2   : > { %v1988_v1 = vsel %vm1476_vm10, %v8804_v57, %v13350_v31  ;;  %v9258_v51 = vpop.f32.mrf.mxu1  ;;  %v9261_v57 = vmul.f32 0.2, %v9205_v41  ;;  %v9264_v34 = vmul.f32 0.2, %v9209_v9  ;;  %v1771_v12 = vmul.f32 0.2, %v1231_v24 }
 0x1a3   : > { %13348 = vst [vmem:[#allocation54_spill] sm:$0xff] %v9233_v10  ;;  %3217 = vmatprep.mubr.bf16.mxu0 %v9233_v10  ;;  %v9254_v33 = vpack.c.bf16 %v1992_v18, %v1988_v1  ;;  %v1235_v7 = vadd.f32 %v13352_v59, %v7540_v19  ;;  %vm1494_vm7 = vcmp.gt.f32.partialorder %v8995_v54, 0.0  ;;  %v9270_v22 = vpack.c.bf16 %v2021_v52, %v2017_v17  ;;  %v9279_v31 = vpop.f32.mrf.mxu0  ;;  %v13357_v17 = vld [vmem:[#allocation8_spill] sm:$0xff] }
 0x1a4   : > { %3218 = vmatmul.mubr.bf16.gmra.mxu0 %v13353_v0  ;;  %v9272_v26 = vpack.c.bf16 %v2023_v50, %v2019_v49  ;;  %vm1515_vm8 = vcmp.gt.f32.partialorder %v1231_v24, 0.0  ;;  %v9276_v4 = vadd.f32 %v13356_v23, %v7547_v21  ;;  %v9281_v1 = vpop.f32.mrf.mxu1  ;;  %v9284_v18 = vmul.f32 0.2, %v9219_v11 }
 0x1a5   : > { %13351 = vst [vmem:[#allocation31_spill] sm:$0xff] %v9254_v33  ;;  %13354 = vst [vmem:[#allocation78_spill] sm:$0xff] %v9270_v22  ;;  %3570 = vmatprep.mubr.bf16.mxu1 %v9254_v33  ;;  %v9287_v59 = vmul.f32 0.2, %v9231_v62  ;;  %v2025_v50 = vsel %vm1513_vm6, %v878_v45, %v1769_v15  ;;  %v1773_v52 = vmul.f32 0.2, %v882_v43  ;;  %v9294_v49 = vadd.f32 %v13357_v17, %v7564_v29  ;;  %v9302_v33 = vpop.f32.mrf.mxu0 }
 0x1a6   : > { %13355 = vst [vmem:[#allocation79_spill] sm:$0xff] %v9272_v26  ;;  %3571 = vmatmul.mubr.bf16.gmra.mxu1 %v8913_v28  ;;  %vm1490_vm9 = vcmp.gt.f32.partialorder %v8983_v61, 0.0  ;;  %vm1517_vm10 = vcmp.gt.f32.partialorder %v882_v43, 0.0  ;;  %v888_v23 = vadd.f32 %v8928_v14, %v7530_v16  ;;  %v1998_v0 = vsel %vm1486_vm14, %v8908_v30, %v8958_v46  ;;  %13358 = vst [vmem:[#allocation75_spill] sm:$0xff] %v9302_v33  ;;  %v9304_v15 = vpop.f32.mrf.mxu1  ;;  %v13366_v33 = vld [vmem:[#allocation60_spill] sm:$0xff] }
 0x1a7   : > { %13359 = vst [vmem:[#allocation58_spill] sm:$0xff] %v9304_v15  ;;  %v2027_v45 = vsel %vm1515_vm8, %v1231_v24, %v1771_v12  ;;  %v1775_v28 = vmul.f32 0.2, %v1235_v7  ;;  %v892_v17 = vadd.f32 %v8974_v3, %v7530_v16  ;;  %v1245_v10 = vadd.f32 %v8976_v2, %v7540_v19  ;;  %v9322_v3 = vpop.f32.mrf.mxu0  ;;  %v13363_v12 = vld [vmem:[#allocation6_spill] sm:$0xff] }
 0x1a8   : > { %vm1492_vm11 = vcmp.gt.f32.partialorder %v8987_v58, 0.0  ;;  %vm1496_vm12 = vcmp.gt.f32.partialorder %v8999_v44, 0.0  ;;  %v9314_v14 = vmul.f32 0.2, %v9276_v4  ;;  %vm1519_vm13 = vcmp.gt.f32.partialorder %v1235_v7, 0.0  ;;  %13361 = vst [vmem:[#allocation61_spill] sm:$0xff] %v9322_v3  ;;  %v9324_v24 = vpop.f32.mrf.mxu1 }
 0x1a9   : > { %v1241_v30 = vadd.f32 %v8930_v35, %v7540_v19  ;;  %v1994_v46 = vsel %vm1482_vm0, %v8886_v38, %v8943_v47  ;;  %13362 = vst [vmem:[#allocation57_spill] sm:$0xff] %v9324_v24  ;;  %v2029_v2 = vsel %vm1517_vm10, %v882_v43, %v1773_v52  ;;  %v9329_v26 = vadd.f32 %v13363_v12, %v7547_v21  ;;  %v6945_v38 = vld [vmem:[%s12841_s3 + $0x128] ss:$16 sps:$4 sm:$0xff]   ;;  %v13367_v52 = vld [vmem:[#allocation83_spill] sm:$0xff] }
 0x1aa   : > { %13360 = vst [vmem:[#allocation59_spill] sm:$0xff] %v9314_v14  ;;  %v13364_v14 = vld [vmem:[#allocation64_spill] sm:$0xff]  ;;  %v9335_v35 = vpack.c.bf16 %v1998_v0, %v1994_v46  ;;  %vm1521_vm14 = vcmp.gt.f32.partialorder %v888_v23, 0.0  ;;  %v1777_v47 = vmul.f32 0.2, %v888_v23  ;;  %v1996_v43 = vsel %vm1484_vm4, %v8892_v40, %v13366_v33  ;;  %v9350_v0 = vpop.f32.mrf.mxu1 }
 0x1ab   : > { %v9333_v15 = vadd.f32 %v13364_v14, %v7564_v29  ;;  %v2000_v12 = vsel %vm1488_vm5, %v8917_v42, %v13367_v52  ;;  %v9348_v14 = vpop.f32.mrf.mxu0  ;;  %13369 = vst [vmem:[#allocation64_spill] sm:$0xff] %v9350_v0  ;;  %v6947_v46 = vld [vmem:[%s12841_s3 + $0x12c] ss:$16 sps:$4 sm:$0xff]   ;;  %v2031_v22 = vsel %vm1519_vm13, %v1235_v7, %v1775_v28  ;;  %v1781_v24 = vmul.f32 0.2, %v892_v17  ;;  %v13371_v52 = vld [vmem:[#allocation63_spill] sm:$0xff] }
 0x1ac   : > { %13365 = vst [vmem:[#allocation8_spill] sm:$0xff] %v9335_v35  ;;  %13368 = vst [vmem:[#allocation6_spill] sm:$0xff] %v9348_v14  ;;  %v1783_v3 = vmul.f32 0.2, %v1245_v10  ;;  %3227 = vmatprep.mubr.bf16.mxu0 %v9335_v35  ;;  %v9357_v40 = vpack.c.bf16 %v2000_v12, %v1996_v43  ;;  %v6950_v42 = vld [vmem:[%s12841_s3 + $0x32c] ss:$16 sps:$4 sm:$0xff]   ;;  %v9364_v0 = vadd.f32 %v13371_v52, %v7547_v21  ;;  %v9369_v7 = vpop.f32.mrf.mxu1  ;;  %3789 = vmatprep.subr.bf16.mxu0 %v6947_v46 }
 0x1ad   : > { %v1779_v33 = vmul.f32 0.2, %v1241_v30  ;;  %vm1525_vm15 = vcmp.gt.f32.partialorder %v892_v17, 0.0  ;;  %vm1527_vm0 = vcmp.gt.f32.partialorder %v1245_v10, 0.0  ;;  %v13372_v14 = vld [vmem:[#allocation62_spill] sm:$0xff]  ;;  %v9367_v28 = vpop.f32.mrf.mxu0  ;;  %13374 = vst [vmem:[#allocation63_spill] sm:$0xff] %v9369_v7  ;;  %v9378_v52 = vpack.c.bf16 %v2029_v2, %v2025_v50  ;;  %3790 = vmatpush2.bf16.msra.mxu0 %v6945_v38  ;;  %4142 = vmatprep.subr.bf16.mxu1 %v6950_v42 }
 0x1ae   : > { %13370 = vst [vmem:[#allocation60_spill] sm:$0xff] %v9357_v40  ;;  %3228 = vmatmul.mubr.bf16.gmra.mxu0 %v13372_v14  ;;  %13373 = vst [vmem:[#allocation83_spill] sm:$0xff] %v9367_v28  ;;  %v6948_v43 = vld [vmem:[%s12841_s3 + $0x328] ss:$16 sps:$4 sm:$0xff]   ;;  %vm1502_vm2 = vcmp.gt.f32.partialorder %v9100_v20, 0.0  ;;  %vm1523_vm3 = vcmp.gt.f32.partialorder %v1241_v30, 0.0  ;;  %3580 = vmatprep.mubr.bf16.mxu1 %v9357_v40  ;;  %v9385_v46 = vpack.c.bf16 %v2031_v22, %v2027_v45  ;;  %v9397_v2 = vpop.f32.mrf.mxu1 }
 0x1af   : > { %v9376_v12 = vmul.f32 0.2, %v9294_v49  ;;  %13376 = vst [vmem:[#allocation102_spill] sm:$0xff] %v9378_v52  ;;  %v13377_v35 = vld [vmem:[#allocation82_spill] sm:$0xff]  ;;  %v9388_v7 = vmul.f32 0.2, %v9329_v26  ;;  %3581 = vmatmul.mubr.bf16.gmra.mxu1 %v9042_v27  ;;  %v9395_v50 = vpop.f32.mrf.mxu0  ;;  %v2039_v22 = vsel %vm1527_vm0, %v1245_v10, %v1783_v3  ;;  %v898_v45 = vadd.f32 %v9026_v32, %v7530_v16 }
 0x1b0   : > { %v9382_v14 = vadd.f32 %v13377_v35, %v7564_v29  ;;  %13378 = vst [vmem:[#allocation82_spill] sm:$0xff] %v9385_v46  ;;  %v9391_v28 = vmul.f32 0.2, %v9333_v15  ;;  %vm1498_vm4 = vcmp.gt.f32.partialorder %v9079_v37, 0.0  ;;  %v2037_v35 = vsel %vm1525_vm15, %v892_v17, %v1781_v24  ;;  %v13380_v27 = vld [vmem:[#allocation85_spill] sm:$0xff]  ;;  %v13381_v17 = vld [vmem:[#allocation92_spill] sm:$0xff]  ;;  %v9418_v32 = vpop.f32.mrf.mxu1  ;;  %4143 = vmatpush2.bf16.msra.mxu1 %v6948_v43 }
 0x1b1   : > { %13375 = vst [vmem:[#allocation101_spill] sm:$0xff] %v9376_v12  ;;  %v2033_v12 = vsel %vm1521_vm14, %v888_v23, %v1777_v47  ;;  %v2006_v23 = vsel %vm1494_vm7, %v8995_v54, %v9045_v55  ;;  %v2035_v38 = vsel %vm1523_vm3, %v1241_v30, %v1779_v33  ;;  %v9410_v47 = vmul.f32 0.2, %v9364_v0  ;;  %v9416_v3 = vpop.f32.mrf.mxu0  ;;  %13382 = vst [vmem:[#allocation85_spill] sm:$0xff] %v9418_v32  ;;  %v13384_v55 = vld [vmem:[#allocation66_spill] sm:$0xff]  ;;  %v13393_v32 = vld [vmem:[#allocation87_spill] sm:$0xff] }
 0x1b2   : > { %v1251_v40 = vadd.f32 %v13380_v27, %v7540_v19  ;;  %v902_v10 = vadd.f32 %v13381_v17, %v7530_v16  ;;  %vm1500_vm5 = vcmp.gt.f32.partialorder %v9094_v39, 0.0  ;;  %vm1504_vm1 = vcmp.gt.f32.partialorder %v9104_v60, 0.0  ;;  %v13385_v27 = vld [vmem:[#allocation93_spill] sm:$0xff]  ;;  %v13386_v42 = vld [vmem:[#allocation86_spill] sm:$0xff]  ;;  %v9447_v52 = vpop.f32.mrf.mxu1 }
 0x1b3   : > { %13379 = vst [vmem:[#allocation103_spill] sm:$0xff] %v9410_v47  ;;  %v9423_v54 = vmul.f32 0.2, %v9382_v14  ;;  %v9427_v30 = vadd.f32 %v13384_v55, %v7547_v21  ;;  %v1255_v24 = vadd.f32 %v13385_v27, %v7540_v19  ;;  %v2002_v33 = vsel %vm1490_vm9, %v8983_v61, %v13386_v42  ;;  %v13389_v47 = vld [vmem:[#allocation84_spill] sm:$0xff]  ;;  %v9445_v55 = vpop.f32.mrf.mxu0  ;;  %13392 = vst [vmem:[#allocation104_spill] sm:$0xff] %v9447_v52  ;;  %v13412_v52 = vld [vmem:[#allocation70_spill] sm:$0xff] }
 0x1b4   : > { %v9435_v43 = vpack.c.bf16 %v2037_v35, %v2033_v12  ;;  %v9437_v17 = vpack.c.bf16 %v2039_v22, %v2035_v38  ;;  %v9441_v46 = vadd.f32 %v13389_v47, %v7564_v29  ;;  %13391 = vst [vmem:[#allocation84_spill] sm:$0xff] %v9445_v55  ;;  %vm1529_vm6 = vcmp.gt.f32.partialorder %v898_v45, 0.0  ;;  %v13394_v12 = vld [vmem:[#allocation89_spill] sm:$0xff]  ;;  %v6954_v55 = vld [vmem:[%s12841_s3 + $0x308] ss:$16 sps:$4 sm:$0xff]  }
 0x1b5   : > { %13383 = vst [vmem:[#allocation92_spill] sm:$0xff] %v9423_v54  ;;  %v9443_v54 = vpack.c.bf16 %v2006_v23, %v2002_v33  ;;  %v1785_v27 = vmul.f32 0.2, %v898_v45  ;;  %v2004_v61 = vsel %vm1492_vm11, %v8987_v58, %v13393_v32  ;;  %v2008_v35 = vsel %vm1496_vm12, %v8999_v44, %v13394_v12  ;;  %v13395_v23 = vld [vmem:[#allocation90_spill] sm:$0xff]  ;;  %v9464_v33 = vpop.f32.mrf.mxu0  ;;  %v13397_v58 = vld [vmem:[#allocation91_spill] sm:$0xff] }
 0x1b6   : > { %13387 = vst [vmem:[#allocation66_spill] sm:$0xff] %v9435_v43  ;;  %13388 = vst [vmem:[#allocation93_spill] sm:$0xff] %v9437_v17  ;;  %v1787_v22 = vmul.f32 0.2, %v1251_v40  ;;  %v9459_v38 = vadd.f32 %v13395_v23, %v7547_v21  ;;  %v1789_v47 = vmul.f32 0.2, %v902_v10  ;;  %v9462_v42 = vpack.c.bf16 %v2008_v35, %v2004_v61  ;;  %v9466_v17 = vpop.f32.mrf.mxu1 }
 0x1b7   : > { %13390 = vst [vmem:[#allocation86_spill] sm:$0xff] %v9443_v54  ;;  %3237 = vmatprep.mubr.bf16.mxu0 %v9443_v54  ;;  %vm1531_vm7 = vcmp.gt.f32.partialorder %v1251_v40, 0.0  ;;  %v9470_v32 = vadd.f32 %v13397_v58, %v7564_v29  ;;  %vm1533_vm8 = vcmp.gt.f32.partialorder %v902_v10, 0.0  ;;  %v1791_v44 = vmul.f32 0.2, %v1255_v24  ;;  %v9485_v23 = vpop.f32.mrf.mxu0 }
 0x1b8   : > { %13396 = vst [vmem:[#allocation87_spill] sm:$0xff] %v9462_v42  ;;  %3238 = vmatmul.mubr.bf16.gmra.mxu0 %v9170_v48  ;;  %vm1510_vm9 = vcmp.gt.f32.partialorder %v9219_v11, 0.0  ;;  %vm1535_vm10 = vcmp.gt.f32.partialorder %v1255_v24, 0.0  ;;  %v9476_v61 = vadd.f32 %v9136_v13, %v7530_v16  ;;  %v9480_v12 = vadd.f32 %v9138_v56, %v7540_v19  ;;  %3590 = vmatprep.mubr.bf16.mxu1 %v9462_v42  ;;  %v9487_v58 = vpop.f32.mrf.mxu1 }
 0x1b9   : > { %13398 = vst [vmem:[#allocation89_spill] sm:$0xff] %v9470_v32  ;;  %v912_v35 = vadd.f32 %v9179_v25, %v7530_v16  ;;  %13399 = vst [vmem:[#allocation90_spill] sm:$0xff] %v9485_v23  ;;  %v9490_v48 = vmul.f32 0.2, %v9427_v30  ;;  %v9493_v54 = vmul.f32 0.2, %v9441_v46  ;;  %v2041_v13 = vsel %vm1529_vm6, %v898_v45, %v1785_v27  ;;  %3591 = vmatmul.mubr.bf16.gmra.mxu1 %v9172_v8  ;;  %v9509_v45 = vpop.f32.mrf.mxu0 }
 0x1ba   : > { %13400 = vst [vmem:[#allocation91_spill] sm:$0xff] %v9487_v58  ;;  %v1265_v56 = vadd.f32 %v9181_v53, %v7540_v19  ;;  %vm1506_vm11 = vcmp.gt.f32.partialorder %v9205_v41, 0.0  ;;  %v2043_v25 = vsel %vm1531_vm7, %v1251_v40, %v1787_v22  ;;  %v9502_v42 = vmul.f32 0.2, %v9459_v38  ;;  %13403 = vst [vmem:[#allocation107_spill] sm:$0xff] %v9509_v45  ;;  %v9511_v27 = vpop.f32.mrf.mxu1 }
 0x1bb   : > { %13401 = vst [vmem:[#allocation105_spill] sm:$0xff] %v9493_v54  ;;  %v2045_v43 = vsel %vm1533_vm8, %v902_v10, %v1789_v47  ;;  %v2014_v58 = vsel %vm1502_vm2, %v9100_v20, %v9152_v6  ;;  %13404 = vst [vmem:[#allocation108_spill] sm:$0xff] %v9511_v27  ;;  %v6951_v53 = vld [vmem:[%s12841_s3 + $0x108] ss:$16 sps:$4 sm:$0xff]   ;;  %v6953_v40 = vld [vmem:[%s12841_s3 + $0x10c] ss:$16 sps:$4 sm:$0xff]   ;;  %v2047_v10 = vsel %vm1535_vm10, %v1255_v24, %v1791_v44  ;;  %v9539_v44 = vpop.f32.mrf.mxu0 }
 0x1bc   : > { %13402 = vst [vmem:[#allocation106_spill] sm:$0xff] %v9502_v42  ;;  %v9520_v22 = vmul.f32 0.2, %v9470_v32  ;;  %v13406_v47 = vld [vmem:[#allocation50_spill] sm:$0xff]  ;;  %v13407_v6 = vld [vmem:[#allocation51_spill] sm:$0xff]  ;;  %vm1508_vm12 = vcmp.gt.f32.partialorder %v9209_v9, 0.0  ;;  %3791 = vmatprep.subr.bf16.mxu0 %v6953_v40  ;;  %v9547_v27 = vadd.f32 %v13412_v52, %v7547_v21 }
 0x1bd   : > { %v9525_v20 = vadd.f32 %v13406_v47, %v7547_v21  ;;  %v9529_v8 = vadd.f32 %v13407_v6, %v7564_v29  ;;  %vm1512_vm13 = vcmp.gt.f32.partialorder %v9231_v62, 0.0  ;;  %v1793_v42 = vmul.f32 0.2, %v9476_v61  ;;  %13409 = vst [vmem:[#allocation50_spill] sm:$0xff] %v9539_v44  ;;  %v9541_v47 = vpop.f32.mrf.mxu1  ;;  %3792 = vmatpush2.bf16.msra.mxu0 %v6951_v53  ;;  %v9565_v53 = vpop.f32.mrf.mxu0  ;;  %v13421_v44 = vld [vmem:[#allocation99_spill] sm:$0xff] }
 0x1be   : > { %13405 = vst [vmem:[#allocation109_spill] sm:$0xff] %v9520_v22  ;;  %v1795_v54 = vmul.f32 0.2, %v9480_v12  ;;  %v1797_v23 = vmul.f32 0.2, %v912_v35  ;;  %v13408_v22 = vld [vmem:[#allocation69_spill] sm:$0xff]  ;;  %v9543_v6 = vpack.c.bf16 %v2045_v43, %v2041_v13 }
 0x1bf   : > { %v2010_v24 = vsel %vm1498_vm4, %v9079_v37, %v13408_v22  ;;  %13410 = vst [vmem:[#allocation51_spill] sm:$0xff] %v9541_v47  ;;  %v1799_v45 = vmul.f32 0.2, %v1265_v56  ;;  %v6956_v37 = vld [vmem:[%s12841_s3 + $0x30c] ss:$16 sps:$4 sm:$0xff]   ;;  %vm1541_vm14 = vcmp.gt.f32.partialorder %v912_v35, 0.0  ;;  %v9567_v40 = vpop.f32.mrf.mxu1  ;;  %v922_v47 = vadd.f32 %v9279_v31, %v7530_v16 }
 0x1c0   : > { %13411 = vst [vmem:[#allocation69_spill] sm:$0xff] %v9543_v6  ;;  %v9549_v32 = vpack.c.bf16 %v2014_v58, %v2010_v24  ;;  %vm1543_vm15 = vcmp.gt.f32.partialorder %v1265_v56, 0.0  ;;  %v13414_v43 = vld [vmem:[#allocation94_spill] sm:$0xff]  ;;  %v13415_v13 = vld [vmem:[#allocation95_spill] sm:$0xff]  ;;  %v13417_v22 = vmov 0   ;;  %vm1537_vm0 = vcmp.gt.f32.partialorder %v9476_v61, 0.0  ;;  %4144 = vmatprep.subr.bf16.mxu1 %v6956_v37 }
 0x1c1   : > { %v2012_v52 = vsel %vm1500_vm5, %v9094_v39, %v13414_v43  ;;  %v2016_v58 = vsel %vm1504_vm1, %v9104_v60, %v13415_v13  ;;  %13416 = vst [vmem:[#allocation94_spill] sm:$0xff] %v9567_v40  ;;  %5626 = vmatprep.subr.bf16.mxu0 %v13417_v22  ;;  %vm1539_vm2 = vcmp.gt.f32.partialorder %v9480_v12, 0.0  ;;  %v13418_v24 = vld [vmem:[#allocation96_spill] sm:$0xff]  ;;  %v9579_v43 = vpack.c.bf16 %v2047_v10, %v2043_v25  ;;  %v9593_v40 = vpop.f32.mrf.mxu1 }
 0x1c2   : > { %13413 = vst [vmem:[#allocation70_spill] sm:$0xff] %v9549_v32  ;;  %v9574_v6 = vadd.f32 %v13418_v24, %v7564_v29  ;;  %3247 = vmatprep.mubr.bf16.mxu0 %v9549_v32  ;;  %v9577_v39 = vpack.c.bf16 %v2016_v58, %v2012_v52  ;;  %v9582_v60 = vmul.f32 0.2, %v9525_v20  ;;  %v9586_v13 = vadd.f32 %v9235_v63, %v7530_v16  ;;  %v9591_v24 = vpop.f32.mrf.mxu0 }
 0x1c3   : > { %13420 = vst [vmem:[#allocation96_spill] sm:$0xff] %v9579_v43  ;;  %3248 = vmatmul.mubr.bf16.gmra.mxu0 %v13421_v44  ;;  %vm1518_vm3 = vcmp.gt.f32.partialorder %v9329_v26, 0.0  ;;  %v9597_v25 = vmul.f32 0.2, %v9529_v8  ;;  %v2053_v10 = vsel %vm1541_vm14, %v912_v35, %v1797_v23  ;;  %v2055_v63 = vsel %vm1543_vm15, %v1265_v56, %v1799_v45  ;;  %4145 = vmatpush2.bf16.msra.mxu1 %v6954_v55  ;;  %v13423_v23 = vld [vmem:[#allocation100_spill] sm:$0xff]  ;;  %v9618_v56 = vpop.f32.mrf.mxu1 }
 0x1c4   : > { %13419 = vst [vmem:[#allocation95_spill] sm:$0xff] %v9577_v39  ;;  %v1275_v52 = vadd.f32 %v9281_v1, %v7540_v19  ;;  %3600 = vmatprep.mubr.bf16.mxu1 %v9577_v39  ;;  %v2049_v31 = vsel %vm1537_vm0, %v9476_v61, %v1793_v42  ;;  %v2051_v37 = vsel %vm1539_vm2, %v9480_v12, %v1795_v54  ;;  %v9611_v58 = vmul.f32 0.2, %v9547_v27  ;;  %v9616_v1 = vpop.f32.mrf.mxu0  ;;  %v13425_v42 = vld [vmem:[#allocation77_spill] sm:$0xff] }
 0x1c5   : > { %v1271_v35 = vadd.f32 %v9237_v36, %v7540_v19  ;;  %3601 = vmatmul.mubr.bf16.gmra.mxu1 %v13423_v23  ;;  %vm1514_vm4 = vcmp.gt.f32.partialorder %v9276_v4, 0.0  ;;  %v9622_v55 = vmul.f32 0.2, %v9574_v6  ;;  %v9626_v54 = vadd.f32 %v13425_v42, %v7547_v21  ;;  %v13426_v61 = vld [vmem:[#allocation53_spill] sm:$0xff]  ;;  %5915 = vmatprep.subr.bf16.mxu1 %v13417_v22  ;;  %v9644_v39 = vpop.f32.mrf.mxu1 }
 0x1c6   : > { %13422 = vst [vmem:[#allocation110_spill] sm:$0xff] %v9611_v58  ;;  %v9630_v12 = vadd.f32 %v13426_v61, %v7564_v29  ;;  %v2022_v36 = vsel %vm1510_vm9, %v9219_v11, %v9284_v18  ;;  %v9637_v45 = vpack.c.bf16 %v2053_v10, %v2049_v31  ;;  %v9639_v23 = vpack.c.bf16 %v2055_v63, %v2051_v37  ;;  %v9642_v42 = vpop.f32.mrf.mxu0 }
 0x1c7   : > { %13424 = vst [vmem:[#allocation111_spill] sm:$0xff] %v9622_v55  ;;  %vm1545_vm5 = vcmp.gt.f32.partialorder %v9586_v13, 0.0  ;;  %v1805_v44 = vmul.f32 0.2, %v922_v47  ;;  %vm1516_vm1 = vcmp.gt.f32.partialorder %v9294_v49, 0.0  ;;  %vm1520_vm6 = vcmp.gt.f32.partialorder %v9333_v15, 0.0  ;;  %v9661_v32 = vpop.f32.mrf.mxu1 }
 0x1c8   : > { %13427 = vst [vmem:[#allocation77_spill] sm:$0xff] %v9637_v45  ;;  %13428 = vst [vmem:[#allocation53_spill] sm:$0xff] %v9639_v23  ;;  %v1801_v61 = vmul.f32 0.2, %v9586_v13  ;;  %vm1549_vm7 = vcmp.gt.f32.partialorder %v922_v47, 0.0  ;;  %v2018_v18 = vsel %vm1506_vm11, %v9205_v41, %v9261_v57  ;;  %v9655_v63 = vadd.f32 %v9256_v5, %v7547_v21  ;;  %v9659_v37 = vpop.f32.mrf.mxu0  ;;  %v13432_v23 = vld [vmem:[#allocation83_spill] sm:$0xff] }
 0x1c9   : > { %v1807_v11 = vmul.f32 0.2, %v1275_v52  ;;  %v1803_v10 = vmul.f32 0.2, %v1271_v35  ;;  %vm1551_vm8 = vcmp.gt.f32.partialorder %v1275_v52, 0.0  ;;  %v9657_v31 = vpack.c.bf16 %v2022_v36, %v2018_v18  ;;  %v13431_v36 = vld [vmem:[#allocation61_spill] sm:$0xff]  ;;  %v9684_v58 = vpop.f32.mrf.mxu1 }
 0x1ca   : > { %vm1547_vm9 = vcmp.gt.f32.partialorder %v1271_v35, 0.0  ;;  %v9665_v22 = vadd.f32 %v9258_v51, %v7564_v29  ;;  %v2020_v41 = vsel %vm1508_vm12, %v9209_v9, %v9264_v34  ;;  %v2024_v5 = vsel %vm1512_vm13, %v9231_v62, %v9287_v59  ;;  %v9682_v55 = vpop.f32.mrf.mxu0  ;;  %13434 = vst [vmem:[#allocation83_spill] sm:$0xff] %v9684_v58  ;;  %v13435_v34 = vld [vmem:[#allocation57_spill] sm:$0xff] }
 0x1cb   : > { %13429 = vst [vmem:[#allocation112_spill] sm:$0xff] %v9657_v31  ;;  %v2061_v57 = vsel %vm1549_vm7, %v922_v47, %v1805_v44  ;;  %v928_v18 = vadd.f32 %v13431_v36, %v7530_v16  ;;  %v932_v45 = vadd.f32 %v13432_v23, %v7530_v16  ;;  %3257 = vmatprep.mubr.bf16.mxu0 %v9657_v31  ;;  %v9687_v9 = vmul.f32 0.2, %v9626_v54  ;;  %v13436_v44 = vld [vmem:[#allocation63_spill] sm:$0xff]  ;;  %v13437_v23 = vld [vmem:[#allocation78_spill] sm:$0xff] }
 0x1cc   : > { %13430 = vst [vmem:[#allocation113_spill] sm:$0xff] %v9665_v22  ;;  %v9680_v51 = vpack.c.bf16 %v2024_v5, %v2020_v41  ;;  %v2063_v62 = vsel %vm1551_vm8, %v1275_v52, %v1807_v11  ;;  %v1281_v59 = vadd.f32 %v13435_v34, %v7540_v19  ;;  %v1285_v47 = vadd.f32 %v13436_v44, %v7540_v19  ;;  %v9707_v11 = vpop.f32.mrf.mxu0  ;;  %v9709_v34 = vpop.f32.mrf.mxu1  ;;  %v13442_v31 = vld [vmem:[#allocation75_spill] sm:$0xff] }
 0x1cd   : > { %3258 = vmatmul.mubr.bf16.gmra.mxu0 %v13437_v23  ;;  %vm1526_vm10 = vcmp.gt.f32.partialorder %v9427_v30, 0.0  ;;  %v9697_v41 = vmul.f32 0.2, %v9630_v12  ;;  %v2057_v5 = vsel %vm1545_vm5, %v9586_v13, %v1801_v61  ;;  %v2059_v36 = vsel %vm1547_vm9, %v1271_v35, %v1803_v10  ;;  %v13443_v13 = vld [vmem:[#allocation58_spill] sm:$0xff]  ;;  %v13444_v61 = vld [vmem:[#allocation79_spill] sm:$0xff] }
 0x1ce   : > { %13433 = vst [vmem:[#allocation61_spill] sm:$0xff] %v9680_v51  ;;  %v9704_v52 = vmul.f32 0.2, %v9655_v63  ;;  %3610 = vmatprep.mubr.bf16.mxu1 %v9680_v51  ;;  %v9712_v44 = vmul.f32 0.2, %v9665_v22  ;;  %v9714_v23 = vpack.c.bf16 %v2061_v57, %v2057_v5  ;;  %v9722_v35 = vadd.f32 %v13443_v13, %v7564_v29  ;;  %v9732_v5 = vpop.f32.mrf.mxu0 }
 0x1cf   : > { %13438 = vst [vmem:[#allocation57_spill] sm:$0xff] %v9697_v41  ;;  %v9718_v41 = vadd.f32 %v13442_v31, %v7547_v21  ;;  %3611 = vmatmul.mubr.bf16.gmra.mxu1 %v13444_v61  ;;  %vm1522_vm11 = vcmp.gt.f32.partialorder %v9364_v0, 0.0  ;;  %v9726_v10 = vpack.c.bf16 %v2063_v62, %v2059_v36  ;;  %vm1553_vm12 = vcmp.gt.f32.partialorder %v928_v18, 0.0  ;;  %13446 = vst [vmem:[#allocation58_spill] sm:$0xff] %v9732_v5  ;;  %v9734_v31 = vpop.f32.mrf.mxu1  ;;  %v13448_v36 = vld [vmem:[#allocation6_spill] sm:$0xff] }
 0x1d0   : > { %13439 = vst [vmem:[#allocation63_spill] sm:$0xff] %v9704_v52  ;;  %13440 = vst [vmem:[#allocation114_spill] sm:$0xff] %v9712_v44  ;;  %v1813_v51 = vmul.f32 0.2, %v932_v45  ;;  %v2030_v57 = vsel %vm1518_vm3, %v9329_v26, %v9388_v7  ;;  %vm1555_vm13 = vcmp.gt.f32.partialorder %v1281_v59, 0.0  ;;  %vm1557_vm14 = vcmp.gt.f32.partialorder %v932_v45, 0.0  ;;  %v9746_v7 = vpop.f32.mrf.mxu0 }
 0x1d1   : > { %13441 = vst [vmem:[#allocation115_spill] sm:$0xff] %v9714_v23  ;;  %13445 = vst [vmem:[#allocation75_spill] sm:$0xff] %v9726_v10  ;;  %v1809_v23 = vmul.f32 0.2, %v928_v18  ;;  %v1815_v13 = vmul.f32 0.2, %v1285_v47  ;;  %v9740_v61 = vadd.f32 %v13448_v36, %v7547_v21  ;;  %v9748_v44 = vpop.f32.mrf.mxu1  ;;  %v9756_v5 = vadd.f32 %v9395_v50, %v7547_v21 }
 0x1d2   : > { %13447 = vst [vmem:[#allocation116_spill] sm:$0xff] %v9734_v31  ;;  %vm1524_vm15 = vcmp.gt.f32.partialorder %v9382_v14, 0.0  ;;  %vm1528_vm0 = vcmp.gt.f32.partialorder %v9441_v46, 0.0  ;;  %v1811_v62 = vmul.f32 0.2, %v1281_v59  ;;  %vm1559_vm2 = vcmp.gt.f32.partialorder %v1285_v47, 0.0 }
 0x1d3   : > { %v13449_v10 = vld [vmem:[#allocation59_spill] sm:$0xff]  ;;  %13450 = vst [vmem:[#allocation6_spill] sm:$0xff] %v9748_v44  ;;  %v13451_v52 = vld [vmem:[#allocation64_spill] sm:$0xff]  ;;  %v9760_v36 = vadd.f32 %v9397_v2, %v7564_v29  ;;  %v2069_v22 = vsel %vm1557_vm14, %v932_v45, %v1813_v51  ;;  %v2032_v50 = vsel %vm1520_vm6, %v9333_v15, %v9391_v28  ;;  %v9774_v44 = vpop.f32.mrf.mxu0  ;;  %v9776_v2 = vpop.f32.mrf.mxu1  ;;  %v13458_v45 = vld [vmem:[#allocation85_spill] sm:$0xff]  ;;  %v9789_v15 = vmul.f32 0.2, %v9722_v35 }
 0x1d4   : > { %v2026_v26 = vsel %vm1514_vm4, %v9276_v4, %v13449_v10  ;;  %v9752_v31 = vadd.f32 %v13451_v52, %v7564_v29  ;;  %v938_v4 = vadd.f32 %v9416_v3, %v7530_v16  ;;  %v13455_v10 = vld [vmem:[#allocation101_spill] sm:$0xff]  ;;  %13457 = vst [vmem:[#allocation118_spill] sm:$0xff] %v9776_v2  ;;  %v1291_v51 = vadd.f32 %v13458_v45, %v7540_v19 }
 0x1d5   : > { %13453 = vst [vmem:[#allocation64_spill] sm:$0xff] %v9760_v36  ;;  %v9762_v58 = vpack.c.bf16 %v2030_v57, %v2026_v26  ;;  %v2028_v52 = vsel %vm1516_vm1, %v9294_v49, %v13455_v10  ;;  %13456 = vst [vmem:[#allocation101_spill] sm:$0xff] %v9774_v44  ;;  %v2071_v57 = vsel %vm1559_vm2, %v1285_v47, %v1815_v13  ;;  %v9786_v49 = vmul.f32 0.2, %v9718_v41  ;;  %v13462_v13 = vld [vmem:[#allocation102_spill] sm:$0xff]  ;;  %v9795_v10 = vpop.f32.mrf.mxu0 }
 0x1d6   : > { %13452 = vst [vmem:[#allocation59_spill] sm:$0xff] %v9752_v31  ;;  %v942_v3 = vadd.f32 %v9464_v33, %v7530_v16  ;;  %v9783_v26 = vpack.c.bf16 %v2032_v50, %v2028_v52  ;;  %13461 = vst [vmem:[#allocation120_spill] sm:$0xff] %v9789_v15  ;;  %v2065_v28 = vsel %vm1553_vm12, %v928_v18, %v1809_v23  ;;  %v9797_v33 = vpop.f32.mrf.mxu1  ;;  %vm1534_vm3 = vcmp.gt.f32.partialorder %v9525_v20, 0.0  ;;  %v13477_v15 = vld [vmem:[#allocation104_spill] sm:$0xff] }
 0x1d7   : > { %13454 = vst [vmem:[#allocation117_spill] sm:$0xff] %v9762_v58  ;;  %3267 = vmatprep.mubr.bf16.mxu0 %v9762_v58  ;;  %13460 = vst [vmem:[#allocation119_spill] sm:$0xff] %v9786_v49  ;;  %v1295_v47 = vadd.f32 %v9466_v17, %v7540_v19  ;;  %v2067_v52 = vsel %vm1555_vm13, %v1281_v59, %v1811_v62  ;;  %v9802_v50 = vmul.f32 0.2, %v9740_v61  ;;  %v9805_v45 = vmul.f32 0.2, %v9752_v31  ;;  %v9819_v62 = vpop.f32.mrf.mxu0 }
 0x1d8   : > { %13459 = vst [vmem:[#allocation85_spill] sm:$0xff] %v9783_v26  ;;  %3268 = vmatmul.mubr.bf16.gmra.mxu0 %v13462_v13  ;;  %v9807_v18 = vpack.c.bf16 %v2069_v22, %v2065_v28  ;;  %3620 = vmatprep.mubr.bf16.mxu1 %v9783_v26  ;;  %v9810_v17 = vpack.c.bf16 %v2071_v57, %v2067_v52  ;;  %v9813_v23 = vmul.f32 0.2, %v9756_v5  ;;  %v9816_v13 = vmul.f32 0.2, %v9760_v36  ;;  %v13469_v59 = vld [vmem:[#allocation82_spill] sm:$0xff] }
 0x1d9   : > { %13463 = vst [vmem:[#allocation121_spill] sm:$0xff] %v9802_v50  ;;  %13464 = vst [vmem:[#allocation122_spill] sm:$0xff] %v9805_v45  ;;  %v1817_v58 = vmul.f32 0.2, %v938_v4  ;;  %3621 = vmatmul.mubr.bf16.gmra.mxu1 %v13469_v59  ;;  %v9821_v50 = vpop.f32.mrf.mxu1  ;;  %vm1530_vm4 = vcmp.gt.f32.partialorder %v9459_v38, 0.0  ;;  %vm1561_vm5 = vcmp.gt.f32.partialorder %v938_v4, 0.0  ;;  %v2038_v57 = vsel %vm1526_vm10, %v9427_v30, %v9490_v48 }
 0x1da   : > { %13465 = vst [vmem:[#allocation123_spill] sm:$0xff] %v9807_v18  ;;  %13466 = vst [vmem:[#allocation124_spill] sm:$0xff] %v9810_v17  ;;  %vm1563_vm1 = vcmp.gt.f32.partialorder %v1291_v51, 0.0  ;;  %v1821_v22 = vmul.f32 0.2, %v942_v3  ;;  %v13472_v52 = vld [vmem:[#allocation84_spill] sm:$0xff]  ;;  %v9832_v17 = vpop.f32.mrf.mxu0  ;;  %v9849_v36 = vadd.f32 %v13477_v15, %v7564_v29 }
 0x1db   : > { %13467 = vst [vmem:[#allocation125_spill] sm:$0xff] %v9813_v23  ;;  %13468 = vst [vmem:[#allocation126_spill] sm:$0xff] %v9816_v13  ;;  %v1819_v28 = vmul.f32 0.2, %v1291_v51  ;;  %v9830_v26 = vadd.f32 %v13472_v52, %v7547_v21  ;;  %vm1565_vm6 = vcmp.gt.f32.partialorder %v942_v3, 0.0  ;;  %v9834_v18 = vpop.f32.mrf.mxu1  ;;  %v13473_v13 = vld [vmem:[#allocation89_spill] sm:$0xff] }
 0x1dc   : > { %13470 = vst [vmem:[#allocation127_spill] sm:$0xff] %v9819_v62  ;;  %13471 = vst [vmem:[#allocation128_spill] sm:$0xff] %v9821_v50  ;;  %v1823_v59 = vmul.f32 0.2, %v1295_v47  ;;  %vm1532_vm7 = vcmp.gt.f32.partialorder %v13473_v13, 0.0  ;;  %vm1536_vm8 = vcmp.gt.f32.partialorder %v9529_v8, 0.0  ;;  %v2073_v62 = vsel %vm1561_vm5, %v938_v4, %v1817_v58 }
 0x1dd   : > { %vm1567_vm9 = vcmp.gt.f32.partialorder %v1295_v47, 0.0  ;;  %v13474_v45 = vld [vmem:[#allocation107_spill] sm:$0xff]  ;;  %v13475_v48 = vld [vmem:[#allocation108_spill] sm:$0xff]  ;;  %v13478_v31 = vld [vmem:[#allocation90_spill] sm:$0xff]  ;;  %v2077_v49 = vsel %vm1565_vm6, %v942_v3, %v1821_v22  ;;  %vm1542_vm10 = vcmp.gt.f32.partialorder %v9626_v54, 0.0  ;;  %vm1538_vm13 = vcmp.gt.f32.partialorder %v9547_v27, 0.0 }
 0x1de   : > { %v948_v23 = vadd.f32 %v13474_v45, %v7530_v16  ;;  %v1301_v30 = vadd.f32 %v13475_v48, %v7540_v19  ;;  %v13476_v50 = vld [vmem:[#allocation103_spill] sm:$0xff]  ;;  %v9853_v2 = vadd.f32 %v13478_v31, %v7547_v21  ;;  %v9857_v45 = vpop.f32.mrf.mxu0  ;;  %v9859_v48 = vpop.f32.mrf.mxu1  ;;  %v13481_v58 = vld [vmem:[#allocation92_spill] sm:$0xff]  ;;  %v13482_v15 = vld [vmem:[#allocation105_spill] sm:$0xff] }
 0x1df   : > { %v2034_v52 = vsel %vm1522_vm11, %v9364_v0, %v13476_v50  ;;  %13480 = vst [vmem:[#allocation89_spill] sm:$0xff] %v9859_v48  ;;  %v952_v0 = vadd.f32 %v9565_v53, %v7530_v16  ;;  %v2036_v4 = vsel %vm1524_vm15, %v9382_v14, %v13481_v58  ;;  %v2040_v31 = vsel %vm1528_vm0, %v9441_v46, %v13482_v15 }
 0x1e0   : > { %v9855_v44 = vpack.c.bf16 %v2038_v57, %v2034_v52  ;;  %v2075_v50 = vsel %vm1563_vm1, %v1291_v51, %v1819_v28  ;;  %v2079_v57 = vsel %vm1567_vm9, %v1295_v47, %v1823_v59  ;;  %v13483_v52 = vld [vmem:[#allocation91_spill] sm:$0xff]  ;;  %v9878_v53 = vpack.c.bf16 %v2040_v31, %v2036_v4  ;;  %v9880_v3 = vpop.f32.mrf.mxu0  ;;  %v9882_v22 = vpop.f32.mrf.mxu1  ;;  %v13486_v51 = vld [vmem:[#allocation94_spill] sm:$0xff] }
 0x1e1   : > { %v9875_v48 = vadd.f32 %v13483_v52, %v7564_v29  ;;  %v9885_v14 = vmul.f32 0.2, %v9830_v26  ;;  %v1825_v58 = vmul.f32 0.2, %v948_v23  ;;  %v1827_v46 = vmul.f32 0.2, %v1301_v30 }
 0x1e2   : > { %13479 = vst [vmem:[#allocation84_spill] sm:$0xff] %v9855_v44  ;;  %3277 = vmatprep.mubr.bf16.mxu0 %v9855_v44  ;;  %13484 = vst [vmem:[#allocation107_spill] sm:$0xff] %v9878_v53  ;;  %v1305_v47 = vadd.f32 %v13486_v51, %v7540_v19  ;;  %v13487_v59 = vld [vmem:[#allocation66_spill] sm:$0xff]  ;;  %v9892_v28 = vmul.f32 0.2, %v9849_v36  ;;  %v9894_v4 = vpack.c.bf16 %v2077_v49, %v2073_v62  ;;  %vm1569_vm11 = vcmp.gt.f32.partialorder %v948_v23, 0.0  ;;  %v9897_v15 = vpop.f32.mrf.mxu0  ;;  %v9899_v31 = vpop.f32.mrf.mxu1 }
 0x1e3   : > { %13485 = vst [vmem:[#allocation108_spill] sm:$0xff] %v9885_v14  ;;  %3278 = vmatmul.mubr.bf16.gmra.mxu0 %v13487_v59  ;;  %vm1571_vm12 = vcmp.gt.f32.partialorder %v1301_v30, 0.0  ;;  %3630 = vmatprep.mubr.bf16.mxu1 %v9878_v53  ;;  %v9901_v52 = vpack.c.bf16 %v2079_v57, %v2075_v50  ;;  %v9904_v51 = vmul.f32 0.2, %v9853_v2  ;;  %v13492_v59 = vld [vmem:[#allocation50_spill] sm:$0xff]  ;;  %v13493_v49 = vld [vmem:[#allocation93_spill] sm:$0xff]  ;;  %v2046_v50 = vsel %vm1534_vm3, %v9525_v20, %v9582_v60 }
 0x1e4   : > { %13488 = vst [vmem:[#allocation103_spill] sm:$0xff] %v9892_v28  ;;  %13489 = vst [vmem:[#allocation104_spill] sm:$0xff] %v9894_v4  ;;  %v9908_v44 = vadd.f32 %v13492_v59, %v7547_v21  ;;  %v1829_v28 = vmul.f32 0.2, %v952_v0  ;;  %3631 = vmatmul.mubr.bf16.gmra.mxu1 %v13493_v49  ;;  %v9913_v62 = vmul.f32 0.2, %v9875_v48  ;;  %v9923_v57 = vpop.f32.mrf.mxu0  ;;  %v9925_v59 = vpop.f32.mrf.mxu1  ;;  %v2081_v49 = vsel %vm1569_vm11, %v948_v23, %v1825_v58 }
 0x1e5   : > { %13490 = vst [vmem:[#allocation90_spill] sm:$0xff] %v9901_v52  ;;  %13491 = vst [vmem:[#allocation92_spill] sm:$0xff] %v9904_v51  ;;  %v13495_v53 = vld [vmem:[#allocation51_spill] sm:$0xff]  ;;  %vm1573_vm14 = vcmp.gt.f32.partialorder %v952_v0, 0.0  ;;  %v2083_v52 = vsel %vm1571_vm12, %v1301_v30, %v1827_v46  ;;  %v1831_v14 = vmul.f32 0.2, %v1305_v47  ;;  %v962_v20 = vadd.f32 %v9659_v37, %v7530_v16 }
 0x1e6   : > { %13494 = vst [vmem:[#allocation105_spill] sm:$0xff] %v9913_v62  ;;  %v9917_v4 = vadd.f32 %v13495_v53, %v7564_v29  ;;  %v958_v62 = vadd.f32 %v9616_v1, %v7530_v16  ;;  %vm1540_vm15 = vcmp.gt.f32.partialorder %v9574_v6, 0.0  ;;  %vm1544_vm0 = vcmp.gt.f32.partialorder %v9630_v12, 0.0  ;;  %v13497_v53 = vld [vmem:[#allocation106_spill] sm:$0xff]  ;;  %v9941_v30 = vpop.f32.mrf.mxu0  ;;  %v9943_v58 = vpop.f32.mrf.mxu1 }
 0x1e7   : > { %vm1575_vm2 = vcmp.gt.f32.partialorder %v1305_v47, 0.0  ;;  %v1315_v60 = vadd.f32 %v9661_v32, %v7540_v19  ;;  %v2042_v23 = vsel %vm1530_vm4, %v9459_v38, %v13497_v53  ;;  %13498 = vst [vmem:[#allocation94_spill] sm:$0xff] %v9943_v58  ;;  %v9946_v1 = vmul.f32 0.2, %v9908_v44  ;;  %v13502_v53 = vld [vmem:[#allocation109_spill] sm:$0xff] }
 0x1e8   : > { %13496 = vst [vmem:[#allocation91_spill] sm:$0xff] %v9917_v4  ;;  %v2085_v46 = vsel %vm1573_vm14, %v952_v0, %v1829_v28  ;;  %v1311_v37 = vadd.f32 %v9618_v56, %v7540_v19  ;;  %v9951_v51 = vpack.c.bf16 %v2046_v50, %v2042_v23  ;;  %v9954_v32 = vmul.f32 0.2, %v9917_v4  ;;  %v9968_v56 = vpop.f32.mrf.mxu0  ;;  %v9970_v28 = vpop.f32.mrf.mxu1 }
 0x1e9   : > { %13499 = vst [vmem:[#allocation50_spill] sm:$0xff] %v9946_v1  ;;  %v9958_v38 = vadd.f32 %v9591_v24, %v7547_v21  ;;  %v2044_v58 = vsel %vm1532_vm7, %v13473_v13, %v13502_v53  ;;  %v2048_v0 = vsel %vm1536_vm8, %v9529_v8, %v9597_v25  ;;  %v2087_v50 = vsel %vm1575_vm2, %v1305_v47, %v1831_v14  ;;  %v13505_v25 = vld [vmem:[#allocation69_spill] sm:$0xff] }
 0x1ea   : > { %13500 = vst [vmem:[#allocation51_spill] sm:$0xff] %v9951_v51  ;;  %13501 = vst [vmem:[#allocation106_spill] sm:$0xff] %v9954_v32  ;;  %v9975_v24 = vadd.f32 %v9593_v40, %v7564_v29  ;;  %v1833_v23 = vmul.f32 0.2, %v958_v62  ;;  %3287 = vmatprep.mubr.bf16.mxu0 %v9951_v51  ;;  %v9978_v32 = vpack.c.bf16 %v2048_v0, %v2044_v58  ;;  %vm1577_vm3 = vcmp.gt.f32.partialorder %v958_v62, 0.0  ;;  %v9983_v1 = vpop.f32.mrf.mxu0  ;;  %v9985_v4 = vpop.f32.mrf.mxu1 }
 0x1eb   : > { %v9980_v13 = vpack.c.bf16 %v2085_v46, %v2081_v49  ;;  %v1837_v53 = vmul.f32 0.2, %v962_v20  ;;  %v1839_v8 = vmul.f32 0.2, %v1315_v60  ;;  %3288 = vmatmul.mubr.bf16.gmra.mxu0 %v13505_v25  ;;  %vm1550_vm4 = vcmp.gt.f32.partialorder %v9718_v41, 0.0 }
 0x1ec   : > { %13503 = vst [vmem:[#allocation109_spill] sm:$0xff] %v9978_v32  ;;  %v1835_v40 = vmul.f32 0.2, %v1311_v37  ;;  %v9990_v14 = vadd.f32 %v9642_v42, %v7547_v21  ;;  %vm1581_vm5 = vcmp.gt.f32.partialorder %v962_v20, 0.0  ;;  %vm1583_vm1 = vcmp.gt.f32.partialorder %v1315_v60, 0.0  ;;  %3640 = vmatprep.mubr.bf16.mxu1 %v9978_v32  ;;  %v10003_v46 = vpop.f32.mrf.mxu0  ;;  %v10005_v42 = vpop.f32.mrf.mxu1 }
 0x1ed   : > { %13504 = vst [vmem:[#allocation129_spill] sm:$0xff] %v9980_v13  ;;  %v9993_v47 = vpack.c.bf16 %v2087_v50, %v2083_v52  ;;  %v9996_v49 = vmul.f32 0.2, %v9958_v38  ;;  %vm1579_vm6 = vcmp.gt.f32.partialorder %v1311_v37, 0.0  ;;  %v10000_v58 = vadd.f32 %v9644_v39, %v7564_v29  ;;  %3641 = vmatmul.mubr.bf16.gmra.mxu1 %v9579_v43 }
 0x1ee   : > { %vm1546_vm7 = vcmp.gt.f32.partialorder %v9655_v63, 0.0  ;;  %v10009_v0 = vmul.f32 0.2, %v9975_v24  ;;  %v2089_v52 = vsel %vm1577_vm3, %v958_v62, %v1833_v23  ;;  %v10014_v50 = vadd.f32 %v9682_v55, %v7547_v21  ;;  %v10026_v62 = vpop.f32.mrf.mxu1  ;;  %v13510_v23 = vld [vmem:[#allocation113_spill] sm:$0xff] }
 0x1ef   : > { %13506 = vst [vmem:[#allocation130_spill] sm:$0xff] %v9993_v47  ;;  %13507 = vst [vmem:[#allocation131_spill] sm:$0xff] %v9996_v49  ;;  %v2054_v39 = vsel %vm1542_vm10, %v9626_v54, %v9687_v9  ;;  %v2093_v43 = vsel %vm1581_vm5, %v962_v20, %v1837_v53  ;;  %v2095_v25 = vsel %vm1583_vm1, %v1315_v60, %v1839_v8  ;;  %v10024_v47 = vpop.f32.mrf.mxu0  ;;  %vm1548_vm8 = vcmp.gt.f32.partialorder %v13510_v23, 0.0  ;;  %v13514_v60 = vld [vmem:[#allocation83_spill] sm:$0xff]  ;;  %v13545_v49 = vld [vmem:[#allocation114_spill] sm:$0xff] }
 0x1f0   : > { %13508 = vst [vmem:[#allocation132_spill] sm:$0xff] %v10000_v58  ;;  %13509 = vst [vmem:[#allocation133_spill] sm:$0xff] %v10009_v0  ;;  %v968_v32 = vadd.f32 %v9707_v11, %v7530_v16  ;;  %v1321_v51 = vadd.f32 %v9709_v34, %v7540_v19  ;;  %vm1552_vm9 = vcmp.gt.f32.partialorder %v9722_v35, 0.0  ;;  %v2091_v55 = vsel %vm1579_vm6, %v1311_v37, %v1835_v40  ;;  %v13512_v11 = vld [vmem:[#allocation110_spill] sm:$0xff] }
 0x1f1   : > { %v10032_v54 = vmul.f32 0.2, %v9990_v14  ;;  %v972_v9 = vadd.f32 %v9746_v7, %v7530_v16  ;;  %v2050_v34 = vsel %vm1538_vm13, %v9547_v27, %v13512_v11  ;;  %v10041_v20 = vmul.f32 0.2, %v10000_v58  ;;  %v13515_v37 = vld [vmem:[#allocation6_spill] sm:$0xff]  ;;  %v10051_v13 = vpop.f32.mrf.mxu0  ;;  %v10053_v7 = vpop.f32.mrf.mxu1  ;;  %v13519_v27 = vld [vmem:[#allocation111_spill] sm:$0xff] }
 0x1f2   : > { %v10045_v53 = vadd.f32 %v13514_v60, %v7564_v29  ;;  %v1325_v8 = vadd.f32 %v13515_v37, %v7540_v19  ;;  %v10049_v40 = vpack.c.bf16 %v2054_v39, %v2050_v34  ;;  %v10057_v0 = vpack.c.bf16 %v2095_v25, %v2091_v55  ;;  %v13520_v60 = vld [vmem:[#allocation57_spill] sm:$0xff] }
 0x1f3   : > { %13511 = vst [vmem:[#allocation113_spill] sm:$0xff] %v10032_v54  ;;  %13513 = vst [vmem:[#allocation110_spill] sm:$0xff] %v10041_v20  ;;  %v10055_v54 = vpack.c.bf16 %v2093_v43, %v2089_v52  ;;  %v2052_v11 = vsel %vm1540_vm15, %v9574_v6, %v13519_v27  ;;  %v2056_v37 = vsel %vm1544_vm0, %v9630_v12, %v13520_v60  ;;  %v10068_v39 = vmul.f32 0.2, %v10014_v50  ;;  %v10073_v25 = vpop.f32.mrf.mxu0  ;;  %v10075_v52 = vpop.f32.mrf.mxu1  ;;  %v13525_v6 = vld [vmem:[#allocation58_spill] sm:$0xff]  ;;  %v13527_v27 = vld [vmem:[#allocation77_spill] sm:$0xff] }
 0x1f4   : > { %13516 = vst [vmem:[#allocation83_spill] sm:$0xff] %v10049_v40  ;;  %13518 = vst [vmem:[#allocation134_spill] sm:$0xff] %v10057_v0  ;;  %v1841_v34 = vmul.f32 0.2, %v968_v32  ;;  %v1843_v20 = vmul.f32 0.2, %v1321_v51  ;;  %3297 = vmatprep.mubr.bf16.mxu0 %v10049_v40  ;;  %v10071_v43 = vpack.c.bf16 %v2056_v37, %v2052_v11  ;;  %v10079_v55 = vadd.f32 %v13525_v6, %v7547_v21 }
 0x1f5   : > { %13517 = vst [vmem:[#allocation6_spill] sm:$0xff] %v10055_v54  ;;  %13521 = vst [vmem:[#allocation111_spill] sm:$0xff] %v10068_v39  ;;  %vm1585_vm10 = vcmp.gt.f32.partialorder %v968_v32, 0.0  ;;  %vm1587_vm11 = vcmp.gt.f32.partialorder %v1321_v51, 0.0  ;;  %v1845_v12 = vmul.f32 0.2, %v972_v9  ;;  %3298 = vmatmul.mubr.bf16.gmra.mxu0 %v13527_v27  ;;  %v978_v37 = vadd.f32 %v9795_v10, %v7530_v16  ;;  %v10089_v40 = vpop.f32.mrf.mxu0  ;;  %v10091_v0 = vpop.f32.mrf.mxu1 }
 0x1f6   : > { %13522 = vst [vmem:[#allocation57_spill] sm:$0xff] %v10071_v43  ;;  %13523 = vst [vmem:[#allocation135_spill] sm:$0xff] %v10073_v25  ;;  %vm1558_vm12 = vcmp.gt.f32.partialorder %v9756_v5, 0.0  ;;  %v10084_v60 = vmul.f32 0.2, %v10045_v53  ;;  %vm1589_vm13 = vcmp.gt.f32.partialorder %v972_v9, 0.0  ;;  %3650 = vmatprep.mubr.bf16.mxu1 %v10071_v43  ;;  %v1331_v6 = vadd.f32 %v9797_v33, %v7540_v19 }
 0x1f7   : > { %13524 = vst [vmem:[#allocation136_spill] sm:$0xff] %v10075_v52  ;;  %13526 = vst [vmem:[#allocation58_spill] sm:$0xff] %v10079_v55  ;;  %v1847_v11 = vmul.f32 0.2, %v1325_v8  ;;  %vm1591_vm14 = vcmp.gt.f32.partialorder %v1325_v8, 0.0  ;;  %v982_v27 = vadd.f32 %v9832_v17, %v7530_v16  ;;  %v1335_v54 = vadd.f32 %v9834_v18, %v7540_v19  ;;  %v13533_v39 = vld [vmem:[#allocation119_spill] sm:$0xff]  ;;  %v10111_v17 = vpop.f32.mrf.mxu0  ;;  %v10113_v18 = vpop.f32.mrf.mxu1 }
 0x1f8   : > { %13528 = vst [vmem:[#allocation137_spill] sm:$0xff] %v10084_v60  ;;  %13529 = vst [vmem:[#allocation138_spill] sm:$0xff] %v10089_v40  ;;  %v13531_v60 = vld [vmem:[#allocation53_spill] sm:$0xff]  ;;  %vm1554_vm15 = vcmp.gt.f32.partialorder %v9740_v61, 0.0  ;;  %v2097_v10 = vsel %vm1585_vm10, %v968_v32, %v1841_v34  ;;  %v2099_v43 = vsel %vm1587_vm11, %v1321_v51, %v1843_v20  ;;  %v2062_v33 = vsel %vm1550_vm4, %v9718_v41, %v13533_v39  ;;  %v13539_v40 = vld [vmem:[#allocation59_spill] sm:$0xff] }
 0x1f9   : > { %13530 = vst [vmem:[#allocation139_spill] sm:$0xff] %v10091_v0  ;;  %3651 = vmatmul.mubr.bf16.gmra.mxu1 %v13531_v60  ;;  %v13532_v0 = vld [vmem:[#allocation116_spill] sm:$0xff]  ;;  %13535 = vst [vmem:[#allocation119_spill] sm:$0xff] %v10113_v18  ;;  %v10116_v60 = vmul.f32 0.2, %v10079_v55  ;;  %v2101_v32 = vsel %vm1589_vm13, %v972_v9, %v1845_v12  ;;  %v13537_v51 = vld [vmem:[#allocation101_spill] sm:$0xff]  ;;  %v2103_v39 = vsel %vm1591_vm14, %v1325_v8, %v1847_v11  ;;  %v10134_v12 = vpop.f32.mrf.mxu0 }
 0x1fa   : > { %v10105_v52 = vadd.f32 %v13532_v0, %v7564_v29  ;;  %13534 = vst [vmem:[#allocation116_spill] sm:$0xff] %v10111_v17  ;;  %v10121_v20 = vadd.f32 %v13537_v51, %v7547_v21  ;;  %v13538_v0 = vld [vmem:[#allocation118_spill] sm:$0xff]  ;;  %vm1556_vm0 = vcmp.gt.f32.partialorder %v13539_v40, 0.0  ;;  %v13540_v41 = vld [vmem:[#allocation64_spill] sm:$0xff]  ;;  %vm1593_vm3 = vcmp.gt.f32.partialorder %v978_v37, 0.0  ;;  %v13541_v17 = vld [vmem:[#allocation63_spill] sm:$0xff]  ;;  %v10136_v51 = vpop.f32.mrf.mxu1 }
 0x1fb   : > { %13536 = vst [vmem:[#allocation140_spill] sm:$0xff] %v10116_v60  ;;  %v10125_v34 = vadd.f32 %v13538_v0, %v7564_v29  ;;  %vm1560_vm2 = vcmp.gt.f32.partialorder %v13540_v41, 0.0  ;;  %v1849_v18 = vmul.f32 0.2, %v978_v37  ;;  %v2058_v9 = vsel %vm1546_vm7, %v9655_v63, %v13541_v17  ;;  %13542 = vst [vmem:[#allocation101_spill] sm:$0xff] %v10134_v12  ;;  %v13546_v11 = vld [vmem:[#allocation120_spill] sm:$0xff]  ;;  %v10148_v17 = vpop.f32.mrf.mxu0 }
 0x1fc   : > { %13543 = vst [vmem:[#allocation118_spill] sm:$0xff] %v10136_v51  ;;  %v1851_v60 = vmul.f32 0.2, %v1331_v6  ;;  %v1853_v0 = vmul.f32 0.2, %v982_v27  ;;  %v10138_v55 = vpack.c.bf16 %v2062_v33, %v2058_v9  ;;  %vm1597_vm4 = vcmp.gt.f32.partialorder %v982_v27, 0.0  ;;  %v10150_v51 = vpop.f32.mrf.mxu1 }
 0x1fd   : > { %v1855_v25 = vmul.f32 0.2, %v1335_v54  ;;  %vm1599_vm5 = vcmp.gt.f32.partialorder %v1335_v54, 0.0  ;;  %v2060_v8 = vsel %vm1548_vm8, %v13510_v23, %v13545_v49  ;;  %v2064_v63 = vsel %vm1552_vm9, %v9722_v35, %v13546_v11  ;;  %13547 = vst [vmem:[#allocation64_spill] sm:$0xff] %v10148_v17  ;;  %13548 = vst [vmem:[#allocation63_spill] sm:$0xff] %v10150_v51  ;;  %v13549_v33 = vld [vmem:[#allocation127_spill] sm:$0xff]  ;;  %v10174_v17 = vpop.f32.mrf.mxu0 }
 0x1fe   : > { %13544 = vst [vmem:[#allocation59_spill] sm:$0xff] %v10138_v55  ;;  %vm1595_vm1 = vcmp.gt.f32.partialorder %v1331_v6, 0.0  ;;  %v10154_v9 = vadd.f32 %v13549_v33, %v7547_v21  ;;  %v13550_v12 = vld [vmem:[#allocation128_spill] sm:$0xff]  ;;  %3307 = vmatprep.mubr.bf16.mxu0 %v10138_v55  ;;  %v10161_v49 = vpack.c.bf16 %v2064_v63, %v2060_v8  ;;  %v10164_v23 = vmul.f32 0.2, %v10105_v52  ;;  %v13554_v33 = vld [vmem:[#allocation115_spill] sm:$0xff] }
 0x1ff   : > { %v10158_v58 = vadd.f32 %v13550_v12, %v7564_v29  ;;  %v10166_v35 = vpack.c.bf16 %v2101_v32, %v2097_v10  ;;  %v10168_v11 = vpack.c.bf16 %v2103_v39, %v2099_v43  ;;  %v10171_v51 = vmul.f32 0.2, %v10121_v20  ;;  %3308 = vmatmul.mubr.bf16.gmra.mxu0 %v13554_v33  ;;  %v10176_v12 = vpop.f32.mrf.mxu1 }
 0x200   : > { %13551 = vst [vmem:[#allocation114_spill] sm:$0xff] %v10161_v49  ;;  %vm1566_vm6 = vcmp.gt.f32.partialorder %v9853_v2, 0.0  ;;  %v2109_v8 = vsel %vm1597_vm4, %v982_v27, %v1853_v0  ;;  %v2111_v63 = vsel %vm1599_vm5, %v1335_v54, %v1855_v25  ;;  %v988_v10 = vadd.f32 %v9880_v3, %v7530_v16  ;;  %3660 = vmatprep.mubr.bf16.mxu1 %v10161_v49  ;;  %v13555_v0 = vld [vmem:[#allocation75_spill] sm:$0xff]  ;;  %v10194_v54 = vpop.f32.mrf.mxu0 }
 0x201   : > { %13552 = vst [vmem:[#allocation120_spill] sm:$0xff] %v10166_v35  ;;  %13553 = vst [vmem:[#allocation127_spill] sm:$0xff] %v10168_v11  ;;  %v992_v43 = vadd.f32 %v9923_v57, %v7530_v16  ;;  %v10187_v32 = vmul.f32 0.2, %v10125_v34  ;;  %v2105_v39 = vsel %vm1593_vm3, %v978_v37, %v1849_v18  ;;  %v2107_v33 = vsel %vm1595_vm1, %v1331_v6, %v1851_v60  ;;  %v10196_v3 = vpop.f32.mrf.mxu1  ;;  %v13558_v37 = vld [vmem:[#allocation125_spill] sm:$0xff] }
 0x202   : > { %v1341_v27 = vadd.f32 %v9882_v22, %v7540_v19  ;;  %3661 = vmatmul.mubr.bf16.gmra.mxu1 %v13555_v0  ;;  %vm1562_vm7 = vcmp.gt.f32.partialorder %v9830_v26, 0.0  ;;  %v10200_v57 = vmul.f32 0.2, %v10154_v9  ;;  %v10203_v25 = vmul.f32 0.2, %v10158_v58  ;;  %v13561_v0 = vld [vmem:[#allocation89_spill] sm:$0xff]  ;;  %v10223_v11 = vpop.f32.mrf.mxu0 }
 0x203   : > { %v10207_v60 = vadd.f32 %v9857_v45, %v7547_v21  ;;  %v2070_v22 = vsel %vm1558_vm12, %v9756_v5, %v13558_v37  ;;  %v10213_v6 = vpack.c.bf16 %v2109_v8, %v2105_v39  ;;  %v10215_v18 = vpack.c.bf16 %v2111_v63, %v2107_v33  ;;  %v10225_v45 = vpop.f32.mrf.mxu1  ;;  %v13562_v33 = vld [vmem:[#allocation121_spill] sm:$0xff] }
 0x204   : > { %13556 = vst [vmem:[#allocation128_spill] sm:$0xff] %v10200_v57  ;;  %13557 = vst [vmem:[#allocation141_spill] sm:$0xff] %v10203_v25  ;;  %v10219_v49 = vadd.f32 %v13561_v0, %v7564_v29  ;;  %v1345_v55 = vadd.f32 %v9925_v59, %v7540_v19  ;;  %vm1564_vm8 = vcmp.gt.f32.partialorder %v9849_v36, 0.0  ;;  %vm1568_vm9 = vcmp.gt.f32.partialorder %v9875_v48, 0.0  ;;  %v10235_v0 = vpop.f32.mrf.mxu0  ;;  %v13566_v25 = vld [vmem:[#allocation122_spill] sm:$0xff] }
 0x205   : > { %13559 = vst [vmem:[#allocation125_spill] sm:$0xff] %v10213_v6  ;;  %13560 = vst [vmem:[#allocation142_spill] sm:$0xff] %v10215_v18  ;;  %vm1601_vm10 = vcmp.gt.f32.partialorder %v988_v10, 0.0  ;;  %v1857_v5 = vmul.f32 0.2, %v988_v10  ;;  %v2066_v63 = vsel %vm1554_vm15, %v9740_v61, %v13562_v33  ;;  %vm1603_vm11 = vcmp.gt.f32.partialorder %v1341_v27, 0.0  ;;  %v10237_v37 = vpop.f32.mrf.mxu1 }
 0x206   : > { %v1861_v8 = vmul.f32 0.2, %v992_v43  ;;  %v1859_v39 = vmul.f32 0.2, %v1341_v27  ;;  %vm1605_vm12 = vcmp.gt.f32.partialorder %v992_v43, 0.0  ;;  %v10233_v59 = vpack.c.bf16 %v2070_v22, %v2066_v63  ;;  %v13567_v33 = vld [vmem:[#allocation126_spill] sm:$0xff]  ;;  %v10262_v35 = vpop.f32.mrf.mxu0 }
 0x207   : > { %v10241_v18 = vadd.f32 %v9897_v15, %v7547_v21  ;;  %v10245_v6 = vadd.f32 %v9899_v31, %v7564_v29  ;;  %v2068_v61 = vsel %vm1556_vm0, %v13539_v40, %v13566_v25  ;;  %v2072_v22 = vsel %vm1560_vm2, %v13540_v41, %v13567_v33  ;;  %v10264_v57 = vpop.f32.mrf.mxu1  ;;  %v13569_v33 = vld [vmem:[#allocation123_spill] sm:$0xff] }
 0x208   : > { %13563 = vst [vmem:[#allocation89_spill] sm:$0xff] %v10233_v59  ;;  %vm1607_vm13 = vcmp.gt.f32.partialorder %v1345_v55, 0.0  ;;  %v1863_v63 = vmul.f32 0.2, %v1345_v55  ;;  %v10257_v15 = vadd.f32 %v9968_v56, %v7530_v16  ;;  %3317 = vmatprep.mubr.bf16.mxu0 %v10233_v59  ;;  %v10260_v31 = vpack.c.bf16 %v2072_v22, %v2068_v61 }
 0x209   : > { %13564 = vst [vmem:[#allocation121_spill] sm:$0xff] %v10241_v18  ;;  %13565 = vst [vmem:[#allocation143_spill] sm:$0xff] %v10245_v6  ;;  %v2117_v40 = vsel %vm1605_vm12, %v992_v43, %v1861_v8  ;;  %v10268_v25 = vadd.f32 %v9970_v28, %v7540_v19  ;;  %v1002_v41 = vadd.f32 %v10003_v46, %v7530_v16  ;;  %3318 = vmatmul.mubr.bf16.gmra.mxu0 %v13569_v33  ;;  %v10285_v46 = vpop.f32.mrf.mxu0  ;;  %v10287_v8 = vpop.f32.mrf.mxu1 }
 0x20a   : > { %13568 = vst [vmem:[#allocation122_spill] sm:$0xff] %v10260_v31  ;;  %v1355_v56 = vadd.f32 %v10005_v42, %v7540_v19  ;;  %vm1574_vm14 = vcmp.gt.f32.partialorder %v9958_v38, 0.0  ;;  %v10277_v61 = vmul.f32 0.2, %v10207_v60  ;;  %v10280_v22 = vmul.f32 0.2, %v10219_v49  ;;  %3670 = vmatprep.mubr.bf16.mxu1 %v10260_v31 }
 0x20b   : > { %v2113_v43 = vsel %vm1601_vm10, %v988_v10, %v1857_v5  ;;  %v2115_v28 = vsel %vm1603_vm11, %v1341_v27, %v1859_v39  ;;  %vm1570_vm15 = vcmp.gt.f32.partialorder %v9908_v44, 0.0  ;;  %v10291_v42 = vmul.f32 0.2, %v10241_v18  ;;  %v13574_v10 = vld [vmem:[#allocation94_spill] sm:$0xff]  ;;  %v13575_v5 = vld [vmem:[#allocation124_spill] sm:$0xff]  ;;  %v13576_v39 = vld [vmem:[#allocation91_spill] sm:$0xff] }
 0x20c   : > { %13570 = vst [vmem:[#allocation126_spill] sm:$0xff] %v10277_v61  ;;  %13571 = vst [vmem:[#allocation144_spill] sm:$0xff] %v10280_v22  ;;  %v10294_v33 = vmul.f32 0.2, %v10245_v6  ;;  %v10298_v59 = vadd.f32 %v9941_v30, %v7547_v21  ;;  %v10302_v27 = vadd.f32 %v13574_v10, %v7564_v29  ;;  %3671 = vmatmul.mubr.bf16.gmra.mxu1 %v13575_v5  ;;  %vm1572_vm0 = vcmp.gt.f32.partialorder %v13576_v39, 0.0  ;;  %v13578_v61 = vld [vmem:[#allocation92_spill] sm:$0xff] }
 0x20d   : > { %13572 = vst [vmem:[#allocation145_spill] sm:$0xff] %v10291_v42  ;;  %v10306_v31 = vpack.c.bf16 %v2117_v40, %v2113_v43  ;;  %v2119_v22 = vsel %vm1607_vm13, %v1345_v55, %v1863_v63  ;;  %v1865_v42 = vmul.f32 0.2, %v10257_v15  ;;  %v2078_v30 = vsel %vm1566_vm6, %v9853_v2, %v13578_v61  ;;  %v10319_v43 = vpop.f32.mrf.mxu1  ;;  %v13580_v55 = vld [vmem:[#allocation108_spill] sm:$0xff] }
 0x20e   : > { %13573 = vst [vmem:[#allocation146_spill] sm:$0xff] %v10294_v33  ;;  %v10314_v33 = vpop.f32.mrf.mxu0  ;;  %vm1576_vm2 = vcmp.gt.f32.partialorder %v9975_v24, 0.0  ;;  %vm1609_vm3 = vcmp.gt.f32.partialorder %v10257_v15, 0.0  ;;  %vm1611_vm4 = vcmp.gt.f32.partialorder %v10268_v25, 0.0  ;;  %v1869_v10 = vmul.f32 0.2, %v1002_v41 }
 0x20f   : > { %13577 = vst [vmem:[#allocation94_spill] sm:$0xff] %v10306_v31  ;;  %v1871_v40 = vmul.f32 0.2, %v1355_v56  ;;  %13579 = vst [vmem:[#allocation91_spill] sm:$0xff] %v10319_v43  ;;  %vm1578_vm5 = vcmp.gt.f32.partialorder %v9990_v14, 0.0  ;;  %vm1582_vm1 = vcmp.gt.f32.partialorder %v10014_v50, 0.0  ;;  %v1008_v2 = vadd.f32 %v10051_v13, %v7530_v16  ;;  %v10342_v13 = vpop.f32.mrf.mxu1 }
 0x210   : > { %vm1613_vm10 = vcmp.gt.f32.partialorder %v1002_v41, 0.0  ;;  %vm1615_vm11 = vcmp.gt.f32.partialorder %v1355_v56, 0.0  ;;  %v2074_v63 = vsel %vm1562_vm7, %v9830_v26, %v13580_v55  ;;  %v10329_v61 = vpop.f32.mrf.mxu0  ;;  %v1867_v5 = vmul.f32 0.2, %v10268_v25  ;;  %13584 = vst [vmem:[#allocation148_spill] sm:$0xff] %v10342_v13  ;;  %v13586_v55 = vld [vmem:[#allocation103_spill] sm:$0xff] }
 0x211   : > { %13581 = vst [vmem:[#allocation92_spill] sm:$0xff] %v10329_v61  ;;  %v10334_v31 = vadd.f32 %v9983_v1, %v7547_v21  ;;  %v10338_v6 = vadd.f32 %v9985_v4, %v7564_v29  ;;  %v10340_v18 = vpack.c.bf16 %v2078_v30, %v2074_v63  ;;  %v10346_v43 = vadd.f32 %v10024_v47, %v7547_v21  ;;  %v13587_v61 = vld [vmem:[#allocation105_spill] sm:$0xff] }
 0x212   : > { %v10350_v26 = vadd.f32 %v10026_v62, %v7564_v29  ;;  %v2076_v1 = vsel %vm1564_vm8, %v9849_v36, %v13586_v55  ;;  %v2080_v4 = vsel %vm1568_vm9, %v9875_v48, %v13587_v61  ;;  %v10360_v30 = vpop.f32.mrf.mxu0  ;;  %v2125_v63 = vsel %vm1613_vm10, %v1002_v41, %v1869_v10  ;;  %v2393_v36 = vld [vmem:[%s12842_s4] sm:$0xf]  ;;  %v10372_v55 = vpop.f32.mrf.mxu1  ;;  %v13592_v10 = vld [vmem:[#allocation104_spill] sm:$0xff] }
 0x213   : > { %13582 = vst [vmem:[#allocation108_spill] sm:$0xff] %v10338_v6  ;;  %13583 = vst [vmem:[#allocation147_spill] sm:$0xff] %v10340_v18  ;;  %v2127_v13 = vsel %vm1615_vm11, %v1355_v56, %v1871_v40  ;;  %v10364_v47 = vadd.f32 %v10053_v7, %v7540_v19  ;;  %3327 = vmatprep.mubr.bf16.mxu0 %v10340_v18  ;;  %v10367_v62 = vpack.c.bf16 %v2080_v4, %v2076_v1  ;;  %v13593_v61 = vld [vmem:[#allocation132_spill] sm:$0xff] }
 0x214   : > { %13585 = vst [vmem:[#allocation149_spill] sm:$0xff] %v10350_v26  ;;  %vm1584_vm6 = vcmp.gt.f32.partialorder %v10045_v53, 0.0  ;;  %v10375_v48 = vpack.c.bf16 %v2119_v22, %v2115_v28  ;;  %v10378_v41 = vmul.f32 0.2, %v10298_v59  ;;  %v10381_v7 = vmul.f32 0.2, %v10302_v27  ;;  %3328 = vmatmul.mubr.bf16.gmra.mxu0 %v13592_v10  ;;  %v10384_v40 = vpop.f32.mrf.mxu0  ;;  %v10397_v4 = vpop.f32.mrf.mxu1 }
 0x215   : > { %13588 = vst [vmem:[#allocation103_spill] sm:$0xff] %v10367_v62  ;;  %v1873_v56 = vmul.f32 0.2, %v1008_v2  ;;  %vm1580_vm7 = vcmp.gt.f32.partialorder %v13593_v61, 0.0  ;;  %v2121_v1 = vsel %vm1609_vm3, %v10257_v15, %v1865_v42  ;;  %v2123_v22 = vsel %vm1611_vm4, %v10268_v25, %v1867_v5  ;;  %3680 = vmatprep.mubr.bf16.mxu1 %v10367_v62  ;;  %v13598_v15 = vld [vmem:[#allocation5_spill] sm:$0xff]  ;;  %v13600_v25 = vld [vmem:[#allocation90_spill] sm:$0xff] }
 0x216   : > { %13589 = vst [vmem:[#allocation105_spill] sm:$0xff] %v10375_v48  ;;  %13590 = vst [vmem:[#allocation150_spill] sm:$0xff] %v10378_v41  ;;  %v10394_v28 = vmul.f32 0.2, %v10334_v31  ;;  %vm1617_vm8 = vcmp.gt.f32.partialorder %v1008_v2, 0.0  ;;  %v10402_v18 = vpack.c.bf16 %v2125_v63, %v2121_v1  ;;  %v10404_v48 = vpack.c.bf16 %v2127_v13, %v2123_v22  ;;  %3681 = vmatmul.mubr.bf16.gmra.mxu1 %v13600_v25  ;;  %v13604_v63 = vld [vmem:[#allocation58_spill] sm:$0xff] }
 0x217   : > { %13591 = vst [vmem:[#allocation151_spill] sm:$0xff] %v10381_v7  ;;  %v10400_v10 = vmul.f32 0.2, %v10338_v6  ;;  %v13599_v42 = vsub.s32 0, %v13598_v15  ;;  %v10412_v5 = vmul.f32 0.2, %v10346_v43  ;;  %v10427_v1 = vsel %vm1617_vm8, %v1008_v2, %v1873_v56 }
 0x218   : > { %13594 = vst [vmem:[#allocation132_spill] sm:$0xff] %v10394_v28  ;;  %13596 = vst [vmem:[#allocation153_spill] sm:$0xff] %v10402_v18  ;;  %v10415_v62 = vmul.f32 0.2, %v10350_v26  ;;  %vm1619_vm9 = vcmp.gt.f32.partialorder %v10364_v47, 0.0  ;;  %v13603_v28 = vld [vmem:[#allocation131_spill] sm:$0xff]  ;;  %v10440_v18 = vpop.f32.mrf.mxu1 }
 0x219   : > { %13595 = vst [vmem:[#allocation152_spill] sm:$0xff] %v10400_v10  ;;  %13597 = vst [vmem:[#allocation154_spill] sm:$0xff] %v10404_v48  ;;  %v10408_v7 = vrot.slane %v2393_v36, %v13599_v42  ;;  %v2086_v13 = vsel %vm1574_vm14, %v9958_v38, %v13603_v28  ;;  %vm1586_vm12 = vcmp.gt.f32.partialorder %v13604_v63, 0.0  ;;  %vm1588_vm13 = vcmp.gt.f32.partialorder %v10105_v52, 0.0  ;;  %v13605_v42 = vld [vmem:[#allocation135_spill] sm:$0xff]  ;;  %v13606_v48 = vld [vmem:[#allocation50_spill] sm:$0xff]  ;;  %v10438_v28 = vpop.f32.mrf.mxu0 }
 0x21a   : > { %13601 = vst [vmem:[#allocation155_spill] sm:$0xff] %v10412_v5  ;;  %13602 = vst [vmem:[#allocation156_spill] sm:$0xff] %v10415_v62  ;;  %vm1590_vm3 = vcmp.gt.f32.partialorder %v10121_v20, 0.0  ;;  %vm1592_vm4 = vcmp.gt.f32.partialorder %v10125_v34, 0.0  ;;  %v1875_v22 = vmul.f32 0.2, %v10364_v47  ;;  %v10432_v25 = vadd.f32 %v13605_v42, %v7547_v21 }
 0x21b   : > { %v2082_v38 = vsel %vm1570_vm15, %v9908_v44, %v13606_v48  ;;  %v13607_v62 = vld [vmem:[#allocation138_spill] sm:$0xff]  ;;  %v13608_v2 = vld [vmem:[#allocation101_spill] sm:$0xff]  ;;  %v13611_v48 = vsub.s32 1, %v13598_v15  ;;  %vm1596_vm10 = vcmp.gt.f32.partialorder %v10158_v58, 0.0  ;;  %vm1606_vm11 = vcmp.gt.f32.partialorder %v10298_v59, 0.0 }
 0x21c   : > { %v10444_v10 = vadd.f32 %v13607_v62, %v7530_v16  ;;  %v3090_v56 = vadd.f32 %v13608_v2, %v10408_v7  ;;  %v10448_v5 = vpack.c.bf16 %v2086_v13, %v2082_v38  ;;  %v13609_v42 = vld [vmem:[#allocation106_spill] sm:$0xff]  ;;  %v13610_v26 = vld [vmem:[#allocation133_spill] sm:$0xff]  ;;  %v3094_v16 = vadd.f32 %v10174_v17, %v10408_v7  ;;  %v10466_v13 = vpop.f32.mrf.mxu0  ;;  %v10468_v38 = vpop.f32.mrf.mxu1 }
 0x21d   : > { %v2084_v41 = vsel %vm1572_vm0, %v13576_v39, %v13609_v42  ;;  %v2088_v44 = vsel %vm1576_vm2, %v9975_v24, %v13610_v26  ;;  %v10460_v6 = vrot.slane %v2393_v36, %v13611_v48  ;;  %v3100_v62 = vadd.f32 %v10223_v11, %v10408_v7  ;;  %v13612_v39 = vld [vmem:[#allocation118_spill] sm:$0xff]  ;;  %v13614_v24 = vld [vmem:[#allocation113_spill] sm:$0xff]  ;;  %v13615_v36 = vld [vmem:[#allocation111_spill] sm:$0xff] }
 0x21e   : > { %v3443_v2 = vadd.f32 %v13612_v39, %v3090_v56  ;;  %3337 = vmatprep.mubr.bf16.mxu0 %v10448_v5  ;;  %v10472_v42 = vpack.c.bf16 %v2088_v44, %v2084_v41  ;;  %v2090_v26 = vsel %vm1578_vm5, %v9990_v14, %v13614_v24  ;;  %v2094_v17 = vsel %vm1582_vm1, %v10014_v50, %v13615_v36  ;;  %v13616_v11 = vld [vmem:[#allocation64_spill] sm:$0xff]  ;;  %v13617_v41 = vld [vmem:[#allocation129_spill] sm:$0xff]  ;;  %v10491_v39 = vpop.f32.mrf.mxu0  ;;  %v10493_v14 = vpop.f32.mrf.mxu1 }
 0x21f   : > { %v3092_v48 = vadd.f32 %v13616_v11, %v10460_v6  ;;  %v3447_v15 = vadd.f32 %v10176_v12, %v3094_v16  ;;  %v3096_v56 = vadd.f32 %v10194_v54, %v10460_v6  ;;  %3338 = vmatmul.mubr.bf16.gmra.mxu0 %v13617_v41  ;;  %v10489_v44 = vadd.f32 %v10225_v45, %v3100_v62  ;;  %v13618_v24 = vld [vmem:[#allocation136_spill] sm:$0xff]  ;;  %v13619_v54 = vld [vmem:[#allocation63_spill] sm:$0xff]  ;;  %v13620_v11 = vld [vmem:[#allocation130_spill] sm:$0xff] }
 0x220   : > { %13613 = vst [vmem:[#allocation131_spill] sm:$0xff] %v10472_v42  ;;  %v10497_v50 = vadd.f32 %v13618_v24, %v7564_v29  ;;  %vm4467_vm14 = vcmp.gt.f32.partialorder %v3443_v2, 0.0  ;;  %v4723_v36 = vmul.f32 0.2, %v3443_v2  ;;  %3690 = vmatprep.mubr.bf16.mxu1 %v10472_v42  ;;  %v10500_v12 = vpack.c.bf16 %v2094_v17, %v2090_v26  ;;  %v10509_v41 = vpop.f32.mrf.mxu0  ;;  %v10511_v24 = vpop.f32.mrf.mxu1  ;;  %v13621_v17 = vld [vmem:[#allocation139_spill] sm:$0xff] }
 0x221   : > { %v10503_v16 = vadd.f32 %v13619_v54, %v3092_v48  ;;  %vm4471_vm15 = vcmp.gt.f32.partialorder %v3447_v15, 0.0  ;;  %v4727_v45 = vmul.f32 0.2, %v3447_v15  ;;  %v10506_v62 = vadd.f32 %v10196_v3, %v3096_v56  ;;  %3691 = vmatmul.mubr.bf16.gmra.mxu1 %v13620_v11  ;;  %v13622_v3 = vld [vmem:[#allocation137_spill] sm:$0xff] }
 0x222   : > { %v10516_v42 = vsel %vm1619_vm9, %v10364_v47, %v1875_v22  ;;  %v10519_v26 = vmul.f32 0.2, %v10432_v25  ;;  %v10523_v48 = vadd.f32 %v13621_v17, %v7540_v19  ;;  %3347 = vmatprep.mubr.bf16.mxu0 %v10500_v12  ;;  %v2096_v56 = vsel %vm1584_vm6, %v10045_v53, %v13622_v3  ;;  %v13625_v19 = vld [vmem:[#allocation110_spill] sm:$0xff]  ;;  %v10542_v11 = vpop.f32.mrf.mxu0 }
 0x223   : > { %vm1594_vm0 = vcmp.gt.f32.partialorder %v10154_v9, 0.0  ;;  %vm1598_vm2 = vcmp.gt.f32.partialorder %v10207_v60, 0.0  ;;  %v1877_v47 = vmul.f32 0.2, %v10444_v10  ;;  %v10534_v22 = vsel %vm4467_vm14, %v3443_v2, %v4723_v36 }
 0x224   : > { %13623 = vst [vmem:[#allocation58_spill] sm:$0xff] %v10534_v22  ;;  %v10536_v54 = vsel %vm4471_vm15, %v3447_v15, %v4727_v45  ;;  %v2092_v17 = vsel %vm1580_vm7, %v13593_v61, %v13625_v19  ;;  %vm1600_vm5 = vcmp.gt.f32.partialorder %v10219_v49, 0.0  ;;  %vm4475_vm1 = vcmp.gt.f32.partialorder %v10489_v44, 0.0  ;;  %v10560_v19 = vpop.f32.mrf.mxu1  ;;  %v10562_v53 = vpop.f32.mrf.mxu0  ;;  %v13627_v22 = vld [vmem:[#allocation6_spill] sm:$0xff] }
 0x225   : > { %13624 = vst [vmem:[#allocation135_spill] sm:$0xff] %v10536_v54  ;;  %v4731_v3 = vmul.f32 0.2, %v10489_v44  ;;  %v10549_v2 = vpack.c.bf16 %v2096_v56, %v2092_v17  ;;  %v3102_v15 = vadd.f32 %v10235_v0, %v10460_v6  ;;  %v3104_v61 = vadd.f32 %v10262_v35, %v10408_v7  ;;  %v13626_v56 = vld [vmem:[#allocation140_spill] sm:$0xff] }
 0x226   : > { %v3106_v36 = vadd.f32 %v10285_v46, %v10460_v6  ;;  %v3110_v45 = vadd.f32 %v10314_v33, %v10408_v7  ;;  %v2098_v0 = vsel %vm1586_vm12, %v13604_v63, %v13626_v56  ;;  %v2102_v35 = vsel %vm1590_vm3, %v10121_v20, %v10171_v51  ;;  %v13628_v20 = vld [vmem:[#allocation91_spill] sm:$0xff]  ;;  %v10590_v54 = vpop.f32.mrf.mxu1 }
 0x227   : > { %3700 = vmatprep.mubr.bf16.mxu1 %v10549_v2  ;;  %v2100_v33 = vsel %vm1588_vm13, %v10105_v52, %v10164_v23  ;;  %v2104_v46 = vsel %vm1592_vm4, %v10125_v34, %v10187_v32  ;;  %v10582_v17 = vadd.f32 %v10237_v37, %v3102_v15  ;;  %v3457_v63 = vadd.f32 %v10264_v57, %v3104_v61  ;;  %v10592_v52 = vpop.f32.mrf.mxu0  ;;  %v13631_v32 = vld [vmem:[#allocation92_spill] sm:$0xff] }
 0x228   : > { %v10586_v56 = vadd.f32 %v10287_v8, %v3106_v36  ;;  %3348 = vmatmul.mubr.bf16.gmra.mxu0 %v13627_v22  ;;  %v3463_v51 = vadd.f32 %v13628_v20, %v3110_v45  ;;  %v10595_v23 = vpack.c.bf16 %v2102_v35, %v2098_v0  ;;  %v10597_v34 = vpack.c.bf16 %v2104_v46, %v2100_v33  ;;  %v13632_v8 = vld [vmem:[#allocation121_spill] sm:$0xff]  ;;  %v13633_v36 = vld [vmem:[#allocation134_spill] sm:$0xff]  ;;  %v10607_v45 = vpop.f32.mrf.mxu1  ;;  %v13635_v33 = vld [vmem:[#allocation143_spill] sm:$0xff] }
 0x229   : > { %v3112_v57 = vadd.f32 %v13631_v32, %v10460_v6  ;;  %v3114_v37 = vadd.f32 %v10360_v30, %v10408_v7  ;;  %vm1602_vm6 = vcmp.gt.f32.partialorder %v13632_v8, 0.0  ;;  %vm1621_vm7 = vcmp.gt.f32.partialorder %v10444_v10, 0.0  ;;  %3701 = vmatmul.mubr.bf16.gmra.mxu1 %v13633_v36  ;;  %v10609_v0 = vpop.f32.mrf.mxu0  ;;  %v13637_v20 = vld [vmem:[#allocation148_spill] sm:$0xff] }
 0x22a   : > { %13629 = vst [vmem:[#allocation50_spill] sm:$0xff] %v10595_v23  ;;  %13630 = vst [vmem:[#allocation138_spill] sm:$0xff] %v10597_v34  ;;  %v1879_v15 = vmul.f32 0.2, %v10523_v48  ;;  %vm4479_vm8 = vcmp.gt.f32.partialorder %v3457_v63, 0.0  ;;  %vm1608_vm9 = vcmp.gt.f32.partialorder %v10302_v27, 0.0  ;;  %v10616_v30 = vsel %vm4475_vm1, %v10489_v44, %v4731_v3  ;;  %3357 = vmatprep.mubr.bf16.mxu0 %v10595_v23  ;;  %3710 = vmatprep.mubr.bf16.mxu1 %v10597_v34  ;;  %v10629_v44 = vpop.f32.mrf.mxu1 }
 0x22b   : > { %v4735_v61 = vmul.f32 0.2, %v3457_v63  ;;  %vm1623_vm12 = vcmp.gt.f32.partialorder %v10523_v48, 0.0  ;;  %13634 = vst [vmem:[#allocation101_spill] sm:$0xff] %v10616_v30  ;;  %vm4483_vm13 = vcmp.gt.f32.partialorder %v3463_v51, 0.0  ;;  %vm1604_vm3 = vcmp.gt.f32.partialorder %v13635_v33, 0.0 }
 0x22c   : > { %v4739_v35 = vmul.f32 0.2, %v3463_v51  ;;  %v10624_v32 = vadd.f32 %v13637_v20, %v3112_v57  ;;  %v3467_v36 = vadd.f32 %v10372_v55, %v3114_v37  ;;  %v3116_v22 = vadd.f32 %v10384_v40, %v10460_v6  ;;  %v13638_v34 = vld [vmem:[#allocation116_spill] sm:$0xff]  ;;  %v10642_v55 = vpop.f32.mrf.mxu0 }
 0x22d   : > { %v10621_v46 = vsel %vm4479_vm8, %v3457_v63, %v4735_v61  ;;  %v2133_v3 = vsel %vm1621_vm7, %v10444_v10, %v1877_v47  ;;  %v10636_v23 = vadd.f32 %v13638_v34, %v7547_v21  ;;  %v3120_v57 = vadd.f32 %v10438_v28, %v10408_v7  ;;  %v13640_v34 = vld [vmem:[#allocation128_spill] sm:$0xff]  ;;  %v13641_v61 = vld [vmem:[#allocation126_spill] sm:$0xff] }
 0x22e   : > { %13636 = vst [vmem:[#allocation106_spill] sm:$0xff] %v10621_v46  ;;  %v2135_v40 = vsel %vm1623_vm12, %v10523_v48, %v1879_v15  ;;  %v10648_v37 = vsel %vm4483_vm13, %v3463_v51, %v4739_v35  ;;  %vm4487_vm4 = vcmp.gt.f32.partialorder %v3467_v36, 0.0  ;;  %v4743_v10 = vmul.f32 0.2, %v3467_v36  ;;  %v10662_v15 = vpop.f32.mrf.mxu1  ;;  %v10664_v51 = vpop.f32.mrf.mxu0  ;;  %v13644_v35 = vld [vmem:[#allocation144_spill] sm:$0xff] }
 0x22f   : > { %13639 = vst [vmem:[#allocation133_spill] sm:$0xff] %v10648_v37  ;;  %v10651_v21 = vadd.f32 %v10397_v4, %v3116_v22  ;;  %v3473_v47 = vadd.f32 %v10440_v18, %v3120_v57  ;;  %v2106_v28 = vsel %vm1594_vm0, %v10154_v9, %v13640_v34  ;;  %v2110_v48 = vsel %vm1598_vm2, %v10207_v60, %v13641_v61  ;;  %v13643_v22 = vld [vmem:[#allocation120_spill] sm:$0xff]  ;;  %v13646_v34 = vld [vmem:[#allocation141_spill] sm:$0xff] }
 0x230   : > { %vm1614_vm14 = vcmp.gt.f32.partialorder %v10346_v43, 0.0  ;;  %v10667_v4 = vsel %vm4487_vm4, %v3467_v36, %v4743_v10  ;;  %3358 = vmatmul.mubr.bf16.gmra.mxu0 %v13643_v22  ;;  %v10670_v18 = vpack.c.bf16 %v2110_v48, %v2106_v28  ;;  %v2112_v9 = vsel %vm1600_vm5, %v10219_v49, %v13644_v35  ;;  %v13645_v36 = vld [vmem:[#allocation119_spill] sm:$0xff]  ;;  %v10692_v28 = vpop.f32.mrf.mxu1  ;;  %v13647_v61 = vld [vmem:[#allocation108_spill] sm:$0xff]  ;;  %v13650_v35 = vld [vmem:[#allocation149_spill] sm:$0xff] }
 0x231   : > { %13642 = vst [vmem:[#allocation118_spill] sm:$0xff] %v10667_v4  ;;  %v3122_v60 = vadd.f32 %v10466_v13, %v10460_v6  ;;  %vm1610_vm15 = vcmp.gt.f32.partialorder %v10334_v31, 0.0  ;;  %v10680_v20 = vpack.c.bf16 %v2133_v3, %v10427_v1  ;;  %v10684_v57 = vadd.f32 %v13645_v36, %v7564_v29  ;;  %v10694_v13 = vpop.f32.mrf.mxu0  ;;  %v13648_v3 = vld [vmem:[#allocation127_spill] sm:$0xff]  ;;  %v13652_v37 = vld [vmem:[#allocation145_spill] sm:$0xff] }
 0x232   : > { %v2108_v49 = vsel %vm1596_vm10, %v10158_v58, %v13646_v34  ;;  %vm1612_vm0 = vcmp.gt.f32.partialorder %v13647_v61, 0.0  ;;  %v10698_v1 = vmul.f32 0.2, %v10497_v50  ;;  %3711 = vmatmul.mubr.bf16.gmra.mxu1 %v13648_v3  ;;  %3367 = vmatprep.mubr.bf16.mxu0 %v10670_v18  ;;  %v3124_v58 = vadd.f32 %v10491_v39, %v10408_v7  ;;  %v13651_v39 = vld [vmem:[#allocation150_spill] sm:$0xff] }
 0x233   : > { %v10702_v29 = vpack.c.bf16 %v2112_v9, %v2108_v49  ;;  %v10705_v48 = vadd.f32 %v10468_v38, %v3122_v60  ;;  %vm1616_vm2 = vcmp.gt.f32.partialorder %v13650_v35, 0.0  ;;  %v10711_v36 = vpack.c.bf16 %v2135_v40, %v10516_v42  ;;  %v10717_v9 = vpop.f32.mrf.mxu1  ;;  %v10719_v49 = vpop.f32.mrf.mxu0 }
 0x234   : > { %v4747_v34 = vmul.f32 0.2, %v3473_v47  ;;  %v3126_v10 = vadd.f32 %v10509_v41, %v10460_v6  ;;  %v3130_v63 = vadd.f32 %v10542_v11, %v10408_v7  ;;  %v10722_v38 = vmul.f32 0.2, %v10636_v23 }
 0x235   : > { %13649 = vst [vmem:[#allocation113_spill] sm:$0xff] %v10702_v29  ;;  %vm4491_vm5 = vcmp.gt.f32.partialorder %v3473_v47, 0.0  ;;  %3720 = vmatprep.mubr.bf16.mxu1 %v10702_v29  ;;  %v3477_v42 = vadd.f32 %v10493_v14, %v3124_v58  ;;  %v2118_v41 = vsel %vm1606_vm11, %v10298_v59, %v13651_v39  ;;  %vm1622_vm1 = vcmp.gt.f32.partialorder %v10636_v23, 0.0  ;;  %v10742_v58 = vpop.f32.mrf.mxu1  ;;  %v13653_v59 = vld [vmem:[#allocation151_spill] sm:$0xff] }
 0x236   : > { %v10732_v11 = vmul.f32 0.2, %v10684_v57  ;;  %v10735_v40 = vadd.f32 %v10511_v24, %v3126_v10  ;;  %v3483_v60 = vadd.f32 %v10560_v19, %v3130_v63  ;;  %v2114_v14 = vsel %vm1602_vm6, %v13632_v8, %v13652_v37  ;;  %v3149_v10 = vpop.f32.mrf.mxu0  ;;  %v13656_v37 = vld [vmem:[#allocation146_spill] sm:$0xff] }
 0x237   : > { %vm4495_vm10 = vcmp.gt.f32.partialorder %v3477_v42, 0.0  ;;  %v4751_v4 = vmul.f32 0.2, %v3477_v42  ;;  %v2120_v39 = vsel %vm1608_vm9, %v10302_v27, %v13653_v59  ;;  %v3132_v24 = vadd.f32 %v10562_v53, %v10460_v6  ;;  %v13658_v59 = vld [vmem:[#allocation125_spill] sm:$0xff] }
 0x238   : > { %vm1618_vm11 = vcmp.gt.f32.partialorder %v10432_v25, 0.0  ;;  %v10752_v19 = vmul.f32 0.2, %v10503_v16  ;;  %v10755_v8 = vsel %vm4491_vm5, %v3473_v47, %v4747_v34  ;;  %v10757_v63 = vpack.c.bf16 %v2118_v41, %v2114_v14  ;;  %3368 = vmatmul.mubr.bf16.gmra.mxu0 %v13658_v59  ;;  %v3502_v47 = vpop.f32.mrf.mxu1  ;;  %v10771_v34 = vpop.f32.mrf.mxu0  ;;  %v13660_v14 = vld [vmem:[#allocation142_spill] sm:$0xff]  ;;  %v13661_v41 = vld [vmem:[#allocation155_spill] sm:$0xff] }
 0x239   : > { %13654 = vst [vmem:[#allocation111_spill] sm:$0xff] %v10755_v8  ;;  %v2116_v30 = vsel %vm1604_vm3, %v13635_v33, %v13656_v37  ;;  %v10763_v27 = vsel %vm4495_vm10, %v3477_v42, %v4751_v4  ;;  %v4755_v53 = vmul.f32 0.2, %v3483_v60  ;;  %v10767_v46 = vadd.f32 %v10590_v54, %v3132_v24 }
 0x23a   : > { %13655 = vst [vmem:[#allocation64_spill] sm:$0xff] %v10757_v63  ;;  %13657 = vst [vmem:[#allocation136_spill] sm:$0xff] %v10763_v27  ;;  %v3134_v29 = vadd.f32 %v10592_v52, %v10408_v7  ;;  %3377 = vmatprep.mubr.bf16.mxu0 %v10757_v63  ;;  %v10776_v33 = vpack.c.bf16 %v2120_v39, %v2116_v30  ;;  %v3136_v4 = vadd.f32 %v10609_v0, %v10460_v6  ;;  %v10791_v39 = vpop.f32.mrf.mxu1  ;;  %v3153_v24 = vpop.f32.mrf.mxu0  ;;  %v13662_v27 = vld [vmem:[#allocation132_spill] sm:$0xff] }
 0x23b   : > { %v3140_v54 = vadd.f32 %v10642_v55, %v10408_v7  ;;  %vm1624_vm6 = vcmp.gt.f32.partialorder %v10684_v57, 0.0  ;;  %v10784_v52 = vmul.f32 0.2, %v10506_v62  ;;  %v10787_v42 = vmul.f32 0.2, %v10582_v17  ;;  %3721 = vmatmul.mubr.bf16.gmra.mxu1 %v13660_v14 }
 0x23c   : > { %13659 = vst [vmem:[#allocation63_spill] sm:$0xff] %v10776_v33  ;;  %vm4499_vm7 = vcmp.gt.f32.partialorder %v3483_v60, 0.0  ;;  %v3487_v30 = vadd.f32 %v10607_v45, %v3134_v29  ;;  %v10794_v0 = vmul.f32 0.2, %v10586_v56  ;;  %3730 = vmatprep.mubr.bf16.mxu1 %v10776_v33  ;;  %v10798_v55 = vadd.f32 %v10629_v44, %v3136_v4  ;;  %v3506_v14 = vpop.f32.mrf.mxu1  ;;  %v3155_v44 = vpop.f32.mrf.mxu0 }
 0x23d   : > { %v3493_v37 = vadd.f32 %v10662_v15, %v3140_v54  ;;  %v2126_v8 = vsel %vm1614_vm14, %v10346_v43, %v13661_v41  ;;  %v10806_v45 = vmul.f32 0.2, %v10624_v32  ;;  %v2122_v33 = vsel %vm1610_vm15, %v10334_v31, %v13662_v27  ;;  %v13665_v41 = vld [vmem:[#allocation152_spill] sm:$0xff] }
 0x23e   : > { %vm4503_vm8 = vcmp.gt.f32.partialorder %v3487_v30, 0.0  ;;  %v4759_v29 = vmul.f32 0.2, %v3487_v30  ;;  %vm1620_vm9 = vcmp.gt.f32.partialorder %v10497_v50, 0.0  ;;  %v10814_v15 = vmul.f32 0.2, %v10651_v21 }
 0x23f   : > { %v10817_v4 = vsel %vm4499_vm7, %v3483_v60, %v4755_v53  ;;  %v10819_v43 = vpack.c.bf16 %v2126_v8, %v2122_v33  ;;  %v2124_v54 = vsel %vm1612_vm0, %v13647_v61, %v13665_v41  ;;  %v13667_v31 = vld [vmem:[#allocation156_spill] sm:$0xff]  ;;  %v3142_v59 = vadd.f32 %v10664_v51, %v10460_v6  ;;  %v3508_v8 = vpop.f32.mrf.mxu1  ;;  %v13668_v41 = vld [vmem:[#allocation94_spill] sm:$0xff]  ;;  %v13670_v53 = vld [vmem:[#allocation105_spill] sm:$0xff] }
 0x240   : > { %13663 = vst [vmem:[#allocation139_spill] sm:$0xff] %v10817_v4  ;;  %v10825_v63 = vsel %vm4503_vm8, %v3487_v30, %v4759_v29  ;;  %v2128_v27 = vsel %vm1616_vm2, %v13650_v35, %v13667_v31  ;;  %v3144_v60 = vadd.f32 %v10694_v13, %v10408_v7  ;;  %v4763_v33 = vmul.f32 0.2, %v3493_v37  ;;  %v3159_v29 = vpop.f32.mrf.mxu0  ;;  %3378 = vmatmul.mubr.bf16.gmra.mxu0 %v13668_v41 }
 0x241   : > { %13664 = vst [vmem:[#allocation137_spill] sm:$0xff] %v10819_v43  ;;  %13666 = vst [vmem:[#allocation110_spill] sm:$0xff] %v10825_v63  ;;  %v3146_v61 = vadd.f32 %v10719_v49, %v10460_v6  ;;  %v3150_v30 = vadd.f32 %v3149_v10, %v10408_v7  ;;  %vm4507_vm12 = vcmp.gt.f32.partialorder %v3493_v37, 0.0  ;;  %v10842_v35 = vadd.f32 %v10692_v28, %v3142_v59  ;;  %v3512_v59 = vpop.f32.mrf.mxu1 }
 0x242   : > { %v3497_v51 = vadd.f32 %v10717_v9, %v3144_v60  ;;  %v2134_v13 = vsel %vm1622_vm1, %v10636_v23, %v10722_v38  ;;  %vm4468_vm13 = vcmp.gt.f32.partialorder %v10503_v16, 0.0  ;;  %v10851_v49 = vmul.f32 0.2, %v10705_v48  ;;  %3387 = vmatprep.mubr.bf16.mxu0 %v10819_v43  ;;  %v3161_v9 = vpop.f32.mrf.mxu0 }
 0x243   : > { %v10854_v10 = vpack.c.bf16 %v2128_v27, %v2124_v54  ;;  %v10857_v31 = vadd.f32 %v10742_v58, %v3146_v61  ;;  %v3503_v28 = vadd.f32 %v3502_v47, %v3150_v30  ;;  %v10860_v60 = vmul.f32 0.2, %v10735_v40  ;;  %3731 = vmatmul.mubr.bf16.gmra.mxu1 %v13670_v53  ;;  %v3514_v61 = vpop.f32.mrf.mxu1 }
 0x244   : > { %vm4511_vm3 = vcmp.gt.f32.partialorder %v3497_v51, 0.0  ;;  %v4767_v23 = vmul.f32 0.2, %v3497_v51  ;;  %v2130_v38 = vsel %vm1618_vm11, %v10432_v25, %v10519_v26  ;;  %vm4472_vm4 = vcmp.gt.f32.partialorder %v10506_v62, 0.0  ;;  %v3163_v30 = vpop.f32.mrf.mxu0 }
 0x245   : > { %13669 = vst [vmem:[#allocation140_spill] sm:$0xff] %v10854_v10  ;;  %vm4476_vm14 = vcmp.gt.f32.partialorder %v10582_v17, 0.0  ;;  %v10870_v58 = vmul.f32 0.2, %v10767_v46  ;;  %v10873_v47 = vmul.f32 0.2, %v10798_v55  ;;  %v10876_v54 = vsel %vm4507_vm12, %v3493_v37, %v4763_v33  ;;  %3740 = vmatprep.mubr.bf16.mxu1 %v10854_v10 }
 0x246   : > { %13671 = vst [vmem:[#allocation91_spill] sm:$0xff] %v10876_v54  ;;  %v10879_v27 = vpack.c.bf16 %v2134_v13, %v2130_v38  ;;  %v10881_v25 = vsel %vm4511_vm3, %v3497_v51, %v4767_v23  ;;  %vm4515_vm15 = vcmp.gt.f32.partialorder %v3503_v28, 0.0  ;;  %v3152_v26 = vadd.f32 %v10771_v34, %v10460_v6  ;;  %v3516_v23 = vpop.f32.mrf.mxu1  ;;  %v3165_v38 = vpop.f32.mrf.mxu0 }
 0x247   : > { %13672 = vst [vmem:[#allocation92_spill] sm:$0xff] %v10881_v25  ;;  %v3154_v4 = vadd.f32 %v3153_v24, %v10408_v7  ;;  %vm4480_vm0 = vcmp.gt.f32.partialorder %v10586_v56, 0.0  ;;  %v4771_v33 = vmul.f32 0.2, %v3503_v28  ;;  %v2136_v13 = vsel %vm1624_vm6, %v10684_v57, %v10732_v11 }
 0x248   : > { %v3156_v51 = vadd.f32 %v3155_v44, %v10460_v6  ;;  %v10895_v63 = vadd.f32 %v10791_v39, %v3152_v26  ;;  %v3160_v24 = vadd.f32 %v3159_v29, %v10408_v7  ;;  %v3162_v10 = vadd.f32 %v3161_v9, %v10460_v6  ;;  %v3518_v11 = vpop.f32.mrf.mxu1  ;;  %v13673_v39 = vld [vmem:[#allocation153_spill] sm:$0xff] }
 0x249   : > { %v3507_v34 = vadd.f32 %v3506_v14, %v3154_v4  ;;  %v10900_v37 = vmul.f32 0.2, %v10842_v35  ;;  %v3164_v25 = vadd.f32 %v3163_v30, %v10408_v7  ;;  %v3166_v57 = vadd.f32 %v3165_v38, %v10460_v6  ;;  %3388 = vmatmul.mubr.bf16.gmra.mxu0 %v13673_v39 }
 0x24a   : > { %v10902_v54 = vadd.f32 %v3508_v8, %v3156_v51  ;;  %vm4484_vm2 = vcmp.gt.f32.partialorder %v10624_v32, 0.0  ;;  %vm4488_vm5 = vcmp.gt.f32.partialorder %v10651_v21, 0.0  ;;  %vm4496_vm1 = vcmp.gt.f32.partialorder %v10735_v40, 0.0  ;;  %v3169_v8 = vpop.f32.mrf.mxu0  ;;  %3397 = vmatprep.mubr.bf16.mxu0 %v10879_v27  ;;  %v13675_v51 = vld [vmem:[#allocation154_spill] sm:$0xff]  ;;  %v3522_v53 = vpop.f32.mrf.mxu1 }
 0x24b   : > { %v10910_v14 = vmul.f32 0.2, %v10857_v31  ;;  %v2132_v44 = vsel %vm1620_vm9, %v10497_v50, %v10698_v1  ;;  %vm4519_vm10 = vcmp.gt.f32.partialorder %v3507_v34, 0.0  ;;  %v4775_v4 = vmul.f32 0.2, %v3507_v34  ;;  %3741 = vmatmul.mubr.bf16.gmra.mxu1 %v13675_v51 }
 0x24c   : > { %vm4492_vm11 = vcmp.gt.f32.partialorder %v10705_v48, 0.0  ;;  %v10919_v29 = vsel %vm4515_vm15, %v3503_v28, %v4771_v33  ;;  %v10922_v9 = vpack.c.bf16 %v2136_v13, %v2132_v44  ;;  %v3513_v30 = vadd.f32 %v3512_v59, %v3160_v24  ;;  %v3171_v43 = vpop.f32.mrf.mxu0  ;;  %v3524_v33 = vpop.f32.mrf.mxu1 }
 0x24d   : > { %13674 = vst [vmem:[#allocation121_spill] sm:$0xff] %v10919_v29  ;;  %v10924_v26 = vadd.f32 %v3514_v61, %v3162_v10  ;;  %v10927_v38 = vsel %vm4519_vm10, %v3507_v34, %v4775_v4  ;;  %v3517_v50 = vadd.f32 %v3516_v23, %v3164_v25  ;;  %v10929_v1 = vadd.f32 %v3518_v11, %v3166_v57 }
 0x24e   : > { %13676 = vst [vmem:[#allocation143_spill] sm:$0xff] %v10927_v38  ;;  %v3170_v39 = vadd.f32 %v3169_v8, %v10408_v7  ;;  %3750 = vmatprep.mubr.bf16.mxu1 %v10922_v9  ;;  %v10934_v28 = vmul.f32 0.2, %v10895_v63  ;;  %vm4523_vm6 = vcmp.gt.f32.partialorder %v3513_v30, 0.0  ;;  %v4779_v59 = vmul.f32 0.2, %v3513_v30  ;;  %v3173_v13 = vpop.f32.mrf.mxu0  ;;  %v3526_v8 = vpop.f32.mrf.mxu1 }
 0x24f   : > { %vm4500_vm7 = vcmp.gt.f32.partialorder %v10767_v46, 0.0  ;;  %vm4504_vm8 = vcmp.gt.f32.partialorder %v10798_v55, 0.0  ;;  %vm4512_vm9 = vcmp.gt.f32.partialorder %v10857_v31, 0.0  ;;  %v10942_v61 = vmul.f32 0.2, %v10902_v54 }
 0x250   : > { %vm4527_vm12 = vcmp.gt.f32.partialorder %v3517_v50, 0.0  ;;  %v4783_v25 = vmul.f32 0.2, %v3517_v50  ;;  %v10948_v23 = vsel %vm4468_vm13, %v10503_v16, %v10752_v19  ;;  %vm4508_vm3 = vcmp.gt.f32.partialorder %v10842_v35, 0.0  ;;  %v3175_v10 = vpop.f32.mrf.mxu0 }
 0x251   : > { %v10951_v34 = vsel %vm4523_vm6, %v3513_v30, %v4779_v59  ;;  %v10954_v24 = vmul.f32 0.2, %v10924_v26  ;;  %v3523_v57 = vadd.f32 %v3522_v53, %v3170_v39  ;;  %v3172_v11 = vadd.f32 %v3171_v43, %v10460_v6  ;;  %3398 = vmatmul.mubr.bf16.gmra.mxu0 %v10680_v20  ;;  %v3528_v30 = vpop.f32.mrf.mxu1 }
 0x252   : > { %13677 = vst [vmem:[#allocation148_spill] sm:$0xff] %v10951_v34  ;;  %vm4516_vm15 = vcmp.gt.f32.partialorder %v10895_v63, 0.0  ;;  %v10958_v44 = vsel %vm4527_vm12, %v3517_v50, %v4783_v25  ;;  %v3174_v4 = vadd.f32 %v3173_v13, %v10408_v7  ;;  %v10965_v16 = vsel %vm4472_vm4, %v10506_v62, %v10784_v52  ;;  %v13679_v50 = vld [vmem:[#allocation16_spill] sm:$0xff]  ;;  %v13897_v34 = vld [vmem:[#allocation63_spill] sm:$0xff] }
 0x253   : > { %13678 = vst [vmem:[#allocation116_spill] sm:$0xff] %v10958_v44  ;;  %v10971_v19 = vsel %vm4476_vm14, %v10582_v17, %v10787_v42  ;;  %vm4520_vm13 = vcmp.gt.f32.partialorder %v10902_v54, 0.0  ;;  %vm4531_vm10 = vcmp.gt.f32.partialorder %v3523_v57, 0.0  ;;  %v4787_v53 = vmul.f32 0.2, %v3523_v57  ;;  %3793 = vmatprep.mubr.bf16.mxu0 %v13679_v50  ;;  %3751 = vmatmul.mubr.bf16.gmra.mxu1 %v10711_v36 }
 0x254   : > { %v10976_v39 = vadd.f32 %v3524_v33, %v3172_v11  ;;  %vm4524_vm4 = vcmp.gt.f32.partialorder %v10924_v26, 0.0  ;;  %v3527_v62 = vadd.f32 %v3526_v8, %v3174_v4  ;;  %v3176_v52 = vadd.f32 %v3175_v10, %v10460_v6  ;;  %v3179_v10 = vpop.f32.mrf.mxu0  ;;  %v3532_v8 = vpop.f32.mrf.mxu1 }
 0x255   : > { %v10987_v42 = vsel %vm4480_vm0, %v10586_v56, %v10794_v0  ;;  %vm4528_vm14 = vcmp.gt.f32.partialorder %v10929_v1, 0.0  ;;  %v10992_v59 = vmul.f32 0.2, %v10929_v1  ;;  %v10994_v25 = vsel %vm4531_vm10, %v3523_v57, %v4787_v53  ;;  %v13681_v0 = vld [vmem:[#allocation17_spill] sm:$0xff] }
 0x256   : > { %13680 = vst [vmem:[#allocation128_spill] sm:$0xff] %v10994_v25  ;;  %vm4535_vm6 = vcmp.gt.f32.partialorder %v3527_v62, 0.0  ;;  %v4791_v13 = vmul.f32 0.2, %v3527_v62  ;;  %v10999_v11 = vadd.f32 %v3528_v30, %v3176_v52  ;;  %v3180_v56 = vadd.f32 %v3179_v10, %v10408_v7  ;;  %4146 = vmatprep.mubr.bf16.mxu1 %v13681_v0  ;;  %v3181_v57 = vpop.f32.mrf.mxu0 }
 0x257   : > { %v11004_v4 = vmul.f32 0.2, %v10976_v39  ;;  %v11010_v53 = vsel %vm4484_vm2, %v10624_v32, %v10806_v45  ;;  %v11016_v52 = vsel %vm4488_vm5, %v10651_v21, %v10814_v15  ;;  %v11022_v30 = vsel %vm4496_vm1, %v10735_v40, %v10860_v60  ;;  %v6957_v21 = vld [vmem:[#allocation2 + $0x38] sm:$0xff]   ;;  %v3534_v60 = vpop.f32.mrf.mxu1 }
 0x258   : > { %vm4532_vm0 = vcmp.gt.f32.partialorder %v10976_v39, 0.0  ;;  %v11025_v50 = vsel %vm4535_vm6, %v3527_v62, %v4791_v13  ;;  %vm4536_vm12 = vcmp.gt.f32.partialorder %v10999_v11, 0.0  ;;  %v3533_v32 = vadd.f32 %v3532_v8, %v3180_v56  ;;  %v3183_v10 = vpop.f32.mrf.mxu0 }
 0x259   : > { %13682 = vst [vmem:[#allocation126_spill] sm:$0xff] %v11025_v50  ;;  %v11032_v45 = vsel %vm4492_vm11, %v10705_v48, %v10851_v49  ;;  %v3182_v40 = vadd.f32 %v3181_v57, %v10460_v6  ;;  %v4792_v56 = vmul.f32 0.2, %v10999_v11  ;;  %v3184_v48 = vadd.f32 %v3183_v10, %v10408_v7  ;;  %v6958_v49 = vld [vmem:[#allocation2 + $0xb8] sm:$0xff]   ;;  %v3536_v43 = vpop.f32.mrf.mxu1 }
 0x25a   : > { %vm4539_vm2 = vcmp.gt.f32.partialorder %v3533_v32, 0.0  ;;  %v4795_v0 = vmul.f32 0.2, %v3533_v32  ;;  %v3185_v15 = vpop.f32.mrf.mxu0  ;;  %v11047_v57 = vsel %vm4500_vm7, %v10767_v46, %v10870_v58  ;;  %v11053_v13 = vsel %vm4504_vm8, %v10798_v55, %v10873_v47  ;;  %v13688_v58 = vld [vmem:[#allocation25_spill] sm:$0xff] }
 0x25b   : > { %v3535_v8 = vadd.f32 %v3534_v60, %v3182_v40  ;;  %13683 = vst [vmem:[#allocation120_spill] sm:$0xff] %v11047_v57  ;;  %13684 = vst [vmem:[#allocation144_spill] sm:$0xff] %v11053_v13  ;;  %v11059_v10 = vsel %vm4512_vm9, %v10857_v31, %v10910_v14  ;;  %v13686_v40 = vld [vmem:[#allocation10_spill] sm:$0xff]  ;;  %v3537_v60 = vadd.f32 %v3536_v43, %v3184_v48  ;;  %v3538_v47 = vpop.f32.mrf.mxu1  ;;  %v6959_v14 = vld [vmem:[#allocation2 + $0x30] sm:$0xff]  }
 0x25c   : > { %13685 = vst [vmem:[#allocation119_spill] sm:$0xff] %v11059_v10  ;;  %3794 = vmatmul.mubr.bf16.vlgmr.msra.gmra.mxu0 %v13686_v40  ;;  %v3186_v62 = vadd.f32 %v3185_v15, %v10460_v6  ;;  %v11069_v55 = vsel %vm4508_vm3, %v10842_v35, %v10900_v37  ;;  %v11073_v31 = vsel %vm4539_vm2, %v3533_v32, %v4795_v0  ;;  %v13691_v35 = vld [vmem:[#allocation11_spill] sm:$0xff]  ;;  %v3189_v48 = vpop.f32.mrf.mxu0  ;;  %v13692_v32 = vmov 0   ;;  %v13694_v40 = vld [vmem:[#allocation29_spill] sm:$0xff] }
 0x25d   : > { %13687 = vst [vmem:[#allocation141_spill] sm:$0xff] %v11069_v55  ;;  %3803 = vmatprep.mubr.bf16.mxu0 %v13688_v58  ;;  %5627 = vmatpush1.bf16.msra.mxu0 %v6957_v21  ;;  %13689 = vst [vmem:[#allocation108_spill] sm:$0xff] %v11073_v31  ;;  %vm4540_vm5 = vcmp.gt.f32.partialorder %v3535_v8, 0.0  ;;  %v11081_v15 = vsel %vm4516_vm15, %v10895_v63, %v10934_v28  ;;  %vm4543_vm1 = vcmp.gt.f32.partialorder %v3537_v60, 0.0  ;;  %v4799_v37 = vmul.f32 0.2, %v3537_v60 }
 0x25e   : > { %13690 = vst [vmem:[#allocation127_spill] sm:$0xff] %v11081_v15  ;;  %4147 = vmatmul.mubr.bf16.vlgmr.msra.gmra.mxu1 %v13691_v35  ;;  %v3539_v21 = vadd.f32 %v3538_v47, %v3186_v62  ;;  %5628 = vmatprep.subr.bf16.mxu0 %v13692_v32  ;;  %v11089_v0 = vsel %vm4520_vm13, %v10902_v54, %v10942_v61  ;;  %v4796_v58 = vmul.f32 0.2, %v3535_v8  ;;  %v6960_v28 = vld [vmem:[#allocation2 + $0xb0] sm:$0xff]   ;;  %v3542_v61 = vpop.f32.mrf.mxu1  ;;  %v13904_v57 = vld [vmem:[#allocation105_spill] sm:$0xff] }
 0x25f   : > { %13693 = vst [vmem:[#allocation149_spill] sm:$0xff] %v11089_v0  ;;  %4156 = vmatprep.mubr.bf16.mxu1 %v13694_v40  ;;  %5916 = vmatpush1.bf16.msra.mxu1 %v6958_v49  ;;  %v3190_v63 = vadd.f32 %v3189_v48, %v10408_v7  ;;  %v11099_v62 = vsel %vm4524_vm4, %v10924_v26, %v10954_v24  ;;  %v3191_v40 = vpop.f32.mrf.mxu0  ;;  %v6961_v24 = vld [vmem:[#allocation2 + $0x28] sm:$0xff]  }
 0x260   : > { %13695 = vst [vmem:[#allocation150_spill] sm:$0xff] %v11099_v62  ;;  %v11101_v47 = vsel %vm4543_vm1, %v3537_v60, %v4799_v37  ;;  %vm4544_vm11 = vcmp.gt.f32.partialorder %v3539_v21, 0.0  ;;  %v4800_v54 = vmul.f32 0.2, %v3539_v21  ;;  %5917 = vmatprep.subr.bf16.mxu1 %v13692_v32  ;;  %v11108_v49 = vsel %vm4528_vm14, %v10929_v1, %v10992_v59  ;;  %v3544_v37 = vpop.f32.mrf.mxu1  ;;  %v13702_v60 = vld [vmem:[#allocation15_spill] sm:$0xff] }
 0x261   : > { %13696 = vst [vmem:[#allocation145_spill] sm:$0xff] %v11101_v47  ;;  %13697 = vst [vmem:[#allocation151_spill] sm:$0xff] %v11108_v49  ;;  %v3543_v35 = vadd.f32 %v3542_v61, %v3190_v63  ;;  %5629 = vmatpush1.bf16.msra.mxu0 %v6959_v14  ;;  %v3192_v26 = vadd.f32 %v3191_v40, %v10460_v6  ;;  %v3193_v43 = vpop.f32.mrf.mxu0  ;;  %v11119_v1 = vsel %vm4536_vm12, %v10999_v11, %v4792_v56  ;;  %v6962_v61 = vld [vmem:[#allocation2 + $0xa8] sm:$0xff]   ;;  %v6982_v47 = vld [vmem:[#allocation2 + $0xd8] sm:$0xff]  }
 0x262   : > { %5630 = vmatprep.subr.bf16.mxu0 %v13692_v32  ;;  %13698 = vst [vmem:[#allocation146_spill] sm:$0xff] %v11119_v1  ;;  %v11122_v59 = vsel %vm4544_vm11, %v3539_v21, %v4800_v54  ;;  %v3194_v14 = vadd.f32 %v3193_v43, %v10408_v7  ;;  %v11129_v40 = vsel %vm4532_vm0, %v10976_v39, %v11004_v4  ;;  %v3546_v11 = vpop.f32.mrf.mxu1  ;;  %v6963_v4 = vld [vmem:[#allocation2 + $0x20] sm:$0xff]   ;;  %v13896_v1 = vld [vmem:[#allocation142_spill] sm:$0xff] }
 0x263   : > { %13699 = vst [vmem:[#allocation155_spill] sm:$0xff] %v11122_v59  ;;  %v3545_v63 = vadd.f32 %v3544_v37, %v3192_v26  ;;  %5918 = vmatpush1.bf16.msra.mxu1 %v6960_v28  ;;  %13700 = vst [vmem:[#allocation132_spill] sm:$0xff] %v11129_v40  ;;  %v11132_v48 = vsel %vm4540_vm5, %v3535_v8, %v4796_v58  ;;  %v3195_v56 = vpop.f32.mrf.mxu0  ;;  %v13703_v28 = vld [vmem:[#allocation36_spill] sm:$0xff]  ;;  %v4803_v54 = vmul.f32 0.2, %v3543_v35  ;;  %v13704_v8 = vld [vmem:[#allocation18_spill] sm:$0xff] }
 0x264   : > { %13701 = vst [vmem:[#allocation152_spill] sm:$0xff] %v11132_v48  ;;  %3804 = vmatmul.mubr.bf16.gmra.mxu0 %v13702_v60  ;;  %5919 = vmatprep.subr.bf16.mxu1 %v13692_v32  ;;  %v3547_v39 = vadd.f32 %v3546_v11, %v3194_v14  ;;  %vm4547_vm7 = vcmp.gt.f32.partialorder %v3543_v35, 0.0  ;;  %v3196_v58 = vadd.f32 %v3195_v56, %v10460_v6  ;;  %v3548_v26 = vpop.f32.mrf.mxu1  ;;  %v13705_v60 = vld [vmem:[#allocation37_spill] sm:$0xff]  ;;  %v13894_v40 = vld [vmem:[#allocation64_spill] sm:$0xff] }
 0x265   : > { %3813 = vmatprep.mubr.bf16.mxu0 %v13703_v28  ;;  %5631 = vmatpush1.bf16.msra.mxu0 %v6961_v24  ;;  %v3199_v21 = vpop.f32.mrf.mxu0  ;;  %v6964_v43 = vld [vmem:[#allocation2 + $0xa0] sm:$0xff]   ;;  %v4804_v28 = vmul.f32 0.2, %v3545_v63  ;;  %v11147_v14 = vsel %vm4547_vm7, %v3543_v35, %v4803_v54  ;;  %vm4548_vm9 = vcmp.gt.f32.partialorder %v3545_v63, 0.0  ;;  %v6966_v54 = vld [vmem:[#allocation2 + $0x98] sm:$0xff]  }
 0x266   : > { %4157 = vmatmul.mubr.bf16.gmra.mxu1 %v13704_v8  ;;  %5632 = vmatprep.subr.bf16.mxu0 %v13692_v32  ;;  %vm4551_vm8 = vcmp.gt.f32.partialorder %v3547_v39, 0.0  ;;  %v4807_v37 = vmul.f32 0.2, %v3547_v39  ;;  %v3549_v46 = vadd.f32 %v3548_v26, %v3196_v58  ;;  %v3200_v24 = vadd.f32 %v3199_v21, %v10408_v7  ;;  %13706 = vst [vmem:[#allocation156_spill] sm:$0xff] %v11147_v14  ;;  %v3552_v56 = vpop.f32.mrf.mxu1 }
 0x267   : > { %4166 = vmatprep.mubr.bf16.mxu1 %v13705_v60  ;;  %5920 = vmatpush1.bf16.msra.mxu1 %v6962_v61  ;;  %v3201_v8 = vpop.f32.mrf.mxu0  ;;  %v6965_v60 = vld [vmem:[#allocation2 + $0x18] sm:$0xff]  }
 0x268   : > { %5921 = vmatprep.subr.bf16.mxu1 %v13692_v32  ;;  %v11149_v11 = vsel %vm4551_vm8, %v3547_v39, %v4807_v37  ;;  %vm4552_vm3 = vcmp.gt.f32.partialorder %v3549_v46, 0.0  ;;  %v4808_v61 = vmul.f32 0.2, %v3549_v46  ;;  %v3553_v17 = vadd.f32 %v3552_v56, %v3200_v24  ;;  %v3554_v58 = vpop.f32.mrf.mxu1  ;;  %v13708_v39 = vld [vmem:[#allocation22_spill] sm:$0xff]  ;;  %v13711_v24 = vld [vmem:[#allocation12_spill] sm:$0xff] }
 0x269   : > { %13707 = vst [vmem:[#allocation94_spill] sm:$0xff] %v11149_v11  ;;  %5633 = vmatpush1.bf16.msra.mxu0 %v6963_v4  ;;  %v3202_v21 = vadd.f32 %v3201_v8, %v10460_v6  ;;  %v3203_v35 = vpop.f32.mrf.mxu0  ;;  %v11159_v4 = vsel %vm4548_vm9, %v3545_v63, %v4804_v28  ;;  %v13712_v11 = vld [vmem:[#allocation26_spill] sm:$0xff] }
 0x26a   : > { %5634 = vmatprep.subr.bf16.mxu0 %v13692_v32  ;;  %v3204_v26 = vadd.f32 %v3203_v35, %v10408_v7  ;;  %13709 = vst [vmem:[#allocation154_spill] sm:$0xff] %v11159_v4  ;;  %v11161_v37 = vsel %vm4552_vm3, %v3549_v46, %v4808_v61  ;;  %v4811_v56 = vmul.f32 0.2, %v3553_v17  ;;  %v3556_v8 = vpop.f32.mrf.mxu1  ;;  %vm4555_vm15 = vcmp.gt.f32.partialorder %v3553_v17, 0.0  ;;  %v13713_v46 = vld [vmem:[#allocation44_spill] sm:$0xff]  ;;  %v6968_v61 = vld [vmem:[#allocation2 + $0x90] sm:$0xff]  }
 0x26b   : > { %5922 = vmatpush1.bf16.msra.mxu1 %v6964_v43  ;;  %13710 = vst [vmem:[#allocation16_spill] sm:$0xff] %v11161_v37  ;;  %v3555_v33 = vadd.f32 %v3554_v58, %v3202_v21  ;;  %v3205_v14 = vpop.f32.mrf.mxu0  ;;  %v6967_v43 = vld [vmem:[#allocation2 + $0x10] sm:$0xff]  }
 0x26c   : > { %3814 = vmatmul.mubr.bf16.gmra.mxu0 %v13708_v39  ;;  %5923 = vmatprep.subr.bf16.mxu1 %v13692_v32  ;;  %v3557_v35 = vadd.f32 %v3556_v8, %v3204_v26  ;;  %v3206_v63 = vadd.f32 %v3205_v14, %v10460_v6  ;;  %v3558_v28 = vpop.f32.mrf.mxu1  ;;  %v6969_v14 = vld [vmem:[#allocation2 + $0x8] sm:$0xff]  }
 0x26d   : > { %3823 = vmatprep.mubr.bf16.mxu0 %v13711_v24  ;;  %5635 = vmatpush1.bf16.msra.mxu0 %v6965_v60  ;;  %v3209_v58 = vpop.f32.mrf.mxu0  ;;  %v11171_v24 = vsel %vm4555_vm15, %v3553_v17, %v4811_v56  ;;  %vm4556_vm10 = vcmp.gt.f32.partialorder %v3555_v33, 0.0  ;;  %v6970_v56 = vld [vmem:[#allocation2 + $0x88] sm:$0xff]  }
 0x26e   : > { %4167 = vmatmul.mubr.bf16.gmra.mxu1 %v13712_v11  ;;  %5636 = vmatprep.subr.bf16.mxu0 %v13692_v32  ;;  %vm4559_vm13 = vcmp.gt.f32.partialorder %v3557_v35, 0.0  ;;  %v4815_v21 = vmul.f32 0.2, %v3557_v35  ;;  %v3559_v60 = vadd.f32 %v3558_v28, %v3206_v63  ;;  %13714 = vst [vmem:[#allocation17_spill] sm:$0xff] %v11171_v24  ;;  %v4812_v11 = vmul.f32 0.2, %v3555_v33 }
 0x26f   : > { %4176 = vmatprep.mubr.bf16.mxu1 %v13713_v46  ;;  %5924 = vmatpush1.bf16.msra.mxu1 %v6966_v54  ;;  %v3210_v26 = vadd.f32 %v3209_v58, %v10408_v7  ;;  %v3562_v54 = vpop.f32.mrf.mxu1  ;;  %v3211_v39 = vpop.f32.mrf.mxu0  ;;  %v13716_v58 = vld [vmem:[#allocation32_spill] sm:$0xff]  ;;  %v6971_v63 = vld [vmem:[#allocation2] sm:$0xff]  }
 0x270   : > { %5925 = vmatprep.subr.bf16.mxu1 %v13692_v32  ;;  %v11174_v8 = vsel %vm4559_vm13, %v3557_v35, %v4815_v21  ;;  %vm4560_vm4 = vcmp.gt.f32.partialorder %v3559_v60, 0.0  ;;  %v4816_v46 = vmul.f32 0.2, %v3559_v60  ;;  %v3212_v17 = vadd.f32 %v3211_v39, %v10460_v6  ;;  %v13718_v21 = vld [vmem:[#allocation19_spill] sm:$0xff]  ;;  %v13720_v39 = vld [vmem:[#allocation33_spill] sm:$0xff] }
 0x271   : > { %5637 = vmatpush1.bf16.msra.mxu0 %v6967_v43  ;;  %13715 = vst [vmem:[#allocation10_spill] sm:$0xff] %v11174_v8  ;;  %v3563_v28 = vadd.f32 %v3562_v54, %v3210_v26  ;;  %v3564_v43 = vpop.f32.mrf.mxu1  ;;  %v3213_v4 = vpop.f32.mrf.mxu0  ;;  %v11187_v26 = vsel %vm4556_vm10, %v3555_v33, %v4812_v11  ;;  %v13724_v8 = vld [vmem:[#allocation35_spill] sm:$0xff] }
 0x272   : > { %5638 = vmatprep.subr.bf16.mxu0 %v13692_v32  ;;  %v11182_v35 = vsel %vm4560_vm4, %v3559_v60, %v4816_v46  ;;  %v3565_v37 = vadd.f32 %v3564_v43, %v3212_v17  ;;  %v3214_v31 = vadd.f32 %v3213_v4, %v10408_v7  ;;  %13719 = vst [vmem:[#allocation11_spill] sm:$0xff] %v11187_v26  ;;  %v13721_v46 = vld [vmem:[#allocation20_spill] sm:$0xff]  ;;  %v6972_v4 = vld [vmem:[#allocation2 + $0x80] sm:$0xff]  }
 0x273   : > { %5926 = vmatpush1.bf16.msra.mxu1 %v6968_v61  ;;  %13717 = vst [vmem:[#allocation25_spill] sm:$0xff] %v11182_v35  ;;  %v3566_v61 = vpop.f32.mrf.mxu1  ;;  %v3215_v54 = vpop.f32.mrf.mxu0  ;;  %vm4563_vm14 = vcmp.gt.f32.partialorder %v3563_v28, 0.0 }
 0x274   : > { %3824 = vmatmul.mubr.bf16.gmra.mxu0 %v13716_v58  ;;  %5927 = vmatprep.subr.bf16.mxu1 %v13692_v32  ;;  %v4819_v58 = vmul.f32 0.2, %v3563_v28  ;;  %v3567_v17 = vadd.f32 %v3566_v61, %v3214_v31  ;;  %vm4564_vm0 = vcmp.gt.f32.partialorder %v3565_v37, 0.0 }
 0x275   : > { %3833 = vmatprep.mubr.bf16.mxu0 %v13718_v21  ;;  %5639 = vmatpush1.bf16.msra.mxu0 %v6969_v14  ;;  %v3216_v14 = vadd.f32 %v3215_v54, %v10460_v6  ;;  %v3568_v33 = vpop.f32.mrf.mxu1  ;;  %v3219_v43 = vpop.f32.mrf.mxu0  ;;  %v6973_v21 = vld [vmem:[#allocation2 + $0x78] sm:$0xff]  }
 0x276   : > { %4177 = vmatmul.mubr.bf16.gmra.mxu1 %v13720_v39  ;;  %5640 = vmatprep.subr.bf16.mxu0 %v13692_v32  ;;  %vm4567_vm6 = vcmp.gt.f32.partialorder %v3567_v17, 0.0  ;;  %v4823_v11 = vmul.f32 0.2, %v3567_v17  ;;  %v4820_v39 = vmul.f32 0.2, %v3565_v37  ;;  %v3220_v60 = vadd.f32 %v3219_v43, %v10408_v7  ;;  %v13725_v43 = vld [vmem:[#allocation27_spill] sm:$0xff] }
 0x277   : > { %4186 = vmatprep.mubr.bf16.mxu1 %v13721_v46  ;;  %5928 = vmatpush1.bf16.msra.mxu1 %v6970_v56  ;;  %v3569_v24 = vadd.f32 %v3568_v33, %v3216_v14  ;;  %v11198_v31 = vsel %vm4563_vm14, %v3563_v28, %v4819_v58  ;;  %v3572_v61 = vpop.f32.mrf.mxu1  ;;  %v3221_v54 = vpop.f32.mrf.mxu0  ;;  %v6974_v46 = vld [vmem:[#allocation2 + $0xf8] sm:$0xff]  }
 0x278   : > { %5929 = vmatprep.subr.bf16.mxu1 %v13692_v32  ;;  %13722 = vst [vmem:[#allocation29_spill] sm:$0xff] %v11198_v31  ;;  %v11200_v56 = vsel %vm4567_vm6, %v3567_v17, %v4823_v11  ;;  %v3573_v33 = vadd.f32 %v3572_v61, %v3220_v60  ;;  %v3222_v28 = vadd.f32 %v3221_v54, %v10460_v6  ;;  %v6975_v11 = vld [vmem:[#allocation2 + $0x70] sm:$0xff]   ;;  %v13729_v61 = vld [vmem:[#allocation28_spill] sm:$0xff] }
 0x279   : > { %5641 = vmatpush1.bf16.msra.mxu0 %v6971_v63  ;;  %13723 = vst [vmem:[#allocation15_spill] sm:$0xff] %v11200_v56  ;;  %vm4568_vm12 = vcmp.gt.f32.partialorder %v3569_v24, 0.0  ;;  %v4824_v14 = vmul.f32 0.2, %v3569_v24  ;;  %v3574_v58 = vpop.f32.mrf.mxu1  ;;  %v3223_v17 = vpop.f32.mrf.mxu0  ;;  %v11212_v63 = vsel %vm4564_vm0, %v3565_v37, %v4820_v39 }
 0x27a   : > { %5642 = vmatprep.subr.bf16.mxu0 %v13692_v32  ;;  %13727 = vst [vmem:[#allocation36_spill] sm:$0xff] %v11212_v63  ;;  %v3575_v31 = vadd.f32 %v3574_v58, %v3222_v28  ;;  %vm4571_vm2 = vcmp.gt.f32.partialorder %v3573_v33, 0.0  ;;  %v13736_v63 = vld [vmem:[#allocation7_spill] sm:$0xff] }
 0x27b   : > { %5930 = vmatpush1.bf16.msra.mxu1 %v6972_v4  ;;  %v13726_v4 = vld [vmem:[#allocation40_spill] sm:$0xff]  ;;  %v11214_v60 = vsel %vm4568_vm12, %v3569_v24, %v4824_v14  ;;  %v3576_v54 = vpop.f32.mrf.mxu1  ;;  %v3225_v56 = vpop.f32.mrf.mxu0 }
 0x27c   : > { %3834 = vmatmul.mubr.bf16.gmra.mxu0 %v13724_v8  ;;  %5931 = vmatprep.subr.bf16.mxu1 %v13692_v32  ;;  %v3224_v8 = vadd.f32 %v3223_v17, %v10408_v7  ;;  %13728 = vst [vmem:[#allocation18_spill] sm:$0xff] %v11214_v60  ;;  %v3226_v26 = vadd.f32 %v3225_v56, %v10460_v6  ;;  %vm4572_vm1 = vcmp.gt.f32.partialorder %v3575_v31, 0.0 }
 0x27d   : > { %3843 = vmatprep.mubr.bf16.mxu0 %v13725_v43  ;;  %5643 = vmatpush2.bf16.msra.mxu0 %v6973_v21  ;;  %v4827_v43 = vmul.f32 0.2, %v3573_v33  ;;  %v6976_v21 = vld [vmem:[#allocation2 + $0xf0] sm:$0xff]   ;;  %v3578_v37 = vpop.f32.mrf.mxu1  ;;  %v3229_v14 = vpop.f32.mrf.mxu0 }
 0x27e   : > { %4187 = vmatmul.mubr.bf16.gmra.mxu1 %v13726_v4  ;;  %5644 = vmatprep.subr.bf16.mxu0 %v13692_v32  ;;  %v3577_v17 = vadd.f32 %v3576_v54, %v3224_v8  ;;  %v3579_v39 = vadd.f32 %v3578_v37, %v3226_v26  ;;  %v3230_v58 = vadd.f32 %v3229_v14, %v10408_v7  ;;  %v6978_v8 = vld [vmem:[#allocation2 + $0xe8] sm:$0xff]   ;;  %v13731_v54 = vld [vmem:[#allocation45_spill] sm:$0xff] }
 0x27f   : > { %4196 = vmatprep.mubr.bf16.mxu1 %v13729_v61  ;;  %5932 = vmatpush2.bf16.msra.mxu1 %v6974_v46  ;;  %v11222_v28 = vsel %vm4571_vm2, %v3573_v33, %v4827_v43  ;;  %v4828_v46 = vmul.f32 0.2, %v3575_v31  ;;  %v6977_v61 = vld [vmem:[#allocation2 + $0x68] sm:$0xff]   ;;  %v3582_v4 = vpop.f32.mrf.mxu1  ;;  %v3231_v26 = vpop.f32.mrf.mxu0  ;;  %v13734_v14 = vld [vmem:[#allocation13_spill] sm:$0xff] }
 0x280   : > { %5933 = vmatprep.subr.bf16.mxu1 %v13692_v32  ;;  %vm4575_vm5 = vcmp.gt.f32.partialorder %v3577_v17, 0.0  ;;  %v4831_v24 = vmul.f32 0.2, %v3577_v17  ;;  %13730 = vst [vmem:[#allocation37_spill] sm:$0xff] %v11222_v28  ;;  %vm4576_vm11 = vcmp.gt.f32.partialorder %v3579_v39, 0.0  ;;  %v13733_v37 = vld [vmem:[#allocation38_spill] sm:$0xff]  ;;  %v3583_v43 = vadd.f32 %v3582_v4, %v3230_v58 }
 0x281   : > { %5645 = vmatpush2.bf16.msra.mxu0 %v6975_v11  ;;  %v4832_v11 = vmul.f32 0.2, %v3579_v39  ;;  %v11240_v33 = vsel %vm4572_vm1, %v3575_v31, %v4828_v46  ;;  %v13740_v28 = vld [vmem:[#allocation43_spill] sm:$0xff] }
 0x282   : > { %5646 = vmatprep.subr.bf16.mxu0 %v13692_v32  ;;  %v11226_v56 = vsel %vm4575_vm5, %v3577_v17, %v4831_v24  ;;  %v3233_v17 = vpop.f32.mrf.mxu0  ;;  %13737 = vst [vmem:[#allocation26_spill] sm:$0xff] %v11240_v33  ;;  %vm4579_vm7 = vcmp.gt.f32.partialorder %v3583_v43, 0.0 }
 0x283   : > { %5934 = vmatpush2.bf16.msra.mxu1 %v6976_v21  ;;  %13732 = vst [vmem:[#allocation22_spill] sm:$0xff] %v11226_v56  ;;  %v3232_v21 = vadd.f32 %v3231_v26, %v10460_v6  ;;  %v11235_v24 = vsel %vm4576_vm11, %v3579_v39, %v4832_v11  ;;  %v4835_v26 = vmul.f32 0.2, %v3583_v43 }
 0x284   : > { %3844 = vmatmul.mubr.bf16.gmra.mxu0 %v13731_v54  ;;  %5935 = vmatprep.subr.bf16.mxu1 %v13692_v32  ;;  %v3584_v54 = vpop.f32.mrf.mxu1  ;;  %13735 = vst [vmem:[#allocation12_spill] sm:$0xff] %v11235_v24  ;;  %v3235_v58 = vpop.f32.mrf.mxu0 }
 0x285   : > { %3853 = vmatprep.mubr.bf16.mxu0 %v13733_v37  ;;  %5647 = vmatpush2.bf16.msra.mxu0 %v6977_v61  ;;  %v3585_v60 = vadd.f32 %v3584_v54, %v3232_v21  ;;  %v3234_v37 = vadd.f32 %v3233_v17, %v10408_v7  ;;  %v3236_v39 = vadd.f32 %v3235_v58, %v10460_v6  ;;  %v13742_v58 = vld [vmem:[#allocation23_spill] sm:$0xff] }
 0x286   : > { %4197 = vmatmul.mubr.bf16.gmra.mxu1 %v13734_v14  ;;  %5648 = vmatprep.subr.bf16.mxu0 %v13692_v32  ;;  %v3586_v4 = vpop.f32.mrf.mxu1  ;;  %v3239_v21 = vpop.f32.mrf.mxu0  ;;  %v11248_v17 = vsel %vm4579_vm7, %v3583_v43, %v4835_v26 }
 0x287   : > { %4206 = vmatprep.mubr.bf16.mxu1 %v13736_v63  ;;  %5936 = vmatpush2.bf16.msra.mxu1 %v6978_v8  ;;  %v3587_v14 = vadd.f32 %v3586_v4, %v3234_v37  ;;  %v13738_v8 = vld [vmem:[#allocation21_spill] sm:$0xff]  ;;  %v4836_v31 = vmul.f32 0.2, %v3585_v60  ;;  %v3240_v54 = vadd.f32 %v3239_v21, %v10408_v7  ;;  %13739 = vst [vmem:[#allocation44_spill] sm:$0xff] %v11248_v17  ;;  %vm4580_vm9 = vcmp.gt.f32.partialorder %v3585_v60, 0.0 }
 0x288   : > { %5937 = vmatprep.subr.bf16.mxu1 %v13692_v32  ;;  %v3588_v63 = vpop.f32.mrf.mxu1  ;;  %v3241_v4 = vpop.f32.mrf.mxu0  ;;  %v6980_v17 = vld [vmem:[#allocation2 + $0xe0] sm:$0xff]  }
 0x289   : > { %vm4583_vm8 = vcmp.gt.f32.partialorder %v3587_v14, 0.0  ;;  %v4839_v11 = vmul.f32 0.2, %v3587_v14  ;;  %v3589_v46 = vadd.f32 %v3588_v63, %v3236_v39  ;;  %v13743_v39 = vld [vmem:[#allocation14_spill] sm:$0xff]  ;;  %v3242_v43 = vadd.f32 %v3241_v4, %v10460_v6 }
 0x28a   : > { %v3592_v37 = vpop.f32.mrf.mxu1  ;;  %v3243_v63 = vpop.f32.mrf.mxu0 }
 0x28b   : > { %v11251_v61 = vsel %vm4583_vm8, %v3587_v14, %v4839_v11  ;;  %vm4584_vm3 = vcmp.gt.f32.partialorder %v3589_v46, 0.0  ;;  %v3593_v33 = vadd.f32 %v3592_v37, %v3240_v54  ;;  %v11259_v14 = vsel %vm4580_vm9, %v3585_v60, %v4836_v31  ;;  %5938 = vmatpush2.bf16.msra.mxu1 %v6980_v17  ;;  %v13754_v17 = vld [vmem:[#allocation34_spill] sm:$0xff] }
 0x28c   : > { %3854 = vmatmul.mubr.bf16.gmra.mxu0 %v13738_v8  ;;  %13741 = vst [vmem:[#allocation32_spill] sm:$0xff] %v11251_v61  ;;  %v4840_v8 = vmul.f32 0.2, %v3589_v46  ;;  %v3594_v26 = vpop.f32.mrf.mxu1  ;;  %13744 = vst [vmem:[#allocation19_spill] sm:$0xff] %v11259_v14  ;;  %v3245_v35 = vpop.f32.mrf.mxu0  ;;  %v13746_v61 = vld [vmem:[#allocation52_spill] sm:$0xff]  ;;  %5939 = vmatprep.subr.bf16.mxu1 %v13692_v32 }
 0x28d   : > { %3863 = vmatprep.mubr.bf16.mxu0 %v13740_v28  ;;  %v3244_v28 = vadd.f32 %v3243_v63, %v10408_v7  ;;  %v4843_v21 = vmul.f32 0.2, %v3593_v33  ;;  %vm4587_vm15 = vcmp.gt.f32.partialorder %v3593_v33, 0.0  ;;  %v3246_v37 = vadd.f32 %v3245_v35, %v10460_v6 }
 0x28e   : > { %4207 = vmatmul.mubr.bf16.gmra.mxu1 %v13742_v58  ;;  %v11261_v11 = vsel %vm4584_vm3, %v3589_v46, %v4840_v8  ;;  %v3595_v58 = vadd.f32 %v3594_v26, %v3242_v43  ;;  %v3596_v24 = vpop.f32.mrf.mxu1  ;;  %v3249_v46 = vpop.f32.mrf.mxu0  ;;  %v13748_v43 = vld [vmem:[#allocation48_spill] sm:$0xff] }
 0x28f   : > { %4216 = vmatprep.mubr.bf16.mxu1 %v13743_v39  ;;  %13745 = vst [vmem:[#allocation33_spill] sm:$0xff] %v11261_v11  ;;  %v3597_v54 = vadd.f32 %v3596_v24, %v3244_v28  ;;  %v6979_v39 = vld [vmem:[#allocation2 + $0x60] sm:$0xff]   ;;  %v11267_v8 = vsel %vm4587_vm15, %v3593_v33, %v4843_v21  ;;  %v3250_v63 = vadd.f32 %v3249_v46, %v10408_v7  ;;  %v13749_v24 = vld [vmem:[#allocation55_spill] sm:$0xff]  ;;  %v6981_v11 = vld [vmem:[#allocation2 + $0x58] sm:$0xff]  }
 0x290   : > { %v3598_v4 = vpop.f32.mrf.mxu1  ;;  %13747 = vst [vmem:[#allocation20_spill] sm:$0xff] %v11267_v8  ;;  %v4844_v26 = vmul.f32 0.2, %v3595_v58  ;;  %5649 = vmatpush2.bf16.msra.mxu0 %v6979_v39  ;;  %vm4588_vm10 = vcmp.gt.f32.partialorder %v3595_v58, 0.0  ;;  %v3251_v56 = vpop.f32.mrf.mxu0  ;;  %5940 = vmatpush2.bf16.msra.mxu1 %v6982_v47 }
 0x291   : > { %vm4591_vm13 = vcmp.gt.f32.partialorder %v3597_v54, 0.0  ;;  %v4847_v60 = vmul.f32 0.2, %v3597_v54  ;;  %v3599_v31 = vadd.f32 %v3598_v4, %v3246_v37  ;;  %5650 = vmatprep.subr.bf16.mxu0 %v13692_v32  ;;  %v13751_v37 = vld [vmem:[#allocation24_spill] sm:$0xff]  ;;  %v3252_v4 = vadd.f32 %v3251_v56, %v10460_v6  ;;  %5941 = vmatprep.subr.bf16.mxu1 %v13692_v32 }
 0x292   : > { %v3253_v46 = vpop.f32.mrf.mxu0 }
 0x293   : > { %v11272_v35 = vsel %vm4591_vm13, %v3597_v54, %v4847_v60  ;;  %vm4592_vm4 = vcmp.gt.f32.partialorder %v3599_v31, 0.0  ;;  %v4848_v28 = vmul.f32 0.2, %v3599_v31 }
 0x294   : > { %3864 = vmatmul.mubr.bf16.gmra.mxu0 %v13746_v61  ;;  %13750 = vst [vmem:[#allocation35_spill] sm:$0xff] %v11272_v35  ;;  %v3602_v61 = vpop.f32.mrf.mxu1  ;;  %v3255_v14 = vpop.f32.mrf.mxu0 }
 0x295   : > { %3873 = vmatprep.mubr.bf16.mxu0 %v13748_v43  ;;  %v3603_v21 = vadd.f32 %v3602_v61, %v3250_v63  ;;  %v11280_v54 = vsel %vm4592_vm4, %v3599_v31, %v4848_v28  ;;  %v3254_v43 = vadd.f32 %v3253_v46, %v10408_v7  ;;  %v3256_v33 = vadd.f32 %v3255_v14, %v10460_v6  ;;  %v13755_v28 = vld [vmem:[#allocation74_spill] sm:$0xff] }
 0x296   : > { %4217 = vmatmul.mubr.bf16.gmra.mxu1 %v13749_v24  ;;  %v3604_v39 = vpop.f32.mrf.mxu1  ;;  %13752 = vst [vmem:[#allocation27_spill] sm:$0xff] %v11280_v54  ;;  %v11284_v24 = vsel %vm4588_vm10, %v3595_v58, %v4844_v26  ;;  %v13756_v58 = vld [vmem:[#allocation56_spill] sm:$0xff]  ;;  %5651 = vmatpush2.bf16.msra.mxu0 %v6981_v11 }
 0x297   : > { %4226 = vmatprep.mubr.bf16.mxu1 %v13751_v37  ;;  %v3605_v60 = vadd.f32 %v3604_v39, %v3252_v4  ;;  %13753 = vst [vmem:[#allocation40_spill] sm:$0xff] %v11284_v24  ;;  %v4851_v61 = vmul.f32 0.2, %v3603_v21  ;;  %vm4595_vm14 = vcmp.gt.f32.partialorder %v3603_v21, 0.0  ;;  %v3259_v39 = vpop.f32.mrf.mxu0  ;;  %5652 = vmatprep.subr.bf16.mxu0 %v13692_v32 }
 0x298   : > { %v3606_v37 = vpop.f32.mrf.mxu1  ;;  %v3260_v8 = vadd.f32 %v3259_v39, %v10408_v7 }
 0x299   : > { %v3607_v56 = vadd.f32 %v3606_v37, %v3254_v43  ;;  %v4852_v26 = vmul.f32 0.2, %v3605_v60  ;;  %v11293_v63 = vsel %vm4595_vm14, %v3603_v21, %v4851_v61  ;;  %v13758_v43 = vld [vmem:[#allocation30_spill] sm:$0xff]  ;;  %vm4596_vm0 = vcmp.gt.f32.partialorder %v3605_v60, 0.0 }
 0x29a   : > { %v3608_v31 = vpop.f32.mrf.mxu1  ;;  %13757 = vst [vmem:[#allocation28_spill] sm:$0xff] %v11293_v63 }
 0x29b   : > { %vm4599_vm6 = vcmp.gt.f32.partialorder %v3607_v56, 0.0  ;;  %v4855_v4 = vmul.f32 0.2, %v3607_v56  ;;  %v3609_v46 = vadd.f32 %v3608_v31, %v3256_v33  ;;  %v11302_v61 = vsel %vm4596_vm0, %v3605_v60, %v4852_v26 }
 0x29c   : > { %3874 = vmatmul.mubr.bf16.gmra.mxu0 %v13754_v17  ;;  %v3612_v14 = vpop.f32.mrf.mxu1  ;;  %v3261_v17 = vpop.f32.mrf.mxu0  ;;  %13760 = vst [vmem:[#allocation38_spill] sm:$0xff] %v11302_v61 }
 0x29d   : > { %3883 = vmatprep.mubr.bf16.mxu0 %v13755_v28  ;;  %v11296_v37 = vsel %vm4599_vm6, %v3607_v56, %v4855_v4  ;;  %vm4600_vm12 = vcmp.gt.f32.partialorder %v3609_v46, 0.0  ;;  %v4856_v35 = vmul.f32 0.2, %v3609_v46  ;;  %v3613_v24 = vadd.f32 %v3612_v14, %v3260_v8  ;;  %v13762_v8 = vld [vmem:[#allocation41_spill] sm:$0xff]  ;;  %v13766_v28 = vld [vmem:[#allocation42_spill] sm:$0xff] }
 0x29e   : > { %4227 = vmatmul.mubr.bf16.gmra.mxu1 %v13756_v58  ;;  %13759 = vst [vmem:[#allocation45_spill] sm:$0xff] %v11296_v37  ;;  %v3262_v58 = vadd.f32 %v3261_v17, %v10460_v6  ;;  %v3614_v33 = vpop.f32.mrf.mxu1  ;;  %v3263_v31 = vpop.f32.mrf.mxu0 }
 0x29f   : > { %4236 = vmatprep.mubr.bf16.mxu1 %v13758_v43  ;;  %v3264_v21 = vadd.f32 %v3263_v31, %v10408_v7  ;;  %v11304_v39 = vsel %vm4600_vm12, %v3609_v46, %v4856_v35  ;;  %v4859_v56 = vmul.f32 0.2, %v3613_v24  ;;  %vm4603_vm2 = vcmp.gt.f32.partialorder %v3613_v24, 0.0  ;;  %v13763_v31 = vld [vmem:[#allocation39_spill] sm:$0xff]  ;;  %v13764_v35 = vld [vmem:[#allocation9_spill] sm:$0xff] }
 0x2a0   : > { %13761 = vst [vmem:[#allocation13_spill] sm:$0xff] %v11304_v39  ;;  %v3615_v4 = vadd.f32 %v3614_v33, %v3262_v58  ;;  %v3616_v43 = vpop.f32.mrf.mxu1  ;;  %v3265_v54 = vpop.f32.mrf.mxu0 }
 0x2a1   : > { %v3617_v14 = vadd.f32 %v3616_v43, %v3264_v21  ;;  %v3266_v17 = vadd.f32 %v3265_v54, %v10460_v6  ;;  %v11313_v33 = vsel %vm4603_vm2, %v3613_v24, %v4859_v56 }
 0x2a2   : > { %v3618_v60 = vpop.f32.mrf.mxu1  ;;  %v3269_v58 = vpop.f32.mrf.mxu0  ;;  %13765 = vst [vmem:[#allocation7_spill] sm:$0xff] %v11313_v33  ;;  %vm4604_vm1 = vcmp.gt.f32.partialorder %v3615_v4, 0.0 }
 0x2a3   : > { %vm4607_vm5 = vcmp.gt.f32.partialorder %v3617_v14, 0.0  ;;  %v4863_v26 = vmul.f32 0.2, %v3617_v14  ;;  %v3619_v46 = vadd.f32 %v3618_v60, %v3266_v17  ;;  %v3270_v21 = vadd.f32 %v3269_v58, %v10408_v7  ;;  %v13770_v58 = vld [vmem:[#allocation46_spill] sm:$0xff] }
 0x2a4   : > { %3884 = vmatmul.mubr.bf16.gmra.mxu0 %v13762_v8  ;;  %v4860_v8 = vmul.f32 0.2, %v3615_v4  ;;  %v3622_v43 = vpop.f32.mrf.mxu1 }
 0x2a5   : > { %3893 = vmatprep.mubr.bf16.mxu0 %v13763_v31  ;;  %v11317_v54 = vsel %vm4607_vm5, %v3617_v14, %v4863_v26  ;;  %vm4608_vm11 = vcmp.gt.f32.partialorder %v3619_v46, 0.0  ;;  %v4864_v11 = vmul.f32 0.2, %v3619_v46  ;;  %v3271_v31 = vpop.f32.mrf.mxu0  ;;  %v3623_v24 = vadd.f32 %v3622_v43, %v3270_v21  ;;  %v13771_v21 = vld [vmem:[#allocation65_spill] sm:$0xff] }
 0x2a6   : > { %4237 = vmatmul.mubr.bf16.gmra.mxu1 %v13764_v35  ;;  %13767 = vst [vmem:[#allocation21_spill] sm:$0xff] %v11317_v54  ;;  %v3272_v56 = vadd.f32 %v3271_v31, %v10460_v6  ;;  %v11326_v26 = vsel %vm4604_vm1, %v3615_v4, %v4860_v8  ;;  %v13772_v31 = vld [vmem:[#allocation47_spill] sm:$0xff] }
 0x2a7   : > { %4246 = vmatprep.mubr.bf16.mxu1 %v13766_v28  ;;  %v3624_v28 = vpop.f32.mrf.mxu1  ;;  %v3273_v60 = vpop.f32.mrf.mxu0  ;;  %v11323_v35 = vsel %vm4608_vm11, %v3619_v46, %v4864_v11  ;;  %13769 = vst [vmem:[#allocation23_spill] sm:$0xff] %v11326_v26  ;;  %v4867_v17 = vmul.f32 0.2, %v3623_v24  ;;  %vm4611_vm7 = vcmp.gt.f32.partialorder %v3623_v24, 0.0 }
 0x2a8   : > { %13768 = vst [vmem:[#allocation43_spill] sm:$0xff] %v11323_v35  ;;  %v3625_v47 = vadd.f32 %v3624_v28, %v3272_v56  ;;  %v3274_v14 = vadd.f32 %v3273_v60, %v10408_v7  ;;  %v13773_v56 = vld [vmem:[#allocation67_spill] sm:$0xff] }
 0x2a9   : > { %v3626_v63 = vpop.f32.mrf.mxu1  ;;  %v3275_v37 = vpop.f32.mrf.mxu0  ;;  %v11336_v61 = vsel %vm4611_vm7, %v3623_v24, %v4867_v17  ;;  %v13779_v35 = vld [vmem:[#allocation71_spill] sm:$0xff] }
 0x2aa   : > { %v3627_v43 = vadd.f32 %v3626_v63, %v3274_v14  ;;  %v3276_v46 = vadd.f32 %v3275_v37, %v10460_v6  ;;  %v4868_v28 = vmul.f32 0.2, %v3625_v47  ;;  %13774 = vst [vmem:[#allocation14_spill] sm:$0xff] %v11336_v61  ;;  %vm4612_vm9 = vcmp.gt.f32.partialorder %v3625_v47, 0.0 }
 0x2ab   : > { %v3628_v11 = vpop.f32.mrf.mxu1  ;;  %v3279_v8 = vpop.f32.mrf.mxu0 }
 0x2ac   : > { %3894 = vmatmul.mubr.bf16.gmra.mxu0 %v13770_v58  ;;  %vm4615_vm8 = vcmp.gt.f32.partialorder %v3627_v43, 0.0  ;;  %v4871_v4 = vmul.f32 0.2, %v3627_v43  ;;  %v3629_v60 = vadd.f32 %v3628_v11, %v3276_v46  ;;  %v3280_v58 = vadd.f32 %v3279_v8, %v10408_v7  ;;  %v6983_v46 = vld [vmem:[#allocation2 + $0x50] sm:$0xff]   ;;  %v13776_v8 = vld [vmem:[#allocation49_spill] sm:$0xff] }
 0x2ad   : > { %3903 = vmatprep.mubr.bf16.mxu0 %v13771_v21  ;;  %v3632_v63 = vpop.f32.mrf.mxu1  ;;  %v3281_v14 = vpop.f32.mrf.mxu0  ;;  %v6984_v11 = vld [vmem:[#allocation2 + $0xd0] sm:$0xff]   ;;  %v11345_v24 = vsel %vm4612_vm9, %v3625_v47, %v4868_v28  ;;  %5653 = vmatpush2.bf16.msra.mxu0 %v6983_v46  ;;  %v13781_v47 = vld [vmem:[#allocation72_spill] sm:$0xff] }
 0x2ae   : > { %4247 = vmatmul.mubr.bf16.gmra.mxu1 %v13772_v31  ;;  %v11338_v21 = vsel %vm4615_vm8, %v3627_v43, %v4871_v4  ;;  %vm4616_vm3 = vcmp.gt.f32.partialorder %v3629_v60, 0.0  ;;  %v4872_v31 = vmul.f32 0.2, %v3629_v60  ;;  %v3282_v33 = vadd.f32 %v3281_v14, %v10460_v6  ;;  %13777 = vst [vmem:[#allocation48_spill] sm:$0xff] %v11345_v24  ;;  %v13780_v14 = vld [vmem:[#allocation68_spill] sm:$0xff]  ;;  %5654 = vmatprep.subr.bf16.mxu0 %v13692_v32 }
 0x2af   : > { %4256 = vmatprep.mubr.bf16.mxu1 %v13773_v56  ;;  %13775 = vst [vmem:[#allocation52_spill] sm:$0xff] %v11338_v21  ;;  %v3633_v56 = vadd.f32 %v3632_v63, %v3280_v58  ;;  %v3634_v54 = vpop.f32.mrf.mxu1  ;;  %v3283_v26 = vpop.f32.mrf.mxu0  ;;  %5942 = vmatpush2.bf16.msra.mxu1 %v6984_v11  ;;  %v13788_v24 = vld [vmem:[#allocation76_spill] sm:$0xff] }
 0x2b0   : > { %v3284_v17 = vadd.f32 %v3283_v26, %v10408_v7  ;;  %v11347_v43 = vsel %vm4616_vm3, %v3629_v60, %v4872_v31  ;;  %v3635_v37 = vadd.f32 %v3634_v54, %v3282_v33  ;;  %5943 = vmatprep.subr.bf16.mxu1 %v13692_v32 }
 0x2b1   : > { %13778 = vst [vmem:[#allocation55_spill] sm:$0xff] %v11347_v43  ;;  %v4875_v4 = vmul.f32 0.2, %v3633_v56  ;;  %v3636_v61 = vpop.f32.mrf.mxu1  ;;  %v3285_v58 = vpop.f32.mrf.mxu0  ;;  %vm4619_vm15 = vcmp.gt.f32.partialorder %v3633_v56, 0.0 }
 0x2b2   : > { %v3286_v26 = vadd.f32 %v3285_v58, %v10460_v6  ;;  %v4876_v31 = vmul.f32 0.2, %v3635_v37  ;;  %vm4620_vm10 = vcmp.gt.f32.partialorder %v3635_v37, 0.0 }
 0x2b3   : > { %v3638_v28 = vpop.f32.mrf.mxu1  ;;  %v11357_v60 = vsel %vm4619_vm15, %v3633_v56, %v4875_v4 }
 0x2b4   : > { %3904 = vmatmul.mubr.bf16.gmra.mxu0 %v13776_v8  ;;  %v3637_v8 = vadd.f32 %v3636_v61, %v3284_v17  ;;  %v3639_v54 = vadd.f32 %v3638_v28, %v3286_v26  ;;  %13782 = vst [vmem:[#allocation24_spill] sm:$0xff] %v11357_v60  ;;  %v13784_v28 = vld [vmem:[#allocation73_spill] sm:$0xff]  ;;  %v11371_v21 = vsel %vm4620_vm10, %v3635_v37, %v4876_v31 }
 0x2b5   : > { %3913 = vmatprep.mubr.bf16.mxu0 %v13779_v35  ;;  %v3289_v35 = vpop.f32.mrf.mxu0  ;;  %v3642_v58 = vpop.f32.mrf.mxu1  ;;  %13787 = vst [vmem:[#allocation56_spill] sm:$0xff] %v11371_v21 }
 0x2b6   : > { %4257 = vmatmul.mubr.bf16.gmra.mxu1 %v13780_v14  ;;  %vm4623_vm13 = vcmp.gt.f32.partialorder %v3637_v8, 0.0  ;;  %v4879_v33 = vmul.f32 0.2, %v3637_v8  ;;  %v3290_v46 = vadd.f32 %v3289_v35, %v10408_v7  ;;  %vm4624_vm4 = vcmp.gt.f32.partialorder %v3639_v54, 0.0  ;;  %v13786_v35 = vld [vmem:[#allocation54_spill] sm:$0xff] }
 0x2b7   : > { %4266 = vmatprep.mubr.bf16.mxu1 %v13781_v47  ;;  %v4880_v17 = vmul.f32 0.2, %v3639_v54  ;;  %v3291_v14 = vpop.f32.mrf.mxu0  ;;  %v3644_v56 = vpop.f32.mrf.mxu1 }
 0x2b8   : > { %v11360_v61 = vsel %vm4623_vm13, %v3637_v8, %v4879_v33  ;;  %v3643_v47 = vadd.f32 %v3642_v58, %v3290_v46  ;;  %v3292_v26 = vadd.f32 %v3291_v14, %v10460_v6 }
 0x2b9   : > { %13783 = vst [vmem:[#allocation34_spill] sm:$0xff] %v11360_v61  ;;  %v3293_v4 = vpop.f32.mrf.mxu0  ;;  %v11366_v63 = vsel %vm4624_vm4, %v3639_v54, %v4880_v17  ;;  %v3646_v11 = vpop.f32.mrf.mxu1 }
 0x2ba   : > { %13785 = vst [vmem:[#allocation74_spill] sm:$0xff] %v11366_v63  ;;  %v3645_v8 = vadd.f32 %v3644_v56, %v3292_v26  ;;  %v3294_v33 = vadd.f32 %v3293_v4, %v10408_v7  ;;  %v4883_v14 = vmul.f32 0.2, %v3643_v47  ;;  %vm4627_vm14 = vcmp.gt.f32.partialorder %v3643_v47, 0.0  ;;  %v13792_v63 = vld [vmem:[#allocation80_spill] sm:$0xff] }
 0x2bb   : > { %v3295_v46 = vpop.f32.mrf.mxu0  ;;  %v3648_v26 = vpop.f32.mrf.mxu1 }
 0x2bc   : > { %3914 = vmatmul.mubr.bf16.gmra.mxu0 %v13784_v28  ;;  %v13789_v28 = vld [vmem:[#allocation31_spill] sm:$0xff]  ;;  %v3647_v54 = vadd.f32 %v3646_v11, %v3294_v33  ;;  %v3296_v17 = vadd.f32 %v3295_v46, %v10460_v6  ;;  %v4884_v37 = vmul.f32 0.2, %v3645_v8  ;;  %vm4628_vm0 = vcmp.gt.f32.partialorder %v3645_v8, 0.0  ;;  %v6986_v11 = vld [vmem:[#allocation2 + $0xc8] sm:$0xff]  }
 0x2bd   : > { %3923 = vmatprep.mubr.bf16.mxu0 %v13786_v35  ;;  %v3299_v4 = vpop.f32.mrf.mxu0  ;;  %v11379_v35 = vsel %vm4627_vm14, %v3643_v47, %v4883_v14  ;;  %v3652_v58 = vpop.f32.mrf.mxu1  ;;  %5944 = vmatpush2.bf16.msra.mxu1 %v6986_v11 }
 0x2be   : > { %4267 = vmatmul.mubr.bf16.gmra.mxu1 %v13788_v24  ;;  %vm4631_vm6 = vcmp.gt.f32.partialorder %v3647_v54, 0.0  ;;  %v4887_v56 = vmul.f32 0.2, %v3647_v54  ;;  %v3649_v31 = vadd.f32 %v3648_v26, %v3296_v17  ;;  %v3300_v24 = vadd.f32 %v3299_v4, %v10408_v7  ;;  %13790 = vst [vmem:[#allocation30_spill] sm:$0xff] %v11379_v35  ;;  %v13793_v17 = vld [vmem:[#allocation8_spill] sm:$0xff]  ;;  %5945 = vmatprep.subr.bf16.mxu1 %v13692_v32 }
 0x2bf   : > { %4276 = vmatprep.mubr.bf16.mxu1 %v13789_v28  ;;  %v3301_v61 = vpop.f32.mrf.mxu0  ;;  %v6985_v28 = vld [vmem:[#allocation2 + $0x48] sm:$0xff]   ;;  %v3654_v14 = vpop.f32.mrf.mxu1  ;;  %v11392_v4 = vsel %vm4628_vm0, %v3645_v8, %v4884_v37 }
 0x2c0   : > { %v11381_v60 = vsel %vm4631_vm6, %v3647_v54, %v4887_v56  ;;  %vm4632_vm12 = vcmp.gt.f32.partialorder %v3649_v31, 0.0  ;;  %v4888_v46 = vmul.f32 0.2, %v3649_v31  ;;  %v3653_v21 = vadd.f32 %v3652_v58, %v3300_v24  ;;  %5655 = vmatpush2.bf16.msra.mxu0 %v6985_v28  ;;  %v13794_v54 = vld [vmem:[#allocation81_spill] sm:$0xff]  ;;  %13795 = vst [vmem:[#allocation39_spill] sm:$0xff] %v11392_v4 }
 0x2c1   : > { %13791 = vst [vmem:[#allocation41_spill] sm:$0xff] %v11381_v60  ;;  %v3302_v47 = vadd.f32 %v3301_v61, %v10460_v6  ;;  %v3303_v26 = vpop.f32.mrf.mxu0  ;;  %5656 = vmatprep.subr.bf16.mxu0 %v13692_v32 }
 0x2c2   : > { %v3304_v56 = vadd.f32 %v3303_v26, %v10408_v7  ;;  %v11394_v33 = vsel %vm4632_vm12, %v3649_v31, %v4888_v46  ;;  %v4891_v58 = vmul.f32 0.2, %v3653_v21  ;;  %vm4635_vm2 = vcmp.gt.f32.partialorder %v3653_v21, 0.0 }
 0x2c3   : > { %13796 = vst [vmem:[#allocation9_spill] sm:$0xff] %v11394_v33  ;;  %v3655_v24 = vadd.f32 %v3654_v14, %v3302_v47  ;;  %v3305_v61 = vpop.f32.mrf.mxu0 }
 0x2c4   : > { %3924 = vmatmul.mubr.bf16.gmra.mxu0 %v13792_v63  ;;  %v13797_v63 = vld [vmem:[#allocation60_spill] sm:$0xff]  ;;  %v3306_v26 = vadd.f32 %v3305_v61, %v10460_v6  ;;  %v11401_v35 = vsel %vm4635_vm2, %v3653_v21, %v4891_v58 }
 0x2c5   : > { %3933 = vmatprep.mubr.bf16.mxu0 %v13793_v17  ;;  %v3656_v17 = vpop.f32.mrf.mxu1  ;;  %v3309_v46 = vpop.f32.mrf.mxu0  ;;  %13798 = vst [vmem:[#allocation42_spill] sm:$0xff] %v11401_v35  ;;  %v4892_v47 = vmul.f32 0.2, %v3655_v24  ;;  %vm4636_vm1 = vcmp.gt.f32.partialorder %v3655_v24, 0.0  ;;  %v13802_v58 = vld [vmem:[#allocation88_spill] sm:$0xff] }
 0x2c6   : > { %4277 = vmatmul.mubr.bf16.gmra.mxu1 %v13794_v54  ;;  %v3657_v54 = vadd.f32 %v3656_v17, %v3304_v56  ;;  %v3310_v14 = vadd.f32 %v3309_v46, %v10408_v7  ;;  %v13800_v17 = vld [vmem:[#allocation62_spill] sm:$0xff] }
 0x2c7   : > { %4286 = vmatprep.mubr.bf16.mxu1 %v13797_v63  ;;  %v3658_v8 = vpop.f32.mrf.mxu1  ;;  %v3311_v61 = vpop.f32.mrf.mxu0  ;;  %v11417_v4 = vsel %vm4636_vm1, %v3655_v24, %v4892_v47  ;;  %v13806_v47 = vld [vmem:[#allocation97_spill] sm:$0xff] }
 0x2c8   : > { %vm4639_vm5 = vcmp.gt.f32.partialorder %v3657_v54, 0.0  ;;  %v4895_v37 = vmul.f32 0.2, %v3657_v54  ;;  %v3659_v31 = vadd.f32 %v3658_v8, %v3306_v26  ;;  %v13801_v26 = vld [vmem:[#allocation86_spill] sm:$0xff]  ;;  %v3312_v21 = vadd.f32 %v3311_v61, %v10460_v6  ;;  %13805 = vst [vmem:[#allocation47_spill] sm:$0xff] %v11417_v4 }
 0x2c9   : > { %v3662_v56 = vpop.f32.mrf.mxu1  ;;  %v3313_v46 = vpop.f32.mrf.mxu0 }
 0x2ca   : > { %v11404_v11 = vsel %vm4639_vm5, %v3657_v54, %v4895_v37  ;;  %vm4640_vm11 = vcmp.gt.f32.partialorder %v3659_v31, 0.0  ;;  %v4896_v63 = vmul.f32 0.2, %v3659_v31  ;;  %v3663_v28 = vadd.f32 %v3662_v56, %v3310_v14  ;;  %v13804_v37 = vld [vmem:[#allocation87_spill] sm:$0xff] }
 0x2cb   : > { %13799 = vst [vmem:[#allocation46_spill] sm:$0xff] %v11404_v11  ;;  %v3664_v8 = vpop.f32.mrf.mxu1  ;;  %v3315_v14 = vpop.f32.mrf.mxu0 }
 0x2cc   : > { %3934 = vmatmul.mubr.bf16.gmra.mxu0 %v13800_v17  ;;  %v11412_v54 = vsel %vm4640_vm11, %v3659_v31, %v4896_v63  ;;  %v3665_v60 = vadd.f32 %v3664_v8, %v3312_v21  ;;  %v3314_v17 = vadd.f32 %v3313_v46, %v10408_v7  ;;  %v4899_v61 = vmul.f32 0.2, %v3663_v28  ;;  %v6987_v21 = vld [vmem:[#allocation2 + $0x40] sm:$0xff]  }
 0x2cd   : > { %3943 = vmatprep.mubr.bf16.mxu0 %v13801_v26  ;;  %13803 = vst [vmem:[#allocation65_spill] sm:$0xff] %v11412_v54  ;;  %v3666_v32 = vpop.f32.mrf.mxu1  ;;  %vm4643_vm7 = vcmp.gt.f32.partialorder %v3663_v28, 0.0  ;;  %v6988_v8 = vld [vmem:[#allocation2 + $0xc0] sm:$0xff]   ;;  %5657 = vmatpush2.bf16.msra.mxu0 %v6987_v21 }
 0x2ce   : > { %4287 = vmatmul.mubr.bf16.gmra.mxu1 %v13802_v58  ;;  %v3667_v26 = vadd.f32 %v3666_v32, %v3314_v17  ;;  %v3316_v58 = vadd.f32 %v3315_v14, %v10460_v6  ;;  %v4900_v46 = vmul.f32 0.2, %v3665_v60  ;;  %v11424_v11 = vsel %vm4643_vm7, %v3663_v28, %v4899_v61  ;;  %v13809_v17 = vld [vmem:[#allocation70_spill] sm:$0xff] }
 0x2cf   : > { %4296 = vmatprep.mubr.bf16.mxu1 %v13804_v37  ;;  %v3668_v31 = vpop.f32.mrf.mxu1  ;;  %v3319_v37 = vpop.f32.mrf.mxu0  ;;  %13807 = vst [vmem:[#allocation67_spill] sm:$0xff] %v11424_v11  ;;  %vm4644_vm9 = vcmp.gt.f32.partialorder %v3665_v60, 0.0  ;;  %5946 = vmatpush2.bf16.msra.mxu1 %v6988_v8 }
 0x2d0   : > { %vm4647_vm8 = vcmp.gt.f32.partialorder %v3667_v26, 0.0  ;;  %v4903_v63 = vmul.f32 0.2, %v3667_v26  ;;  %v3669_v35 = vadd.f32 %v3668_v31, %v3316_v58  ;;  %v3320_v24 = vadd.f32 %v3319_v37, %v10408_v7  ;;  %v13810_v31 = vld [vmem:[#allocation98_spill] sm:$0xff]  ;;  %v13811_v37 = vld [vmem:[#allocation95_spill] sm:$0xff] }
 0x2d1   : > { %v3672_v32 = vpop.f32.mrf.mxu1  ;;  %v3321_v14 = vpop.f32.mrf.mxu0 }
 0x2d2   : > { %v11426_v56 = vsel %vm4647_vm8, %v3667_v26, %v4903_v63  ;;  %vm4648_vm3 = vcmp.gt.f32.partialorder %v3669_v35, 0.0  ;;  %v4904_v54 = vmul.f32 0.2, %v3669_v35  ;;  %v3673_v58 = vadd.f32 %v3672_v32, %v3320_v24 }
 0x2d3   : > { %13808 = vst [vmem:[#allocation49_spill] sm:$0xff] %v11426_v56  ;;  %v3322_v28 = vadd.f32 %v3321_v14, %v10460_v6  ;;  %v3674_v61 = vpop.f32.mrf.mxu1  ;;  %v3323_v26 = vpop.f32.mrf.mxu0 }
 0x2d4   : > { %3944 = vmatmul.mubr.bf16.gmra.mxu0 %v13806_v47  ;;  %v3324_v63 = vadd.f32 %v3323_v26, %v10408_v7  ;;  %v11436_v47 = vsel %vm4644_vm9, %v3665_v60, %v4900_v46  ;;  %v11438_v21 = vsel %vm4648_vm3, %v3669_v35, %v4904_v54  ;;  %vm4651_vm15 = vcmp.gt.f32.partialorder %v3673_v58, 0.0  ;;  %v13814_v60 = vld [vmem:[#allocation99_spill] sm:$0xff] }
 0x2d5   : > { %3953 = vmatprep.mubr.bf16.mxu0 %v13809_v17  ;;  %13812 = vst [vmem:[#allocation71_spill] sm:$0xff] %v11436_v47  ;;  %13813 = vst [vmem:[#allocation68_spill] sm:$0xff] %v11438_v21  ;;  %v4907_v17 = vmul.f32 0.2, %v3673_v58  ;;  %v3675_v4 = vadd.f32 %v3674_v61, %v3322_v28  ;;  %v3676_v11 = vpop.f32.mrf.mxu1  ;;  %v3325_v24 = vpop.f32.mrf.mxu0  ;;  %v13816_v28 = vld [vmem:[#allocation112_spill] sm:$0xff] }
 0x2d6   : > { %4297 = vmatmul.mubr.bf16.gmra.mxu1 %v13810_v31  ;;  %v3677_v31 = vadd.f32 %v3676_v11, %v3324_v63  ;;  %v3326_v14 = vadd.f32 %v3325_v24, %v10460_v6  ;;  %v13818_v24 = vld [vmem:[#allocation100_spill] sm:$0xff] }
 0x2d7   : > { %4306 = vmatprep.mubr.bf16.mxu1 %v13811_v37  ;;  %v3678_v37 = vpop.f32.mrf.mxu1  ;;  %v3329_v56 = vpop.f32.mrf.mxu0  ;;  %v11444_v35 = vsel %vm4651_vm15, %v3673_v58, %v4907_v17  ;;  %v4908_v54 = vmul.f32 0.2, %v3675_v4  ;;  %vm4652_vm10 = vcmp.gt.f32.partialorder %v3675_v4, 0.0  ;;  %v13819_v58 = vld [vmem:[#allocation61_spill] sm:$0xff] }
 0x2d8   : > { %vm4655_vm13 = vcmp.gt.f32.partialorder %v3677_v31, 0.0  ;;  %v4911_v8 = vmul.f32 0.2, %v3677_v31  ;;  %v3679_v26 = vadd.f32 %v3678_v37, %v3326_v14  ;;  %13815 = vst [vmem:[#allocation72_spill] sm:$0xff] %v11444_v35  ;;  %v3330_v46 = vadd.f32 %v3329_v56, %v10408_v7  ;;  %v13825_v35 = vld [vmem:[#allocation79_spill] sm:$0xff] }
 0x2d9   : > { %v3682_v63 = vpop.f32.mrf.mxu1  ;;  %v3331_v32 = vpop.f32.mrf.mxu0  ;;  %v11459_v47 = vsel %vm4652_vm10, %v3675_v4, %v4908_v54  ;;  %v13823_v4 = vld [vmem:[#allocation117_spill] sm:$0xff] }
 0x2da   : > { %v11448_v61 = vsel %vm4655_vm13, %v3677_v31, %v4911_v8  ;;  %vm4656_vm4 = vcmp.gt.f32.partialorder %v3679_v26, 0.0  ;;  %v4912_v11 = vmul.f32 0.2, %v3679_v26  ;;  %v3683_v37 = vadd.f32 %v3682_v63, %v3330_v46  ;;  %13821 = vst [vmem:[#allocation76_spill] sm:$0xff] %v11459_v47 }
 0x2db   : > { %13817 = vst [vmem:[#allocation73_spill] sm:$0xff] %v11448_v61  ;;  %v3332_v17 = vadd.f32 %v3331_v32, %v10460_v6  ;;  %v3684_v56 = vpop.f32.mrf.mxu1  ;;  %v13827_v61 = vld [vmem:[#allocation85_spill] sm:$0xff] }
 0x2dc   : > { %3954 = vmatmul.mubr.bf16.gmra.mxu0 %v13814_v60  ;;  %v3333_v60 = vpop.f32.mrf.mxu0  ;;  %vm4659_vm14 = vcmp.gt.f32.partialorder %v3683_v37, 0.0 }
 0x2dd   : > { %3963 = vmatprep.mubr.bf16.mxu0 %v13816_v28  ;;  %v11455_v28 = vsel %vm4656_vm4, %v3679_v26, %v4912_v11  ;;  %v3685_v31 = vadd.f32 %v3684_v56, %v3332_v17  ;;  %v3334_v8 = vadd.f32 %v3333_v60, %v10408_v7  ;;  %v3686_v21 = vpop.f32.mrf.mxu1  ;;  %v13822_v26 = vld [vmem:[#allocation78_spill] sm:$0xff] }
 0x2de   : > { %4307 = vmatmul.mubr.bf16.gmra.mxu1 %v13818_v24  ;;  %13820 = vst [vmem:[#allocation54_spill] sm:$0xff] %v11455_v28  ;;  %v4915_v24 = vmul.f32 0.2, %v3683_v37  ;;  %v3335_v33 = vpop.f32.mrf.mxu0  ;;  %v13835_v28 = vld [vmem:[#allocation107_spill] sm:$0xff] }
 0x2df   : > { %4316 = vmatprep.mubr.bf16.mxu1 %v13819_v58  ;;  %v3687_v63 = vadd.f32 %v3686_v21, %v3334_v8  ;;  %v3336_v32 = vadd.f32 %v3335_v33, %v10460_v6  ;;  %v3688_v58 = vpop.f32.mrf.mxu1  ;;  %v4916_v21 = vmul.f32 0.2, %v3685_v31  ;;  %vm4660_vm0 = vcmp.gt.f32.partialorder %v3685_v31, 0.0 }
 0x2e0   : > { %v3339_v14 = vpop.f32.mrf.mxu0  ;;  %v11467_v54 = vsel %vm4659_vm14, %v3683_v37, %v4915_v24 }
 0x2e1   : > { %vm4663_vm6 = vcmp.gt.f32.partialorder %v3687_v63, 0.0  ;;  %v4919_v11 = vmul.f32 0.2, %v3687_v63  ;;  %v3340_v17 = vadd.f32 %v3339_v14, %v10408_v7  ;;  %13824 = vst [vmem:[#allocation31_spill] sm:$0xff] %v11467_v54  ;;  %v3689_v56 = vadd.f32 %v3688_v58, %v3336_v32  ;;  %v3692_v60 = vpop.f32.mrf.mxu1  ;;  %v13830_v54 = vld [vmem:[#allocation102_spill] sm:$0xff] }
 0x2e2   : > { %v3341_v46 = vpop.f32.mrf.mxu0 }
 0x2e3   : > { %v11470_v8 = vsel %vm4663_vm6, %v3687_v63, %v4919_v11  ;;  %v3693_v33 = vadd.f32 %v3692_v60, %v3340_v17  ;;  %vm4664_vm12 = vcmp.gt.f32.partialorder %v3689_v56, 0.0  ;;  %v4920_v37 = vmul.f32 0.2, %v3689_v56  ;;  %v3694_v24 = vpop.f32.mrf.mxu1 }
 0x2e4   : > { %3964 = vmatmul.mubr.bf16.gmra.mxu0 %v13822_v26  ;;  %13826 = vst [vmem:[#allocation80_spill] sm:$0xff] %v11470_v8  ;;  %v3342_v26 = vadd.f32 %v3341_v46, %v10460_v6  ;;  %v3343_v32 = vpop.f32.mrf.mxu0  ;;  %v11479_v17 = vsel %vm4660_vm0, %v3685_v31, %v4916_v21  ;;  %v13831_v8 = vld [vmem:[#allocation84_spill] sm:$0xff]  ;;  %v13833_v21 = vld [vmem:[#allocation82_spill] sm:$0xff] }
 0x2e5   : > { %3973 = vmatprep.mubr.bf16.mxu0 %v13823_v4  ;;  %v4923_v4 = vmul.f32 0.2, %v3693_v33  ;;  %v3696_v47 = vpop.f32.mrf.mxu1  ;;  %v11477_v11 = vsel %vm4664_vm12, %v3689_v56, %v4920_v37  ;;  %vm4667_vm2 = vcmp.gt.f32.partialorder %v3693_v33, 0.0  ;;  %13829 = vst [vmem:[#allocation81_spill] sm:$0xff] %v11479_v17 }
 0x2e6   : > { %4317 = vmatmul.mubr.bf16.gmra.mxu1 %v13825_v35  ;;  %v3695_v58 = vadd.f32 %v3694_v24, %v3342_v26  ;;  %v3344_v35 = vadd.f32 %v3343_v32, %v10408_v7  ;;  %v3345_v63 = vpop.f32.mrf.mxu0  ;;  %13828 = vst [vmem:[#allocation8_spill] sm:$0xff] %v11477_v11  ;;  %v13843_v11 = vld [vmem:[#allocation109_spill] sm:$0xff] }
 0x2e7   : > { %4326 = vmatprep.mubr.bf16.mxu1 %v13827_v61  ;;  %v3346_v46 = vadd.f32 %v3345_v63, %v10460_v6  ;;  %v3698_v60 = vpop.f32.mrf.mxu1  ;;  %v11487_v56 = vsel %vm4667_vm2, %v3693_v33, %v4923_v4 }
 0x2e8   : > { %v3697_v61 = vadd.f32 %v3696_v47, %v3344_v35  ;;  %v3349_v14 = vpop.f32.mrf.mxu0  ;;  %13832 = vst [vmem:[#allocation60_spill] sm:$0xff] %v11487_v56  ;;  %v4924_v35 = vmul.f32 0.2, %v3695_v58  ;;  %vm4668_vm1 = vcmp.gt.f32.partialorder %v3695_v58, 0.0  ;;  %v13838_v56 = vld [vmem:[#allocation66_spill] sm:$0xff] }
 0x2e9   : > { %v3350_v32 = vadd.f32 %v3349_v14, %v10408_v7  ;;  %v3699_v47 = vadd.f32 %v3698_v60, %v3346_v46  ;;  %v3702_v31 = vpop.f32.mrf.mxu1 }
 0x2ea   : > { %vm4671_vm5 = vcmp.gt.f32.partialorder %v3697_v61, 0.0  ;;  %v4927_v24 = vmul.f32 0.2, %v3697_v61  ;;  %v3351_v37 = vpop.f32.mrf.mxu0 }
 0x2eb   : > { %v3352_v26 = vadd.f32 %v3351_v37, %v10460_v6  ;;  %vm4672_vm11 = vcmp.gt.f32.partialorder %v3699_v47, 0.0  ;;  %v3704_v33 = vpop.f32.mrf.mxu1 }
 0x2ec   : > { %3974 = vmatmul.mubr.bf16.gmra.mxu0 %v13830_v54  ;;  %v11490_v63 = vsel %vm4671_vm5, %v3697_v61, %v4927_v24  ;;  %v3703_v54 = vadd.f32 %v3702_v31, %v3350_v32  ;;  %v3353_v4 = vpop.f32.mrf.mxu0  ;;  %v11499_v32 = vsel %vm4668_vm1, %v3695_v58, %v4924_v35  ;;  %v13841_v35 = vld [vmem:[#allocation93_spill] sm:$0xff] }
 0x2ed   : > { %3983 = vmatprep.mubr.bf16.mxu0 %v13831_v8  ;;  %13834 = vst [vmem:[#allocation62_spill] sm:$0xff] %v11490_v63  ;;  %v4928_v8 = vmul.f32 0.2, %v3699_v47  ;;  %v3705_v46 = vadd.f32 %v3704_v33, %v3352_v26  ;;  %v3354_v60 = vadd.f32 %v3353_v4, %v10408_v7  ;;  %v3706_v17 = vpop.f32.mrf.mxu1  ;;  %13837 = vst [vmem:[#allocation88_spill] sm:$0xff] %v11499_v32  ;;  %v13839_v63 = vld [vmem:[#allocation51_spill] sm:$0xff] }
 0x2ee   : > { %4327 = vmatmul.mubr.bf16.gmra.mxu1 %v13833_v21  ;;  %v4931_v21 = vmul.f32 0.2, %v3703_v54  ;;  %v3355_v61 = vpop.f32.mrf.mxu0  ;;  %vm4675_vm7 = vcmp.gt.f32.partialorder %v3703_v54, 0.0 }
 0x2ef   : > { %4336 = vmatprep.mubr.bf16.mxu1 %v13835_v28  ;;  %v11497_v24 = vsel %vm4672_vm11, %v3699_v47, %v4928_v8  ;;  %v3707_v28 = vadd.f32 %v3706_v17, %v3354_v60  ;;  %v3356_v31 = vadd.f32 %v3355_v61, %v10460_v6  ;;  %v3708_v37 = vpop.f32.mrf.mxu1  ;;  %v4932_v60 = vmul.f32 0.2, %v3705_v46 }
 0x2f0   : > { %13836 = vst [vmem:[#allocation86_spill] sm:$0xff] %v11497_v24  ;;  %v3359_v14 = vpop.f32.mrf.mxu0  ;;  %v11507_v47 = vsel %vm4675_vm7, %v3703_v54, %v4931_v21  ;;  %vm4676_vm9 = vcmp.gt.f32.partialorder %v3705_v46, 0.0  ;;  %v13851_v24 = vld [vmem:[#allocation57_spill] sm:$0xff] }
 0x2f1   : > { %vm4679_vm8 = vcmp.gt.f32.partialorder %v3707_v28, 0.0  ;;  %v4935_v33 = vmul.f32 0.2, %v3707_v28  ;;  %v3360_v4 = vadd.f32 %v3359_v14, %v10408_v7  ;;  %13840 = vst [vmem:[#allocation87_spill] sm:$0xff] %v11507_v47  ;;  %v3709_v17 = vadd.f32 %v3708_v37, %v3356_v31  ;;  %v13846_v47 = vld [vmem:[#allocation69_spill] sm:$0xff] }
 0x2f2   : > { %v3712_v58 = vpop.f32.mrf.mxu1  ;;  %v3361_v8 = vpop.f32.mrf.mxu0 }
 0x2f3   : > { %v11510_v61 = vsel %vm4679_vm8, %v3707_v28, %v4935_v33  ;;  %v3362_v26 = vadd.f32 %v3361_v8, %v10460_v6  ;;  %vm4680_vm3 = vcmp.gt.f32.partialorder %v3709_v17, 0.0 }
 0x2f4   : > { %3984 = vmatmul.mubr.bf16.gmra.mxu0 %v13838_v56  ;;  %13842 = vst [vmem:[#allocation97_spill] sm:$0xff] %v11510_v61  ;;  %v3713_v56 = vadd.f32 %v3712_v58, %v3360_v4  ;;  %v3714_v54 = vpop.f32.mrf.mxu1  ;;  %v3363_v21 = vpop.f32.mrf.mxu0  ;;  %v11519_v4 = vsel %vm4676_vm9, %v3705_v46, %v4932_v60  ;;  %v13847_v61 = vld [vmem:[#allocation83_spill] sm:$0xff]  ;;  %v13849_v60 = vld [vmem:[#allocation96_spill] sm:$0xff] }
 0x2f5   : > { %3993 = vmatprep.mubr.bf16.mxu0 %v13839_v63  ;;  %v4936_v63 = vmul.f32 0.2, %v3709_v17  ;;  %v3715_v31 = vadd.f32 %v3714_v54, %v3362_v26  ;;  %v3364_v37 = vadd.f32 %v3363_v21, %v10408_v7  ;;  %13845 = vst [vmem:[#allocation98_spill] sm:$0xff] %v11519_v4 }
 0x2f6   : > { %4337 = vmatmul.mubr.bf16.gmra.mxu1 %v13841_v35  ;;  %v4939_v35 = vmul.f32 0.2, %v3713_v56  ;;  %v3716_v32 = vpop.f32.mrf.mxu1  ;;  %v3365_v28 = vpop.f32.mrf.mxu0  ;;  %vm4683_vm15 = vcmp.gt.f32.partialorder %v3713_v56, 0.0 }
 0x2f7   : > { %4346 = vmatprep.mubr.bf16.mxu1 %v13843_v11  ;;  %v11517_v33 = vsel %vm4680_vm3, %v3709_v17, %v4936_v63  ;;  %v3717_v11 = vadd.f32 %v3716_v32, %v3364_v37  ;;  %v3366_v58 = vadd.f32 %v3365_v28, %v10460_v6  ;;  %v4940_v37 = vmul.f32 0.2, %v3715_v31 }
 0x2f8   : > { %13844 = vst [vmem:[#allocation70_spill] sm:$0xff] %v11517_v33  ;;  %v3718_v8 = vpop.f32.mrf.mxu1  ;;  %v3369_v14 = vpop.f32.mrf.mxu0  ;;  %v11527_v17 = vsel %vm4683_vm15, %v3713_v56, %v4939_v35  ;;  %vm4684_vm10 = vcmp.gt.f32.partialorder %v3715_v31, 0.0  ;;  %v13859_v33 = vld [vmem:[#allocation114_spill] sm:$0xff] }
 0x2f9   : > { %vm4687_vm13 = vcmp.gt.f32.partialorder %v3717_v11, 0.0  ;;  %v4943_v54 = vmul.f32 0.2, %v3717_v11  ;;  %v3370_v21 = vadd.f32 %v3369_v14, %v10408_v7  ;;  %13848 = vst [vmem:[#allocation95_spill] sm:$0xff] %v11527_v17  ;;  %v3719_v32 = vadd.f32 %v3718_v8, %v3366_v58  ;;  %v13854_v17 = vld [vmem:[#allocation77_spill] sm:$0xff] }
 0x2fa   : > { %v3371_v63 = vpop.f32.mrf.mxu0 }
 0x2fb   : > { %v3722_v46 = vpop.f32.mrf.mxu1  ;;  %v11530_v28 = vsel %vm4687_vm13, %v3717_v11, %v4943_v54  ;;  %v3372_v26 = vadd.f32 %v3371_v63, %v10460_v6  ;;  %vm4688_vm4 = vcmp.gt.f32.partialorder %v3719_v32, 0.0 }
 0x2fc   : > { %3994 = vmatmul.mubr.bf16.gmra.mxu0 %v13846_v47  ;;  %13850 = vst [vmem:[#allocation99_spill] sm:$0xff] %v11530_v28  ;;  %v3723_v47 = vadd.f32 %v3722_v46, %v3370_v21  ;;  %v3373_v35 = vpop.f32.mrf.mxu0  ;;  %v11539_v21 = vsel %vm4684_vm10, %v3715_v31, %v4940_v37  ;;  %v13855_v28 = vld [vmem:[#allocation59_spill] sm:$0xff]  ;;  %v13857_v37 = vld [vmem:[#allocation53_spill] sm:$0xff] }
 0x2fd   : > { %4003 = vmatprep.mubr.bf16.mxu0 %v13847_v61  ;;  %v4944_v61 = vmul.f32 0.2, %v3719_v32  ;;  %v3724_v56 = vpop.f32.mrf.mxu1  ;;  %v3374_v8 = vadd.f32 %v3373_v35, %v10408_v7  ;;  %13853 = vst [vmem:[#allocation100_spill] sm:$0xff] %v11539_v21 }
 0x2fe   : > { %4347 = vmatmul.mubr.bf16.gmra.mxu1 %v13849_v60  ;;  %v3725_v58 = vadd.f32 %v3724_v56, %v3372_v26  ;;  %v4947_v60 = vmul.f32 0.2, %v3723_v47  ;;  %v3375_v11 = vpop.f32.mrf.mxu0  ;;  %vm4691_vm14 = vcmp.gt.f32.partialorder %v3723_v47, 0.0 }
 0x2ff   : > { %4356 = vmatprep.mubr.bf16.mxu1 %v13851_v24  ;;  %v3726_v4 = vpop.f32.mrf.mxu1  ;;  %v11537_v54 = vsel %vm4688_vm4, %v3719_v32, %v4944_v61  ;;  %v3376_v46 = vadd.f32 %v3375_v11, %v10460_v6 }
 0x300   : > { %13852 = vst [vmem:[#allocation112_spill] sm:$0xff] %v11537_v54  ;;  %v3727_v24 = vadd.f32 %v3726_v4, %v3374_v8  ;;  %v3379_v14 = vpop.f32.mrf.mxu0  ;;  %v11547_v32 = vsel %vm4691_vm14, %v3723_v47, %v4947_v60  ;;  %v4948_v8 = vmul.f32 0.2, %v3725_v58  ;;  %vm4692_vm0 = vcmp.gt.f32.partialorder %v3725_v58, 0.0  ;;  %v13867_v54 = vld [vmem:[#allocation122_spill] sm:$0xff] }
 0x301   : > { %v3728_v63 = vpop.f32.mrf.mxu1  ;;  %v3380_v35 = vadd.f32 %v3379_v14, %v10408_v7  ;;  %13856 = vst [vmem:[#allocation61_spill] sm:$0xff] %v11547_v32  ;;  %v13862_v32 = vld [vmem:[#allocation115_spill] sm:$0xff] }
 0x302   : > { %vm4695_vm6 = vcmp.gt.f32.partialorder %v3727_v24, 0.0  ;;  %v4951_v56 = vmul.f32 0.2, %v3727_v24  ;;  %v3729_v4 = vadd.f32 %v3728_v63, %v3376_v46  ;;  %v3381_v61 = vpop.f32.mrf.mxu0 }
 0x303   : > { %v3732_v31 = vpop.f32.mrf.mxu1  ;;  %v3382_v26 = vadd.f32 %v3381_v61, %v10460_v6 }
 0x304   : > { %4004 = vmatmul.mubr.bf16.gmra.mxu0 %v13854_v17  ;;  %v11550_v11 = vsel %vm4695_vm6, %v3727_v24, %v4951_v56  ;;  %v3733_v17 = vadd.f32 %v3732_v31, %v3380_v35  ;;  %vm4696_vm12 = vcmp.gt.f32.partialorder %v3729_v4, 0.0  ;;  %v3383_v60 = vpop.f32.mrf.mxu0  ;;  %v11559_v35 = vsel %vm4692_vm0, %v3725_v58, %v4948_v8  ;;  %v13865_v8 = vld [vmem:[#allocation75_spill] sm:$0xff] }
 0x305   : > { %4013 = vmatprep.mubr.bf16.mxu0 %v13855_v28  ;;  %13858 = vst [vmem:[#allocation78_spill] sm:$0xff] %v11550_v11  ;;  %v4952_v28 = vmul.f32 0.2, %v3729_v4  ;;  %v3734_v47 = vpop.f32.mrf.mxu1  ;;  %v3384_v63 = vadd.f32 %v3383_v60, %v10408_v7  ;;  %13861 = vst [vmem:[#allocation79_spill] sm:$0xff] %v11559_v35  ;;  %v13863_v11 = vld [vmem:[#allocation89_spill] sm:$0xff] }
 0x306   : > { %4357 = vmatmul.mubr.bf16.gmra.mxu1 %v13857_v37  ;;  %v3735_v46 = vadd.f32 %v3734_v47, %v3382_v26  ;;  %v4955_v37 = vmul.f32 0.2, %v3733_v17  ;;  %v3385_v24 = vpop.f32.mrf.mxu0  ;;  %vm4699_vm2 = vcmp.gt.f32.partialorder %v3733_v17, 0.0 }
 0x307   : > { %4366 = vmatprep.mubr.bf16.mxu1 %v13859_v33  ;;  %v3736_v21 = vpop.f32.mrf.mxu1  ;;  %v11557_v56 = vsel %vm4696_vm12, %v3729_v4, %v4952_v28  ;;  %v3386_v31 = vadd.f32 %v3385_v24, %v10460_v6 }
 0x308   : > { %13860 = vst [vmem:[#allocation117_spill] sm:$0xff] %v11557_v56  ;;  %v3737_v33 = vadd.f32 %v3736_v21, %v3384_v63  ;;  %v11567_v4 = vsel %vm4699_vm2, %v3733_v17, %v4955_v37  ;;  %v4956_v63 = vmul.f32 0.2, %v3735_v46  ;;  %vm4700_vm1 = vcmp.gt.f32.partialorder %v3735_v46, 0.0  ;;  %v13875_v56 = vld [vmem:[#allocation103_spill] sm:$0xff] }
 0x309   : > { %v3738_v61 = vpop.f32.mrf.mxu1  ;;  %v3389_v14 = vpop.f32.mrf.mxu0  ;;  %13864 = vst [vmem:[#allocation85_spill] sm:$0xff] %v11567_v4  ;;  %v13870_v4 = vld [vmem:[#allocation123_spill] sm:$0xff] }
 0x30a   : > { %vm4703_vm5 = vcmp.gt.f32.partialorder %v3737_v33, 0.0  ;;  %v4959_v47 = vmul.f32 0.2, %v3737_v33  ;;  %v3390_v60 = vadd.f32 %v3389_v14, %v10408_v7  ;;  %v3739_v21 = vadd.f32 %v3738_v61, %v3386_v31 }
 0x30b   : > { %v3742_v58 = vpop.f32.mrf.mxu1  ;;  %v3391_v28 = vpop.f32.mrf.mxu0 }
 0x30c   : > { %4014 = vmatmul.mubr.bf16.gmra.mxu0 %v13862_v32  ;;  %v11570_v24 = vsel %vm4703_vm5, %v3737_v33, %v4959_v47  ;;  %v3743_v32 = vadd.f32 %v3742_v58, %v3390_v60  ;;  %v3392_v26 = vadd.f32 %v3391_v28, %v10460_v6  ;;  %vm4704_vm11 = vcmp.gt.f32.partialorder %v3739_v21, 0.0 }
 0x30d   : > { %4023 = vmatprep.mubr.bf16.mxu0 %v13863_v11  ;;  %13866 = vst [vmem:[#allocation102_spill] sm:$0xff] %v11570_v24  ;;  %v4960_v11 = vmul.f32 0.2, %v3739_v21  ;;  %v3744_v17 = vpop.f32.mrf.mxu1  ;;  %v3393_v37 = vpop.f32.mrf.mxu0  ;;  %v11579_v60 = vsel %vm4700_vm1, %v3735_v46, %v4956_v63  ;;  %v13871_v24 = vld [vmem:[#allocation147_spill] sm:$0xff]  ;;  %v13873_v63 = vld [vmem:[#allocation124_spill] sm:$0xff] }
 0x30e   : > { %4367 = vmatmul.mubr.bf16.gmra.mxu1 %v13865_v8  ;;  %v3745_v31 = vadd.f32 %v3744_v17, %v3392_v26  ;;  %v3394_v61 = vadd.f32 %v3393_v37, %v10408_v7  ;;  %v4963_v8 = vmul.f32 0.2, %v3743_v32  ;;  %vm4707_vm7 = vcmp.gt.f32.partialorder %v3743_v32, 0.0  ;;  %13869 = vst [vmem:[#allocation82_spill] sm:$0xff] %v11579_v60 }
 0x30f   : > { %4376 = vmatprep.mubr.bf16.mxu1 %v13867_v54  ;;  %v3746_v35 = vpop.f32.mrf.mxu1  ;;  %v3395_v33 = vpop.f32.mrf.mxu0  ;;  %v11577_v47 = vsel %vm4704_vm11, %v3739_v21, %v4960_v11 }
 0x310   : > { %13868 = vst [vmem:[#allocation84_spill] sm:$0xff] %v11577_v47  ;;  %v3747_v54 = vadd.f32 %v3746_v35, %v3394_v61  ;;  %v3396_v58 = vadd.f32 %v3395_v33, %v10460_v6  ;;  %v11587_v21 = vsel %vm4707_vm7, %v3743_v32, %v4963_v8  ;;  %v4964_v61 = vmul.f32 0.2, %v3745_v31 }
 0x311   : > { %v3748_v28 = vpop.f32.mrf.mxu1  ;;  %v3399_v14 = vpop.f32.mrf.mxu0  ;;  %13872 = vst [vmem:[#allocation107_spill] sm:$0xff] %v11587_v21  ;;  %vm4708_vm9 = vcmp.gt.f32.partialorder %v3745_v31, 0.0  ;;  %v13878_v21 = vld [vmem:[#allocation104_spill] sm:$0xff] }
 0x312   : > { %vm4711_vm8 = vcmp.gt.f32.partialorder %v3747_v54, 0.0  ;;  %v4967_v17 = vmul.f32 0.2, %v3747_v54  ;;  %v3400_v37 = vadd.f32 %v3399_v14, %v10408_v7  ;;  %v3749_v35 = vadd.f32 %v3748_v28, %v3396_v58 }
 0x313   : > { %v3752_v46 = vpop.f32.mrf.mxu1  ;;  %v3401_v11 = vpop.f32.mrf.mxu0 }
 0x314   : > { %4024 = vmatmul.mubr.bf16.gmra.mxu0 %v13870_v4  ;;  %v11590_v33 = vsel %vm4711_vm8, %v3747_v54, %v4967_v17  ;;  %v3753_v4 = vadd.f32 %v3752_v46, %v3400_v37  ;;  %v3402_v26 = vadd.f32 %v3401_v11, %v10460_v6  ;;  %vm4712_vm3 = vcmp.gt.f32.partialorder %v3749_v35, 0.0 }
 0x315   : > { %4033 = vmatprep.mubr.bf16.mxu0 %v13871_v24  ;;  %13874 = vst [vmem:[#allocation66_spill] sm:$0xff] %v11590_v33  ;;  %v4968_v24 = vmul.f32 0.2, %v3749_v35  ;;  %v3754_v32 = vpop.f32.mrf.mxu1  ;;  %v3403_v8 = vpop.f32.mrf.mxu0 }
 0x316   : > { %4377 = vmatmul.mubr.bf16.gmra.mxu1 %v13873_v63  ;;  %v3755_v58 = vadd.f32 %v3754_v32, %v3402_v26  ;;  %v3404_v28 = vadd.f32 %v3403_v8, %v10408_v7  ;;  %v4971_v17 = vmul.f32 0.2, %v3753_v4  ;;  %vm4715_vm15 = vcmp.gt.f32.partialorder %v3753_v4, 0.0  ;;  %v13886_v26 = vld [vmem:[#allocation130_spill] sm:$0xff] }
 0x317   : > { %4386 = vmatprep.mubr.bf16.mxu1 %v13875_v56  ;;  %v3756_v63 = vpop.f32.mrf.mxu1  ;;  %v3405_v60 = vpop.f32.mrf.mxu0  ;;  %v11597_v54 = vsel %vm4712_vm3, %v3749_v35, %v4968_v24  ;;  %v11599_v56 = vsel %vm4708_vm9, %v3745_v31, %v4964_v61  ;;  %v13879_v31 = vld [vmem:[#allocation90_spill] sm:$0xff] }
 0x318   : > { %13876 = vst [vmem:[#allocation51_spill] sm:$0xff] %v11597_v54  ;;  %v3757_v37 = vadd.f32 %v3756_v63, %v3404_v28  ;;  %13877 = vst [vmem:[#allocation93_spill] sm:$0xff] %v11599_v56  ;;  %v3406_v46 = vadd.f32 %v3405_v60, %v10460_v6  ;;  %v11613_v6 = vsel %vm4715_vm15, %v3753_v4, %v4971_v17  ;;  %v4972_v60 = vmul.f32 0.2, %v3755_v58 }
 0x319   : > { %v3758_v11 = vpop.f32.mrf.mxu1  ;;  %13880 = vst [vmem:[#allocation109_spill] sm:$0xff] %v11613_v6  ;;  %vm4716_vm10 = vcmp.gt.f32.partialorder %v3755_v58, 0.0 }
 0x31a   : > { %vm4719_vm13 = vcmp.gt.f32.partialorder %v3757_v37, 0.0  ;;  %v4975_v7 = vmul.f32 0.2, %v3757_v37  ;;  %v3759_v35 = vadd.f32 %v3758_v11, %v3406_v46  ;;  %v11628_v17 = vsel %vm4716_vm10, %v3755_v58, %v4972_v60 }
 0x31b   : > { %13884 = vst [vmem:[#allocation96_spill] sm:$0xff] %v11628_v17  ;;  %v13889_v17 = vld [vmem:[#allocation134_spill] sm:$0xff] }
 0x31c   : > { %v11602_v14 = vpop.f32.mrf.mxu0  ;;  %4034 = vmatmul.mubr.bf16.gmra.mxu0 %v13878_v21  ;;  %v11615_v32 = vsel %vm4719_vm13, %v3757_v37, %v4975_v7  ;;  %v13882_v21 = vld [vmem:[#allocation131_spill] sm:$0xff]  ;;  %vm4720_vm4 = vcmp.gt.f32.partialorder %v3759_v35, 0.0 }
 0x31d   : > { %4043 = vmatprep.mubr.bf16.mxu0 %v10448_v5  ;;  %13881 = vst [vmem:[#allocation69_spill] sm:$0xff] %v11615_v32  ;;  %v4976_v5 = vmul.f32 0.2, %v3759_v35  ;;  %v13888_v32 = vld [vmem:[#allocation50_spill] sm:$0xff] }
 0x31e   : > { %v11608_v24 = vpop.f32.mrf.mxu1  ;;  %4387 = vmatmul.mubr.bf16.gmra.mxu1 %v13879_v31  ;;  %v11611_v61 = vpop.f32.mrf.mxu0  ;;  %v13885_v31 = vld [vmem:[#allocation129_spill] sm:$0xff] }
 0x31f   : > { %4396 = vmatprep.mubr.bf16.mxu1 %v13882_v21  ;;  %v11626_v4 = vsel %vm4720_vm4, %v3759_v35, %v4976_v5 }
 0x320   : > { %v11620_v28 = vpop.f32.mrf.mxu1  ;;  %v11622_v63 = vpop.f32.mrf.mxu0  ;;  %13883 = vst [vmem:[#allocation83_spill] sm:$0xff] %v11626_v4  ;;  %v13890_v4 = vld [vmem:[#allocation138_spill] sm:$0xff] }
 0x322   : > { %v11624_v46 = vpop.f32.mrf.mxu1  ;;  %v3801_v11 = vpop.f32.mrf.mxu0 }
 0x324   : > { %v11630_v37 = vpop.f32.mrf.mxu1  ;;  %v11632_v7 = vpop.f32.mrf.mxu0  ;;  %4044 = vmatmul.mubr.bf16.gmra.mxu0 %v13885_v31 }
 0x325   : > { %4053 = vmatprep.mubr.bf16.mxu0 %v10500_v12  ;;  %v13887_v12 = vld [vmem:[#allocation6_spill] sm:$0xff] }
 0x326   : > { %v11638_v8 = vpop.f32.mrf.mxu1  ;;  %4397 = vmatmul.mubr.bf16.gmra.mxu1 %v13886_v26  ;;  %v11641_v6 = vpop.f32.mrf.mxu0 }
 0x327   : > { %4406 = vmatprep.mubr.bf16.mxu1 %v10549_v2 }
 0x328   : > { %v11644_v58 = vpop.f32.mrf.mxu1  ;;  %v11646_v35 = vpop.f32.mrf.mxu0 }
 0x32a   : > { %v11648_v60 = vpop.f32.mrf.mxu1  ;;  %v3811_v5 = vpop.f32.mrf.mxu0 }
 0x32c   : > { %v11650_v31 = vpop.f32.mrf.mxu1  ;;  %v11652_v21 = vpop.f32.mrf.mxu0  ;;  %4054 = vmatmul.mubr.bf16.gmra.mxu0 %v13887_v12 }
 0x32d   : > { %4063 = vmatprep.mubr.bf16.mxu0 %v13888_v32 }
 0x32e   : > { %v11656_v26 = vpop.f32.mrf.mxu1  ;;  %4407 = vmatmul.mubr.bf16.gmra.mxu1 %v13889_v17  ;;  %v11659_v2 = vpop.f32.mrf.mxu0  ;;  %v13891_v17 = vld [vmem:[#allocation113_spill] sm:$0xff] }
 0x32f   : > { %4416 = vmatprep.mubr.bf16.mxu1 %v13890_v4 }
 0x330   : > { %v11662_v33 = vpop.f32.mrf.mxu1  ;;  %v11664_v56 = vpop.f32.mrf.mxu0 }
 0x332   : > { %v11666_v54 = vpop.f32.mrf.mxu1  ;;  %v11668_v47 = vpop.f32.mrf.mxu0 }
 0x334   : > { %v11670_v43 = vpop.f32.mrf.mxu1  ;;  %v11672_v12 = vpop.f32.mrf.mxu0  ;;  %4064 = vmatmul.mubr.bf16.gmra.mxu0 %v13643_v22 }
 0x335   : > { %4073 = vmatprep.mubr.bf16.mxu0 %v10670_v18  ;;  %v13893_v18 = vld [vmem:[#allocation125_spill] sm:$0xff] }
 0x336   : > { %v11676_v32 = vpop.f32.mrf.mxu1  ;;  %4417 = vmatmul.mubr.bf16.gmra.mxu1 %v13648_v3  ;;  %v11679_v4 = vpop.f32.mrf.mxu0 }
 0x337   : > { %4426 = vmatprep.mubr.bf16.mxu1 %v13891_v17 }
 0x338   : > { %v11682_v39 = vpop.f32.mrf.mxu1  ;;  %v11684_v48 = vpop.f32.mrf.mxu0 }
 0x33a   : > { %v11686_v59 = vpop.f32.mrf.mxu1  ;;  %v11688_v25 = vpop.f32.mrf.mxu0 }
 0x33c   : > { %v11690_v50 = vpop.f32.mrf.mxu1  ;;  %v11692_v22 = vpop.f32.mrf.mxu0  ;;  %4074 = vmatmul.mubr.bf16.gmra.mxu0 %v13893_v18  ;;  %v13899_v18 = vld [vmem:[#allocation5_spill] sm:$0xff] }
 0x33d   : > { %13892 = vst [vmem:[#allocation57_spill] sm:$0xff] %v11692_v22  ;;  %4083 = vmatprep.mubr.bf16.mxu0 %v13894_v40  ;;  %v6989_v40 = vld [vmem:[%s12842_s4] sm:$0xf]  ;;  %v13900_v38 = vsub.s32 3, %v13899_v18 }
 0x33e   : > { %v11696_v3 = vpop.f32.mrf.mxu1  ;;  %4427 = vmatmul.mubr.bf16.gmra.mxu1 %v13896_v1  ;;  %v11699_v17 = vpop.f32.mrf.mxu0 }
 0x33f   : > { %13895 = vst [vmem:[#allocation77_spill] sm:$0xff] %v11696_v3  ;;  %4436 = vmatprep.mubr.bf16.mxu1 %v13897_v34  ;;  %v11715_v15 = vrot.slane %v6989_v40, %v13900_v38  ;;  %v13902_v34 = vld [vmem:[#allocation137_spill] sm:$0xff]  ;;  %v13906_v3 = vld [vmem:[#allocation140_spill] sm:$0xff] }
 0x340   : > { %v11702_v44 = vpop.f32.mrf.mxu1  ;;  %v11704_v62 = vpop.f32.mrf.mxu0 }
 0x341   : > { %v3802_v55 = vadd.f32 %v3801_v11, %v11715_v15  ;;  %v3798_v38 = vadd.f32 %v11611_v61, %v11715_v15  ;;  %v13911_v61 = vld [vmem:[#allocation153_spill] sm:$0xff] }
 0x342   : > { %v11706_v49 = vpop.f32.mrf.mxu1  ;;  %v11708_v29 = vpop.f32.mrf.mxu0 }
 0x343   : > { %13898 = vst [vmem:[#allocation59_spill] sm:$0xff] %v11706_v49 }
 0x344   : > { %v11717_v1 = vpop.f32.mrf.mxu1  ;;  %v11719_v0 = vpop.f32.mrf.mxu0  ;;  %4084 = vmatmul.mubr.bf16.gmra.mxu0 %v13668_v41  ;;  %v4155_v41 = vadd.f32 %v11630_v37, %v3802_v55  ;;  %v3812_v37 = vadd.f32 %v3811_v5, %v11715_v15 }
 0x345   : > { %13901 = vst [vmem:[#allocation53_spill] sm:$0xff] %v11719_v0  ;;  %4093 = vmatprep.mubr.bf16.mxu0 %v13902_v34 }
 0x346   : > { %v11724_v10 = vpop.f32.mrf.mxu1  ;;  %4437 = vmatmul.mubr.bf16.gmra.mxu1 %v13904_v57  ;;  %v11727_v13 = vpop.f32.mrf.mxu0  ;;  %v4730_v55 = vmul.f32 0.2, %v4155_v41  ;;  %vm4474_vm14 = vcmp.gt.f32.partialorder %v4155_v41, 0.0 }
 0x347   : > { %13903 = vst [vmem:[#allocation114_spill] sm:$0xff] %v11724_v10  ;;  %13905 = vst [vmem:[#allocation115_spill] sm:$0xff] %v11727_v13  ;;  %4446 = vmatprep.mubr.bf16.mxu1 %v13906_v3  ;;  %v13909_v10 = vsub.s32 2, %v13899_v18  ;;  %v4151_v13 = vadd.f32 %v11620_v28, %v3798_v38 }
 0x348   : > { %v11732_v49 = vpop.f32.mrf.mxu1  ;;  %v11734_v0 = vpop.f32.mrf.mxu0 }
 0x349   : > { %13907 = vst [vmem:[#allocation89_spill] sm:$0xff] %v11734_v0  ;;  %v11743_v57 = vrot.slane %v6989_v40, %v13909_v10  ;;  %v4726_v40 = vmul.f32 0.2, %v4151_v13  ;;  %vm4470_vm6 = vcmp.gt.f32.partialorder %v4151_v13, 0.0 }
 0x34a   : > { %v11737_v34 = vpop.f32.mrf.mxu1  ;;  %v11739_v11 = vpop.f32.mrf.mxu0 }
 0x34b   : > { %13908 = vst [vmem:[#allocation75_spill] sm:$0xff] %v11737_v34  ;;  %v3800_v0 = vadd.f32 %v11622_v63, %v11743_v57  ;;  %v3796_v28 = vadd.f32 %v11602_v14, %v11743_v57  ;;  %v3808_v63 = vadd.f32 %v11641_v6, %v11715_v15  ;;  %v4986_v14 = vsel %vm4474_vm14, %v4155_v41, %v4730_v55 }
 0x34c   : > { %v11746_v3 = vpop.f32.mrf.mxu1  ;;  %v11748_v22 = vpop.f32.mrf.mxu0  ;;  %4094 = vmatmul.mubr.bf16.gmra.mxu0 %v13911_v61 }
 0x34d   : > { %13910 = vst [vmem:[#allocation122_spill] sm:$0xff] %v11748_v22  ;;  %4103 = vmatprep.mubr.bf16.mxu0 %v10879_v27  ;;  %v4153_v5 = vadd.f32 %v11624_v46, %v3800_v0  ;;  %v3810_v0 = vadd.f32 %v11646_v35, %v11743_v57  ;;  %v13915_v46 = vpack.c.bf16 %v10965_v16, %v10948_v23 }
 0x34e   : > { %v11755_v34 = vpop.f32.mrf.mxu1  ;;  %4447 = vmatmul.mubr.bf16.gmra.mxu1 %v13675_v51  ;;  %v11758_v10 = vpop.f32.mrf.mxu0  ;;  %v4165_v51 = vadd.f32 %v11650_v31, %v3812_v37  ;;  %v3806_v35 = vadd.f32 %v11632_v7, %v11743_v57  ;;  %v3818_v16 = vadd.f32 %v11659_v2, %v11715_v15 }
 0x34f   : > { %13912 = vst [vmem:[#allocation123_spill] sm:$0xff] %v11755_v34  ;;  %4456 = vmatprep.mubr.bf16.mxu1 %v10922_v9  ;;  %v4149_v9 = vadd.f32 %v11608_v24, %v3796_v28  ;;  %v4161_v34 = vadd.f32 %v11644_v58, %v3808_v63  ;;  %vm4473_vm0 = vcmp.gt.f32.partialorder %v4153_v5, 0.0  ;;  %v3822_v58 = vadd.f32 %v11668_v47, %v11715_v15 }
 0x350   : > { %v11765_v27 = vpop.f32.mrf.mxu1  ;;  %v11767_v38 = vpop.f32.mrf.mxu0  ;;  %v4738_v24 = vmul.f32 0.2, %v4165_v51  ;;  %vm4482_vm12 = vcmp.gt.f32.partialorder %v4165_v51, 0.0  ;;  %v4171_v2 = vadd.f32 %v11662_v33, %v3818_v16 }
 0x351   : > { %13913 = vst [vmem:[#allocation147_spill] sm:$0xff] %v11765_v27  ;;  %13914 = vst [vmem:[#allocation124_spill] sm:$0xff] %v11767_v38  ;;  %v4982_v38 = vsel %vm4470_vm6, %v4151_v13, %v4726_v40  ;;  %v4729_v27 = vmul.f32 0.2, %v4153_v5  ;;  %v4725_v13 = vmul.f32 0.2, %v4149_v9  ;;  %v4175_v28 = vadd.f32 %v11670_v43, %v3822_v58 }
 0x352   : > { %v11771_v61 = vpop.f32.mrf.mxu1  ;;  %v11773_v18 = vpop.f32.mrf.mxu0  ;;  %v5238_v31 = vpack.c.bf16 %v4986_v14, %v4982_v38  ;;  %vm4469_vm2 = vcmp.gt.f32.partialorder %v4149_v9, 0.0  ;;  %v4734_v23 = vmul.f32 0.2, %v4161_v34  ;;  %vm4478_vm5 = vcmp.gt.f32.partialorder %v4161_v34, 0.0 }
 0x353   : > { %v4985_v37 = vsel %vm4473_vm0, %v4153_v5, %v4729_v27  ;;  %v4994_v63 = vsel %vm4482_vm12, %v4165_v51, %v4738_v24  ;;  %v4981_v38 = vsel %vm4469_vm2, %v4149_v9, %v4725_v13  ;;  %v4159_v14 = vadd.f32 %v11638_v8, %v3806_v35  ;;  %v13917_v27 = vld [vmem:[#allocation135_spill] sm:$0xff]  ;;  %v13918_v5 = vld [vmem:[#allocation58_spill] sm:$0xff] }
 0x354   : > { %v11777_v22 = vpop.f32.mrf.mxu1  ;;  %v11779_v6 = vpop.f32.mrf.mxu0  ;;  %4104 = vmatmul.mubr.bf16.gmra.mxu0 %v10680_v20  ;;  %v4990_v43 = vsel %vm4478_vm5, %v4161_v34, %v4734_v23  ;;  %v3820_v58 = vadd.f32 %v11664_v56, %v11743_v57  ;;  %v13920_v51 = vpack.c.bf16 %v10987_v42, %v10971_v19  ;;  %v4746_v33 = vmul.f32 0.2, %v4175_v28 }
 0x355   : > { %5658 = vmatprep.mubr.bf16.mxu0 %v13915_v46  ;;  %v5237_v46 = vpack.c.bf16 %v4985_v37, %v4981_v38  ;;  %v5242_v8 = vpack.c.bf16 %v4994_v63, %v4990_v43  ;;  %v3832_v9 = vadd.f32 %v11688_v25, %v11715_v15  ;;  %v4733_v34 = vmul.f32 0.2, %v4159_v14 }
 0x356   : > { %v11789_v41 = vpop.f32.mrf.mxu1  ;;  %4457 = vmatmul.mubr.bf16.gmra.mxu1 %v10711_v36  ;;  %v11792_v20 = vpop.f32.mrf.mxu0  ;;  %v4163_v36 = vadd.f32 %v11648_v60, %v3810_v0  ;;  %v13919_v60 = vpack.c.bf16 %v13917_v27, %v13918_v5  ;;  %v3816_v35 = vadd.f32 %v11652_v21, %v11743_v57  ;;  %vm4490_vm11 = vcmp.gt.f32.partialorder %v4175_v28, 0.0 }
 0x357   : > { %13916 = vst [vmem:[#allocation103_spill] sm:$0xff] %v11789_v41  ;;  %5947 = vmatprep.mubr.bf16.mxu1 %v5238_v31  ;;  %vm4477_vm7 = vcmp.gt.f32.partialorder %v4159_v14, 0.0  ;;  %v4742_v19 = vmul.f32 0.2, %v4171_v2  ;;  %v3828_v42 = vadd.f32 %v11679_v4, %v11715_v15  ;;  %vm4486_vm8 = vcmp.gt.f32.partialorder %v4171_v2, 0.0 }
 0x358   : > { %v11798_v55 = vpop.f32.mrf.mxu1  ;;  %v11800_v47 = vpop.f32.mrf.mxu0  ;;  %v4737_v0 = vmul.f32 0.2, %v4163_v36  ;;  %vm4481_vm1 = vcmp.gt.f32.partialorder %v4163_v36, 0.0  ;;  %v4173_v16 = vadd.f32 %v11666_v54, %v3820_v58  ;;  %v4185_v37 = vadd.f32 %v11690_v50, %v3832_v9 }
 0x359   : > { %v5002_v38 = vsel %vm4490_vm11, %v4175_v28, %v4746_v33  ;;  %v4169_v27 = vadd.f32 %v11656_v26, %v3816_v35  ;;  %v4181_v4 = vadd.f32 %v11682_v39, %v3828_v42  ;;  %v4998_v50 = vsel %vm4486_vm8, %v4171_v2, %v4742_v19 }
 0x35a   : > { %v11804_v40 = vpop.f32.mrf.mxu1  ;;  %v11806_v7 = vpop.f32.mrf.mxu0  ;;  %v4993_v25 = vsel %vm4481_vm1, %v4163_v36, %v4737_v0  ;;  %v13921_v36 = vld [vmem:[#allocation106_spill] sm:$0xff]  ;;  %v13922_v0 = vld [vmem:[#allocation101_spill] sm:$0xff]  ;;  %v4745_v58 = vmul.f32 0.2, %v4173_v16  ;;  %v13924_v28 = vpack.c.bf16 %v11016_v52, %v11010_v53  ;;  %v5246_v26 = vpack.c.bf16 %v5002_v38, %v4998_v50 }
 0x35b   : > { %v13923_v54 = vpack.c.bf16 %v13921_v36, %v13922_v0  ;;  %vm4489_vm9 = vcmp.gt.f32.partialorder %v4173_v16, 0.0  ;;  %v4754_v39 = vmul.f32 0.2, %v4185_v37  ;;  %v4741_v2 = vmul.f32 0.2, %v4169_v27 }
 0x35c   : > { %v11810_v31 = vpop.f32.mrf.mxu1  ;;  %v11812_v41 = vpop.f32.mrf.mxu0  ;;  %5659 = vmatmul.mubr.bf16.vlgmr.msra.gmra.mxu0 %v13919_v60  ;;  %v3826_v9 = vadd.f32 %v11672_v12, %v11743_v57  ;;  %vm4498_vm3 = vcmp.gt.f32.partialorder %v4185_v37, 0.0  ;;  %vm4485_vm15 = vcmp.gt.f32.partialorder %v4169_v27, 0.0  ;;  %v4750_v53 = vmul.f32 0.2, %v4181_v4 }
 0x35d   : > { %5666 = vmatprep.mubr.bf16.mxu0 %v13920_v51  ;;  %v3830_v51 = vadd.f32 %v11684_v48, %v11743_v57  ;;  %v3838_v52 = vadd.f32 %v11699_v17, %v11715_v15  ;;  %vm4494_vm13 = vcmp.gt.f32.partialorder %v4181_v4, 0.0  ;;  %v4997_v38 = vsel %vm4485_vm15, %v4169_v27, %v4741_v2 }
 0x35e   : > { %v11824_v24 = vpop.f32.mrf.mxu1  ;;  %5948 = vmatmul.mubr.bf16.vlgmr.msra.gmra.mxu1 %v5237_v46  ;;  %v11826_v13 = vpop.f32.mrf.mxu0  ;;  %v4989_v46 = vsel %vm4477_vm7, %v4159_v14, %v4733_v34  ;;  %v3842_v14 = vadd.f32 %v11708_v29, %v11715_v15  ;;  %v5001_v29 = vsel %vm4489_vm9, %v4173_v16, %v4745_v58  ;;  %v13925_v16 = vld [vmem:[#allocation118_spill] sm:$0xff]  ;;  %v3840_v58 = vadd.f32 %v11704_v62, %v11743_v57 }
 0x35f   : > { %5955 = vmatprep.mubr.bf16.mxu1 %v5242_v8  ;;  %v5241_v5 = vpack.c.bf16 %v4993_v25, %v4989_v46  ;;  %v4183_v35 = vadd.f32 %v11686_v59, %v3830_v51  ;;  %v5010_v25 = vsel %vm4498_vm3, %v4185_v37, %v4754_v39  ;;  %v4179_v46 = vadd.f32 %v11676_v32, %v3826_v9  ;;  %v13931_v9 = vld [vmem:[#allocation59_spill] sm:$0xff] }
 0x360   : > { %v11832_v56 = vpop.f32.mrf.mxu1  ;;  %v11834_v23 = vpop.f32.mrf.mxu0  ;;  %v4195_v19 = vadd.f32 %v11717_v1, %v3842_v14  ;;  %v4191_v17 = vadd.f32 %v11702_v44, %v3838_v52  ;;  %v5006_v1 = vsel %vm4494_vm13, %v4181_v4, %v4750_v53  ;;  %v13928_v37 = vpack.c.bf16 %v11022_v30, %v11032_v45  ;;  %v13930_v45 = vld [vmem:[#allocation115_spill] sm:$0xff] }
 0x361   : > { %v4753_v50 = vmul.f32 0.2, %v4183_v35  ;;  %v5250_v32 = vpack.c.bf16 %v5010_v25, %v5006_v1  ;;  %vm4497_vm10 = vcmp.gt.f32.partialorder %v4183_v35, 0.0  ;;  %v3852_v27 = vadd.f32 %v11739_v11, %v11715_v15 }
 0x362   : > { %v11838_v63 = vpop.f32.mrf.mxu1  ;;  %v11840_v21 = vpop.f32.mrf.mxu0  ;;  %v4762_v44 = vmul.f32 0.2, %v4195_v19  ;;  %v4749_v4 = vmul.f32 0.2, %v4179_v46  ;;  %vm4506_vm4 = vcmp.gt.f32.partialorder %v4195_v19, 0.0  ;;  %vm4493_vm14 = vcmp.gt.f32.partialorder %v4179_v46, 0.0 }
 0x363   : > { %v4758_v30 = vmul.f32 0.2, %v4191_v17  ;;  %v3848_v62 = vadd.f32 %v13930_v45, %v11715_v15  ;;  %v5009_v11 = vsel %vm4497_vm10, %v4183_v35, %v4753_v50  ;;  %vm4502_vm6 = vcmp.gt.f32.partialorder %v4191_v17, 0.0  ;;  %v13934_v35 = vld [vmem:[#allocation136_spill] sm:$0xff]  ;;  %v13935_v50 = vld [vmem:[#allocation111_spill] sm:$0xff] }
 0x364   : > { %v11844_v60 = vpop.f32.mrf.mxu1  ;;  %v11846_v43 = vpop.f32.mrf.mxu0  ;;  %5667 = vmatmul.mubr.bf16.gmra.mxu0 %v13923_v54  ;;  %v13926_v54 = vld [vmem:[#allocation133_spill] sm:$0xff]  ;;  %v4193_v53 = vadd.f32 %v13931_v9, %v3840_v58  ;;  %v4205_v52 = vadd.f32 %v11746_v3, %v3852_v27  ;;  %v13936_v58 = vpack.c.bf16 %v13934_v35, %v13935_v50 }
 0x365   : > { %5674 = vmatprep.mubr.bf16.mxu0 %v13924_v28  ;;  %v13927_v59 = vpack.c.bf16 %v13925_v16, %v13926_v54  ;;  %v13932_v16 = vld [vmem:[#allocation77_spill] sm:$0xff]  ;;  %v4201_v1 = vadd.f32 %v11732_v49, %v3848_v62  ;;  %v5014_v3 = vsel %vm4502_vm6, %v4191_v17, %v4758_v30 }
 0x366   : > { %v11858_v8 = vpop.f32.mrf.mxu1  ;;  %5956 = vmatmul.mubr.bf16.gmra.mxu1 %v5241_v5  ;;  %v11860_v33 = vpop.f32.mrf.mxu0  ;;  %v5245_v5 = vpack.c.bf16 %v5001_v29, %v4997_v38  ;;  %v5018_v38 = vsel %vm4506_vm4, %v4195_v19, %v4762_v44  ;;  %v4761_v27 = vmul.f32 0.2, %v4193_v53  ;;  %v13938_v19 = vld [vmem:[#allocation144_spill] sm:$0xff]  ;;  %vm4505_vm0 = vcmp.gt.f32.partialorder %v4193_v53, 0.0  ;;  %v13942_v30 = vld [vmem:[#allocation53_spill] sm:$0xff] }
 0x367   : > { %5963 = vmatprep.mubr.bf16.mxu1 %v5246_v26  ;;  %v13929_v26 = vld [vmem:[#allocation57_spill] sm:$0xff]  ;;  %v4770_v49 = vmul.f32 0.2, %v4205_v52  ;;  %v3846_v9 = vadd.f32 %v13942_v30, %v11743_v57  ;;  %vm4514_vm12 = vcmp.gt.f32.partialorder %v4205_v52, 0.0  ;;  %vm4510_vm5 = vcmp.gt.f32.partialorder %v4201_v1, 0.0 }
 0x368   : > { %v11866_v48 = vpop.f32.mrf.mxu1  ;;  %v11868_v34 = vpop.f32.mrf.mxu0  ;;  %v3836_v39 = vadd.f32 %v13929_v26, %v11743_v57  ;;  %v13937_v26 = vld [vmem:[#allocation89_spill] sm:$0xff] }
 0x369   : > { %v3850_v45 = vadd.f32 %v13937_v26, %v11743_v57 }
 0x36a   : > { %v11872_v42 = vpop.f32.mrf.mxu1  ;;  %v11874_v12 = vpop.f32.mrf.mxu0  ;;  %v4189_v54 = vadd.f32 %v13932_v16, %v3836_v39  ;;  %v3862_v39 = vadd.f32 %v11773_v18, %v11715_v15  ;;  %v5017_v18 = vsel %vm4505_vm0, %v4193_v53, %v4761_v27  ;;  %v13949_v53 = vld [vmem:[#allocation110_spill] sm:$0xff]  ;;  %v13950_v27 = vld [vmem:[#allocation139_spill] sm:$0xff] }
 0x36c   : > { %v11878_v36 = vpop.f32.mrf.mxu1  ;;  %v11880_v0 = vpop.f32.mrf.mxu0  ;;  %5675 = vmatmul.mubr.bf16.gmra.mxu0 %v13927_v59  ;;  %v4757_v17 = vmul.f32 0.2, %v4189_v54  ;;  %vm4501_vm2 = vcmp.gt.f32.partialorder %v4189_v54, 0.0 }
 0x36d   : > { %5682 = vmatprep.mubr.bf16.mxu0 %v13928_v37 }
 0x36e   : > { %v11892_v51 = vpop.f32.mrf.mxu1  ;;  %5964 = vmatmul.mubr.bf16.gmra.mxu1 %v5245_v5  ;;  %v11894_v28 = vpop.f32.mrf.mxu0  ;;  %v5005_v5 = vsel %vm4493_vm14, %v4179_v46, %v4749_v4  ;;  %v13939_v46 = vld [vmem:[#allocation120_spill] sm:$0xff]  ;;  %v5254_v4 = vpack.c.bf16 %v5018_v38, %v5014_v3  ;;  %v3858_v38 = vadd.f32 %v11758_v10, %v11715_v15  ;;  %v13947_v10 = vld [vmem:[#allocation147_spill] sm:$0xff] }
 0x36f   : > { %5971 = vmatprep.mubr.bf16.mxu1 %v5250_v32  ;;  %v5249_v59 = vpack.c.bf16 %v5009_v11, %v5005_v5  ;;  %v13940_v44 = vpack.c.bf16 %v13938_v19, %v13939_v46  ;;  %v4766_v5 = vmul.f32 0.2, %v4201_v1  ;;  %v5026_v19 = vsel %vm4514_vm12, %v4205_v52, %v4770_v49  ;;  %v13953_v52 = vld [vmem:[#allocation119_spill] sm:$0xff] }
 0x370   : > { %v11900_v14 = vpop.f32.mrf.mxu1  ;;  %v11902_v2 = vpop.f32.mrf.mxu0  ;;  %v5013_v46 = vsel %vm4501_vm2, %v4189_v54, %v4757_v17  ;;  %v13954_v54 = vld [vmem:[#allocation141_spill] sm:$0xff] }
 0x371   : > { %v5253_v30 = vpack.c.bf16 %v5017_v18, %v5013_v46  ;;  %v13955_v49 = vpack.c.bf16 %v13953_v52, %v13954_v54 }
 0x372   : > { %v11906_v29 = vpop.f32.mrf.mxu1  ;;  %v11908_v25 = vpop.f32.mrf.mxu0 }
 0x374   : > { %v11912_v37 = vpop.f32.mrf.mxu1  ;;  %v11914_v32 = vpop.f32.mrf.mxu0  ;;  %5683 = vmatmul.mubr.bf16.gmra.mxu0 %v13936_v58  ;;  %v4215_v58 = vadd.f32 %v11777_v22, %v3862_v39  ;;  %v5022_v22 = vsel %vm4510_vm5, %v4201_v1, %v4766_v5  ;;  %v13957_v5 = vld [vmem:[#allocation122_spill] sm:$0xff] }
 0x375   : > { %13933 = vst [vmem:[#allocation104_spill] sm:$0xff] %v11914_v32  ;;  %5690 = vmatprep.mubr.bf16.mxu0 %v13940_v44  ;;  %v13946_v44 = vld [vmem:[#allocation114_spill] sm:$0xff]  ;;  %v5258_v17 = vpack.c.bf16 %v5026_v19, %v5022_v22  ;;  %v3868_v19 = vadd.f32 %v11792_v20, %v11715_v15 }
 0x376   : > { %v11926_v62 = vpop.f32.mrf.mxu1  ;;  %5972 = vmatmul.mubr.bf16.gmra.mxu1 %v5249_v59  ;;  %v11928_v11 = vpop.f32.mrf.mxu0  ;;  %v13944_v59 = vld [vmem:[#allocation75_spill] sm:$0xff]  ;;  %vm4522_vm11 = vcmp.gt.f32.partialorder %v4215_v58, 0.0 }
 0x377   : > { %13941 = vst [vmem:[#allocation90_spill] sm:$0xff] %v11926_v62  ;;  %5979 = vmatprep.mubr.bf16.mxu1 %v5254_v4  ;;  %v4203_v50 = vadd.f32 %v13944_v59, %v3850_v45  ;;  %v4199_v4 = vadd.f32 %v13946_v44, %v3846_v9  ;;  %v4211_v62 = vadd.f32 %v13947_v10, %v3858_v38  ;;  %v13952_v59 = vld [vmem:[#allocation124_spill] sm:$0xff]  ;;  %v4778_v9 = vmul.f32 0.2, %v4215_v58 }
 0x378   : > { %v11934_v16 = vpop.f32.mrf.mxu1  ;;  %v11936_v35 = vpop.f32.mrf.mxu0  ;;  %v13951_v45 = vpack.c.bf16 %v13949_v53, %v13950_v27  ;;  %v3872_v38 = vadd.f32 %v11806_v7, %v11715_v15  ;;  %v3856_v44 = vadd.f32 %v13957_v5, %v11743_v57  ;;  %v4221_v20 = vadd.f32 %v11798_v55, %v3868_v19 }
 0x379   : > { %13943 = vst [vmem:[#allocation131_spill] sm:$0xff] %v11936_v35  ;;  %v4769_v39 = vmul.f32 0.2, %v4203_v50  ;;  %vm4513_vm1 = vcmp.gt.f32.partialorder %v4203_v50, 0.0  ;;  %v4765_v1 = vmul.f32 0.2, %v4199_v4  ;;  %v5034_v52 = vsel %vm4522_vm11, %v4215_v58, %v4778_v9 }
 0x37a   : > { %v11940_v3 = vpop.f32.mrf.mxu1  ;;  %v11942_v26 = vpop.f32.mrf.mxu0  ;;  %vm4509_vm7 = vcmp.gt.f32.partialorder %v4199_v4, 0.0  ;;  %v4774_v10 = vmul.f32 0.2, %v4211_v62  ;;  %vm4518_vm8 = vcmp.gt.f32.partialorder %v4211_v62, 0.0  ;;  %v13962_v58 = vld [vmem:[#allocation149_spill] sm:$0xff]  ;;  %vm4526_vm13 = vcmp.gt.f32.partialorder %v4221_v20, 0.0 }
 0x37b   : > { %13945 = vst [vmem:[#allocation129_spill] sm:$0xff] %v11940_v3  ;;  %v3860_v3 = vadd.f32 %v13952_v59, %v11743_v57  ;;  %v5025_v7 = vsel %vm4513_vm1, %v4203_v50, %v4769_v39  ;;  %v5021_v54 = vsel %vm4509_vm7, %v4199_v4, %v4765_v1  ;;  %v13959_v50 = vld [vmem:[#allocation92_spill] sm:$0xff]  ;;  %v13960_v39 = vld [vmem:[#allocation91_spill] sm:$0xff] }
 0x37c   : > { %v11946_v32 = vpop.f32.mrf.mxu1  ;;  %v11948_v35 = vpop.f32.mrf.mxu0  ;;  %5691 = vmatmul.mubr.bf16.gmra.mxu0 %v13951_v45  ;;  %v4225_v45 = vadd.f32 %v11810_v31, %v3872_v38  ;;  %v5257_v5 = vpack.c.bf16 %v5025_v7, %v5021_v54  ;;  %v5030_v31 = vsel %vm4518_vm8, %v4211_v62, %v4774_v10  ;;  %v3870_v38 = vadd.f32 %v11800_v47, %v11743_v57  ;;  %v13963_v4 = vld [vmem:[#allocation127_spill] sm:$0xff] }
 0x37d   : > { %13948 = vst [vmem:[#allocation130_spill] sm:$0xff] %v11948_v35  ;;  %5698 = vmatprep.mubr.bf16.mxu0 %v13955_v49  ;;  %v13958_v49 = vld [vmem:[#allocation123_spill] sm:$0xff]  ;;  %v13964_v9 = vpack.c.bf16 %v13962_v58, %v13963_v4  ;;  %v5262_v1 = vpack.c.bf16 %v5034_v52, %v5030_v31  ;;  %v3866_v10 = vadd.f32 %v11779_v6, %v11743_v57  ;;  %v4782_v47 = vmul.f32 0.2, %v4221_v20 }
 0x37e   : > { %v11960_v18 = vpop.f32.mrf.mxu1  ;;  %5980 = vmatmul.mubr.bf16.gmra.mxu1 %v5253_v30  ;;  %v11962_v46 = vpop.f32.mrf.mxu0  ;;  %v4213_v30 = vadd.f32 %v11771_v61, %v3860_v3  ;;  %v13961_v61 = vpack.c.bf16 %v13959_v50, %v13960_v39  ;;  %v4786_v55 = vmul.f32 0.2, %v4225_v45  ;;  %vm4530_vm3 = vcmp.gt.f32.partialorder %v4225_v45, 0.0  ;;  %v13966_v58 = vld [vmem:[#allocation103_spill] sm:$0xff] }
 0x37f   : > { %13956 = vst [vmem:[#allocation6_spill] sm:$0xff] %v11960_v18  ;;  %5987 = vmatprep.mubr.bf16.mxu1 %v5258_v17  ;;  %v4209_v17 = vadd.f32 %v13958_v49, %v3856_v44  ;;  %v3882_v44 = vadd.f32 %v11840_v21, %v11715_v15  ;;  %v3878_v52 = vadd.f32 %v11826_v13, %v11715_v15 }
 0x380   : > { %v11968_v53 = vpop.f32.mrf.mxu1  ;;  %v11970_v27 = vpop.f32.mrf.mxu0  ;;  %v4777_v3 = vmul.f32 0.2, %v4213_v30  ;;  %vm4521_vm9 = vcmp.gt.f32.partialorder %v4213_v30, 0.0  ;;  %v4219_v4 = vadd.f32 %v13966_v58, %v3866_v10  ;;  %v3892_v10 = vadd.f32 %v11874_v12, %v11715_v15 }
 0x381   : > { %v4773_v62 = vmul.f32 0.2, %v4209_v17  ;;  %vm4517_vm15 = vcmp.gt.f32.partialorder %v4209_v17, 0.0  ;;  %v4235_v50 = vadd.f32 %v11844_v60, %v3882_v44  ;;  %v4231_v13 = vadd.f32 %v11832_v56, %v3878_v52 }
 0x382   : > { %v11974_v22 = vpop.f32.mrf.mxu1  ;;  %v11976_v59 = vpop.f32.mrf.mxu0  ;;  %v5033_v21 = vsel %vm4521_vm9, %v4213_v30, %v4777_v3  ;;  %v13967_v30 = vld [vmem:[#allocation143_spill] sm:$0xff]  ;;  %v13968_v3 = vld [vmem:[#allocation121_spill] sm:$0xff]  ;;  %v5038_v60 = vsel %vm4526_vm13, %v4221_v20, %v4782_v47  ;;  %v3880_v44 = vadd.f32 %v11834_v23, %v11743_v57  ;;  %v4781_v20 = vmul.f32 0.2, %v4219_v4 }
 0x383   : > { %v5029_v31 = vsel %vm4517_vm15, %v4209_v17, %v4773_v62  ;;  %v13971_v17 = vld [vmem:[#allocation150_spill] sm:$0xff]  ;;  %v4794_v56 = vmul.f32 0.2, %v4235_v50  ;;  %v3876_v47 = vadd.f32 %v11812_v41, %v11743_v57  ;;  %vm4538_vm4 = vcmp.gt.f32.partialorder %v4235_v50, 0.0 }
 0x384   : > { %v11980_v18 = vpop.f32.mrf.mxu1  ;;  %v11982_v35 = vpop.f32.mrf.mxu0  ;;  %5699 = vmatmul.mubr.bf16.gmra.mxu0 %v13961_v61  ;;  %v5042_v61 = vsel %vm4530_vm3, %v4225_v45, %v4786_v55  ;;  %v13970_v45 = vld [vmem:[#allocation151_spill] sm:$0xff]  ;;  %vm4525_vm14 = vcmp.gt.f32.partialorder %v4219_v4, 0.0  ;;  %v4790_v23 = vmul.f32 0.2, %v4231_v13  ;;  %vm4534_vm6 = vcmp.gt.f32.partialorder %v4231_v13, 0.0 }
 0x385   : > { %5706 = vmatprep.mubr.bf16.mxu0 %v13964_v9  ;;  %v5261_v9 = vpack.c.bf16 %v5033_v21, %v5029_v31  ;;  %v13972_v55 = vpack.c.bf16 %v13970_v45, %v13971_v17  ;;  %v5266_v62 = vpack.c.bf16 %v5042_v61, %v5038_v60  ;;  %v3888_v61 = vadd.f32 %v11860_v33, %v11715_v15 }
 0x386   : > { %v11994_v19 = vpop.f32.mrf.mxu1  ;;  %5988 = vmatmul.mubr.bf16.gmra.mxu1 %v5257_v5  ;;  %v11996_v7 = vpop.f32.mrf.mxu0  ;;  %v4223_v5 = vadd.f32 %v11804_v40, %v3870_v38  ;;  %v13969_v40 = vpack.c.bf16 %v13967_v30, %v13968_v3  ;;  %v4245_v30 = vadd.f32 %v11878_v36, %v3892_v10  ;;  %v5037_v60 = vsel %vm4525_vm14, %v4219_v4, %v4781_v20  ;;  %v13977_v4 = vld [vmem:[#allocation132_spill] sm:$0xff] }
 0x387   : > { %13965 = vst [vmem:[#allocation50_spill] sm:$0xff] %v11994_v19  ;;  %5995 = vmatprep.mubr.bf16.mxu1 %v5262_v1  ;;  %v4229_v45 = vadd.f32 %v11824_v24, %v3876_v47  ;;  %v4241_v33 = vadd.f32 %v11866_v48, %v3888_v61  ;;  %v5046_v36 = vsel %vm4534_vm6, %v4231_v13, %v4790_v23 }
 0x388   : > { %v12002_v54 = vpop.f32.mrf.mxu1  ;;  %v12004_v49 = vpop.f32.mrf.mxu0  ;;  %v4785_v38 = vmul.f32 0.2, %v4223_v5  ;;  %vm4529_vm10 = vcmp.gt.f32.partialorder %v4223_v5, 0.0  ;;  %v3890_v10 = vadd.f32 %v11868_v34, %v11743_v57  ;;  %v4802_v48 = vmul.f32 0.2, %v4245_v30 }
 0x389   : > { %v3902_v20 = vadd.f32 %v11908_v25, %v11715_v15  ;;  %v4789_v13 = vmul.f32 0.2, %v4229_v45  ;;  %v3886_v23 = vadd.f32 %v11846_v43, %v11743_v57  ;;  %vm4546_vm12 = vcmp.gt.f32.partialorder %v4245_v30, 0.0 }
 0x38a   : > { %v12008_v39 = vpop.f32.mrf.mxu1  ;;  %v12010_v6 = vpop.f32.mrf.mxu0  ;;  %v5041_v12 = vsel %vm4529_vm10, %v4223_v5, %v4785_v38  ;;  %v13973_v5 = vld [vmem:[#allocation116_spill] sm:$0xff]  ;;  %vm4533_vm2 = vcmp.gt.f32.partialorder %v4229_v45, 0.0  ;;  %v4798_v34 = vmul.f32 0.2, %v4241_v33  ;;  %vm4542_vm5 = vcmp.gt.f32.partialorder %v4241_v33, 0.0 }
 0x38b   : > { %v5265_v17 = vpack.c.bf16 %v5041_v12, %v5037_v60  ;;  %v13974_v38 = vld [vmem:[#allocation148_spill] sm:$0xff]  ;;  %v3898_v12 = vadd.f32 %v11894_v28, %v11715_v15 }
 0x38c   : > { %v12014_v1 = vpop.f32.mrf.mxu1  ;;  %v12016_v19 = vpop.f32.mrf.mxu0  ;;  %5707 = vmatmul.mubr.bf16.gmra.mxu0 %v13969_v40  ;;  %v5050_v40 = vsel %vm4538_vm4, %v4235_v50, %v4794_v56  ;;  %v13976_v50 = vld [vmem:[#allocation146_spill] sm:$0xff] }
 0x38d   : > { %5714 = vmatprep.mubr.bf16.mxu0 %v13972_v55  ;;  %v13978_v56 = vpack.c.bf16 %v13976_v50, %v13977_v4  ;;  %v5270_v24 = vpack.c.bf16 %v5050_v40, %v5046_v36  ;;  %v5045_v36 = vsel %vm4533_vm2, %v4229_v45, %v4789_v13  ;;  %v4239_v50 = vadd.f32 %v11858_v8, %v3886_v23  ;;  %v13983_v45 = vld [vmem:[#allocation152_spill] sm:$0xff] }
 0x38e   : > { %v12028_v52 = vpop.f32.mrf.mxu1  ;;  %5996 = vmatmul.mubr.bf16.gmra.mxu1 %v5261_v9  ;;  %v12030_v21 = vpop.f32.mrf.mxu0  ;;  %v4233_v9 = vadd.f32 %v11838_v63, %v3880_v44  ;;  %v13975_v63 = vpack.c.bf16 %v13973_v5, %v13974_v38  ;;  %v4255_v5 = vadd.f32 %v11912_v37, %v3902_v20  ;;  %v4251_v28 = vadd.f32 %v11900_v14, %v3898_v12 }
 0x38f   : > { %6003 = vmatprep.mubr.bf16.mxu1 %v5266_v62  ;;  %v5054_v37 = vsel %vm4542_vm5, %v4241_v33, %v4798_v34  ;;  %v3900_v20 = vadd.f32 %v11902_v2, %v11743_v57  ;;  %v3912_v13 = vadd.f32 %v11942_v26, %v11715_v15  ;;  %v4797_v33 = vmul.f32 0.2, %v4239_v50 }
 0x390   : > { %v12036_v31 = vpop.f32.mrf.mxu1  ;;  %v12038_v58 = vpop.f32.mrf.mxu0  ;;  %v4793_v44 = vmul.f32 0.2, %v4233_v9  ;;  %vm4537_vm0 = vcmp.gt.f32.partialorder %v4233_v9, 0.0  ;;  %v4810_v14 = vmul.f32 0.2, %v4255_v5  ;;  %v3896_v34 = vadd.f32 %v11880_v0, %v11743_v57 }
 0x391   : > { %vm4554_vm11 = vcmp.gt.f32.partialorder %v4255_v5, 0.0  ;;  %vm4541_vm7 = vcmp.gt.f32.partialorder %v4239_v50, 0.0  ;;  %v4806_v2 = vmul.f32 0.2, %v4251_v28  ;;  %vm4550_vm8 = vcmp.gt.f32.partialorder %v4251_v28, 0.0 }
 0x392   : > { %v12042_v3 = vpop.f32.mrf.mxu1  ;;  %v12044_v41 = vpop.f32.mrf.mxu0  ;;  %v5049_v25 = vsel %vm4537_vm0, %v4233_v9, %v4793_v44  ;;  %v13979_v9 = vld [vmem:[#allocation126_spill] sm:$0xff]  ;;  %v13980_v44 = vld [vmem:[#allocation128_spill] sm:$0xff] }
 0x393   : > { %v5269_v4 = vpack.c.bf16 %v5049_v25, %v5045_v36  ;;  %v3908_v25 = vadd.f32 %v11928_v11, %v11715_v15 }
 0x394   : > { %v12048_v55 = vpop.f32.mrf.mxu1  ;;  %v12050_v62 = vpop.f32.mrf.mxu0  ;;  %5715 = vmatmul.mubr.bf16.gmra.mxu0 %v13975_v63  ;;  %v5058_v63 = vsel %vm4546_vm12, %v4245_v30, %v4802_v48  ;;  %v13982_v30 = vld [vmem:[#allocation155_spill] sm:$0xff] }
 0x395   : > { %5722 = vmatprep.mubr.bf16.mxu0 %v13978_v56  ;;  %v13984_v48 = vpack.c.bf16 %v13982_v30, %v13983_v45  ;;  %v5274_v8 = vpack.c.bf16 %v5058_v63, %v5054_v37  ;;  %v5053_v37 = vsel %vm4541_vm7, %v4239_v50, %v4797_v33  ;;  %v4249_v30 = vadd.f32 %v11892_v51, %v3896_v34  ;;  %v13992_v50 = vld [vmem:[#allocation154_spill] sm:$0xff] }
 0x396   : > { %v12062_v47 = vpop.f32.mrf.mxu1  ;;  %6004 = vmatmul.mubr.bf16.gmra.mxu1 %v5265_v17  ;;  %v12064_v61 = vpop.f32.mrf.mxu0  ;;  %v4243_v17 = vadd.f32 %v11872_v42, %v3890_v10  ;;  %v13981_v42 = vpack.c.bf16 %v13979_v9, %v13980_v44  ;;  %v4265_v9 = vadd.f32 %v11946_v32, %v3912_v13  ;;  %v4261_v11 = vadd.f32 %v11934_v16, %v3908_v25  ;;  %v13990_v13 = vld [vmem:[#allocation131_spill] sm:$0xff] }
 0x397   : > { %6011 = vmatprep.mubr.bf16.mxu1 %v5270_v24  ;;  %v5062_v32 = vsel %vm4550_vm8, %v4251_v28, %v4806_v2  ;;  %v3922_v33 = vadd.f32 %v11976_v59, %v11715_v15  ;;  %v4805_v28 = vmul.f32 0.2, %v4249_v30  ;;  %v13995_v2 = vld [vmem:[#allocation104_spill] sm:$0xff]  ;;  %vm4549_vm15 = vcmp.gt.f32.partialorder %v4249_v30, 0.0 }
 0x398   : > { %v12070_v40 = vpop.f32.mrf.mxu1  ;;  %v12072_v60 = vpop.f32.mrf.mxu0  ;;  %v4801_v10 = vmul.f32 0.2, %v4243_v17  ;;  %vm4545_vm1 = vcmp.gt.f32.partialorder %v4243_v17, 0.0  ;;  %v4818_v16 = vmul.f32 0.2, %v4265_v9  ;;  %vm4562_vm3 = vcmp.gt.f32.partialorder %v4265_v9, 0.0 }
 0x399   : > { %vm4558_vm13 = vcmp.gt.f32.partialorder %v4261_v11, 0.0 }
 0x39a   : > { %v12076_v38 = vpop.f32.mrf.mxu1  ;;  %v12078_v43 = vpop.f32.mrf.mxu0  ;;  %v5057_v26 = vsel %vm4545_vm1, %v4243_v17, %v4801_v10  ;;  %v13987_v17 = vld [vmem:[#allocation145_spill] sm:$0xff]  ;;  %v13988_v10 = vld [vmem:[#allocation108_spill] sm:$0xff] }
 0x39b   : > { %v5273_v45 = vpack.c.bf16 %v5057_v26, %v5053_v37  ;;  %v3906_v26 = vadd.f32 %v13995_v2, %v11743_v57  ;;  %v4814_v37 = vmul.f32 0.2, %v4261_v11 }
 0x39c   : > { %v12082_v56 = vpop.f32.mrf.mxu1  ;;  %v12084_v24 = vpop.f32.mrf.mxu0  ;;  %5723 = vmatmul.mubr.bf16.gmra.mxu0 %v13981_v42  ;;  %v5066_v42 = vsel %vm4554_vm11, %v4255_v5, %v4810_v14  ;;  %v13991_v5 = vld [vmem:[#allocation16_spill] sm:$0xff] }
 0x39d   : > { %5730 = vmatprep.mubr.bf16.mxu0 %v13984_v48  ;;  %v13993_v14 = vpack.c.bf16 %v13991_v5, %v13992_v50  ;;  %v5278_v51 = vpack.c.bf16 %v5066_v42, %v5062_v32  ;;  %v3918_v42 = vadd.f32 %v11962_v46, %v11715_v15  ;;  %v4275_v32 = vadd.f32 %v11980_v18, %v3922_v33 }
 0x39e   : > { %v12096_v23 = vpop.f32.mrf.mxu1  ;;  %6012 = vmatmul.mubr.bf16.gmra.mxu1 %v5269_v4  ;;  %v12098_v12 = vpop.f32.mrf.mxu0  ;;  %v4253_v4 = vadd.f32 %v11906_v29, %v3900_v20  ;;  %v13989_v29 = vpack.c.bf16 %v13987_v17, %v13988_v10  ;;  %v5074_v50 = vsel %vm4562_vm3, %v4265_v9, %v4818_v16  ;;  %v5070_v18 = vsel %vm4558_vm13, %v4261_v11, %v4814_v37  ;;  %v14003_v9 = vld [vmem:[#allocation25_spill] sm:$0xff]  ;;  %v14007_v37 = vld [vmem:[#allocation130_spill] sm:$0xff] }
 0x39f   : > { %13985 = vst [vmem:[#allocation134_spill] sm:$0xff] %v12096_v23  ;;  %6019 = vmatprep.mubr.bf16.mxu1 %v5274_v8  ;;  %v3910_v23 = vadd.f32 %v13990_v13, %v11743_v57  ;;  %v4271_v46 = vadd.f32 %v11968_v53, %v3918_v42  ;;  %v4826_v53 = vmul.f32 0.2, %v4275_v32  ;;  %vm4570_vm4 = vcmp.gt.f32.partialorder %v4275_v32, 0.0 }
 0x3a0   : > { %v12104_v63 = vpop.f32.mrf.mxu1  ;;  %v12106_v36 = vpop.f32.mrf.mxu0  ;;  %v4809_v20 = vmul.f32 0.2, %v4253_v4  ;;  %vm4553_vm9 = vcmp.gt.f32.partialorder %v4253_v4, 0.0 }
 0x3a1   : > { %vm4566_vm6 = vcmp.gt.f32.partialorder %v4271_v46, 0.0 }
 0x3a2   : > { %v12110_v44 = vpop.f32.mrf.mxu1  ;;  %v12112_v0 = vpop.f32.mrf.mxu0  ;;  %v5065_v59 = vsel %vm4553_vm9, %v4253_v4, %v4809_v20  ;;  %v14000_v4 = vld [vmem:[#allocation94_spill] sm:$0xff]  ;;  %v14001_v20 = vld [vmem:[#allocation156_spill] sm:$0xff] }
 0x3a4   : > { %v12116_v48 = vpop.f32.mrf.mxu1  ;;  %v12118_v8 = vpop.f32.mrf.mxu0  ;;  %5731 = vmatmul.mubr.bf16.gmra.mxu0 %v13989_v29 }
 0x3a5   : > { %13986 = vst [vmem:[#allocation138_spill] sm:$0xff] %v12118_v8  ;;  %5738 = vmatprep.mubr.bf16.mxu0 %v13993_v14  ;;  %v5061_v14 = vsel %vm4549_vm15, %v4249_v30, %v4805_v28  ;;  %v14004_v30 = vld [vmem:[#allocation11_spill] sm:$0xff]  ;;  %v5282_v28 = vpack.c.bf16 %v5074_v50, %v5070_v18  ;;  %v3928_v50 = vadd.f32 %v11996_v7, %v11715_v15 }
 0x3a6   : > { %v12130_v34 = vpop.f32.mrf.mxu1  ;;  %6020 = vmatmul.mubr.bf16.gmra.mxu1 %v5273_v45  ;;  %v12132_v25 = vpop.f32.mrf.mxu0  ;;  %v13997_v45 = vld [vmem:[#allocation129_spill] sm:$0xff]  ;;  %v14005_v16 = vpack.c.bf16 %v14003_v9, %v14004_v30  ;;  %v5082_v9 = vsel %vm4570_vm4, %v4275_v32, %v4826_v53  ;;  %v14012_v32 = vld [vmem:[#allocation18_spill] sm:$0xff] }
 0x3a7   : > { %13994 = vst [vmem:[#allocation113_spill] sm:$0xff] %v12130_v34  ;;  %6027 = vmatprep.mubr.bf16.mxu1 %v5278_v51  ;;  %v4263_v29 = vadd.f32 %v13997_v45, %v3910_v23  ;;  %v13998_v51 = vld [vmem:[#allocation90_spill] sm:$0xff]  ;;  %v5277_v34 = vpack.c.bf16 %v5065_v59, %v5061_v14  ;;  %v14002_v23 = vpack.c.bf16 %v14000_v4, %v14001_v20 }
 0x3a8   : > { %v12138_v17 = vpop.f32.mrf.mxu1  ;;  %v12140_v10 = vpop.f32.mrf.mxu0  ;;  %v4259_v2 = vadd.f32 %v13998_v51, %v3906_v26  ;;  %v3920_v45 = vadd.f32 %v11970_v27, %v11743_v57  ;;  %v3932_v26 = vadd.f32 %v12010_v6, %v11715_v15  ;;  %v3916_v14 = vadd.f32 %v14007_v37, %v11743_v57 }
 0x3a9   : > { %13996 = vst [vmem:[#allocation125_spill] sm:$0xff] %v12140_v10  ;;  %v4817_v33 = vmul.f32 0.2, %v4263_v29  ;;  %vm4561_vm10 = vcmp.gt.f32.partialorder %v4263_v29, 0.0  ;;  %v4822_v27 = vmul.f32 0.2, %v4271_v46  ;;  %v4281_v7 = vadd.f32 %v12002_v54, %v3928_v50 }
 0x3aa   : > { %v12144_v13 = vpop.f32.mrf.mxu1  ;;  %v12146_v5 = vpop.f32.mrf.mxu0  ;;  %v4813_v11 = vmul.f32 0.2, %v4259_v2  ;;  %vm4557_vm14 = vcmp.gt.f32.partialorder %v4259_v2, 0.0  ;;  %v4285_v20 = vadd.f32 %v12014_v1, %v3932_v26  ;;  %v3930_v26 = vadd.f32 %v12004_v49, %v11743_v57 }
 0x3ab   : > { %v5073_v6 = vsel %vm4561_vm10, %v4263_v29, %v4817_v33  ;;  %v14009_v29 = vld [vmem:[#allocation10_spill] sm:$0xff]  ;;  %v14010_v33 = vld [vmem:[#allocation17_spill] sm:$0xff]  ;;  %v5078_v1 = vsel %vm4566_vm6, %v4271_v46, %v4822_v27  ;;  %v3926_v27 = vadd.f32 %v11982_v35, %v11743_v57  ;;  %v4830_v49 = vmul.f32 0.2, %v4281_v7 }
 0x3ac   : > { %v12150_v8 = vpop.f32.mrf.mxu1  ;;  %v12152_v10 = vpop.f32.mrf.mxu0  ;;  %5739 = vmatmul.mubr.bf16.gmra.mxu0 %v14002_v23  ;;  %v5069_v30 = vsel %vm4557_vm14, %v4259_v2, %v4813_v11  ;;  %v14013_v2 = vld [vmem:[#allocation36_spill] sm:$0xff]  ;;  %v5286_v11 = vpack.c.bf16 %v5082_v9, %v5078_v1  ;;  %v4834_v54 = vmul.f32 0.2, %v4285_v20  ;;  %vm4578_vm12 = vcmp.gt.f32.partialorder %v4285_v20, 0.0 }
 0x3ad   : > { %13999 = vst [vmem:[#allocation64_spill] sm:$0xff] %v12152_v10  ;;  %5746 = vmatprep.mubr.bf16.mxu0 %v14005_v16  ;;  %v14008_v16 = vld [vmem:[#allocation6_spill] sm:$0xff]  ;;  %v5281_v37 = vpack.c.bf16 %v5073_v6, %v5069_v30  ;;  %v14014_v53 = vpack.c.bf16 %v14012_v32, %v14013_v2  ;;  %v3938_v9 = vadd.f32 %v12030_v21, %v11715_v15  ;;  %vm4574_vm5 = vcmp.gt.f32.partialorder %v4281_v7, 0.0 }
 0x3ae   : > { %v12164_v42 = vpop.f32.mrf.mxu1  ;;  %6028 = vmatmul.mubr.bf16.gmra.mxu1 %v5277_v34  ;;  %v12166_v59 = vpop.f32.mrf.mxu0  ;;  %v4273_v34 = vadd.f32 %v11974_v22, %v3920_v45  ;;  %v14011_v22 = vpack.c.bf16 %v14009_v29, %v14010_v33  ;;  %v14016_v32 = vld [vmem:[#allocation50_spill] sm:$0xff] }
 0x3af   : > { %14006 = vst [vmem:[#allocation142_spill] sm:$0xff] %v12164_v42  ;;  %6035 = vmatprep.mubr.bf16.mxu1 %v5282_v28  ;;  %v4269_v28 = vadd.f32 %v14008_v16, %v3916_v14  ;;  %v3942_v14 = vadd.f32 %v12044_v41, %v11715_v15  ;;  %v4279_v2 = vadd.f32 %v14016_v32, %v3926_v27 }
 0x3b0   : > { %v12172_v51 = vpop.f32.mrf.mxu1  ;;  %v12174_v4 = vpop.f32.mrf.mxu0  ;;  %v4825_v45 = vmul.f32 0.2, %v4273_v34  ;;  %vm4569_vm0 = vcmp.gt.f32.partialorder %v4273_v34, 0.0  ;;  %v4291_v21 = vadd.f32 %v12036_v31, %v3938_v9  ;;  %v3952_v27 = vadd.f32 %v12078_v43, %v11715_v15 }
 0x3b1   : > { %v4821_v46 = vmul.f32 0.2, %v4269_v28  ;;  %vm4565_vm2 = vcmp.gt.f32.partialorder %v4269_v28, 0.0  ;;  %v4295_v29 = vadd.f32 %v12048_v55, %v3942_v14  ;;  %v5086_v55 = vsel %vm4574_vm5, %v4281_v7, %v4830_v49 }
 0x3b2   : > { %v12178_v23 = vpop.f32.mrf.mxu1  ;;  %v12180_v18 = vpop.f32.mrf.mxu0  ;;  %v5081_v41 = vsel %vm4569_vm0, %v4273_v34, %v4825_v45  ;;  %v14017_v34 = vld [vmem:[#allocation15_spill] sm:$0xff]  ;;  %v14018_v45 = vld [vmem:[#allocation29_spill] sm:$0xff]  ;;  %v3940_v14 = vadd.f32 %v12038_v58, %v11743_v57  ;;  %v4829_v7 = vmul.f32 0.2, %v4279_v2  ;;  %v3936_v49 = vadd.f32 %v12016_v19, %v11743_v57 }
 0x3b3   : > { %v5077_v1 = vsel %vm4565_vm2, %v4269_v28, %v4821_v46  ;;  %v14021_v28 = vld [vmem:[#allocation26_spill] sm:$0xff]  ;;  %v4842_v31 = vmul.f32 0.2, %v4295_v29  ;;  %vm4586_vm11 = vcmp.gt.f32.partialorder %v4295_v29, 0.0  ;;  %vm4573_vm7 = vcmp.gt.f32.partialorder %v4279_v2, 0.0 }
 0x3b4   : > { %v12184_v42 = vpop.f32.mrf.mxu1  ;;  %v12186_v10 = vpop.f32.mrf.mxu0  ;;  %5747 = vmatmul.mubr.bf16.gmra.mxu0 %v14011_v22  ;;  %v5090_v22 = vsel %vm4578_vm12, %v4285_v20, %v4834_v54  ;;  %v14020_v20 = vld [vmem:[#allocation12_spill] sm:$0xff]  ;;  %v4838_v58 = vmul.f32 0.2, %v4291_v21  ;;  %vm4582_vm8 = vcmp.gt.f32.partialorder %v4291_v21, 0.0 }
 0x3b5   : > { %5754 = vmatprep.mubr.bf16.mxu0 %v14014_v53  ;;  %v5285_v53 = vpack.c.bf16 %v5081_v41, %v5077_v1  ;;  %v14022_v54 = vpack.c.bf16 %v14020_v20, %v14021_v28  ;;  %v5290_v46 = vpack.c.bf16 %v5090_v22, %v5086_v55  ;;  %v3948_v22 = vadd.f32 %v12064_v61, %v11715_v15 }
 0x3b6   : > { %v12198_v50 = vpop.f32.mrf.mxu1  ;;  %6036 = vmatmul.mubr.bf16.gmra.mxu1 %v5281_v37  ;;  %v12200_v6 = vpop.f32.mrf.mxu0  ;;  %v4283_v37 = vadd.f32 %v12008_v39, %v3930_v26  ;;  %v14019_v39 = vpack.c.bf16 %v14017_v34, %v14018_v45  ;;  %v4305_v34 = vadd.f32 %v12082_v56, %v3952_v27  ;;  %v5085_v55 = vsel %vm4573_vm7, %v4279_v2, %v4829_v7  ;;  %v14027_v2 = vld [vmem:[#allocation19_spill] sm:$0xff] }
 0x3b7   : > { %14015 = vst [vmem:[#allocation63_spill] sm:$0xff] %v12198_v50  ;;  %6043 = vmatprep.mubr.bf16.mxu1 %v5286_v11  ;;  %v4289_v20 = vadd.f32 %v12028_v52, %v3936_v49  ;;  %v4301_v61 = vadd.f32 %v12070_v40, %v3948_v22  ;;  %v5094_v56 = vsel %vm4582_vm8, %v4291_v21, %v4838_v58 }
 0x3b8   : > { %v12206_v30 = vpop.f32.mrf.mxu1  ;;  %v12208_v16 = vpop.f32.mrf.mxu0  ;;  %v4833_v26 = vmul.f32 0.2, %v4283_v37  ;;  %vm4577_vm1 = vcmp.gt.f32.partialorder %v4283_v37, 0.0  ;;  %v3950_v27 = vadd.f32 %v12072_v60, %v11743_v57  ;;  %v4850_v40 = vmul.f32 0.2, %v4305_v34 }
 0x3b9   : > { %v3962_v7 = vadd.f32 %v12112_v0, %v11715_v15  ;;  %v4837_v21 = vmul.f32 0.2, %v4289_v20  ;;  %v3946_v58 = vadd.f32 %v12050_v62, %v11743_v57  ;;  %vm4594_vm3 = vcmp.gt.f32.partialorder %v4305_v34, 0.0 }
 0x3ba   : > { %v12212_v33 = vpop.f32.mrf.mxu1  ;;  %v12214_v35 = vpop.f32.mrf.mxu0  ;;  %v5089_v43 = vsel %vm4577_vm1, %v4283_v37, %v4833_v26  ;;  %v14023_v37 = vld [vmem:[#allocation22_spill] sm:$0xff]  ;;  %v14024_v26 = vld [vmem:[#allocation37_spill] sm:$0xff]  ;;  %vm4581_vm15 = vcmp.gt.f32.partialorder %v4289_v20, 0.0  ;;  %v4846_v60 = vmul.f32 0.2, %v4301_v61  ;;  %vm4590_vm13 = vcmp.gt.f32.partialorder %v4301_v61, 0.0 }
 0x3bb   : > { %v5289_v28 = vpack.c.bf16 %v5089_v43, %v5085_v55  ;;  %v3958_v43 = vadd.f32 %v12098_v12, %v11715_v15 }
 0x3bc   : > { %v12218_v11 = vpop.f32.mrf.mxu1  ;;  %v12220_v50 = vpop.f32.mrf.mxu0  ;;  %5755 = vmatmul.mubr.bf16.gmra.mxu0 %v14019_v39  ;;  %v5098_v39 = vsel %vm4586_vm11, %v4295_v29, %v4842_v31  ;;  %v14026_v29 = vld [vmem:[#allocation33_spill] sm:$0xff] }
 0x3bd   : > { %5762 = vmatprep.mubr.bf16.mxu0 %v14022_v54  ;;  %v14028_v31 = vpack.c.bf16 %v14026_v29, %v14027_v2  ;;  %v5294_v52 = vpack.c.bf16 %v5098_v39, %v5094_v56  ;;  %v5093_v56 = vsel %vm4581_vm15, %v4289_v20, %v4837_v21  ;;  %v4299_v29 = vadd.f32 %v12062_v47, %v3946_v58  ;;  %v14033_v20 = vld [vmem:[#allocation40_spill] sm:$0xff] }
 0x3be   : > { %v12232_v9 = vpop.f32.mrf.mxu1  ;;  %6044 = vmatmul.mubr.bf16.gmra.mxu1 %v5285_v53  ;;  %v12234_v41 = vpop.f32.mrf.mxu0  ;;  %v4293_v53 = vadd.f32 %v12042_v3, %v3940_v14  ;;  %v14025_v3 = vpack.c.bf16 %v14023_v37, %v14024_v26  ;;  %v4315_v37 = vadd.f32 %v12116_v48, %v3962_v7  ;;  %v4311_v12 = vadd.f32 %v12104_v63, %v3958_v43 }
 0x3bf   : > { %6051 = vmatprep.mubr.bf16.mxu1 %v5290_v46  ;;  %v5102_v48 = vsel %vm4590_vm13, %v4301_v61, %v4846_v60  ;;  %v3960_v7 = vadd.f32 %v12106_v36, %v11743_v57  ;;  %v3972_v21 = vadd.f32 %v12146_v5, %v11715_v15  ;;  %v4845_v61 = vmul.f32 0.2, %v4299_v29 }
 0x3c0   : > { %v12240_v1 = vpop.f32.mrf.mxu1  ;;  %v12242_v32 = vpop.f32.mrf.mxu0  ;;  %v4841_v14 = vmul.f32 0.2, %v4293_v53  ;;  %vm4585_vm9 = vcmp.gt.f32.partialorder %v4293_v53, 0.0  ;;  %v4858_v63 = vmul.f32 0.2, %v4315_v37  ;;  %v3956_v60 = vadd.f32 %v12084_v24, %v11743_v57 }
 0x3c1   : > { %vm4602_vm4 = vcmp.gt.f32.partialorder %v4315_v37, 0.0  ;;  %vm4589_vm14 = vcmp.gt.f32.partialorder %v4299_v29, 0.0  ;;  %v4854_v36 = vmul.f32 0.2, %v4311_v12  ;;  %vm4598_vm6 = vcmp.gt.f32.partialorder %v4311_v12, 0.0 }
 0x3c2   : > { %v12246_v45 = vpop.f32.mrf.mxu1  ;;  %v12248_v19 = vpop.f32.mrf.mxu0  ;;  %v5097_v0 = vsel %vm4585_vm9, %v4293_v53, %v4841_v14  ;;  %v14029_v53 = vld [vmem:[#allocation32_spill] sm:$0xff] }
 0x3c3   : > { %v5293_v2 = vpack.c.bf16 %v5097_v0, %v5093_v56  ;;  %v14030_v14 = vld [vmem:[#allocation44_spill] sm:$0xff]  ;;  %v3968_v0 = vadd.f32 %v12132_v25, %v11715_v15 }
 0x3c4   : > { %v12252_v54 = vpop.f32.mrf.mxu1  ;;  %v12254_v46 = vpop.f32.mrf.mxu0  ;;  %5763 = vmatmul.mubr.bf16.gmra.mxu0 %v14025_v3  ;;  %v5106_v3 = vsel %vm4594_vm3, %v4305_v34, %v4850_v40  ;;  %v14032_v34 = vld [vmem:[#allocation27_spill] sm:$0xff] }
 0x3c5   : > { %5770 = vmatprep.mubr.bf16.mxu0 %v14028_v31  ;;  %v14034_v40 = vpack.c.bf16 %v14032_v34, %v14033_v20  ;;  %v5298_v47 = vpack.c.bf16 %v5106_v3, %v5102_v48  ;;  %v5101_v48 = vsel %vm4589_vm14, %v4299_v29, %v4845_v61  ;;  %v14037_v34 = vld [vmem:[#allocation134_spill] sm:$0xff]  ;;  %v4321_v25 = vadd.f32 %v12138_v17, %v3968_v0 }
 0x3c6   : > { %v12266_v49 = vpop.f32.mrf.mxu1  ;;  %6052 = vmatmul.mubr.bf16.gmra.mxu1 %v5289_v28  ;;  %v12268_v22 = vpop.f32.mrf.mxu0  ;;  %v4303_v28 = vadd.f32 %v12076_v38, %v3950_v27  ;;  %v14031_v38 = vpack.c.bf16 %v14029_v53, %v14030_v14  ;;  %v4325_v53 = vadd.f32 %v12150_v8, %v3972_v21  ;;  %v4309_v20 = vadd.f32 %v14037_v34, %v3956_v60  ;;  %v14042_v21 = vld [vmem:[#allocation125_spill] sm:$0xff]  ;;  %v14044_v29 = vld [vmem:[#allocation38_spill] sm:$0xff] }
 0x3c7   : > { %6059 = vmatprep.mubr.bf16.mxu1 %v5294_v52  ;;  %v5110_v8 = vsel %vm4598_vm6, %v4311_v12, %v4854_v36  ;;  %v3982_v60 = vadd.f32 %v12180_v18, %v11715_v15  ;;  %v14047_v36 = vld [vmem:[#allocation138_spill] sm:$0xff]  ;;  %v4862_v34 = vmul.f32 0.2, %v4321_v25  ;;  %vm4606_vm5 = vcmp.gt.f32.partialorder %v4321_v25, 0.0 }
 0x3c8   : > { %v12274_v39 = vpop.f32.mrf.mxu1  ;;  %v12276_v55 = vpop.f32.mrf.mxu0  ;;  %v4849_v27 = vmul.f32 0.2, %v4303_v28  ;;  %vm4593_vm10 = vcmp.gt.f32.partialorder %v4303_v28, 0.0  ;;  %v4866_v17 = vmul.f32 0.2, %v4325_v53  ;;  %vm4610_vm12 = vcmp.gt.f32.partialorder %v4325_v53, 0.0 }
 0x3c9   : > { %v4853_v12 = vmul.f32 0.2, %v4309_v20  ;;  %vm4597_vm2 = vcmp.gt.f32.partialorder %v4309_v20, 0.0 }
 0x3ca   : > { %v12280_v26 = vpop.f32.mrf.mxu1  ;;  %v12282_v62 = vpop.f32.mrf.mxu0  ;;  %v5105_v5 = vsel %vm4593_vm10, %v4303_v28, %v4849_v27  ;;  %v14039_v28 = vld [vmem:[#allocation35_spill] sm:$0xff]  ;;  %v14040_v27 = vld [vmem:[#allocation20_spill] sm:$0xff] }
 0x3cc   : > { %v12286_v31 = vpop.f32.mrf.mxu1  ;;  %v12288_v52 = vpop.f32.mrf.mxu0  ;;  %5771 = vmatmul.mubr.bf16.gmra.mxu0 %v14031_v38  ;;  %v5114_v38 = vsel %vm4602_vm4, %v4315_v37, %v4858_v63  ;;  %v14043_v37 = vld [vmem:[#allocation13_spill] sm:$0xff] }
 0x3cd   : > { %5778 = vmatprep.mubr.bf16.mxu0 %v14034_v40  ;;  %v5297_v40 = vpack.c.bf16 %v5105_v5, %v5101_v48  ;;  %v14045_v63 = vpack.c.bf16 %v14043_v37, %v14044_v29  ;;  %v5302_v61 = vpack.c.bf16 %v5114_v38, %v5110_v8  ;;  %v3966_v48 = vadd.f32 %v14047_v36, %v11743_v57 }
 0x3ce   : > { %v12300_v58 = vpop.f32.mrf.mxu1  ;;  %6060 = vmatmul.mubr.bf16.gmra.mxu1 %v5293_v2  ;;  %v12302_v43 = vpop.f32.mrf.mxu0  ;;  %v4313_v2 = vadd.f32 %v12110_v44, %v3960_v7  ;;  %v14041_v44 = vpack.c.bf16 %v14039_v28, %v14040_v27  ;;  %v3978_v38 = vadd.f32 %v12166_v59, %v11715_v15  ;;  %v5122_v37 = vsel %vm4610_vm12, %v4325_v53, %v4866_v17  ;;  %v14053_v53 = vld [vmem:[#allocation43_spill] sm:$0xff] }
 0x3cf   : > { %14035 = vst [vmem:[#allocation137_spill] sm:$0xff] %v12300_v58  ;;  %6067 = vmatprep.mubr.bf16.mxu1 %v5298_v47  ;;  %v5109_v29 = vsel %vm4597_vm2, %v4309_v20, %v4853_v12  ;;  %v14054_v20 = vld [vmem:[#allocation23_spill] sm:$0xff] }
 0x3d0   : > { %v12308_v3 = vpop.f32.mrf.mxu1  ;;  %v12310_v56 = vpop.f32.mrf.mxu0  ;;  %v4857_v7 = vmul.f32 0.2, %v4313_v2  ;;  %vm4601_vm0 = vcmp.gt.f32.partialorder %v4313_v2, 0.0  ;;  %v4331_v59 = vadd.f32 %v12172_v51, %v3978_v38  ;;  %v14055_v17 = vpack.c.bf16 %v14053_v53, %v14054_v20 }
 0x3d2   : > { %v12314_v14 = vpop.f32.mrf.mxu1  ;;  %v12316_v24 = vpop.f32.mrf.mxu0  ;;  %v5113_v18 = vsel %vm4601_vm0, %v4313_v2, %v4857_v7  ;;  %v14050_v2 = vld [vmem:[#allocation45_spill] sm:$0xff]  ;;  %v14051_v7 = vld [vmem:[#allocation28_spill] sm:$0xff]  ;;  %vm4614_vm8 = vcmp.gt.f32.partialorder %v4331_v59, 0.0 }
 0x3d3   : > { %14036 = vst [vmem:[#allocation105_spill] sm:$0xff] %v12314_v14  ;;  %v3970_v14 = vadd.f32 %v14042_v21, %v11743_v57  ;;  %v5301_v36 = vpack.c.bf16 %v5113_v18, %v5109_v29 }
 0x3d4   : > { %v12320_v47 = vpop.f32.mrf.mxu1  ;;  %v12322_v58 = vpop.f32.mrf.mxu0  ;;  %5779 = vmatmul.mubr.bf16.gmra.mxu0 %v14041_v44  ;;  %v4335_v44 = vadd.f32 %v12184_v42, %v3982_v60  ;;  %v5118_v42 = vsel %vm4606_vm5, %v4321_v25, %v4862_v34  ;;  %v3980_v60 = vadd.f32 %v12174_v4, %v11743_v57  ;;  %v14057_v34 = vld [vmem:[#allocation64_spill] sm:$0xff]  ;;  %v4870_v4 = vmul.f32 0.2, %v4331_v59 }
 0x3d5   : > { %14038 = vst [vmem:[#allocation140_spill] sm:$0xff] %v12322_v58  ;;  %5786 = vmatprep.mubr.bf16.mxu0 %v14045_v63  ;;  %v14048_v63 = vld [vmem:[#allocation113_spill] sm:$0xff]  ;;  %v5306_v12 = vpack.c.bf16 %v5122_v37, %v5118_v42  ;;  %v3976_v29 = vadd.f32 %v14057_v34, %v11743_v57  ;;  %v3988_v37 = vadd.f32 %v12200_v6, %v11715_v15 }
 0x3d6   : > { %v12334_v0 = vpop.f32.mrf.mxu1  ;;  %6068 = vmatmul.mubr.bf16.gmra.mxu1 %v5297_v40  ;;  %v12336_v5 = vpop.f32.mrf.mxu0  ;;  %v4323_v40 = vadd.f32 %v12144_v13, %v3970_v14  ;;  %v14052_v13 = vpack.c.bf16 %v14050_v2, %v14051_v7  ;;  %v4874_v51 = vmul.f32 0.2, %v4335_v44  ;;  %vm4618_vm11 = vcmp.gt.f32.partialorder %v4335_v44, 0.0 }
 0x3d7   : > { %14046 = vst [vmem:[#allocation153_spill] sm:$0xff] %v12334_v0  ;;  %6075 = vmatprep.mubr.bf16.mxu1 %v5302_v61  ;;  %v4319_v61 = vadd.f32 %v14048_v63, %v3966_v48  ;;  %v3992_v48 = vadd.f32 %v12214_v35, %v11715_v15  ;;  %v4341_v6 = vadd.f32 %v12206_v30, %v3988_v37 }
 0x3d8   : > { %v12342_v28 = vpop.f32.mrf.mxu1  ;;  %v12344_v27 = vpop.f32.mrf.mxu0  ;;  %v4865_v14 = vmul.f32 0.2, %v4323_v40  ;;  %vm4609_vm1 = vcmp.gt.f32.partialorder %v4323_v40, 0.0  ;;  %v5130_v53 = vsel %vm4618_vm11, %v4335_v44, %v4874_v51  ;;  %v14062_v44 = vld [vmem:[#allocation55_spill] sm:$0xff] }
 0x3d9   : > { %v4861_v25 = vmul.f32 0.2, %v4319_v61  ;;  %vm4605_vm7 = vcmp.gt.f32.partialorder %v4319_v61, 0.0  ;;  %v4345_v7 = vadd.f32 %v12218_v11, %v3992_v48  ;;  %v5126_v11 = vsel %vm4614_vm8, %v4331_v59, %v4870_v4 }
 0x3da   : > { %v12348_v8 = vpop.f32.mrf.mxu1  ;;  %v12350_v21 = vpop.f32.mrf.mxu0  ;;  %v5121_v35 = vsel %vm4609_vm1, %v4323_v40, %v4865_v14  ;;  %v14059_v40 = vld [vmem:[#allocation21_spill] sm:$0xff]  ;;  %v14060_v14 = vld [vmem:[#allocation7_spill] sm:$0xff]  ;;  %v3990_v48 = vadd.f32 %v12208_v16, %v11743_v57  ;;  %v3986_v4 = vadd.f32 %v12186_v10, %v11743_v57  ;;  %v4878_v16 = vmul.f32 0.2, %v4341_v6 }
 0x3db   : > { %v5117_v20 = vsel %vm4605_vm7, %v4319_v61, %v4861_v25  ;;  %v14063_v61 = vld [vmem:[#allocation48_spill] sm:$0xff]  ;;  %v5310_v25 = vpack.c.bf16 %v5130_v53, %v5126_v11  ;;  %v4882_v30 = vmul.f32 0.2, %v4345_v7  ;;  %vm4626_vm3 = vcmp.gt.f32.partialorder %v4345_v7, 0.0 }
 0x3dc   : > { %v12354_v0 = vpop.f32.mrf.mxu1  ;;  %v12356_v58 = vpop.f32.mrf.mxu0  ;;  %5787 = vmatmul.mubr.bf16.gmra.mxu0 %v14052_v13  ;;  %v5305_v34 = vpack.c.bf16 %v5121_v35, %v5117_v20  ;;  %v14064_v51 = vpack.c.bf16 %v14062_v44, %v14063_v61  ;;  %v3998_v53 = vadd.f32 %v12234_v41, %v11715_v15  ;;  %vm4622_vm13 = vcmp.gt.f32.partialorder %v4341_v6, 0.0  ;;  %v14066_v44 = vld [vmem:[#allocation63_spill] sm:$0xff] }
 0x3dd   : > { %14049 = vst [vmem:[#allocation135_spill] sm:$0xff] %v12356_v58  ;;  %5794 = vmatprep.mubr.bf16.mxu0 %v14055_v17  ;;  %v14058_v17 = vld [vmem:[#allocation142_spill] sm:$0xff]  ;;  %v4339_v61 = vadd.f32 %v14066_v44, %v3986_v4  ;;  %v4012_v4 = vadd.f32 %v12282_v62, %v11715_v15 }
 0x3de   : > { %v12368_v38 = vpop.f32.mrf.mxu1  ;;  %6076 = vmatmul.mubr.bf16.gmra.mxu1 %v5301_v36  ;;  %v12370_v18 = vpop.f32.mrf.mxu0  ;;  %v4333_v36 = vadd.f32 %v12178_v23, %v3980_v60  ;;  %v14061_v23 = vpack.c.bf16 %v14059_v40, %v14060_v14  ;;  %v4351_v41 = vadd.f32 %v12240_v1, %v3998_v53 }
 0x3df   : > { %14056 = vst [vmem:[#allocation58_spill] sm:$0xff] %v12368_v38  ;;  %6083 = vmatprep.mubr.bf16.mxu1 %v5306_v12  ;;  %v4329_v12 = vadd.f32 %v14058_v17, %v3976_v29  ;;  %v4002_v29 = vadd.f32 %v12248_v19, %v11715_v15  ;;  %vm4621_vm14 = vcmp.gt.f32.partialorder %v4339_v61, 0.0 }
 0x3e0   : > { %v12376_v63 = vpop.f32.mrf.mxu1  ;;  %v12378_v2 = vpop.f32.mrf.mxu0  ;;  %v4873_v60 = vmul.f32 0.2, %v4333_v36  ;;  %vm4617_vm9 = vcmp.gt.f32.partialorder %v4333_v36, 0.0  ;;  %vm4630_vm6 = vcmp.gt.f32.partialorder %v4351_v41, 0.0 }
 0x3e1   : > { %v4869_v59 = vmul.f32 0.2, %v4329_v12  ;;  %vm4613_vm15 = vcmp.gt.f32.partialorder %v4329_v12, 0.0  ;;  %v4355_v40 = vadd.f32 %v12252_v54, %v4002_v29  ;;  %v5134_v54 = vsel %vm4622_vm13, %v4341_v6, %v4878_v16 }
 0x3e2   : > { %v12382_v13 = vpop.f32.mrf.mxu1  ;;  %v12384_v42 = vpop.f32.mrf.mxu0  ;;  %v5129_v19 = vsel %vm4617_vm9, %v4333_v36, %v4873_v60  ;;  %v14067_v36 = vld [vmem:[#allocation52_spill] sm:$0xff]  ;;  %v14068_v60 = vld [vmem:[#allocation14_spill] sm:$0xff]  ;;  %v4000_v29 = vadd.f32 %v12242_v32, %v11743_v57  ;;  %v4877_v6 = vmul.f32 0.2, %v4339_v61  ;;  %v3996_v16 = vadd.f32 %v12220_v50, %v11743_v57 }
 0x3e3   : > { %v5125_v11 = vsel %vm4613_vm15, %v4329_v12, %v4869_v59  ;;  %v14071_v12 = vld [vmem:[#allocation56_spill] sm:$0xff]  ;;  %v4890_v1 = vmul.f32 0.2, %v4355_v40  ;;  %vm4634_vm4 = vcmp.gt.f32.partialorder %v4355_v40, 0.0  ;;  %v4886_v32 = vmul.f32 0.2, %v4351_v41 }
 0x3e4   : > { %v12388_v38 = vpop.f32.mrf.mxu1  ;;  %v12390_v58 = vpop.f32.mrf.mxu0  ;;  %5795 = vmatmul.mubr.bf16.gmra.mxu0 %v14061_v23  ;;  %v5138_v23 = vsel %vm4626_vm3, %v4345_v7, %v4882_v30  ;;  %v14070_v7 = vld [vmem:[#allocation74_spill] sm:$0xff] }
 0x3e5   : > { %5802 = vmatprep.mubr.bf16.mxu0 %v14064_v51  ;;  %v5309_v51 = vpack.c.bf16 %v5129_v19, %v5125_v11  ;;  %v14072_v30 = vpack.c.bf16 %v14070_v7, %v14071_v12  ;;  %v5314_v59 = vpack.c.bf16 %v5138_v23, %v5134_v54  ;;  %v4008_v23 = vadd.f32 %v12268_v22, %v11715_v15 }
 0x3e6   : > { %v12402_v37 = vpop.f32.mrf.mxu1  ;;  %6084 = vmatmul.mubr.bf16.gmra.mxu1 %v5305_v34  ;;  %v12404_v35 = vpop.f32.mrf.mxu0  ;;  %v4343_v34 = vadd.f32 %v12212_v33, %v3990_v48  ;;  %v14069_v33 = vpack.c.bf16 %v14067_v36, %v14068_v60  ;;  %v4365_v36 = vadd.f32 %v12286_v31, %v4012_v4  ;;  %v5133_v54 = vsel %vm4621_vm14, %v4339_v61, %v4877_v6  ;;  %v14077_v61 = vld [vmem:[#allocation39_spill] sm:$0xff] }
 0x3e7   : > { %14065 = vst [vmem:[#allocation106_spill] sm:$0xff] %v12402_v37  ;;  %6091 = vmatprep.mubr.bf16.mxu1 %v5310_v25  ;;  %v4349_v7 = vadd.f32 %v12232_v9, %v3996_v16  ;;  %v4361_v22 = vadd.f32 %v12274_v39, %v4008_v23  ;;  %v5142_v31 = vsel %vm4630_vm6, %v4351_v41, %v4886_v32 }
 0x3e8   : > { %v12410_v20 = vpop.f32.mrf.mxu1  ;;  %v12412_v17 = vpop.f32.mrf.mxu0  ;;  %v4881_v48 = vmul.f32 0.2, %v4343_v34  ;;  %vm4625_vm10 = vcmp.gt.f32.partialorder %v4343_v34, 0.0  ;;  %v4010_v4 = vadd.f32 %v12276_v55, %v11743_v57  ;;  %v4898_v39 = vmul.f32 0.2, %v4365_v36 }
 0x3e9   : > { %v4022_v6 = vadd.f32 %v12316_v24, %v11715_v15  ;;  %v4885_v41 = vmul.f32 0.2, %v4349_v7  ;;  %v4006_v32 = vadd.f32 %v12254_v46, %v11743_v57  ;;  %vm4642_vm12 = vcmp.gt.f32.partialorder %v4365_v36, 0.0 }
 0x3ea   : > { %v12416_v14 = vpop.f32.mrf.mxu1  ;;  %v12418_v10 = vpop.f32.mrf.mxu0  ;;  %v5137_v62 = vsel %vm4625_vm10, %v4343_v34, %v4881_v48  ;;  %v14073_v34 = vld [vmem:[#allocation34_spill] sm:$0xff]  ;;  %v14074_v48 = vld [vmem:[#allocation24_spill] sm:$0xff]  ;;  %vm4629_vm2 = vcmp.gt.f32.partialorder %v4349_v7, 0.0  ;;  %v4894_v55 = vmul.f32 0.2, %v4361_v22  ;;  %vm4638_vm5 = vcmp.gt.f32.partialorder %v4361_v22, 0.0 }
 0x3eb   : > { %v5313_v12 = vpack.c.bf16 %v5137_v62, %v5133_v54  ;;  %v4018_v62 = vadd.f32 %v12302_v43, %v11715_v15 }
 0x3ec   : > { %v12422_v25 = vpop.f32.mrf.mxu1  ;;  %v12424_v37 = vpop.f32.mrf.mxu0  ;;  %5803 = vmatmul.mubr.bf16.gmra.mxu0 %v14069_v33  ;;  %v5146_v33 = vsel %vm4634_vm4, %v4355_v40, %v4890_v1  ;;  %v14076_v40 = vld [vmem:[#allocation9_spill] sm:$0xff] }
 0x3ed   : > { %5810 = vmatprep.mubr.bf16.mxu0 %v14072_v30  ;;  %v14078_v1 = vpack.c.bf16 %v14076_v40, %v14077_v61  ;;  %v5318_v9 = vpack.c.bf16 %v5146_v33, %v5142_v31  ;;  %v5141_v31 = vsel %vm4629_vm2, %v4349_v7, %v4885_v41  ;;  %v4359_v40 = vadd.f32 %v12266_v49, %v4006_v32  ;;  %v14084_v7 = vld [vmem:[#allocation47_spill] sm:$0xff] }
 0x3ee   : > { %v12436_v53 = vpop.f32.mrf.mxu1  ;;  %6092 = vmatmul.mubr.bf16.gmra.mxu1 %v5309_v51  ;;  %v12438_v19 = vpop.f32.mrf.mxu0  ;;  %v4353_v51 = vadd.f32 %v12246_v45, %v4000_v29  ;;  %v14075_v45 = vpack.c.bf16 %v14073_v34, %v14074_v48  ;;  %v4375_v34 = vadd.f32 %v12320_v47, %v4022_v6  ;;  %v4371_v43 = vadd.f32 %v12308_v3, %v4018_v62 }
 0x3ef   : > { %6099 = vmatprep.mubr.bf16.mxu1 %v5314_v59  ;;  %v5150_v47 = vsel %vm4638_vm5, %v4361_v22, %v4894_v55  ;;  %v4020_v6 = vadd.f32 %v12310_v56, %v11743_v57  ;;  %v4032_v41 = vadd.f32 %v12350_v21, %v11715_v15  ;;  %v4893_v22 = vmul.f32 0.2, %v4359_v40 }
 0x3f0   : > { %v12444_v11 = vpop.f32.mrf.mxu1  ;;  %v12446_v44 = vpop.f32.mrf.mxu0  ;;  %v4889_v29 = vmul.f32 0.2, %v4353_v51  ;;  %vm4633_vm0 = vcmp.gt.f32.partialorder %v4353_v51, 0.0  ;;  %v4906_v3 = vmul.f32 0.2, %v4375_v34  ;;  %v4016_v55 = vadd.f32 %v12288_v52, %v11743_v57 }
 0x3f1   : > { %vm4650_vm11 = vcmp.gt.f32.partialorder %v4375_v34, 0.0  ;;  %vm4637_vm7 = vcmp.gt.f32.partialorder %v4359_v40, 0.0  ;;  %v4902_v56 = vmul.f32 0.2, %v4371_v43  ;;  %vm4646_vm8 = vcmp.gt.f32.partialorder %v4371_v43, 0.0 }
 0x3f2   : > { %v12450_v60 = vpop.f32.mrf.mxu1  ;;  %v12452_v50 = vpop.f32.mrf.mxu0  ;;  %v5145_v24 = vsel %vm4633_vm0, %v4353_v51, %v4889_v29  ;;  %v14080_v51 = vld [vmem:[#allocation41_spill] sm:$0xff]  ;;  %v14081_v29 = vld [vmem:[#allocation30_spill] sm:$0xff] }
 0x3f3   : > { %v5317_v61 = vpack.c.bf16 %v5145_v24, %v5141_v31  ;;  %v4028_v24 = vadd.f32 %v12336_v5, %v11715_v15 }
 0x3f4   : > { %v12456_v30 = vpop.f32.mrf.mxu1  ;;  %v12458_v59 = vpop.f32.mrf.mxu0  ;;  %5811 = vmatmul.mubr.bf16.gmra.mxu0 %v14075_v45  ;;  %v5154_v45 = vsel %vm4642_vm12, %v4365_v36, %v4898_v39  ;;  %v14083_v36 = vld [vmem:[#allocation65_spill] sm:$0xff] }
 0x3f5   : > { %5818 = vmatprep.mubr.bf16.mxu0 %v14078_v1  ;;  %v14085_v39 = vpack.c.bf16 %v14083_v36, %v14084_v7  ;;  %v5322_v49 = vpack.c.bf16 %v5154_v45, %v5150_v47  ;;  %v5162_v47 = vsel %vm4650_vm11, %v4375_v34, %v4906_v3  ;;  %v5149_v36 = vsel %vm4637_vm7, %v4359_v40, %v4893_v22  ;;  %v14088_v7 = vld [vmem:[#allocation137_spill] sm:$0xff]  ;;  %v14093_v34 = vld [vmem:[#allocation68_spill] sm:$0xff]  ;;  %v14094_v40 = vld [vmem:[#allocation71_spill] sm:$0xff] }
 0x3f6   : > { %v12470_v16 = vpop.f32.mrf.mxu1  ;;  %6100 = vmatmul.mubr.bf16.gmra.mxu1 %v5313_v12  ;;  %v12472_v23 = vpop.f32.mrf.mxu0  ;;  %v4363_v12 = vadd.f32 %v12280_v26, %v4010_v4  ;;  %v14082_v26 = vpack.c.bf16 %v14080_v51, %v14081_v29  ;;  %v4385_v29 = vadd.f32 %v12354_v0, %v4032_v41  ;;  %v4381_v5 = vadd.f32 %v12342_v28, %v4028_v24 }
 0x3f7   : > { %6107 = vmatprep.mubr.bf16.mxu1 %v5318_v9  ;;  %v5158_v0 = vsel %vm4646_vm8, %v4371_v43, %v4902_v56  ;;  %v14095_v3 = vpack.c.bf16 %v14093_v34, %v14094_v40  ;;  %v14097_v56 = vld [vmem:[#allocation140_spill] sm:$0xff] }
 0x3f8   : > { %v12478_v33 = vpop.f32.mrf.mxu1  ;;  %v12480_v54 = vpop.f32.mrf.mxu0  ;;  %v4897_v4 = vmul.f32 0.2, %v4363_v12  ;;  %vm4641_vm1 = vcmp.gt.f32.partialorder %v4363_v12, 0.0  ;;  %v5326_v22 = vpack.c.bf16 %v5162_v47, %v5158_v0  ;;  %v4914_v28 = vmul.f32 0.2, %v4385_v29 }
 0x3f9   : > { %vm4658_vm3 = vcmp.gt.f32.partialorder %v4385_v29, 0.0  ;;  %v4038_v47 = vadd.f32 %v12370_v18, %v11715_v15  ;;  %vm4654_vm13 = vcmp.gt.f32.partialorder %v4381_v5, 0.0 }
 0x3fa   : > { %v12484_v48 = vpop.f32.mrf.mxu1  ;;  %v12486_v46 = vpop.f32.mrf.mxu0  ;;  %v5153_v21 = vsel %vm4641_vm1, %v4363_v12, %v4897_v4  ;;  %v14090_v12 = vld [vmem:[#allocation46_spill] sm:$0xff]  ;;  %v5170_v34 = vsel %vm4658_vm3, %v4385_v29, %v4914_v28 }
 0x3fb   : > { %v14091_v4 = vld [vmem:[#allocation42_spill] sm:$0xff]  ;;  %v4391_v18 = vadd.f32 %v12376_v63, %v4038_v47 }
 0x3fc   : > { %v12490_v1 = vpop.f32.mrf.mxu1  ;;  %v12492_v9 = vpop.f32.mrf.mxu0  ;;  %5819 = vmatmul.mubr.bf16.gmra.mxu0 %v14082_v26  ;;  %v14103_v29 = vld [vmem:[#allocation54_spill] sm:$0xff] }
 0x3fd   : > { %14079 = vst [vmem:[#allocation101_spill] sm:$0xff] %v12492_v9  ;;  %5826 = vmatprep.mubr.bf16.mxu0 %v14085_v39  ;;  %v4369_v39 = vadd.f32 %v14088_v7, %v4016_v55  ;;  %v4042_v55 = vadd.f32 %v12384_v42, %v11715_v15  ;;  %vm4662_vm6 = vcmp.gt.f32.partialorder %v4391_v18, 0.0 }
 0x3fe   : > { %v12504_v32 = vpop.f32.mrf.mxu1  ;;  %6108 = vmatmul.mubr.bf16.gmra.mxu1 %v5317_v61  ;;  %v12506_v62 = vpop.f32.mrf.mxu0  ;;  %v14087_v61 = vld [vmem:[#allocation105_spill] sm:$0xff] }
 0x3ff   : > { %14086 = vst [vmem:[#allocation118_spill] sm:$0xff] %v12504_v32  ;;  %6115 = vmatprep.mubr.bf16.mxu1 %v5322_v49  ;;  %v4373_v51 = vadd.f32 %v14087_v61, %v4020_v6  ;;  %v5321_v49 = vpack.c.bf16 %v5153_v21, %v5149_v36  ;;  %v14092_v6 = vpack.c.bf16 %v14090_v12, %v14091_v4  ;;  %v4901_v43 = vmul.f32 0.2, %v4369_v39 }
 0x400   : > { %v12512_v45 = vpop.f32.mrf.mxu1  ;;  %v12514_v31 = vpop.f32.mrf.mxu0  ;;  %v4030_v61 = vadd.f32 %v12344_v27, %v11743_v57  ;;  %v4026_v36 = vadd.f32 %v14097_v56, %v11743_v57  ;;  %vm4645_vm15 = vcmp.gt.f32.partialorder %v4369_v39, 0.0  ;;  %v4910_v27 = vmul.f32 0.2, %v4381_v5 }
 0x401   : > { %v4905_v41 = vmul.f32 0.2, %v4373_v51  ;;  %vm4649_vm9 = vcmp.gt.f32.partialorder %v4373_v51, 0.0  ;;  %v4395_v4 = vadd.f32 %v12388_v38, %v4042_v55  ;;  %v5157_v40 = vsel %vm4645_vm15, %v4369_v39, %v4901_v43  ;;  %v14104_v39 = vld [vmem:[#allocation76_spill] sm:$0xff] }
 0x402   : > { %v12518_v26 = vpop.f32.mrf.mxu1  ;;  %v12520_v52 = vpop.f32.mrf.mxu0  ;;  %v5166_v38 = vsel %vm4654_vm13, %v4381_v5, %v4910_v27  ;;  %v4040_v55 = vadd.f32 %v12378_v2, %v11743_v57  ;;  %v14105_v28 = vpack.c.bf16 %v14103_v29, %v14104_v39  ;;  %v14107_v27 = vld [vmem:[#allocation135_spill] sm:$0xff]  ;;  %v4918_v2 = vmul.f32 0.2, %v4391_v18 }
 0x403   : > { %v5161_v42 = vsel %vm4649_vm9, %v4373_v51, %v4905_v41  ;;  %v14100_v51 = vld [vmem:[#allocation49_spill] sm:$0xff]  ;;  %v14101_v41 = vld [vmem:[#allocation67_spill] sm:$0xff]  ;;  %v5330_v43 = vpack.c.bf16 %v5170_v34, %v5166_v38  ;;  %v4922_v63 = vmul.f32 0.2, %v4395_v4  ;;  %vm4666_vm4 = vcmp.gt.f32.partialorder %v4395_v4, 0.0 }
 0x404   : > { %v12524_v32 = vpop.f32.mrf.mxu1  ;;  %v12526_v9 = vpop.f32.mrf.mxu0  ;;  %5827 = vmatmul.mubr.bf16.gmra.mxu0 %v14092_v6  ;;  %v5325_v56 = vpack.c.bf16 %v5161_v42, %v5157_v40  ;;  %v4036_v40 = vadd.f32 %v14107_v27, %v11743_v57  ;;  %v4048_v34 = vadd.f32 %v12404_v35, %v11715_v15 }
 0x405   : > { %14089 = vst [vmem:[#allocation133_spill] sm:$0xff] %v12526_v9  ;;  %5834 = vmatprep.mubr.bf16.mxu0 %v14095_v3  ;;  %v14098_v3 = vld [vmem:[#allocation153_spill] sm:$0xff]  ;;  %v5178_v29 = vsel %vm4666_vm4, %v4395_v4, %v4922_v63  ;;  %v14112_v4 = vld [vmem:[#allocation8_spill] sm:$0xff] }
 0x406   : > { %v12538_v24 = vpop.f32.mrf.mxu1  ;;  %6116 = vmatmul.mubr.bf16.gmra.mxu1 %v5321_v49  ;;  %v12540_v21 = vpop.f32.mrf.mxu0  ;;  %v4383_v49 = vadd.f32 %v12348_v8, %v4030_v61  ;;  %v14102_v8 = vpack.c.bf16 %v14100_v51, %v14101_v41  ;;  %v4401_v35 = vadd.f32 %v12410_v20, %v4048_v34 }
 0x407   : > { %14096 = vst [vmem:[#allocation57_spill] sm:$0xff] %v12538_v24  ;;  %6123 = vmatprep.mubr.bf16.mxu1 %v5326_v22  ;;  %v4379_v22 = vadd.f32 %v14098_v3, %v4026_v36  ;;  %v4052_v36 = vadd.f32 %v12418_v10, %v11715_v15 }
 0x408   : > { %v12546_v7 = vpop.f32.mrf.mxu1  ;;  %v12548_v12 = vpop.f32.mrf.mxu0  ;;  %v4913_v61 = vmul.f32 0.2, %v4383_v49  ;;  %vm4657_vm10 = vcmp.gt.f32.partialorder %v4383_v49, 0.0  ;;  %vm4670_vm5 = vcmp.gt.f32.partialorder %v4401_v35, 0.0 }
 0x409   : > { %v4909_v5 = vmul.f32 0.2, %v4379_v22  ;;  %vm4653_vm14 = vcmp.gt.f32.partialorder %v4379_v22, 0.0  ;;  %v4405_v41 = vadd.f32 %v12422_v25, %v4052_v36  ;;  %v5174_v25 = vsel %vm4662_vm6, %v4391_v18, %v4918_v2 }
 0x40a   : > { %v12552_v6 = vpop.f32.mrf.mxu1  ;;  %v12554_v0 = vpop.f32.mrf.mxu0  ;;  %v5169_v10 = vsel %vm4657_vm10, %v4383_v49, %v4913_v61  ;;  %v14109_v49 = vld [vmem:[#allocation73_spill] sm:$0xff]  ;;  %v14110_v61 = vld [vmem:[#allocation72_spill] sm:$0xff]  ;;  %v4050_v36 = vadd.f32 %v12412_v17, %v11743_v57  ;;  %v4046_v2 = vadd.f32 %v12390_v58, %v11743_v57  ;;  %v4926_v17 = vmul.f32 0.2, %v4401_v35 }
 0x40b   : > { %v5165_v39 = vsel %vm4653_vm14, %v4379_v22, %v4909_v5  ;;  %v14113_v22 = vld [vmem:[#allocation81_spill] sm:$0xff]  ;;  %v5334_v5 = vpack.c.bf16 %v5178_v29, %v5174_v25  ;;  %v4930_v20 = vmul.f32 0.2, %v4405_v41  ;;  %vm4674_vm12 = vcmp.gt.f32.partialorder %v4405_v41, 0.0 }
 0x40c   : > { %v12558_v24 = vpop.f32.mrf.mxu1  ;;  %v12560_v9 = vpop.f32.mrf.mxu0  ;;  %5835 = vmatmul.mubr.bf16.gmra.mxu0 %v14102_v8  ;;  %v5329_v27 = vpack.c.bf16 %v5169_v10, %v5165_v39  ;;  %v14114_v63 = vpack.c.bf16 %v14112_v4, %v14113_v22  ;;  %v4058_v29 = vadd.f32 %v12438_v19, %v11715_v15  ;;  %v14117_v4 = vld [vmem:[#allocation106_spill] sm:$0xff] }
 0x40d   : > { %14099 = vst [vmem:[#allocation115_spill] sm:$0xff] %v12560_v9  ;;  %5842 = vmatprep.mubr.bf16.mxu0 %v14105_v28  ;;  %v14108_v28 = vld [vmem:[#allocation58_spill] sm:$0xff]  ;;  %v5186_v19 = vsel %vm4674_vm12, %v4405_v41, %v4930_v20  ;;  %v4399_v22 = vadd.f32 %v14117_v4, %v4046_v2  ;;  %v14122_v20 = vld [vmem:[#allocation88_spill] sm:$0xff] }
 0x40e   : > { %v12572_v47 = vpop.f32.mrf.mxu1  ;;  %6124 = vmatmul.mubr.bf16.gmra.mxu1 %v5325_v56  ;;  %v12574_v42 = vpop.f32.mrf.mxu0  ;;  %v4393_v56 = vadd.f32 %v12382_v13, %v4040_v55  ;;  %v14111_v13 = vpack.c.bf16 %v14109_v49, %v14110_v61 }
 0x40f   : > { %14106 = vst [vmem:[#allocation59_spill] sm:$0xff] %v12572_v47  ;;  %6131 = vmatprep.mubr.bf16.mxu1 %v5330_v43  ;;  %v4389_v43 = vadd.f32 %v14108_v28, %v4036_v40  ;;  %v4062_v40 = vadd.f32 %v12452_v50, %v11715_v15  ;;  %vm4669_vm7 = vcmp.gt.f32.partialorder %v4399_v22, 0.0 }
 0x410   : > { %v12580_v3 = vpop.f32.mrf.mxu1  ;;  %v12582_v51 = vpop.f32.mrf.mxu0  ;;  %v4921_v55 = vmul.f32 0.2, %v4393_v56  ;;  %vm4665_vm0 = vcmp.gt.f32.partialorder %v4393_v56, 0.0 }
 0x411   : > { %v4917_v18 = vmul.f32 0.2, %v4389_v43  ;;  %vm4661_vm2 = vcmp.gt.f32.partialorder %v4389_v43, 0.0  ;;  %v4415_v49 = vadd.f32 %v12456_v30, %v4062_v40  ;;  %v14118_v30 = vld [vmem:[#allocation80_spill] sm:$0xff]  ;;  %v5182_v40 = vsel %vm4670_vm5, %v4401_v35, %v4926_v17 }
 0x412   : > { %v12586_v8 = vpop.f32.mrf.mxu1  ;;  %v12588_v38 = vpop.f32.mrf.mxu0  ;;  %v5177_v50 = vsel %vm4665_vm0, %v4393_v56, %v4921_v55  ;;  %v4411_v56 = vadd.f32 %v12444_v11, %v4058_v29  ;;  %v5338_v2 = vpack.c.bf16 %v5186_v19, %v5182_v40  ;;  %v4072_v29 = vadd.f32 %v12486_v46, %v11715_v15 }
 0x413   : > { %v5173_v25 = vsel %vm4661_vm2, %v4389_v43, %v4917_v18  ;;  %v14121_v43 = vld [vmem:[#allocation86_spill] sm:$0xff]  ;;  %v4938_v11 = vmul.f32 0.2, %v4415_v49  ;;  %v4925_v35 = vmul.f32 0.2, %v4399_v22  ;;  %v4056_v17 = vadd.f32 %v12424_v37, %v11743_v57 }
 0x414   : > { %v12592_v47 = vpop.f32.mrf.mxu1  ;;  %v12594_v9 = vpop.f32.mrf.mxu0  ;;  %5843 = vmatmul.mubr.bf16.gmra.mxu0 %v14111_v13  ;;  %v12627_v13 = vld [vmem:[%s12844_s6] ss:$0 sm:$0xff]  ;;  %v14123_v18 = vpack.c.bf16 %v14121_v43, %v14122_v20  ;;  %vm4682_vm11 = vcmp.gt.f32.partialorder %v4415_v49, 0.0  ;;  %v4934_v4 = vmul.f32 0.2, %v4411_v56  ;;  %v4068_v19 = vadd.f32 %v12472_v23, %v11715_v15 }
 0x415   : > { %5850 = vmatprep.mubr.bf16.mxu0 %v14114_v63  ;;  %v5333_v63 = vpack.c.bf16 %v5177_v50, %v5173_v25  ;;  %vm4678_vm8 = vcmp.gt.f32.partialorder %v4411_v56, 0.0  ;;  %v4425_v37 = vadd.f32 %v12490_v1, %v4072_v29  ;;  %v5181_v43 = vsel %vm4669_vm7, %v4399_v22, %v4925_v35  ;;  %v14127_v22 = vld [vmem:[#allocation70_spill] sm:$0xff] }
 0x416   : > { %v12606_v34 = vpop.f32.mrf.mxu1  ;;  %6132 = vmatmul.mubr.bf16.gmra.mxu1 %v5329_v27  ;;  %v12608_v10 = vpop.f32.mrf.mxu0  ;;  %v4403_v27 = vadd.f32 %v12416_v14, %v4050_v36  ;;  %v14119_v36 = vld [vmem:[#allocation31_spill] sm:$0xff]  ;;  %v4409_v20 = vadd.f32 %v12436_v53, %v4056_v17  ;;  %v4070_v29 = vadd.f32 %v12480_v54, %v11743_v57  ;;  %v14128_v53 = vld [vmem:[#allocation98_spill] sm:$0xff]  ;;  %v4082_v17 = vadd.f32 %v12520_v52, %v11715_v15 }
 0x417   : > { %14115 = vst [vmem:[#allocation77_spill] sm:$0xff] %v12606_v34  ;;  %6139 = vmatprep.mubr.bf16.mxu1 %v5334_v5  ;;  %v14120_v5 = vpack.c.bf16 %v14118_v30, %v14119_v36  ;;  %v4066_v54 = vadd.f32 %v12458_v59, %v11743_v57  ;;  %vm4690_vm3 = vcmp.gt.f32.partialorder %v4425_v37, 0.0 }
 0x418   : > { %v12614_v39 = vpop.f32.mrf.mxu1  ;;  %v12616_v28 = vpop.f32.mrf.mxu0  ;;  %v4929_v34 = vmul.f32 0.2, %v4403_v27  ;;  %vm4673_vm1 = vcmp.gt.f32.partialorder %v4403_v27, 0.0  ;;  %vm4677_vm15 = vcmp.gt.f32.partialorder %v4409_v20, 0.0  ;;  %v4423_v52 = vadd.f32 %v12484_v48, %v4070_v29  ;;  %v14131_v48 = vld [vmem:[#allocation87_spill] sm:$0xff] }
 0x419   : > { %v4435_v59 = vadd.f32 %v12524_v32, %v4082_v17  ;;  %v4080_v29 = vadd.f32 %v12514_v31, %v11743_v57 }
 0x41a   : > { %v12620_v61 = vpop.f32.mrf.mxu1  ;;  %v12622_v58 = vpop.f32.mrf.mxu0  ;;  %v5185_v36 = vsel %vm4673_vm1, %v4403_v27, %v4929_v34  ;;  %v4945_v32 = vmul.f32 0.2, %v4423_v52  ;;  %vm4689_vm10 = vcmp.gt.f32.partialorder %v4423_v52, 0.0 }
 0x41b   : > { %14116 = vst [vmem:[#allocation136_spill] sm:$0xff] %v12620_v61  ;;  %v4060_v61 = vadd.f32 %v12446_v44, %v11743_v57  ;;  %vm4698_vm4 = vcmp.gt.f32.partialorder %v4435_v59, 0.0 }
 0x41c   : > { %v12631_v55 = vpop.f32.mrf.mxu1  ;;  %v5660_v14 = vpop.f32.mrf.mxu0  ;;  %5851 = vmatmul.mubr.bf16.gmra.mxu0 %v14120_v5 }
 0x41d   : > { %v5661_v41 = vadd.f32 %v12627_v13, %v5660_v14  ;;  %5858 = vmatprep.mubr.bf16.mxu0 %v14123_v18  ;;  %v4413_v46 = vadd.f32 %v12450_v60, %v4060_v61  ;;  %v5337_v18 = vpack.c.bf16 %v5185_v36, %v5181_v43  ;;  %v14125_v60 = vld [vmem:[#allocation60_spill] sm:$0xff] }
 0x41e   : > { %v5949_v50 = vpop.f32.mrf.mxu1  ;;  %6140 = vmatmul.mubr.bf16.gmra.mxu1 %v5333_v63  ;;  %v5662_v25 = vpop.f32.mrf.mxu0 }
 0x41f   : > { %6147 = vmatprep.mubr.bf16.mxu1 %v5338_v2  ;;  %v5950_v44 = vadd.f32 %v5949_v50, %v5661_v41  ;;  %v5194_v41 = vsel %vm4682_vm11, %v4415_v49, %v4938_v11  ;;  %v4421_v2 = vadd.f32 %v12478_v33, %v4068_v19  ;;  %v14124_v50 = vld [vmem:[#allocation62_spill] sm:$0xff]  ;;  %v5190_v25 = vsel %vm4678_vm8, %v4411_v56, %v4934_v4 }
 0x420   : > { %v5951_v14 = vpop.f32.mrf.mxu1  ;;  %v5663_v30 = vpop.f32.mrf.mxu0  ;;  %v14126_v61 = vpack.c.bf16 %v14124_v50, %v14125_v60  ;;  %v4937_v1 = vmul.f32 0.2, %v4413_v46  ;;  %v14129_v11 = vpack.c.bf16 %v14127_v22, %v14128_v53  ;;  %v5342_v35 = vpack.c.bf16 %v5194_v41, %v5190_v25 }
 0x421   : > { %v5664_v63 = vadd.f32 %v12627_v13, %v5663_v30  ;;  %6204 = vxpose.xlu0.b32.start [1/16] (narrow) %v5950_v44, 8  ;;  %vm4681_vm9 = vcmp.gt.f32.partialorder %v4413_v46, 0.0  ;;  %v4946_v33 = vmul.f32 0.2, %v4425_v37  ;;  %v4933_v4 = vmul.f32 0.2, %v4409_v20 }
 0x422   : > { %v5952_v5 = vpop.f32.mrf.mxu1  ;;  %v5665_v40 = vpop.f32.mrf.mxu0  ;;  %v4942_v14 = vmul.f32 0.2, %v4421_v2  ;;  %v4078_v30 = vadd.f32 %v12506_v62, %v11715_v15  ;;  %vm4686_vm13 = vcmp.gt.f32.partialorder %v4421_v2, 0.0  ;;  %v4092_v53 = vadd.f32 %v12554_v0, %v11715_v15 }
 0x423   : > { %v5953_v23 = vadd.f32 %v5952_v5, %v5664_v63  ;;  %v5193_v5 = vsel %vm4681_vm9, %v4413_v46, %v4937_v1  ;;  %v4433_v0 = vadd.f32 %v12518_v26, %v4080_v29  ;;  %v14139_v26 = vld [vmem:[#allocation95_spill] sm:$0xff] }
 0x424   : > { %v5954_v34 = vpop.f32.mrf.mxu1  ;;  %v5668_v27 = vpop.f32.mrf.mxu0  ;;  %5859 = vmatmul.mubr.bf16.gmra.mxu0 %v14126_v61  ;;  %v4431_v50 = vadd.f32 %v12512_v45, %v4078_v30  ;;  %v14130_v61 = vld [vmem:[#allocation97_spill] sm:$0xff]  ;;  %v5198_v1 = vsel %vm4686_vm13, %v4421_v2, %v4942_v14  ;;  %v4954_v45 = vmul.f32 0.2, %v4435_v59  ;;  %v4445_v30 = vadd.f32 %v12558_v24, %v4092_v53 }
 0x425   : > { %v5669_v49 = vadd.f32 %v12627_v13, %v5668_v27  ;;  %5866 = vmatprep.mubr.bf16.mxu0 %v14129_v11  ;;  %6205 = vxpose.xlu0.b32.cont [2/16] (narrow) %v5953_v23, 8  ;;  %v5202_v23 = vsel %vm4690_vm3, %v4425_v37, %v4946_v33  ;;  %v4419_v34 = vadd.f32 %v12470_v16, %v4066_v54  ;;  %v14134_v16 = vld [vmem:[#allocation100_spill] sm:$0xff]  ;;  %v14136_v33 = vld [vmem:[#allocation101_spill] sm:$0xff]  ;;  %v4953_v24 = vmul.f32 0.2, %v4433_v0 }
 0x426   : > { %v5957_v44 = vpop.f32.mrf.mxu1  ;;  %6148 = vmatmul.mubr.bf16.gmra.mxu1 %v5337_v18  ;;  %v5670_v56 = vpop.f32.mrf.mxu0  ;;  %v5189_v18 = vsel %vm4677_vm15, %v4409_v20, %v4933_v4  ;;  %v14132_v25 = vpack.c.bf16 %v14130_v61, %v14131_v48  ;;  %v14133_v20 = vld [vmem:[#allocation112_spill] sm:$0xff]  ;;  %v5346_v22 = vpack.c.bf16 %v5202_v23, %v5198_v1  ;;  %v4076_v31 = vadd.f32 %v14136_v33, %v11743_v57  ;;  %v14142_v48 = vld [vmem:[#allocation79_spill] sm:$0xff] }
 0x427   : > { %v5958_v19 = vadd.f32 %v5957_v44, %v5669_v49  ;;  %6155 = vmatprep.mubr.bf16.mxu1 %v5342_v35  ;;  %v5341_v27 = vpack.c.bf16 %v5193_v5, %v5189_v18  ;;  %v14135_v49 = vpack.c.bf16 %v14133_v20, %v14134_v16  ;;  %v4941_v35 = vmul.f32 0.2, %v4419_v34  ;;  %v14144_v20 = vld [vmem:[#allocation133_spill] sm:$0xff] }
 0x428   : > { %v5959_v36 = vpop.f32.mrf.mxu1  ;;  %v5671_v63 = vpop.f32.mrf.mxu0  ;;  %vm4685_vm14 = vcmp.gt.f32.partialorder %v4419_v34, 0.0  ;;  %v4950_v44 = vmul.f32 0.2, %v4431_v50  ;;  %v4088_v56 = vadd.f32 %v12540_v21, %v11715_v15  ;;  %vm4694_vm6 = vcmp.gt.f32.partialorder %v4431_v50, 0.0 }
 0x429   : > { %v5672_v40 = vadd.f32 %v12627_v13, %v5671_v63  ;;  %6206 = vxpose.xlu0.b32.cont [3/16] (narrow) %v5958_v19, 8  ;;  %v5201_v19 = vsel %vm4689_vm10, %v4423_v52, %v4945_v32  ;;  %v5210_v5 = vsel %vm4698_vm4, %v4435_v59, %v4954_v45  ;;  %v4090_v61 = vadd.f32 %v12548_v12, %v11743_v57 }
 0x42a   : > { %v5960_v41 = vpop.f32.mrf.mxu1  ;;  %v5673_v43 = vpop.f32.mrf.mxu0  ;;  %v4441_v18 = vadd.f32 %v12546_v7, %v4088_v56  ;;  %vm4697_vm0 = vcmp.gt.f32.partialorder %v4433_v0, 0.0  ;;  %v4962_v7 = vmul.f32 0.2, %v4445_v30  ;;  %v4102_v32 = vadd.f32 %v12588_v38, %v11715_v15  ;;  %v14145_v56 = vld [vmem:[#allocation57_spill] sm:$0xff] }
 0x42b   : > { %v5961_v62 = vadd.f32 %v5960_v41, %v5672_v40  ;;  %v5197_v40 = vsel %vm4685_vm14, %v4419_v34, %v4941_v35  ;;  %v14137_v41 = vld [vmem:[#allocation118_spill] sm:$0xff]  ;;  %v14141_v34 = vld [vmem:[#allocation117_spill] sm:$0xff]  ;;  %v4086_v12 = vadd.f32 %v14144_v20, %v11743_v57  ;;  %vm4706_vm12 = vcmp.gt.f32.partialorder %v4445_v30, 0.0 }
 0x42c   : > { %v5962_v46 = vpop.f32.mrf.mxu1  ;;  %v5676_v60 = vpop.f32.mrf.mxu0  ;;  %5867 = vmatmul.mubr.bf16.gmra.mxu0 %v14132_v25  ;;  %v4429_v43 = vadd.f32 %v14137_v41, %v4076_v31  ;;  %v5345_v23 = vpack.c.bf16 %v5201_v19, %v5197_v40  ;;  %v14143_v25 = vpack.c.bf16 %v14141_v34, %v14142_v48  ;;  %vm4702_vm5 = vcmp.gt.f32.partialorder %v4441_v18, 0.0  ;;  %v14149_v41 = vld [vmem:[#allocation84_spill] sm:$0xff] }
 0x42d   : > { %v5677_v37 = vadd.f32 %v12627_v13, %v5676_v60  ;;  %5874 = vmatprep.mubr.bf16.mxu0 %v14135_v49  ;;  %6207 = vxpose.xlu0.b32.cont [4/16] (narrow) %v5961_v62, 8  ;;  %v5206_v60 = vsel %vm4694_vm6, %v4431_v50, %v4950_v44  ;;  %v4958_v49 = vmul.f32 0.2, %v4441_v18  ;;  %v4443_v38 = vadd.f32 %v12552_v6, %v4090_v61  ;;  %v14147_v6 = vld [vmem:[#allocation61_spill] sm:$0xff] }
 0x42e   : > { %v5965_v11 = vpop.f32.mrf.mxu1  ;;  %6156 = vmatmul.mubr.bf16.gmra.mxu1 %v5341_v27  ;;  %v5678_v2 = vpop.f32.mrf.mxu0  ;;  %v14138_v27 = vld [vmem:[#allocation99_spill] sm:$0xff]  ;;  %v5350_v1 = vpack.c.bf16 %v5210_v5, %v5206_v60  ;;  %vm4693_vm2 = vcmp.gt.f32.partialorder %v4429_v43, 0.0  ;;  %v4455_v35 = vadd.f32 %v12592_v47, %v4102_v32  ;;  %v4100_v40 = vadd.f32 %v12582_v51, %v11743_v57 }
 0x42f   : > { %v5966_v17 = vadd.f32 %v5965_v11, %v5677_v37  ;;  %6163 = vmatprep.mubr.bf16.mxu1 %v5346_v22  ;;  %v14140_v46 = vpack.c.bf16 %v14138_v27, %v14139_v26  ;;  %v4949_v37 = vmul.f32 0.2, %v4429_v43  ;;  %v4098_v22 = vadd.f32 %v12574_v42, %v11715_v15  ;;  %v14152_v26 = vld [vmem:[#allocation115_spill] sm:$0xff] }
 0x430   : > { %v5967_v4 = vpop.f32.mrf.mxu1  ;;  %v5679_v54 = vpop.f32.mrf.mxu0  ;;  %v5209_v11 = vsel %vm4697_vm0, %v4433_v0, %v4953_v24  ;;  %v5214_v5 = vsel %vm4702_vm5, %v4441_v18, %v4958_v49  ;;  %v4961_v47 = vmul.f32 0.2, %v4443_v38  ;;  %vm4705_vm1 = vcmp.gt.f32.partialorder %v4443_v38, 0.0  ;;  %v14154_v49 = vld [vmem:[#allocation102_spill] sm:$0xff] }
 0x431   : > { %v5680_v14 = vadd.f32 %v12627_v13, %v5679_v54  ;;  %6208 = vxpose.xlu0.b32.cont [5/16] (narrow) %v5966_v17, 8  ;;  %v5218_v17 = vsel %vm4706_vm12, %v4445_v30, %v4962_v7  ;;  %v5205_v44 = vsel %vm4693_vm2, %v4429_v43, %v4949_v37  ;;  %v4439_v4 = vadd.f32 %v14145_v56, %v4086_v12  ;;  %v14150_v43 = vld [vmem:[#allocation82_spill] sm:$0xff] }
 0x432   : > { %v5968_v36 = vpop.f32.mrf.mxu1  ;;  %v5681_v63 = vpop.f32.mrf.mxu0  ;;  %v5349_v54 = vpack.c.bf16 %v5209_v11, %v5205_v44  ;;  %v4451_v19 = vadd.f32 %v12580_v3, %v4098_v22  ;;  %v4970_v3 = vmul.f32 0.2, %v4455_v35  ;;  %v4096_v51 = vadd.f32 %v14152_v26, %v11743_v57  ;;  %v14166_v26 = vld [vmem:[#allocation96_spill] sm:$0xff] }
 0x433   : > { %v5969_v21 = vadd.f32 %v5968_v36, %v5680_v14  ;;  %v14146_v36 = vld [vmem:[#allocation78_spill] sm:$0xff]  ;;  %v4957_v27 = vmul.f32 0.2, %v4439_v4  ;;  %vm4714_vm11 = vcmp.gt.f32.partialorder %v4455_v35, 0.0  ;;  %vm4701_vm7 = vcmp.gt.f32.partialorder %v4439_v4, 0.0 }
 0x434   : > { %v5970_v52 = vpop.f32.mrf.mxu1  ;;  %v5684_v62 = vpop.f32.mrf.mxu0  ;;  %5875 = vmatmul.mubr.bf16.gmra.mxu0 %v14140_v46  ;;  %v14148_v63 = vpack.c.bf16 %v14146_v36, %v14147_v6  ;;  %v4966_v60 = vmul.f32 0.2, %v4451_v19  ;;  %v4108_v24 = vadd.f32 %v12608_v10, %v11715_v15  ;;  %v5217_v34 = vsel %vm4705_vm1, %v4443_v38, %v4961_v47  ;;  %v14157_v38 = vld [vmem:[#allocation51_spill] sm:$0xff] }
 0x435   : > { %v5685_v59 = vadd.f32 %v12627_v13, %v5684_v62  ;;  %5882 = vmatprep.mubr.bf16.mxu0 %v14143_v25  ;;  %6209 = vxpose.xlu0.b32.cont [6/16] (narrow) %v5969_v21, 8  ;;  %v14151_v21 = vpack.c.bf16 %v14149_v41, %v14150_v43  ;;  %v4112_v52 = vadd.f32 %v12622_v58, %v11715_v15  ;;  %vm4710_vm8 = vcmp.gt.f32.partialorder %v4451_v19, 0.0 }
 0x436   : > { %v5973_v29 = vpop.f32.mrf.mxu1  ;;  %6164 = vmatmul.mubr.bf16.gmra.mxu1 %v5345_v23  ;;  %v5686_v50 = vpop.f32.mrf.mxu0  ;;  %v5354_v23 = vpack.c.bf16 %v5218_v17, %v5214_v5  ;;  %v4453_v58 = vadd.f32 %v12586_v8, %v4100_v40  ;;  %v5226_v32 = vsel %vm4714_vm11, %v4455_v35, %v4970_v3  ;;  %v4461_v20 = vadd.f32 %v12614_v39, %v4108_v24  ;;  %v14155_v8 = vld [vmem:[#allocation85_spill] sm:$0xff] }
 0x437   : > { %v5974_v16 = vadd.f32 %v5973_v29, %v5685_v59  ;;  %6171 = vmatprep.mubr.bf16.mxu1 %v5350_v1  ;;  %v4465_v25 = vadd.f32 %v12631_v55, %v4112_v52  ;;  %v5213_v29 = vsel %vm4701_vm7, %v4439_v4, %v4957_v27  ;;  %v14153_v50 = vld [vmem:[#allocation59_spill] sm:$0xff]  ;;  %v14156_v22 = vpack.c.bf16 %v14154_v49, %v14155_v8  ;;  %v14161_v40 = vld [vmem:[#allocation77_spill] sm:$0xff] }
 0x438   : > { %v5975_v45 = vpop.f32.mrf.mxu1  ;;  %v5687_v53 = vpop.f32.mrf.mxu0  ;;  %v4449_v37 = vadd.f32 %v14153_v50, %v4096_v51  ;;  %v5353_v10 = vpack.c.bf16 %v5217_v34, %v5213_v29  ;;  %v4969_v55 = vmul.f32 0.2, %v4453_v58  ;;  %vm4713_vm9 = vcmp.gt.f32.partialorder %v4453_v58, 0.0  ;;  %v14165_v27 = vld [vmem:[#allocation83_spill] sm:$0xff] }
 0x439   : > { %v5688_v2 = vadd.f32 %v12627_v13, %v5687_v53  ;;  %6210 = vxpose.xlu0.b32.cont [7/16] (narrow) %v5974_v16, 8  ;;  %v5222_v45 = vsel %vm4710_vm8, %v4451_v19, %v4966_v60  ;;  %v4110_v53 = vadd.f32 %v12616_v28, %v11743_v57  ;;  %v4978_v39 = vmul.f32 0.2, %v4465_v25 }
 0x43a   : > { %v5976_v33 = vpop.f32.mrf.mxu1  ;;  %v5689_v31 = vpop.f32.mrf.mxu0  ;;  %v4965_v44 = vmul.f32 0.2, %v4449_v37  ;;  %v4106_v56 = vadd.f32 %v12594_v9, %v11743_v57  ;;  %vm4722_vm3 = vcmp.gt.f32.partialorder %v4465_v25, 0.0  ;;  %vm4709_vm15 = vcmp.gt.f32.partialorder %v4449_v37, 0.0 }
 0x43b   : > { %v5977_v42 = vadd.f32 %v5976_v33, %v5688_v2  ;;  %v14158_v2 = vld [vmem:[#allocation93_spill] sm:$0xff]  ;;  %v5358_v33 = vpack.c.bf16 %v5226_v32, %v5222_v45  ;;  %v4974_v28 = vmul.f32 0.2, %v4461_v20  ;;  %v5225_v19 = vsel %vm4713_vm9, %v4453_v58, %v4969_v55 }
 0x43c   : > { %v5978_v0 = vpop.f32.mrf.mxu1  ;;  %v5692_v14 = vpop.f32.mrf.mxu0  ;;  %5883 = vmatmul.mubr.bf16.gmra.mxu0 %v14148_v63  ;;  %v14159_v35 = vpack.c.bf16 %v14157_v38, %v14158_v2  ;;  %vm4718_vm13 = vcmp.gt.f32.partialorder %v4461_v20, 0.0  ;;  %v5234_v5 = vsel %vm4722_vm3, %v4465_v25, %v4978_v39  ;;  %v5221_v47 = vsel %vm4709_vm15, %v4449_v37, %v4965_v44 }
 0x43d   : > { %v5693_v30 = vadd.f32 %v12627_v13, %v5692_v14  ;;  %5890 = vmatprep.mubr.bf16.mxu0 %v14151_v21  ;;  %6211 = vxpose.xlu0.b32.cont [8/16] (narrow) %v5977_v42, 8  ;;  %v14160_v0 = vld [vmem:[#allocation136_spill] sm:$0xff]  ;;  %v4459_v57 = vadd.f32 %v14161_v40, %v4106_v56  ;;  %v14162_v21 = vld [vmem:[#allocation66_spill] sm:$0xff]  ;;  %v5230_v52 = vsel %vm4718_vm13, %v4461_v20, %v4974_v28  ;;  %v14169_v20 = vld [vmem:[#allocation109_spill] sm:$0xff] }
 0x43e   : > { %v5981_v62 = vpop.f32.mrf.mxu1  ;;  %6172 = vmatmul.mubr.bf16.gmra.mxu1 %v5349_v54  ;;  %v5694_v18 = vpop.f32.mrf.mxu0  ;;  %v4463_v14 = vadd.f32 %v14160_v0, %v4110_v53  ;;  %v14167_v51 = vpack.c.bf16 %v14165_v27, %v14166_v26 }
 0x43f   : > { %v5982_v46 = vadd.f32 %v5981_v62, %v5693_v30  ;;  %6179 = vmatprep.mubr.bf16.mxu1 %v5354_v23  ;;  %v5357_v30 = vpack.c.bf16 %v5225_v19, %v5221_v47  ;;  %v14163_v23 = vld [vmem:[#allocation107_spill] sm:$0xff]  ;;  %vm4717_vm4 = vcmp.gt.f32.partialorder %v4459_v57, 0.0 }
 0x440   : > { %v5983_v61 = vpop.f32.mrf.mxu1  ;;  %v5695_v59 = vpop.f32.mrf.mxu0  ;;  %v14164_v3 = vpack.c.bf16 %v14162_v21, %v14163_v23  ;;  %v4977_v62 = vmul.f32 0.2, %v4463_v14  ;;  %vm4721_vm10 = vcmp.gt.f32.partialorder %v4463_v14, 0.0 }
 0x441   : > { %v5696_v48 = vadd.f32 %v12627_v13, %v5695_v59  ;;  %6212 = vxpose.xlu0.b32.cont [9/16] (narrow) %v5982_v46, 8  ;;  %v5362_v46 = vpack.c.bf16 %v5234_v5, %v5230_v52  ;;  %v4973_v61 = vmul.f32 0.2, %v4459_v57 }
 0x442   : > { %v5984_v1 = vpop.f32.mrf.mxu1  ;;  %v5697_v7 = vpop.f32.mrf.mxu0 }
 0x443   : > { %v5985_v15 = vadd.f32 %v5984_v1, %v5696_v48  ;;  %v5233_v48 = vsel %vm4721_vm10, %v4463_v14, %v4977_v62  ;;  %v5229_v32 = vsel %vm4717_vm4, %v4459_v57, %v4973_v61 }
 0x444   : > { %v5986_v12 = vpop.f32.mrf.mxu1  ;;  %v5700_v16 = vpop.f32.mrf.mxu0  ;;  %5891 = vmatmul.mubr.bf16.gmra.mxu0 %v14156_v22  ;;  %v5361_v50 = vpack.c.bf16 %v5233_v48, %v5229_v32 }
 0x445   : > { %v5701_v11 = vadd.f32 %v12627_v13, %v5700_v16  ;;  %5898 = vmatprep.mubr.bf16.mxu0 %v14159_v35  ;;  %6213 = vxpose.xlu0.b32.cont [10/16] (narrow) %v5985_v15, 8 }
 0x446   : > { %v5989_v31 = vpop.f32.mrf.mxu1  ;;  %6180 = vmatmul.mubr.bf16.gmra.mxu1 %v5353_v10  ;;  %v5702_v17 = vpop.f32.mrf.mxu0  ;;  %v14168_v10 = vld [vmem:[#allocation69_spill] sm:$0xff] }
 0x447   : > { %v5990_v4 = vadd.f32 %v5989_v31, %v5701_v11  ;;  %6187 = vmatprep.mubr.bf16.mxu1 %v5358_v33  ;;  %v14170_v12 = vpack.c.bf16 %v14168_v10, %v14169_v20 }
 0x448   : > { %v5991_v42 = vpop.f32.mrf.mxu1  ;;  %v5703_v54 = vpop.f32.mrf.mxu0 }
 0x449   : > { %v5704_v36 = vadd.f32 %v12627_v13, %v5703_v54  ;;  %6214 = vxpose.xlu0.b32.cont [11/16] (narrow) %v5990_v4, 8 }
 0x44a   : > { %v5992_v6 = vpop.f32.mrf.mxu1  ;;  %v5705_v63 = vpop.f32.mrf.mxu0 }
 0x44b   : > { %v5993_v9 = vadd.f32 %v5992_v6, %v5704_v36 }
 0x44c   : > { %v5994_v41 = vpop.f32.mrf.mxu1  ;;  %v5708_v43 = vpop.f32.mrf.mxu0  ;;  %5899 = vmatmul.mubr.bf16.gmra.mxu0 %v14164_v3 }
 0x44d   : > { %v5709_v18 = vadd.f32 %v12627_v13, %v5708_v43  ;;  %5906 = vmatprep.mubr.bf16.mxu0 %v14167_v51  ;;  %6215 = vxpose.xlu0.b32.cont [12/16] (narrow) %v5993_v9, 8 }
 0x44e   : > { %v5997_v60 = vpop.f32.mrf.mxu1  ;;  %6188 = vmatmul.mubr.bf16.gmra.mxu1 %v5357_v30  ;;  %v5710_v24 = vpop.f32.mrf.mxu0 }
 0x44f   : > { %v5998_v59 = vadd.f32 %v5997_v60, %v5709_v18  ;;  %6195 = vmatprep.mubr.bf16.mxu1 %v5362_v46 }
 0x450   : > { %v5999_v34 = vpop.f32.mrf.mxu1  ;;  %v5711_v58 = vpop.f32.mrf.mxu0 }
 0x451   : > { %v5712_v25 = vadd.f32 %v12627_v13, %v5711_v58  ;;  %6216 = vxpose.xlu0.b32.cont [13/16] (narrow) %v5998_v59, 8 }
 0x452   : > { %v6000_v1 = vpop.f32.mrf.mxu1  ;;  %v5713_v7 = vpop.f32.mrf.mxu0 }
 0x453   : > { %v6001_v29 = vadd.f32 %v6000_v1, %v5712_v25 }
 0x454   : > { %v6002_v37 = vpop.f32.mrf.mxu1  ;;  %v5716_v15 = vpop.f32.mrf.mxu0  ;;  %5907 = vmatmul.mubr.bf16.gmra.mxu0 %v14170_v12 }
 0x455   : > { %v5717_v16 = vadd.f32 %v12627_v13, %v5716_v15  ;;  %6217 = vxpose.xlu0.b32.cont [14/16] (narrow) %v6001_v29, 8 }
 0x456   : > { %v6005_v49 = vpop.f32.mrf.mxu1  ;;  %6196 = vmatmul.mubr.bf16.gmra.mxu1 %v5361_v50  ;;  %v5718_v8 = vpop.f32.mrf.mxu0 }
 0x457   : > { %v6006_v22 = vadd.f32 %v6005_v49, %v5717_v16 }
 0x458   : > { %v6007_v45 = vpop.f32.mrf.mxu1  ;;  %v5719_v55 = vpop.f32.mrf.mxu0 }
 0x459   : > { %v5720_v53 = vadd.f32 %v12627_v13, %v5719_v55  ;;  %6218 = vxpose.xlu0.b32.cont [15/16] (narrow) %v6006_v22, 8 }
 0x45a   : > { %v6008_v11 = vpop.f32.mrf.mxu1  ;;  %v5721_v38 = vpop.f32.mrf.mxu0 }
 0x45b   : > { %v6009_v2 = vadd.f32 %v6008_v11, %v5720_v53 }
 0x45c   : > { %v6010_v35 = vpop.f32.mrf.mxu1  ;;  %v5724_v33 = vpop.f32.mrf.mxu0 }
 0x45d   : > { %v5725_v39 = vadd.f32 %v12627_v13, %v5724_v33  ;;  %6219 = vxpose.xlu0.b32.end [16/16] (narrow) %v6009_v2, 8 }
 0x45e   : > { %v6013_v31 = vpop.f32.mrf.mxu1  ;;  %v5726_v17 = vpop.f32.mrf.mxu0 }
 0x45f   : > { %v6014_v44 = vadd.f32 %v6013_v31, %v5725_v39 }
 0x460   : > { %v6015_v56 = vpop.f32.mrf.mxu1  ;;  %v5727_v4 = vpop.f32.mrf.mxu0 }
 0x461   : > { %v5728_v28 = vadd.f32 %v12627_v13, %v5727_v4  ;;  %6236 = vxpose.xlu1.b32.start [1/16] (narrow) %v6014_v44, 8 }
 0x462   : > { %v6016_v42 = vpop.f32.mrf.mxu1  ;;  %v5729_v54 = vpop.f32.mrf.mxu0 }
 0x463   : > { %v6017_v19 = vadd.f32 %v6016_v42, %v5728_v28 }
 0x464   : > { %v6018_v0 = vpop.f32.mrf.mxu1  ;;  %v5732_v14 = vpop.f32.mrf.mxu0 }
 0x465   : > { %v5733_v36 = vadd.f32 %v12627_v13, %v5732_v14  ;;  %6237 = vxpose.xlu1.b32.cont [2/16] (narrow) %v6017_v19, 8 }
 0x466   : > { %v6021_v6 = vpop.f32.mrf.mxu1  ;;  %v5734_v63 = vpop.f32.mrf.mxu0 }
 0x467   : > { %v6022_v5 = vadd.f32 %v6021_v6, %v5733_v36 }
 0x468   : > { %v6023_v47 = vpop.f32.mrf.mxu1  ;;  %v5735_v40 = vpop.f32.mrf.mxu0 }
 0x469   : > { %v5736_v57 = vadd.f32 %v12627_v13, %v5735_v40  ;;  %6238 = vxpose.xlu1.b32.cont [3/16] (narrow) %v6022_v5, 8 }
 0x46a   : > { %v6024_v9 = vpop.f32.mrf.mxu1  ;;  %v5737_v30 = vpop.f32.mrf.mxu0 }
 0x46b   : > { %v6025_v41 = vadd.f32 %v6024_v9, %v5736_v57 }
 0x46c   : > { %v6026_v43 = vpop.f32.mrf.mxu1  ;;  %v5740_v21 = vpop.f32.mrf.mxu0 }
 0x46d   : > { %v5741_v23 = vadd.f32 %v12627_v13, %v5740_v21  ;;  %6239 = vxpose.xlu1.b32.cont [4/16] (narrow) %v6025_v41, 8 }
 0x46e   : > { %v6029_v3 = vpop.f32.mrf.mxu1  ;;  %v5742_v52 = vpop.f32.mrf.mxu0 }
 0x46f   : > { %v6030_v62 = vadd.f32 %v6029_v3, %v5741_v23 }
 0x470   : > { %v6031_v18 = vpop.f32.mrf.mxu1  ;;  %v5743_v27 = vpop.f32.mrf.mxu0 }
 0x471   : > { %v5744_v26 = vadd.f32 %v12627_v13, %v5743_v27  ;;  %6240 = vxpose.xlu1.b32.cont [5/16] (narrow) %v6030_v62, 8 }
 0x472   : > { %v6032_v51 = vpop.f32.mrf.mxu1  ;;  %v5745_v46 = vpop.f32.mrf.mxu0 }
 0x473   : > { %v6033_v60 = vadd.f32 %v6032_v51, %v5744_v26 }
 0x474   : > { %v6034_v24 = vpop.f32.mrf.mxu1  ;;  %v5748_v61 = vpop.f32.mrf.mxu0 }
 0x475   : > { %v5749_v59 = vadd.f32 %v12627_v13, %v5748_v61  ;;  %6241 = vxpose.xlu1.b32.cont [6/16] (narrow) %v6033_v60, 8 }
 0x476   : > { %v6037_v34 = vpop.f32.mrf.mxu1  ;;  %v5750_v58 = vpop.f32.mrf.mxu0 }
 0x477   : > { %v6038_v48 = vadd.f32 %v6037_v34, %v5749_v59 }
 0x478   : > { %v6039_v25 = vpop.f32.mrf.mxu1  ;;  %v5751_v1 = vpop.f32.mrf.mxu0 }
 0x479   : > { %v5752_v7 = vadd.f32 %v12627_v13, %v5751_v1  ;;  %6242 = vxpose.xlu1.b32.cont [7/16] (narrow) %v6038_v48, 8 }
 0x47a   : > { %v6040_v32 = vpop.f32.mrf.mxu1  ;;  %v5753_v29 = vpop.f32.mrf.mxu0 }
 0x47b   : > { %v6041_v50 = vadd.f32 %v6040_v32, %v5752_v7 }
 0x47c   : > { %v6042_v37 = vpop.f32.mrf.mxu1  ;;  %v5756_v15 = vpop.f32.mrf.mxu0 }
 0x47d   : > { %v5757_v10 = vadd.f32 %v12627_v13, %v5756_v15  ;;  %6243 = vxpose.xlu1.b32.cont [8/16] (narrow) %v6041_v50, 8 }
 0x47e   : > { %v6045_v20 = vpop.f32.mrf.mxu1  ;;  %v5758_v12 = vpop.f32.mrf.mxu0 }
 0x47f   : > { %v6046_v16 = vadd.f32 %v6045_v20, %v5757_v10 }
 0x480   : > { %v6047_v49 = vpop.f32.mrf.mxu1  ;;  %v5759_v8 = vpop.f32.mrf.mxu0 }
 0x481   : > { %v5760_v22 = vadd.f32 %v12627_v13, %v5759_v8  ;;  %6244 = vxpose.xlu1.b32.cont [9/16] (narrow) %v6046_v16, 8 }
 0x482   : > { %v6048_v45 = vpop.f32.mrf.mxu1  ;;  %v5761_v55 = vpop.f32.mrf.mxu0 }
 0x483   : > { %v6049_v53 = vadd.f32 %v6048_v45, %v5760_v22 }
 0x484   : > { %v6050_v11 = vpop.f32.mrf.mxu1  ;;  %v5764_v38 = vpop.f32.mrf.mxu0 }
 0x485   : > { %v5765_v2 = vadd.f32 %v12627_v13, %v5764_v38  ;;  %6245 = vxpose.xlu1.b32.cont [10/16] (narrow) %v6049_v53, 8 }
 0x486   : > { %v6053_v35 = vpop.f32.mrf.mxu1  ;;  %v5766_v33 = vpop.f32.mrf.mxu0 }
 0x487   : > { %v6054_v39 = vadd.f32 %v6053_v35, %v5765_v2 }
 0x488   : > { %v6055_v31 = vpop.f32.mrf.mxu1  ;;  %v5767_v17 = vpop.f32.mrf.mxu0 }
 0x489   : > { %v5768_v44 = vadd.f32 %v12627_v13, %v5767_v17  ;;  %6246 = vxpose.xlu1.b32.cont [11/16] (narrow) %v6054_v39, 8 }
 0x48a   : > { %v6056_v56 = vpop.f32.mrf.mxu1  ;;  %v5769_v4 = vpop.f32.mrf.mxu0 }
 0x48b   : > { %v6057_v28 = vadd.f32 %v6056_v56, %v5768_v44 }
 0x48c   : > { %v6058_v42 = vpop.f32.mrf.mxu1  ;;  %v5772_v54 = vpop.f32.mrf.mxu0 }
 0x48d   : > { %v5773_v19 = vadd.f32 %v12627_v13, %v5772_v54  ;;  %6247 = vxpose.xlu1.b32.cont [12/16] (narrow) %v6057_v28, 8 }
 0x48e   : > { %v6061_v0 = vpop.f32.mrf.mxu1  ;;  %v5774_v14 = vpop.f32.mrf.mxu0 }
 0x48f   : > { %v6062_v36 = vadd.f32 %v6061_v0, %v5773_v19 }
 0x490   : > { %v6063_v6 = vpop.f32.mrf.mxu1  ;;  %v5775_v63 = vpop.f32.mrf.mxu0 }
 0x491   : > { %v5776_v5 = vadd.f32 %v12627_v13, %v5775_v63  ;;  %6248 = vxpose.xlu1.b32.cont [13/16] (narrow) %v6062_v36, 8 }
 0x492   : > { %v6064_v47 = vpop.f32.mrf.mxu1  ;;  %v5777_v40 = vpop.f32.mrf.mxu0 }
 0x493   : > { %v6065_v57 = vadd.f32 %v6064_v47, %v5776_v5 }
 0x494   : > { %v6066_v9 = vpop.f32.mrf.mxu1  ;;  %v5780_v30 = vpop.f32.mrf.mxu0 }
 0x495   : > { %v5781_v41 = vadd.f32 %v12627_v13, %v5780_v30  ;;  %6249 = vxpose.xlu1.b32.cont [14/16] (narrow) %v6065_v57, 8 }
 0x496   : > { %v6069_v43 = vpop.f32.mrf.mxu1  ;;  %v5782_v21 = vpop.f32.mrf.mxu0 }
 0x497   : > { %v6070_v23 = vadd.f32 %v6069_v43, %v5781_v41 }
 0x498   : > { %v6071_v3 = vpop.f32.mrf.mxu1  ;;  %v5783_v52 = vpop.f32.mrf.mxu0 }
 0x499   : > { %v5784_v62 = vadd.f32 %v12627_v13, %v5783_v52  ;;  %6250 = vxpose.xlu1.b32.cont [15/16] (narrow) %v6070_v23, 8 }
 0x49a   : > { %v6072_v18 = vpop.f32.mrf.mxu1  ;;  %v5785_v27 = vpop.f32.mrf.mxu0 }
 0x49b   : > { %v6073_v26 = vadd.f32 %v6072_v18, %v5784_v62 }
 0x49c   : > { %v6074_v51 = vpop.f32.mrf.mxu1  ;;  %v5788_v46 = vpop.f32.mrf.mxu0 }
 0x49d   : > { %v5789_v60 = vadd.f32 %v12627_v13, %v5788_v46  ;;  %6251 = vxpose.xlu1.b32.end [16/16] (narrow) %v6073_v26, 8 }
 0x49e   : > { %v6077_v24 = vpop.f32.mrf.mxu1  ;;  %v5790_v61 = vpop.f32.mrf.mxu0 }
 0x49f   : > { %v6078_v59 = vadd.f32 %v6077_v24, %v5789_v60 }
 0x4a0   : > { %v6079_v34 = vpop.f32.mrf.mxu1  ;;  %v5791_v58 = vpop.f32.mrf.mxu0 }
 0x4a1   : > { %v5792_v48 = vadd.f32 %v12627_v13, %v5791_v58  ;;  %6268 = vxpose.xlu0.b32.start [1/16] (narrow) %v6078_v59, 8 }
 0x4a2   : > { %v6080_v25 = vpop.f32.mrf.mxu1  ;;  %v5793_v1 = vpop.f32.mrf.mxu0 }
 0x4a3   : > { %v6081_v7 = vadd.f32 %v6080_v25, %v5792_v48 }
 0x4a4   : > { %v6082_v32 = vpop.f32.mrf.mxu1  ;;  %v5796_v29 = vpop.f32.mrf.mxu0 }
 0x4a5   : > { %v5797_v50 = vadd.f32 %v12627_v13, %v5796_v29  ;;  %6269 = vxpose.xlu0.b32.cont [2/16] (narrow) %v6081_v7, 8 }
 0x4a6   : > { %v6085_v37 = vpop.f32.mrf.mxu1  ;;  %v5798_v15 = vpop.f32.mrf.mxu0 }
 0x4a7   : > { %v6086_v10 = vadd.f32 %v6085_v37, %v5797_v50 }
 0x4a8   : > { %v6087_v20 = vpop.f32.mrf.mxu1  ;;  %v5799_v12 = vpop.f32.mrf.mxu0 }
 0x4a9   : > { %v5800_v16 = vadd.f32 %v12627_v13, %v5799_v12  ;;  %6270 = vxpose.xlu0.b32.cont [3/16] (narrow) %v6086_v10, 8 }
 0x4aa   : > { %v6088_v49 = vpop.f32.mrf.mxu1  ;;  %v5801_v8 = vpop.f32.mrf.mxu0 }
 0x4ab   : > { %v6089_v22 = vadd.f32 %v6088_v49, %v5800_v16 }
 0x4ac   : > { %v6090_v45 = vpop.f32.mrf.mxu1  ;;  %v5804_v55 = vpop.f32.mrf.mxu0 }
 0x4ad   : > { %v5805_v53 = vadd.f32 %v12627_v13, %v5804_v55  ;;  %6271 = vxpose.xlu0.b32.cont [4/16] (narrow) %v6089_v22, 8 }
 0x4ae   : > { %v6093_v11 = vpop.f32.mrf.mxu1  ;;  %v5806_v38 = vpop.f32.mrf.mxu0 }
 0x4af   : > { %v6094_v2 = vadd.f32 %v6093_v11, %v5805_v53 }
 0x4b0   : > { %v6095_v35 = vpop.f32.mrf.mxu1  ;;  %v5807_v33 = vpop.f32.mrf.mxu0 }
 0x4b1   : > { %v5808_v39 = vadd.f32 %v12627_v13, %v5807_v33  ;;  %6272 = vxpose.xlu0.b32.cont [5/16] (narrow) %v6094_v2, 8 }
 0x4b2   : > { %v6096_v31 = vpop.f32.mrf.mxu1  ;;  %v5809_v17 = vpop.f32.mrf.mxu0 }
 0x4b3   : > { %v6097_v44 = vadd.f32 %v6096_v31, %v5808_v39 }
 0x4b4   : > { %v6098_v56 = vpop.f32.mrf.mxu1  ;;  %v5812_v4 = vpop.f32.mrf.mxu0 }
 0x4b5   : > { %v5813_v28 = vadd.f32 %v12627_v13, %v5812_v4  ;;  %6273 = vxpose.xlu0.b32.cont [6/16] (narrow) %v6097_v44, 8 }
 0x4b6   : > { %v6101_v42 = vpop.f32.mrf.mxu1  ;;  %v5814_v54 = vpop.f32.mrf.mxu0 }
 0x4b7   : > { %v6102_v19 = vadd.f32 %v6101_v42, %v5813_v28 }
 0x4b8   : > { %v6103_v0 = vpop.f32.mrf.mxu1  ;;  %v5815_v14 = vpop.f32.mrf.mxu0 }
 0x4b9   : > { %v5816_v36 = vadd.f32 %v12627_v13, %v5815_v14  ;;  %6274 = vxpose.xlu0.b32.cont [7/16] (narrow) %v6102_v19, 8  ;;  %v12811_v19 = vld [vmem:[%s12844_s6] ss:$0 sm:$0xff] }
 0x4ba   : > { %v6104_v6 = vpop.f32.mrf.mxu1  ;;  %v5817_v63 = vpop.f32.mrf.mxu0 }
 0x4bb   : > { %v6105_v5 = vadd.f32 %v6104_v6, %v5816_v36 }
 0x4bc   : > { %v6106_v47 = vpop.f32.mrf.mxu1  ;;  %v5820_v40 = vpop.f32.mrf.mxu0 }
 0x4bd   : > { %v5821_v57 = vadd.f32 %v12627_v13, %v5820_v40  ;;  %6275 = vxpose.xlu0.b32.cont [8/16] (narrow) %v6105_v5, 8 }
 0x4be   : > { %v6109_v9 = vpop.f32.mrf.mxu1  ;;  %v5822_v30 = vpop.f32.mrf.mxu0 }
 0x4bf   : > { %v6110_v41 = vadd.f32 %v6109_v9, %v5821_v57 }
 0x4c0   : > { %v6111_v43 = vpop.f32.mrf.mxu1  ;;  %v5823_v21 = vpop.f32.mrf.mxu0 }
 0x4c1   : > { %v5824_v23 = vadd.f32 %v12627_v13, %v5823_v21  ;;  %6276 = vxpose.xlu0.b32.cont [9/16] (narrow) %v6110_v41, 8 }
 0x4c2   : > { %v6112_v3 = vpop.f32.mrf.mxu1  ;;  %v5825_v52 = vpop.f32.mrf.mxu0 }
 0x4c3   : > { %v6113_v62 = vadd.f32 %v6112_v3, %v5824_v23 }
 0x4c4   : > { %v6114_v18 = vpop.f32.mrf.mxu1  ;;  %v5828_v27 = vpop.f32.mrf.mxu0 }
 0x4c5   : > { %v5829_v26 = vadd.f32 %v12627_v13, %v5828_v27  ;;  %6277 = vxpose.xlu0.b32.cont [10/16] (narrow) %v6113_v62, 8 }
 0x4c6   : > { %v6117_v51 = vpop.f32.mrf.mxu1  ;;  %v5830_v46 = vpop.f32.mrf.mxu0 }
 0x4c7   : > { %v6118_v60 = vadd.f32 %v6117_v51, %v5829_v26 }
 0x4c8   : > { %v6119_v24 = vpop.f32.mrf.mxu1  ;;  %v5831_v61 = vpop.f32.mrf.mxu0 }
 0x4c9   : > { %v5832_v59 = vadd.f32 %v12627_v13, %v5831_v61  ;;  %6278 = vxpose.xlu0.b32.cont [11/16] (narrow) %v6118_v60, 8 }
 0x4ca   : > { %v6120_v34 = vpop.f32.mrf.mxu1  ;;  %v5833_v58 = vpop.f32.mrf.mxu0 }
 0x4cb   : > { %v6121_v48 = vadd.f32 %v6120_v34, %v5832_v59 }
 0x4cc   : > { %v6122_v25 = vpop.f32.mrf.mxu1  ;;  %v5836_v1 = vpop.f32.mrf.mxu0 }
 0x4cd   : > { %v5837_v7 = vadd.f32 %v12627_v13, %v5836_v1  ;;  %6279 = vxpose.xlu0.b32.cont [12/16] (narrow) %v6121_v48, 8 }
 0x4ce   : > { %v6125_v32 = vpop.f32.mrf.mxu1  ;;  %v5838_v29 = vpop.f32.mrf.mxu0 }
 0x4cf   : > { %v6126_v50 = vadd.f32 %v6125_v32, %v5837_v7 }
 0x4d0   : > { %v6127_v37 = vpop.f32.mrf.mxu1  ;;  %v5839_v15 = vpop.f32.mrf.mxu0 }
 0x4d1   : > { %v5840_v10 = vadd.f32 %v12627_v13, %v5839_v15  ;;  %6280 = vxpose.xlu0.b32.cont [13/16] (narrow) %v6126_v50, 8 }
 0x4d2   : > { %v6128_v20 = vpop.f32.mrf.mxu1  ;;  %v5841_v12 = vpop.f32.mrf.mxu0 }
 0x4d3   : > { %v6129_v16 = vadd.f32 %v6128_v20, %v5840_v10 }
 0x4d4   : > { %v6130_v49 = vpop.f32.mrf.mxu1  ;;  %v5844_v8 = vpop.f32.mrf.mxu0 }
 0x4d5   : > { %v5845_v22 = vadd.f32 %v12627_v13, %v5844_v8  ;;  %6281 = vxpose.xlu0.b32.cont [14/16] (narrow) %v6129_v16, 8 }
 0x4d6   : > { %v6133_v45 = vpop.f32.mrf.mxu1  ;;  %v5846_v55 = vpop.f32.mrf.mxu0 }
 0x4d7   : > { %v6134_v53 = vadd.f32 %v6133_v45, %v5845_v22 }
 0x4d8   : > { %v6135_v11 = vpop.f32.mrf.mxu1  ;;  %v5847_v38 = vpop.f32.mrf.mxu0 }
 0x4d9   : > { %v5848_v2 = vadd.f32 %v12627_v13, %v5847_v38  ;;  %6282 = vxpose.xlu0.b32.cont [15/16] (narrow) %v6134_v53, 8 }
 0x4da   : > { %v6136_v35 = vpop.f32.mrf.mxu1  ;;  %v5849_v33 = vpop.f32.mrf.mxu0 }
 0x4db   : > { %v6137_v39 = vadd.f32 %v6136_v35, %v5848_v2 }
 0x4dc   : > { %v6138_v31 = vpop.f32.mrf.mxu1  ;;  %v5852_v17 = vpop.f32.mrf.mxu0 }
 0x4dd   : > { %v5853_v44 = vadd.f32 %v12627_v13, %v5852_v17  ;;  %6283 = vxpose.xlu0.b32.end [16/16] (narrow) %v6137_v39, 8 }
 0x4de   : > { %v6141_v56 = vpop.f32.mrf.mxu1  ;;  %v5854_v4 = vpop.f32.mrf.mxu0 }
 0x4df   : > { %v6142_v28 = vadd.f32 %v6141_v56, %v5853_v44 }
 0x4e0   : > { %v6143_v42 = vpop.f32.mrf.mxu1  ;;  %v5855_v54 = vpop.f32.mrf.mxu0 }
 0x4e1   : > { %v5856_v0 = vadd.f32 %v12811_v19, %v5855_v54  ;;  %6300 = vxpose.xlu1.b32.start [1/16] (narrow) %v6142_v28, 8 }
 0x4e2   : > { %v6144_v14 = vpop.f32.mrf.mxu1  ;;  %v5857_v36 = vpop.f32.mrf.mxu0 }
 0x4e3   : > { %v6145_v6 = vadd.f32 %v6144_v14, %v5856_v0 }
 0x4e4   : > { %v6146_v63 = vpop.f32.mrf.mxu1  ;;  %v5860_v5 = vpop.f32.mrf.mxu0 }
 0x4e5   : > { %v5861_v13 = vadd.f32 %v12811_v19, %v5860_v5  ;;  %6301 = vxpose.xlu1.b32.cont [2/16] (narrow) %v6145_v6, 8 }
 0x4e6   : > { %v6149_v47 = vpop.f32.mrf.mxu1  ;;  %v5862_v40 = vpop.f32.mrf.mxu0 }
 0x4e7   : > { %v6150_v57 = vadd.f32 %v6149_v47, %v5861_v13 }
 0x4e8   : > { %v6151_v9 = vpop.f32.mrf.mxu1  ;;  %v5863_v30 = vpop.f32.mrf.mxu0 }
 0x4e9   : > { %v5864_v41 = vadd.f32 %v12811_v19, %v5863_v30  ;;  %6302 = vxpose.xlu1.b32.cont [3/16] (narrow) %v6150_v57, 8 }
 0x4ea   : > { %v6152_v43 = vpop.f32.mrf.mxu1  ;;  %v5865_v21 = vpop.f32.mrf.mxu0 }
 0x4eb   : > { %v6153_v23 = vadd.f32 %v6152_v43, %v5864_v41 }
 0x4ec   : > { %v6154_v3 = vpop.f32.mrf.mxu1  ;;  %v5868_v52 = vpop.f32.mrf.mxu0 }
 0x4ed   : > { %v5869_v62 = vadd.f32 %v12811_v19, %v5868_v52  ;;  %6303 = vxpose.xlu1.b32.cont [4/16] (narrow) %v6153_v23, 8 }
 0x4ee   : > { %v6157_v18 = vpop.f32.mrf.mxu1  ;;  %v5870_v27 = vpop.f32.mrf.mxu0 }
 0x4ef   : > { %v6158_v26 = vadd.f32 %v6157_v18, %v5869_v62 }
 0x4f0   : > { %v6159_v51 = vpop.f32.mrf.mxu1  ;;  %v5871_v46 = vpop.f32.mrf.mxu0 }
 0x4f1   : > { %v5872_v60 = vadd.f32 %v12811_v19, %v5871_v46  ;;  %6304 = vxpose.xlu1.b32.cont [5/16] (narrow) %v6158_v26, 8 }
 0x4f2   : > { %v6160_v24 = vpop.f32.mrf.mxu1  ;;  %v5873_v61 = vpop.f32.mrf.mxu0 }
 0x4f3   : > { %v6161_v59 = vadd.f32 %v6160_v24, %v5872_v60  ;;  %v7033_v61 = vmov 1966171168  }
 0x4f4   : > { %v6162_v34 = vpop.f32.mrf.mxu1  ;;  %v5876_v58 = vpop.f32.mrf.mxu0 }
 0x4f5   : > { %v5877_v48 = vadd.f32 %v12811_v19, %v5876_v58  ;;  %6305 = vxpose.xlu1.b32.cont [6/16] (narrow) %v6161_v59, 8  ;;  %v6339_v59 = vunpack.c.l.s4 %v7033_v61  ;;  %v6220_v34 = vpop.trf.xlu0  ;;  %v6252_v58 = vpop.trf.xlu1 }
 0x4f6   : > { %v6165_v25 = vpop.f32.mrf.mxu1  ;;  %v5878_v1 = vpop.f32.mrf.mxu0 }
 0x4f7   : > { %v6166_v7 = vadd.f32 %v6165_v25, %v5877_v48  ;;  %v6340_v48 = vunpack.c.0.s8 %v6339_v59  ;;  %v14171_v1 = vld [vmem:[#allocation5_spill] sm:$0xff] }
 0x4f8   : > { %v6167_v32 = vpop.f32.mrf.mxu1  ;;  %v5879_v29 = vpop.f32.mrf.mxu0 }
 0x4f9   : > { %v5880_v50 = vadd.f32 %v12811_v19, %v5879_v29  ;;  %6306 = vxpose.xlu1.b32.cont [7/16] (narrow) %v6166_v7, 8  ;;  %v6343_v7 = vsub.s32 %v6340_v48, %v14171_v1  ;;  %v6336_v32 = vcombine.low %v6220_v34, %v6252_v58 }
 0x4fa   : > { %v6168_v37 = vpop.f32.mrf.mxu1  ;;  %v5881_v15 = vpop.f32.mrf.mxu0 }
 0x4fb   : > { %v6169_v10 = vadd.f32 %v6168_v37, %v5880_v50  ;;  %v6344_v50 = vrot.slane %v6336_v32, %v6343_v7 }
 0x4fc   : > { %v6170_v20 = vpop.f32.mrf.mxu1  ;;  %v5884_v12 = vpop.f32.mrf.mxu0 }
 0x4fd   : > { %v5885_v16 = vadd.f32 %v12811_v19, %v5884_v12  ;;  %6307 = vxpose.xlu1.b32.cont [8/16] (narrow) %v6169_v10, 8  ;;  %v14172_v10 = vlaneseq }
 0x4fe   : > { %v6173_v49 = vpop.f32.mrf.mxu1  ;;  %v5886_v8 = vpop.f32.mrf.mxu0 }
 0x4ff   : > { %v6174_v22 = vadd.f32 %v6173_v49, %v5885_v16  ;;  %vm6363_vm14 = vcmp.lt.s32.totalorder %v14172_v10, 512 }
 0x500   : > { %v6175_v45 = vpop.f32.mrf.mxu1  ;;  %v5887_v55 = vpop.f32.mrf.mxu0 }
 0x501   : > { %v5888_v53 = vadd.f32 %v12811_v19, %v5887_v55  ;;  %6308 = vxpose.xlu1.b32.cont [9/16] (narrow) %v6174_v22, 8 }
 0x502   : > { %v6176_v11 = vpop.f32.mrf.mxu1  ;;  %v5889_v38 = vpop.f32.mrf.mxu0 }
 0x503   : > { %v6177_v2 = vadd.f32 %v6176_v11, %v5888_v53 }
 0x504   : > { %v6178_v35 = vpop.f32.mrf.mxu1  ;;  %v5892_v33 = vpop.f32.mrf.mxu0 }
 0x505   : > { %v5893_v39 = vadd.f32 %v12811_v19, %v5892_v33  ;;  %6309 = vxpose.xlu1.b32.cont [10/16] (narrow) %v6177_v2, 8 }
 0x506   : > { %v6181_v31 = vpop.f32.mrf.mxu1  ;;  %v5894_v17 = vpop.f32.mrf.mxu0 }
 0x507   : > { %v6182_v44 = vadd.f32 %v6181_v31, %v5893_v39 }
 0x508   : > { %v6183_v56 = vpop.f32.mrf.mxu1  ;;  %v5895_v4 = vpop.f32.mrf.mxu0 }
 0x509   : > { %v5896_v28 = vadd.f32 %v12811_v19, %v5895_v4  ;;  %6310 = vxpose.xlu1.b32.cont [11/16] (narrow) %v6182_v44, 8 }
 0x50a   : > { %v6184_v42 = vpop.f32.mrf.mxu1  ;;  %v5897_v54 = vpop.f32.mrf.mxu0 }
 0x50b   : > { %v6185_v0 = vadd.f32 %v6184_v42, %v5896_v28 }
 0x50c   : > { %v6186_v14 = vpop.f32.mrf.mxu1  ;;  %v5900_v36 = vpop.f32.mrf.mxu0 }
 0x50d   : > { %v5901_v6 = vadd.f32 %v12811_v19, %v5900_v36  ;;  %6311 = vxpose.xlu1.b32.cont [12/16] (narrow) %v6185_v0, 8 }
 0x50e   : > { %v6189_v63 = vpop.f32.mrf.mxu1  ;;  %v5902_v5 = vpop.f32.mrf.mxu0 }
 0x50f   : > { %v6190_v13 = vadd.f32 %v6189_v63, %v5901_v6 }
 0x510   : > { %v6191_v47 = vpop.f32.mrf.mxu1  ;;  %v5903_v40 = vpop.f32.mrf.mxu0 }
 0x511   : > { %v5904_v57 = vadd.f32 %v12811_v19, %v5903_v40  ;;  %6312 = vxpose.xlu1.b32.cont [13/16] (narrow) %v6190_v13, 8 }
 0x512   : > { %v6192_v9 = vpop.f32.mrf.mxu1  ;;  %v5905_v30 = vpop.f32.mrf.mxu0 }
 0x513   : > { %v6193_v41 = vadd.f32 %v6192_v9, %v5904_v57 }
 0x514   : > { %v6194_v43 = vpop.f32.mrf.mxu1  ;;  %v5908_v21 = vpop.f32.mrf.mxu0 }
 0x515   : > { %v5909_v23 = vadd.f32 %v12811_v19, %v5908_v21  ;;  %6313 = vxpose.xlu1.b32.cont [14/16] (narrow) %v6193_v41, 8 }
 0x516   : > { %v6197_v3 = vpop.f32.mrf.mxu1  ;;  %v5910_v52 = vpop.f32.mrf.mxu0 }
 0x517   : > { %v6198_v62 = vadd.f32 %v6197_v3, %v5909_v23 }
 0x518   : > { %v6199_v18 = vpop.f32.mrf.mxu1  ;;  %v5911_v27 = vpop.f32.mrf.mxu0 }
 0x519   : > { %v5912_v26 = vadd.f32 %v12811_v19, %v5911_v27  ;;  %6314 = vxpose.xlu1.b32.cont [15/16] (narrow) %v6198_v62, 8 }
 0x51a   : > { %v6200_v51 = vpop.f32.mrf.mxu1  ;;  %v5913_v46 = vpop.f32.mrf.mxu0 }
 0x51b   : > { %v6201_v60 = vadd.f32 %v6200_v51, %v5912_v26 }
 0x51c   : > { %v6202_v24 = vpop.f32.mrf.mxu1 }
 0x51d   : > { %6315 = vxpose.xlu1.b32.end [16/16] (narrow) %v6201_v60, 8  ;;  %v6284_v25 = vpop.trf.xlu0 }
 0x55d   : > { %v6316_v29 = vpop.trf.xlu1 }
 0x55e   : > { %v6337_v19 = vcombine.low %v6284_v25, %v6316_v29 }
 0x560   : > { %v6351_v37 = vrot.slane %v6337_v19, %v6343_v7 }
 0x562   : > { %v6352_v15 = vcombine.low %v6344_v50, %v6351_v37 }
 0x564   : > { %v6359_v20 = vrot.slane %v6352_v15, %v6343_v7 }
 0x566   : > { %6365 = vst.msk [vmem:[%s293_s22] sm:$0xf] %vm6363_vm14, %v6359_v20 }
 0x567 PF: > { %s18_s24 = sadd.s32 1, %s7027_s24  }
 0x568   : > { %p15_p2 = scmp.ge.s32.totalorder %s18_s24, 4  }
 0x56a   :  { %17 = sbr.rel (!%p15_p2) target bundleno = 1 (0x1), region = 83 }
 0x56f   :  { %6385 = vsyncpa [#allocation3], 1 }
 0x570   :  { %6387 = vsyncpa [#allocation3 + $0x1], 1 }

</bundles_post_ra>
